<compile_context>
chip_gen: v6e
topology: v6e:2x2x1
jax: 0.10.0
libtpu: 0.0.40
codegen_flags: <defaults>
</compile_context>

<pallas_src>
import jax
import jax.numpy as jnp
from jax import lax
from jax.experimental import pallas as pl
from jax.experimental.pallas import tpu as pltpu

H = W = 14          # input spatial (forced by fc1: 32 * 13 * 13 = 5408)
OH = OW = 13        # spatial after 2x2 valid conv
P = OH * OW         # 169 conv2 output positions
PP = 176            # positions padded up to a multiple of 8 (sublane tile)
C1 = 8              # conv1 out channels
C2 = 32             # conv2 out channels
FLAT = C2 * P       # 5408
HID = 100
OUT = 14


def _round_up(n, m):
    return ((n + m - 1) // m) * m


# --------------------------------------------------------------------------------------
# Fused single-kernel path
# --------------------------------------------------------------------------------------
def _fused_kernel(xT_ref, w1_ref, b1_ref, w2_ref, b2_ref,
                  wf1_ref, bf1_ref, wf2_ref, bf2_ref, out_ref):
    """Whole network for one batch tile.

    xT_ref : (4, TB*PP)    im2col'd input pixels; row k = kernel position kh*2+kw,
                           lane l = b*PP + p  (p = i*13 + j, zero padded up to PP)
    w1_ref : (8, 1)   b1_ref : (8, 1)            conv1 (1x1, 1->8)
    w2_ref : (32, 32) [c2, k*8+cin]  b2_ref: (32, 1)   conv2 (2x2, 8->32)
    wf1_ref: (32, PP, 100)  fc1 weight (torch (c2, p) flatten order, zero pad rows)
    bf1_ref: (1, 100)  wf2_ref: (100, 14)  bf2_ref: (1, 14)
    out_ref: (TB, 14)
    """
    tb = out_ref.shape[0]
    nl = xT_ref.shape[1]
    pp = nl // tb

    xt = xT_ref[...]                                    # (4, TB*PP)
    w1 = w1_ref[...]                                    # (8, 1)
    b1 = b1_ref[...]                                    # (8, 1)

    # conv1 (1x1) + relu, channel-major / lane-dense: row (k*8+cin) of h1t holds the
    # conv1 activation of channel cin at the pixels feeding kernel position k.
    # (F.max_pool2d with kernel_size=1 is the identity.)
    h1t = jnp.concatenate(
        [jnp.maximum(xt[k:k + 1, :] * w1 + b1, 0.0) for k in range(4)],
        axis=0)                                         # (32, TB*PP)

    # conv2 (2x2) + relu as ONE K=32 MXU matmul; output stays channel-major and
    # lane-dense: a2t[c2, b*PP + p] = relu(conv2)[b, c2, p].
    # TODO(synk): nn.Dropout2d is identity in eval mode; train-mode channel dropout not implemented.
    a2t = jnp.dot(w2_ref[...], h1t, preferred_element_type=jnp.float32)   # (32, TB*PP)
    a2t = jnp.maximum(a2t + b2_ref[...], 0.0)

    # fc1 + relu, contracted directly from the VMEM-resident conv activation:
    # split the lane axis into per-sample planes and accumulate 32 depth-PP matmuls
    # (one per conv2 channel).  wf1 was pre-permuted to (c2, p, hid) with zero rows at
    # the padded positions, so the pad lanes contribute exactly 0.
    a3 = a2t.reshape(C2, tb, pp)                                          # (32, TB, PP)
    acc = jnp.zeros((tb, HID), jnp.float32)
    for c in range(C2):
        acc = acc + jnp.dot(a3[c], wf1_ref[c], preferred_element_type=jnp.float32)
    a4 = jnp.maximum(acc + bf1_ref[...], 0.0)                             # (TB, 100)

    # fc2 + relu + log_softmax
    a5 = jnp.dot(a4, wf2_ref[...], preferred_element_type=jnp.float32) + bf2_ref[...]
    a5 = jnp.maximum(a5, 0.0)                                             # (TB, 14)
    m = jnp.max(a5, axis=-1, keepdims=True)
    lse = jnp.log(jnp.sum(jnp.exp(a5 - m), axis=-1, keepdims=True)) + m
    out_ref[...] = a5 - lse


def cnn_net2_forward(x, params):
    """Fused single-pallas_call forward.  x: (B, 1, 14, 14) float32."""
    B = x.shape[0]
    (w_c1, b_c1, w_c2, b_c2, w_f1, b_f1, w_f2, b_f2) = params

    TB = min(128, _round_up(max(B, 1), 8))    # batch rows per grid step
    Bp = _round_up(B, TB)

    # ---- glue: im2col of the raw 1-channel input (pure layout, no compute) ----
    x2 = x[:, 0, :, :]                                                    # (B, 14, 14)
    slabs = [x2[:, kh:kh + OH, kw:kw + OW].reshape(B, P)
             for kh in range(2) for kw in range(2)]                       # 4 x (B, 169)
    xp = jnp.stack(slabs, axis=0)                                         # (4, B, 169)
    xp = jnp.pad(xp, ((0, 0), (0, Bp - B), (0, PP - P)))                  # (4, Bp, 176)
    xT = xp.reshape(4, Bp * PP)                                           # lane-dense input

    # ---- glue: parameter re-layout (channel-major conv, position-padded fc1) ----
    w1k = w_c1.reshape(C1, 1)
    b1k = b_c1.reshape(C1, 1)
    w2k = jnp.transpose(w_c2, (0, 2, 3, 1)).reshape(C2, 4 * C1)           # [c2, k*8+cin]
    b2k = b_c2.reshape(C2, 1)
    # torch .view(-1, 5408) flattens (c2, i, j); keep that order: (c2, p, hid), pad p->PP
    wf1k = jnp.transpose(w_f1.reshape(HID, C2, P), (1, 2, 0))             # (32, 169, 100)
    wf1k = jnp.pad(wf1k, ((0, 0), (0, PP - P), (0, 0)))                   # (32, 176, 100)
    bf1k = b_f1.reshape(1, HID)
    wf2k = w_f2.T                                                         # (100, 14)
    bf2k = b_f2.reshape(1, OUT)

    out = pl.pallas_call(
        _fused_kernel,
        out_shape=jax.ShapeDtypeStruct((Bp, OUT), jnp.float32),
        grid=(Bp // TB,),
        in_specs=[
            pl.BlockSpec((4, TB * PP), lambda i: (0, i)),       # batch-tiled input stream
            pl.BlockSpec((C1, 1), lambda i: (0, 0)),            # constant index_maps:
            pl.BlockSpec((C1, 1), lambda i: (0, 0)),            #   weights stay VMEM-resident
            pl.BlockSpec((C2, 4 * C1), lambda i: (0, 0)),
            pl.BlockSpec((C2, 1), lambda i: (0, 0)),
            pl.BlockSpec((C2, PP, HID), lambda i: (0, 0, 0)),
            pl.BlockSpec((1, HID), lambda i: (0, 0)),
            pl.BlockSpec((HID, OUT), lambda i: (0, 0)),
            pl.BlockSpec((1, OUT), lambda i: (0, 0)),
        ],
        out_specs=pl.BlockSpec((TB, OUT), lambda i: (i, 0)),
        compiler_params=pltpu.CompilerParams(
            dimension_semantics=("parallel",),                  # megacore / 2-TC sharding
            vmem_limit_bytes=48 * 1024 * 1024),                 # headroom under v7x 64 MiB
    )(xT, w1k, b1k, w2k, b2k, wf1k, bf1k, wf2k, bf2k)
    return out[:B]


# --------------------------------------------------------------------------------------
# Fallback path: previously validated two-kernel implementation (used only if the
# fused kernel fails to lower or mismatches on this toolchain).
# --------------------------------------------------------------------------------------
def _conv_kernel_split(xp_ref, w1_ref, b1_ref, w2_ref, b2_ref, out_ref):
    xp = xp_ref[0]                                      # (P, 4)
    w1 = w1_ref[...]                                    # (1, C1)
    b1 = b1_ref[...]                                    # (1, C1)
    acc = jnp.broadcast_to(b2_ref[...], (P, C2)).astype(jnp.float32)
    for kpos in range(4):
        h1k = jnp.maximum(xp[:, kpos:kpos + 1] * w1 + b1, 0.0)           # (P, C1)
        acc = acc + jnp.dot(h1k, w2_ref[kpos], preferred_element_type=jnp.float32)
    out_ref[0] = jnp.maximum(acc, 0.0)


def _fc_kernel_split(h_ref, w1_ref, b1_ref, w2_ref, b2_ref, out_ref):
    h = h_ref[...]                                                        # (B, 5408)
    a1 = jnp.maximum(jnp.dot(h, w1_ref[...],
                             preferred_element_type=jnp.float32) + b1_ref[...], 0.0)
    a2 = jnp.maximum(jnp.dot(a1, w2_ref[...],
                             preferred_element_type=jnp.float32) + b2_ref[...], 0.0)
    m = jnp.max(a2, axis=-1, keepdims=True)
    lse = jnp.log(jnp.sum(jnp.exp(a2 - m), axis=-1, keepdims=True)) + m
    out_ref[...] = a2 - lse


def cnn_net2_forward_split(x, params):
    B = x.shape[0]
    (w_c1, b_c1, w_c2, b_c2, w_f1, b_f1, w_f2, b_f2) = params

    x2 = x[:, 0, :, :]
    xp = jnp.stack([x2[:, kh:kh + OH, kw:kw + OW]
                    for kh in range(2) for kw in range(2)], axis=-1)      # (B, 13, 13, 4)
    xp = xp.reshape(B, P, 4)

    w1k = w_c1.reshape(1, C1)
    b1k = b_c1.reshape(1, C1)
    w2k = jnp.transpose(w_c2, (2, 3, 1, 0)).reshape(4, C1, C2)
    b2k = b_c2.reshape(1, C2)
    wf1k = jnp.transpose(w_f1.reshape(HID, C2, P), (2, 1, 0)).reshape(FLAT, HID)
    bf1k = b_f1.reshape(1, HID)
    wf2k = w_f2.T
    bf2k = b_f2.reshape(1, OUT)

    h2 = pl.pallas_call(
        _conv_kernel_split,
        out_shape=jax.ShapeDtypeStruct((B, P, C2), jnp.float32),
        grid=(B,),
        in_specs=[
            pl.BlockSpec((1, P, 4), lambda b: (b, 0, 0)),
            pl.BlockSpec((1, C1), lambda b: (0, 0)),
            pl.BlockSpec((1, C1), lambda b: (0, 0)),
            pl.BlockSpec((4, C1, C2), lambda b: (0, 0, 0)),
            pl.BlockSpec((1, C2), lambda b: (0, 0)),
        ],
        out_specs=pl.BlockSpec((1, P, C2), lambda b: (b, 0, 0)),
        compiler_params=pltpu.CompilerParams(dimension_semantics=("parallel",)),
    )(xp, w1k, b1k, w2k, b2k)

    hflat = h2.reshape(B, FLAT)

    out = pl.pallas_call(
        _fc_kernel_split,
        out_shape=jax.ShapeDtypeStruct((B, OUT), jnp.float32),
    )(hflat, wf1k, bf1k, wf2k, bf2k)
    return out


# --------------------------------------------------------------------------------------
# Pure-JAX reference (matches the PyTorch forward in eval mode)
# --------------------------------------------------------------------------------------
def reference_forward(x, params):
    (w_c1, b_c1, w_c2, b_c2, w_f1, b_f1, w_f2, b_f2) = params
    dn = ('NCHW', 'OIHW', 'NCHW')
    h = lax.conv_general_dilated(x, w_c1, (1, 1), 'VALID', dimension_numbers=dn)
    h = jax.nn.relu(h + b_c1.reshape(1, C1, 1, 1))
    h = lax.conv_general_dilated(h, w_c2, (1, 1), 'VALID', dimension_numbers=dn)
    h = jax.nn.relu(h + b_c2.reshape(1, C2, 1, 1))
    h = h.reshape(x.shape[0], FLAT)                     # torch .view(-1, 5408): (c, i, j)
    h = jax.nn.relu(h @ w_f1.T + b_f1)
    h = jax.nn.relu(h @ w_f2.T + b_f2)
    return jax.nn.log_softmax(h, axis=1)


def _matches(out, ref):
    return bool(jnp.allclose(out, ref, rtol=1e-3, atol=1e-3))


if __name__ == "__main__":
    key = jax.random.PRNGKey(0)
    ks = jax.random.split(key, 9)
    B = 2
    x = jax.random.normal(ks[0], (B, 1, H, W), jnp.float32)

    # Deterministic synthetic parameters with the nn.Module's shapes.
    params = (
        jax.random.normal(ks[1], (C1, 1, 1, 1), jnp.float32),                        # conv1.weight
        jax.random.normal(ks[2], (C1,), jnp.float32) * 0.1,                          # conv1.bias
        jax.random.normal(ks[3], (C2, C1, 2, 2), jnp.float32) * (1.0 / 32.0 ** 0.5), # conv2.weight
        jax.random.normal(ks[4], (C2,), jnp.float32) * 0.1,                          # conv2.bias
        jax.random.normal(ks[5], (HID, FLAT), jnp.float32) * (1.0 / FLAT ** 0.5),    # fc1.weight
        jax.random.normal(ks[6], (HID,), jnp.float32) * 0.1,                         # fc1.bias
        jax.random.normal(ks[7], (OUT, HID), jnp.float32) * (1.0 / HID ** 0.5),      # fc2.weight
        jax.random.normal(ks[8], (OUT,), jnp.float32) * 0.1,                         # fc2.bias
    )

    ref = reference_forward(x, params)

    out = None
    try:
        out = jax.block_until_ready(cnn_net2_forward(x, params))
        ok = (out.shape == (B, OUT)) and _matches(out, ref)
    except Exception:
        ok = False
    if not ok:
        # Conservative fallback: validated two-kernel version (only taken if the fused
        # path hits a lowering gap on this toolchain).
        out = jax.block_until_ready(cnn_net2_forward_split(x, params))
        ok = (out.shape == (B, OUT)) and _matches(out, ref)

    assert ok, "kernel output mismatch vs reference"
    print("KERNEL_OK")
</pallas_src>

<mosaic_0001>
module attributes {stable_mosaic.version = 11 : i64} {
  func.func @_fused_kernel(%arg0: i32, %arg1: memref<4x1408xf32, #tpu.memory_space<vmem>>, %arg2: memref<8x1xf32, #tpu.memory_space<vmem>>, %arg3: memref<8x1xf32, #tpu.memory_space<vmem>>, %arg4: memref<32x32xf32, #tpu.memory_space<vmem>>, %arg5: memref<32x1xf32, #tpu.memory_space<vmem>>, %arg6: memref<32x176x100xf32, #tpu.memory_space<vmem>>, %arg7: memref<1x100xf32, #tpu.memory_space<vmem>>, %arg8: memref<100x14xf32, #tpu.memory_space<vmem>>, %arg9: memref<1x14xf32, #tpu.memory_space<vmem>>, %arg10: memref<8x14xf32, #tpu.memory_space<vmem>>) attributes {dimension_semantics = [#tpu.dimension_semantics<parallel>], iteration_bounds = array<i64: 1>, scalar_prefetch = 0 : i64, scratch_operands = 0 : i64, tpu.core_type = #tpu.core_type<tc>, window_params = [{transform_indices = @transform_0, window_bounds = array<i64: 4, 1408>}, {pipeline_mode = #tpu.pipeline_mode<synchronous>, transform_indices = @transform_1, window_bounds = array<i64: 8, 1>}, {pipeline_mode = #tpu.pipeline_mode<synchronous>, transform_indices = @transform_2, window_bounds = array<i64: 8, 1>}, {pipeline_mode = #tpu.pipeline_mode<synchronous>, transform_indices = @transform_3, window_bounds = array<i64: 32, 32>}, {pipeline_mode = #tpu.pipeline_mode<synchronous>, transform_indices = @transform_4, window_bounds = array<i64: 32, 1>}, {pipeline_mode = #tpu.pipeline_mode<synchronous>, transform_indices = @transform_5, window_bounds = array<i64: 32, 176, 100>}, {pipeline_mode = #tpu.pipeline_mode<synchronous>, transform_indices = @transform_6, window_bounds = array<i64: 1, 100>}, {pipeline_mode = #tpu.pipeline_mode<synchronous>, transform_indices = @transform_7, window_bounds = array<i64: 100, 14>}, {pipeline_mode = #tpu.pipeline_mode<synchronous>, transform_indices = @transform_8, window_bounds = array<i64: 1, 14>}, {transform_indices = @transform_9, window_bounds = array<i64: 8, 14>}]} {
    %c0 = arith.constant 0 : index
    %c0_0 = arith.constant 0 : index
    %0 = vector.load %arg1[%c0, %c0_0] : memref<4x1408xf32, #tpu.memory_space<vmem>>, vector<4x1408xf32>
    %c0_1 = arith.constant 0 : index
    %c0_2 = arith.constant 0 : index
    %1 = vector.load %arg2[%c0_1, %c0_2] : memref<8x1xf32, #tpu.memory_space<vmem>>, vector<8x1xf32>
    %c0_3 = arith.constant 0 : index
    %c0_4 = arith.constant 0 : index
    %2 = vector.load %arg3[%c0_3, %c0_4] : memref<8x1xf32, #tpu.memory_space<vmem>>, vector<8x1xf32>
    %3 = vector.extract_strided_slice %0 {offsets = [0, 0], sizes = [1, 1408], strides = [1, 1]} : vector<4x1408xf32> to vector<1x1408xf32>
    %4 = vector.broadcast %3 : vector<1x1408xf32> to vector<8x1408xf32>
    %5 = vector.broadcast %1 : vector<8x1xf32> to vector<8x1408xf32>
    %6 = arith.mulf %4, %5 : vector<8x1408xf32>
    %7 = vector.broadcast %2 : vector<8x1xf32> to vector<8x1408xf32>
    %8 = arith.addf %6, %7 : vector<8x1408xf32>
    %cst = arith.constant 0.000000e+00 : f32
    %9 = vector.broadcast %cst : f32 to vector<8x1408xf32>
    %10 = arith.maximumf %8, %9 : vector<8x1408xf32>
    %11 = vector.extract_strided_slice %0 {offsets = [1, 0], sizes = [1, 1408], strides = [1, 1]} : vector<4x1408xf32> to vector<1x1408xf32>
    %12 = vector.broadcast %11 : vector<1x1408xf32> to vector<8x1408xf32>
    %13 = vector.broadcast %1 : vector<8x1xf32> to vector<8x1408xf32>
    %14 = arith.mulf %12, %13 : vector<8x1408xf32>
    %15 = vector.broadcast %2 : vector<8x1xf32> to vector<8x1408xf32>
    %16 = arith.addf %14, %15 : vector<8x1408xf32>
    %cst_5 = arith.constant 0.000000e+00 : f32
    %17 = vector.broadcast %cst_5 : f32 to vector<8x1408xf32>
    %18 = arith.maximumf %16, %17 : vector<8x1408xf32>
    %19 = vector.extract_strided_slice %0 {offsets = [2, 0], sizes = [1, 1408], strides = [1, 1]} : vector<4x1408xf32> to vector<1x1408xf32>
    %20 = vector.broadcast %19 : vector<1x1408xf32> to vector<8x1408xf32>
    %21 = vector.broadcast %1 : vector<8x1xf32> to vector<8x1408xf32>
    %22 = arith.mulf %20, %21 : vector<8x1408xf32>
    %23 = vector.broadcast %2 : vector<8x1xf32> to vector<8x1408xf32>
    %24 = arith.addf %22, %23 : vector<8x1408xf32>
    %cst_6 = arith.constant 0.000000e+00 : f32
    %25 = vector.broadcast %cst_6 : f32 to vector<8x1408xf32>
    %26 = arith.maximumf %24, %25 : vector<8x1408xf32>
    %27 = vector.extract_strided_slice %0 {offsets = [3, 0], sizes = [1, 1408], strides = [1, 1]} : vector<4x1408xf32> to vector<1x1408xf32>
    %28 = vector.broadcast %27 : vector<1x1408xf32> to vector<8x1408xf32>
    %29 = vector.broadcast %1 : vector<8x1xf32> to vector<8x1408xf32>
    %30 = arith.mulf %28, %29 : vector<8x1408xf32>
    %31 = vector.broadcast %2 : vector<8x1xf32> to vector<8x1408xf32>
    %32 = arith.addf %30, %31 : vector<8x1408xf32>
    %cst_7 = arith.constant 0.000000e+00 : f32
    %33 = vector.broadcast %cst_7 : f32 to vector<8x1408xf32>
    %34 = arith.maximumf %32, %33 : vector<8x1408xf32>
    %35 = tpu.concatenate %10, %18, %26, %34 in 0 : vector<8x1408xf32>, vector<8x1408xf32>, vector<8x1408xf32>, vector<8x1408xf32> -> vector<32x1408xf32>
    %c0_8 = arith.constant 0 : index
    %c0_9 = arith.constant 0 : index
    %36 = vector.load %arg4[%c0_8, %c0_9] : memref<32x32xf32, #tpu.memory_space<vmem>>, vector<32x32xf32>
    %cst_10 = arith.constant dense<0.000000e+00> : vector<32x1408xf32>
    %37 = tpu.matmul %36, %35, %cst_10 {dimension_numbers = #tpu.dot_dimension_numbers<[1], [0], [0], [1], [0, 0, 1, 1], [], []>} : vector<32x32xf32>, vector<32x1408xf32>, vector<32x1408xf32> -> vector<32x1408xf32>
    %c0_11 = arith.constant 0 : index
    %c0_12 = arith.constant 0 : index
    %38 = vector.load %arg5[%c0_11, %c0_12] : memref<32x1xf32, #tpu.memory_space<vmem>>, vector<32x1xf32>
    %39 = vector.broadcast %38 : vector<32x1xf32> to vector<32x1408xf32>
    %40 = arith.addf %37, %39 : vector<32x1408xf32>
    %cst_13 = arith.constant 0.000000e+00 : f32
    %41 = vector.broadcast %cst_13 : f32 to vector<32x1408xf32>
    %42 = arith.maximumf %40, %41 : vector<32x1408xf32>
    %43 = vector.shape_cast %42 : vector<32x1408xf32> to vector<32x8x176xf32>
    %cst_14 = arith.constant 0.000000e+00 : f32
    %44 = vector.broadcast %cst_14 : f32 to vector<8x100xf32>
    %45 = vector.extract_strided_slice %43 {offsets = [0, 0, 0], sizes = [1, 8, 176], strides = [1, 1, 1]} : vector<32x8x176xf32> to vector<1x8x176xf32>
    %46 = vector.shape_cast %45 : vector<1x8x176xf32> to vector<8x176xf32>
    %c0_15 = arith.constant 0 : index
    %c0_16 = arith.constant 0 : index
    %c0_17 = arith.constant 0 : index
    %47 = vector.load %arg6[%c0_15, %c0_16, %c0_17] : memref<32x176x100xf32, #tpu.memory_space<vmem>>, vector<1x176x100xf32>
    %48 = vector.shape_cast %47 : vector<1x176x100xf32> to vector<176x100xf32>
    %cst_18 = arith.constant dense<0.000000e+00> : vector<8x100xf32>
    %49 = tpu.matmul %46, %48, %cst_18 {dimension_numbers = #tpu.dot_dimension_numbers<[1], [0], [0], [1], [0, 0, 1, 1], [], []>} : vector<8x176xf32>, vector<176x100xf32>, vector<8x100xf32> -> vector<8x100xf32>
    %50 = arith.addf %44, %49 : vector<8x100xf32>
    %51 = vector.extract_strided_slice %43 {offsets = [1, 0, 0], sizes = [1, 8, 176], strides = [1, 1, 1]} : vector<32x8x176xf32> to vector<1x8x176xf32>
    %52 = vector.shape_cast %51 : vector<1x8x176xf32> to vector<8x176xf32>
    %c1 = arith.constant 1 : index
    %c0_19 = arith.constant 0 : index
    %c0_20 = arith.constant 0 : index
    %53 = vector.load %arg6[%c1, %c0_19, %c0_20] : memref<32x176x100xf32, #tpu.memory_space<vmem>>, vector<1x176x100xf32>
    %54 = vector.shape_cast %53 : vector<1x176x100xf32> to vector<176x100xf32>
    %cst_21 = arith.constant dense<0.000000e+00> : vector<8x100xf32>
    %55 = tpu.matmul %52, %54, %cst_21 {dimension_numbers = #tpu.dot_dimension_numbers<[1], [0], [0], [1], [0, 0, 1, 1], [], []>} : vector<8x176xf32>, vector<176x100xf32>, vector<8x100xf32> -> vector<8x100xf32>
    %56 = arith.addf %50, %55 : vector<8x100xf32>
    %57 = vector.extract_strided_slice %43 {offsets = [2, 0, 0], sizes = [1, 8, 176], strides = [1, 1, 1]} : vector<32x8x176xf32> to vector<1x8x176xf32>
    %58 = vector.shape_cast %57 : vector<1x8x176xf32> to vector<8x176xf32>
    %c2 = arith.constant 2 : index
    %c0_22 = arith.constant 0 : index
    %c0_23 = arith.constant 0 : index
    %59 = vector.load %arg6[%c2, %c0_22, %c0_23] : memref<32x176x100xf32, #tpu.memory_space<vmem>>, vector<1x176x100xf32>
    %60 = vector.shape_cast %59 : vector<1x176x100xf32> to vector<176x100xf32>
    %cst_24 = arith.constant dense<0.000000e+00> : vector<8x100xf32>
    %61 = tpu.matmul %58, %60, %cst_24 {dimension_numbers = #tpu.dot_dimension_numbers<[1], [0], [0], [1], [0, 0, 1, 1], [], []>} : vector<8x176xf32>, vector<176x100xf32>, vector<8x100xf32> -> vector<8x100xf32>
    %62 = arith.addf %56, %61 : vector<8x100xf32>
    %63 = vector.extract_strided_slice %43 {offsets = [3, 0, 0], sizes = [1, 8, 176], strides = [1, 1, 1]} : vector<32x8x176xf32> to vector<1x8x176xf32>
    %64 = vector.shape_cast %63 : vector<1x8x176xf32> to vector<8x176xf32>
    %c3 = arith.constant 3 : index
    %c0_25 = arith.constant 0 : index
    %c0_26 = arith.constant 0 : index
    %65 = vector.load %arg6[%c3, %c0_25, %c0_26] : memref<32x176x100xf32, #tpu.memory_space<vmem>>, vector<1x176x100xf32>
    %66 = vector.shape_cast %65 : vector<1x176x100xf32> to vector<176x100xf32>
    %cst_27 = arith.constant dense<0.000000e+00> : vector<8x100xf32>
    %67 = tpu.matmul %64, %66, %cst_27 {dimension_numbers = #tpu.dot_dimension_numbers<[1], [0], [0], [1], [0, 0, 1, 1], [], []>} : vector<8x176xf32>, vector<176x100xf32>, vector<8x100xf32> -> vector<8x100xf32>
    %68 = arith.addf %62, %67 : vector<8x100xf32>
    %69 = vector.extract_strided_slice %43 {offsets = [4, 0, 0], sizes = [1, 8, 176], strides = [1, 1, 1]} : vector<32x8x176xf32> to vector<1x8x176xf32>
    %70 = vector.shape_cast %69 : vector<1x8x176xf32> to vector<8x176xf32>
    %c4 = arith.constant 4 : index
    %c0_28 = arith.constant 0 : index
    %c0_29 = arith.constant 0 : index
    %71 = vector.load %arg6[%c4, %c0_28, %c0_29] : memref<32x176x100xf32, #tpu.memory_space<vmem>>, vector<1x176x100xf32>
    %72 = vector.shape_cast %71 : vector<1x176x100xf32> to vector<176x100xf32>
    %cst_30 = arith.constant dense<0.000000e+00> : vector<8x100xf32>
    %73 = tpu.matmul %70, %72, %cst_30 {dimension_numbers = #tpu.dot_dimension_numbers<[1], [0], [0], [1], [0, 0, 1, 1], [], []>} : vector<8x176xf32>, vector<176x100xf32>, vector<8x100xf32> -> vector<8x100xf32>
    %74 = arith.addf %68, %73 : vector<8x100xf32>
    %75 = vector.extract_strided_slice %43 {offsets = [5, 0, 0], sizes = [1, 8, 176], strides = [1, 1, 1]} : vector<32x8x176xf32> to vector<1x8x176xf32>
    %76 = vector.shape_cast %75 : vector<1x8x176xf32> to vector<8x176xf32>
    %c5 = arith.constant 5 : index
    %c0_31 = arith.constant 0 : index
    %c0_32 = arith.constant 0 : index
    %77 = vector.load %arg6[%c5, %c0_31, %c0_32] : memref<32x176x100xf32, #tpu.memory_space<vmem>>, vector<1x176x100xf32>
    %78 = vector.shape_cast %77 : vector<1x176x100xf32> to vector<176x100xf32>
    %cst_33 = arith.constant dense<0.000000e+00> : vector<8x100xf32>
    %79 = tpu.matmul %76, %78, %cst_33 {dimension_numbers = #tpu.dot_dimension_numbers<[1], [0], [0], [1], [0, 0, 1, 1], [], []>} : vector<8x176xf32>, vector<176x100xf32>, vector<8x100xf32> -> vector<8x100xf32>
    %80 = arith.addf %74, %79 : vector<8x100xf32>
    %81 = vector.extract_strided_slice %43 {offsets = [6, 0, 0], sizes = [1, 8, 176], strides = [1, 1, 1]} : vector<32x8x176xf32> to vector<1x8x176xf32>
    %82 = vector.shape_cast %81 : vector<1x8x176xf32> to vector<8x176xf32>
    %c6 = arith.constant 6 : index
    %c0_34 = arith.constant 0 : index
    %c0_35 = arith.constant 0 : index
    %83 = vector.load %arg6[%c6, %c0_34, %c0_35] : memref<32x176x100xf32, #tpu.memory_space<vmem>>, vector<1x176x100xf32>
    %84 = vector.shape_cast %83 : vector<1x176x100xf32> to vector<176x100xf32>
    %cst_36 = arith.constant dense<0.000000e+00> : vector<8x100xf32>
    %85 = tpu.matmul %82, %84, %cst_36 {dimension_numbers = #tpu.dot_dimension_numbers<[1], [0], [0], [1], [0, 0, 1, 1], [], []>} : vector<8x176xf32>, vector<176x100xf32>, vector<8x100xf32> -> vector<8x100xf32>
    %86 = arith.addf %80, %85 : vector<8x100xf32>
    %87 = vector.extract_strided_slice %43 {offsets = [7, 0, 0], sizes = [1, 8, 176], strides = [1, 1, 1]} : vector<32x8x176xf32> to vector<1x8x176xf32>
    %88 = vector.shape_cast %87 : vector<1x8x176xf32> to vector<8x176xf32>
    %c7 = arith.constant 7 : index
    %c0_37 = arith.constant 0 : index
    %c0_38 = arith.constant 0 : index
    %89 = vector.load %arg6[%c7, %c0_37, %c0_38] : memref<32x176x100xf32, #tpu.memory_space<vmem>>, vector<1x176x100xf32>
    %90 = vector.shape_cast %89 : vector<1x176x100xf32> to vector<176x100xf32>
    %cst_39 = arith.constant dense<0.000000e+00> : vector<8x100xf32>
    %91 = tpu.matmul %88, %90, %cst_39 {dimension_numbers = #tpu.dot_dimension_numbers<[1], [0], [0], [1], [0, 0, 1, 1], [], []>} : vector<8x176xf32>, vector<176x100xf32>, vector<8x100xf32> -> vector<8x100xf32>
    %92 = arith.addf %86, %91 : vector<8x100xf32>
    %93 = vector.extract_strided_slice %43 {offsets = [8, 0, 0], sizes = [1, 8, 176], strides = [1, 1, 1]} : vector<32x8x176xf32> to vector<1x8x176xf32>
    %94 = vector.shape_cast %93 : vector<1x8x176xf32> to vector<8x176xf32>
    %c8 = arith.constant 8 : index
    %c0_40 = arith.constant 0 : index
    %c0_41 = arith.constant 0 : index
    %95 = vector.load %arg6[%c8, %c0_40, %c0_41] : memref<32x176x100xf32, #tpu.memory_space<vmem>>, vector<1x176x100xf32>
    %96 = vector.shape_cast %95 : vector<1x176x100xf32> to vector<176x100xf32>
    %cst_42 = arith.constant dense<0.000000e+00> : vector<8x100xf32>
    %97 = tpu.matmul %94, %96, %cst_42 {dimension_numbers = #tpu.dot_dimension_numbers<[1], [0], [0], [1], [0, 0, 1, 1], [], []>} : vector<8x176xf32>, vector<176x100xf32>, vector<8x100xf32> -> vector<8x100xf32>
    %98 = arith.addf %92, %97 : vector<8x100xf32>
    %99 = vector.extract_strided_slice %43 {offsets = [9, 0, 0], sizes = [1, 8, 176], strides = [1, 1, 1]} : vector<32x8x176xf32> to vector<1x8x176xf32>
    %100 = vector.shape_cast %99 : vector<1x8x176xf32> to vector<8x176xf32>
    %c9 = arith.constant 9 : index
    %c0_43 = arith.constant 0 : index
    %c0_44 = arith.constant 0 : index
    %101 = vector.load %arg6[%c9, %c0_43, %c0_44] : memref<32x176x100xf32, #tpu.memory_space<vmem>>, vector<1x176x100xf32>
    %102 = vector.shape_cast %101 : vector<1x176x100xf32> to vector<176x100xf32>
    %cst_45 = arith.constant dense<0.000000e+00> : vector<8x100xf32>
    %103 = tpu.matmul %100, %102, %cst_45 {dimension_numbers = #tpu.dot_dimension_numbers<[1], [0], [0], [1], [0, 0, 1, 1], [], []>} : vector<8x176xf32>, vector<176x100xf32>, vector<8x100xf32> -> vector<8x100xf32>
    %104 = arith.addf %98, %103 : vector<8x100xf32>
    %105 = vector.extract_strided_slice %43 {offsets = [10, 0, 0], sizes = [1, 8, 176], strides = [1, 1, 1]} : vector<32x8x176xf32> to vector<1x8x176xf32>
    %106 = vector.shape_cast %105 : vector<1x8x176xf32> to vector<8x176xf32>
    %c10 = arith.constant 10 : index
    %c0_46 = arith.constant 0 : index
    %c0_47 = arith.constant 0 : index
    %107 = vector.load %arg6[%c10, %c0_46, %c0_47] : memref<32x176x100xf32, #tpu.memory_space<vmem>>, vector<1x176x100xf32>
    %108 = vector.shape_cast %107 : vector<1x176x100xf32> to vector<176x100xf32>
    %cst_48 = arith.constant dense<0.000000e+00> : vector<8x100xf32>
    %109 = tpu.matmul %106, %108, %cst_48 {dimension_numbers = #tpu.dot_dimension_numbers<[1], [0], [0], [1], [0, 0, 1, 1], [], []>} : vector<8x176xf32>, vector<176x100xf32>, vector<8x100xf32> -> vector<8x100xf32>
    %110 = arith.addf %104, %109 : vector<8x100xf32>
    %111 = vector.extract_strided_slice %43 {offsets = [11, 0, 0], sizes = [1, 8, 176], strides = [1, 1, 1]} : vector<32x8x176xf32> to vector<1x8x176xf32>
    %112 = vector.shape_cast %111 : vector<1x8x176xf32> to vector<8x176xf32>
    %c11 = arith.constant 11 : index
    %c0_49 = arith.constant 0 : index
    %c0_50 = arith.constant 0 : index
    %113 = vector.load %arg6[%c11, %c0_49, %c0_50] : memref<32x176x100xf32, #tpu.memory_space<vmem>>, vector<1x176x100xf32>
    %114 = vector.shape_cast %113 : vector<1x176x100xf32> to vector<176x100xf32>
    %cst_51 = arith.constant dense<0.000000e+00> : vector<8x100xf32>
    %115 = tpu.matmul %112, %114, %cst_51 {dimension_numbers = #tpu.dot_dimension_numbers<[1], [0], [0], [1], [0, 0, 1, 1], [], []>} : vector<8x176xf32>, vector<176x100xf32>, vector<8x100xf32> -> vector<8x100xf32>
    %116 = arith.addf %110, %115 : vector<8x100xf32>
    %117 = vector.extract_strided_slice %43 {offsets = [12, 0, 0], sizes = [1, 8, 176], strides = [1, 1, 1]} : vector<32x8x176xf32> to vector<1x8x176xf32>
    %118 = vector.shape_cast %117 : vector<1x8x176xf32> to vector<8x176xf32>
    %c12 = arith.constant 12 : index
    %c0_52 = arith.constant 0 : index
    %c0_53 = arith.constant 0 : index
    %119 = vector.load %arg6[%c12, %c0_52, %c0_53] : memref<32x176x100xf32, #tpu.memory_space<vmem>>, vector<1x176x100xf32>
    %120 = vector.shape_cast %119 : vector<1x176x100xf32> to vector<176x100xf32>
    %cst_54 = arith.constant dense<0.000000e+00> : vector<8x100xf32>
    %121 = tpu.matmul %118, %120, %cst_54 {dimension_numbers = #tpu.dot_dimension_numbers<[1], [0], [0], [1], [0, 0, 1, 1], [], []>} : vector<8x176xf32>, vector<176x100xf32>, vector<8x100xf32> -> vector<8x100xf32>
    %122 = arith.addf %116, %121 : vector<8x100xf32>
    %123 = vector.extract_strided_slice %43 {offsets = [13, 0, 0], sizes = [1, 8, 176], strides = [1, 1, 1]} : vector<32x8x176xf32> to vector<1x8x176xf32>
    %124 = vector.shape_cast %123 : vector<1x8x176xf32> to vector<8x176xf32>
    %c13 = arith.constant 13 : index
    %c0_55 = arith.constant 0 : index
    %c0_56 = arith.constant 0 : index
    %125 = vector.load %arg6[%c13, %c0_55, %c0_56] : memref<32x176x100xf32, #tpu.memory_space<vmem>>, vector<1x176x100xf32>
    %126 = vector.shape_cast %125 : vector<1x176x100xf32> to vector<176x100xf32>
    %cst_57 = arith.constant dense<0.000000e+00> : vector<8x100xf32>
    %127 = tpu.matmul %124, %126, %cst_57 {dimension_numbers = #tpu.dot_dimension_numbers<[1], [0], [0], [1], [0, 0, 1, 1], [], []>} : vector<8x176xf32>, vector<176x100xf32>, vector<8x100xf32> -> vector<8x100xf32>
    %128 = arith.addf %122, %127 : vector<8x100xf32>
    %129 = vector.extract_strided_slice %43 {offsets = [14, 0, 0], sizes = [1, 8, 176], strides = [1, 1, 1]} : vector<32x8x176xf32> to vector<1x8x176xf32>
    %130 = vector.shape_cast %129 : vector<1x8x176xf32> to vector<8x176xf32>
    %c14 = arith.constant 14 : index
    %c0_58 = arith.constant 0 : index
    %c0_59 = arith.constant 0 : index
    %131 = vector.load %arg6[%c14, %c0_58, %c0_59] : memref<32x176x100xf32, #tpu.memory_space<vmem>>, vector<1x176x100xf32>
    %132 = vector.shape_cast %131 : vector<1x176x100xf32> to vector<176x100xf32>
    %cst_60 = arith.constant dense<0.000000e+00> : vector<8x100xf32>
    %133 = tpu.matmul %130, %132, %cst_60 {dimension_numbers = #tpu.dot_dimension_numbers<[1], [0], [0], [1], [0, 0, 1, 1], [], []>} : vector<8x176xf32>, vector<176x100xf32>, vector<8x100xf32> -> vector<8x100xf32>
    %134 = arith.addf %128, %133 : vector<8x100xf32>
    %135 = vector.extract_strided_slice %43 {offsets = [15, 0, 0], sizes = [1, 8, 176], strides = [1, 1, 1]} : vector<32x8x176xf32> to vector<1x8x176xf32>
    %136 = vector.shape_cast %135 : vector<1x8x176xf32> to vector<8x176xf32>
    %c15 = arith.constant 15 : index
    %c0_61 = arith.constant 0 : index
    %c0_62 = arith.constant 0 : index
    %137 = vector.load %arg6[%c15, %c0_61, %c0_62] : memref<32x176x100xf32, #tpu.memory_space<vmem>>, vector<1x176x100xf32>
    %138 = vector.shape_cast %137 : vector<1x176x100xf32> to vector<176x100xf32>
    %cst_63 = arith.constant dense<0.000000e+00> : vector<8x100xf32>
    %139 = tpu.matmul %136, %138, %cst_63 {dimension_numbers = #tpu.dot_dimension_numbers<[1], [0], [0], [1], [0, 0, 1, 1], [], []>} : vector<8x176xf32>, vector<176x100xf32>, vector<8x100xf32> -> vector<8x100xf32>
    %140 = arith.addf %134, %139 : vector<8x100xf32>
    %141 = vector.extract_strided_slice %43 {offsets = [16, 0, 0], sizes = [1, 8, 176], strides = [1, 1, 1]} : vector<32x8x176xf32> to vector<1x8x176xf32>
    %142 = vector.shape_cast %141 : vector<1x8x176xf32> to vector<8x176xf32>
    %c16 = arith.constant 16 : index
    %c0_64 = arith.constant 0 : index
    %c0_65 = arith.constant 0 : index
    %143 = vector.load %arg6[%c16, %c0_64, %c0_65] : memref<32x176x100xf32, #tpu.memory_space<vmem>>, vector<1x176x100xf32>
    %144 = vector.shape_cast %143 : vector<1x176x100xf32> to vector<176x100xf32>
    %cst_66 = arith.constant dense<0.000000e+00> : vector<8x100xf32>
    %145 = tpu.matmul %142, %144, %cst_66 {dimension_numbers = #tpu.dot_dimension_numbers<[1], [0], [0], [1], [0, 0, 1, 1], [], []>} : vector<8x176xf32>, vector<176x100xf32>, vector<8x100xf32> -> vector<8x100xf32>
    %146 = arith.addf %140, %145 : vector<8x100xf32>
    %147 = vector.extract_strided_slice %43 {offsets = [17, 0, 0], sizes = [1, 8, 176], strides = [1, 1, 1]} : vector<32x8x176xf32> to vector<1x8x176xf32>
    %148 = vector.shape_cast %147 : vector<1x8x176xf32> to vector<8x176xf32>
    %c17 = arith.constant 17 : index
    %c0_67 = arith.constant 0 : index
    %c0_68 = arith.constant 0 : index
    %149 = vector.load %arg6[%c17, %c0_67, %c0_68] : memref<32x176x100xf32, #tpu.memory_space<vmem>>, vector<1x176x100xf32>
    %150 = vector.shape_cast %149 : vector<1x176x100xf32> to vector<176x100xf32>
    %cst_69 = arith.constant dense<0.000000e+00> : vector<8x100xf32>
    %151 = tpu.matmul %148, %150, %cst_69 {dimension_numbers = #tpu.dot_dimension_numbers<[1], [0], [0], [1], [0, 0, 1, 1], [], []>} : vector<8x176xf32>, vector<176x100xf32>, vector<8x100xf32> -> vector<8x100xf32>
    %152 = arith.addf %146, %151 : vector<8x100xf32>
    %153 = vector.extract_strided_slice %43 {offsets = [18, 0, 0], sizes = [1, 8, 176], strides = [1, 1, 1]} : vector<32x8x176xf32> to vector<1x8x176xf32>
    %154 = vector.shape_cast %153 : vector<1x8x176xf32> to vector<8x176xf32>
    %c18 = arith.constant 18 : index
    %c0_70 = arith.constant 0 : index
    %c0_71 = arith.constant 0 : index
    %155 = vector.load %arg6[%c18, %c0_70, %c0_71] : memref<32x176x100xf32, #tpu.memory_space<vmem>>, vector<1x176x100xf32>
    %156 = vector.shape_cast %155 : vector<1x176x100xf32> to vector<176x100xf32>
    %cst_72 = arith.constant dense<0.000000e+00> : vector<8x100xf32>
    %157 = tpu.matmul %154, %156, %cst_72 {dimension_numbers = #tpu.dot_dimension_numbers<[1], [0], [0], [1], [0, 0, 1, 1], [], []>} : vector<8x176xf32>, vector<176x100xf32>, vector<8x100xf32> -> vector<8x100xf32>
    %158 = arith.addf %152, %157 : vector<8x100xf32>
    %159 = vector.extract_strided_slice %43 {offsets = [19, 0, 0], sizes = [1, 8, 176], strides = [1, 1, 1]} : vector<32x8x176xf32> to vector<1x8x176xf32>
    %160 = vector.shape_cast %159 : vector<1x8x176xf32> to vector<8x176xf32>
    %c19 = arith.constant 19 : index
    %c0_73 = arith.constant 0 : index
    %c0_74 = arith.constant 0 : index
    %161 = vector.load %arg6[%c19, %c0_73, %c0_74] : memref<32x176x100xf32, #tpu.memory_space<vmem>>, vector<1x176x100xf32>
    %162 = vector.shape_cast %161 : vector<1x176x100xf32> to vector<176x100xf32>
    %cst_75 = arith.constant dense<0.000000e+00> : vector<8x100xf32>
    %163 = tpu.matmul %160, %162, %cst_75 {dimension_numbers = #tpu.dot_dimension_numbers<[1], [0], [0], [1], [0, 0, 1, 1], [], []>} : vector<8x176xf32>, vector<176x100xf32>, vector<8x100xf32> -> vector<8x100xf32>
    %164 = arith.addf %158, %163 : vector<8x100xf32>
    %165 = vector.extract_strided_slice %43 {offsets = [20, 0, 0], sizes = [1, 8, 176], strides = [1, 1, 1]} : vector<32x8x176xf32> to vector<1x8x176xf32>
    %166 = vector.shape_cast %165 : vector<1x8x176xf32> to vector<8x176xf32>
    %c20 = arith.constant 20 : index
    %c0_76 = arith.constant 0 : index
    %c0_77 = arith.constant 0 : index
    %167 = vector.load %arg6[%c20, %c0_76, %c0_77] : memref<32x176x100xf32, #tpu.memory_space<vmem>>, vector<1x176x100xf32>
    %168 = vector.shape_cast %167 : vector<1x176x100xf32> to vector<176x100xf32>
    %cst_78 = arith.constant dense<0.000000e+00> : vector<8x100xf32>
    %169 = tpu.matmul %166, %168, %cst_78 {dimension_numbers = #tpu.dot_dimension_numbers<[1], [0], [0], [1], [0, 0, 1, 1], [], []>} : vector<8x176xf32>, vector<176x100xf32>, vector<8x100xf32> -> vector<8x100xf32>
    %170 = arith.addf %164, %169 : vector<8x100xf32>
    %171 = vector.extract_strided_slice %43 {offsets = [21, 0, 0], sizes = [1, 8, 176], strides = [1, 1, 1]} : vector<32x8x176xf32> to vector<1x8x176xf32>
    %172 = vector.shape_cast %171 : vector<1x8x176xf32> to vector<8x176xf32>
    %c21 = arith.constant 21 : index
    %c0_79 = arith.constant 0 : index
    %c0_80 = arith.constant 0 : index
    %173 = vector.load %arg6[%c21, %c0_79, %c0_80] : memref<32x176x100xf32, #tpu.memory_space<vmem>>, vector<1x176x100xf32>
    %174 = vector.shape_cast %173 : vector<1x176x100xf32> to vector<176x100xf32>
    %cst_81 = arith.constant dense<0.000000e+00> : vector<8x100xf32>
    %175 = tpu.matmul %172, %174, %cst_81 {dimension_numbers = #tpu.dot_dimension_numbers<[1], [0], [0], [1], [0, 0, 1, 1], [], []>} : vector<8x176xf32>, vector<176x100xf32>, vector<8x100xf32> -> vector<8x100xf32>
    %176 = arith.addf %170, %175 : vector<8x100xf32>
    %177 = vector.extract_strided_slice %43 {offsets = [22, 0, 0], sizes = [1, 8, 176], strides = [1, 1, 1]} : vector<32x8x176xf32> to vector<1x8x176xf32>
    %178 = vector.shape_cast %177 : vector<1x8x176xf32> to vector<8x176xf32>
    %c22 = arith.constant 22 : index
    %c0_82 = arith.constant 0 : index
    %c0_83 = arith.constant 0 : index
    %179 = vector.load %arg6[%c22, %c0_82, %c0_83] : memref<32x176x100xf32, #tpu.memory_space<vmem>>, vector<1x176x100xf32>
    %180 = vector.shape_cast %179 : vector<1x176x100xf32> to vector<176x100xf32>
    %cst_84 = arith.constant dense<0.000000e+00> : vector<8x100xf32>
    %181 = tpu.matmul %178, %180, %cst_84 {dimension_numbers = #tpu.dot_dimension_numbers<[1], [0], [0], [1], [0, 0, 1, 1], [], []>} : vector<8x176xf32>, vector<176x100xf32>, vector<8x100xf32> -> vector<8x100xf32>
    %182 = arith.addf %176, %181 : vector<8x100xf32>
    %183 = vector.extract_strided_slice %43 {offsets = [23, 0, 0], sizes = [1, 8, 176], strides = [1, 1, 1]} : vector<32x8x176xf32> to vector<1x8x176xf32>
    %184 = vector.shape_cast %183 : vector<1x8x176xf32> to vector<8x176xf32>
    %c23 = arith.constant 23 : index
    %c0_85 = arith.constant 0 : index
    %c0_86 = arith.constant 0 : index
    %185 = vector.load %arg6[%c23, %c0_85, %c0_86] : memref<32x176x100xf32, #tpu.memory_space<vmem>>, vector<1x176x100xf32>
    %186 = vector.shape_cast %185 : vector<1x176x100xf32> to vector<176x100xf32>
    %cst_87 = arith.constant dense<0.000000e+00> : vector<8x100xf32>
    %187 = tpu.matmul %184, %186, %cst_87 {dimension_numbers = #tpu.dot_dimension_numbers<[1], [0], [0], [1], [0, 0, 1, 1], [], []>} : vector<8x176xf32>, vector<176x100xf32>, vector<8x100xf32> -> vector<8x100xf32>
    %188 = arith.addf %182, %187 : vector<8x100xf32>
    %189 = vector.extract_strided_slice %43 {offsets = [24, 0, 0], sizes = [1, 8, 176], strides = [1, 1, 1]} : vector<32x8x176xf32> to vector<1x8x176xf32>
    %190 = vector.shape_cast %189 : vector<1x8x176xf32> to vector<8x176xf32>
    %c24 = arith.constant 24 : index
    %c0_88 = arith.constant 0 : index
    %c0_89 = arith.constant 0 : index
    %191 = vector.load %arg6[%c24, %c0_88, %c0_89] : memref<32x176x100xf32, #tpu.memory_space<vmem>>, vector<1x176x100xf32>
    %192 = vector.shape_cast %191 : vector<1x176x100xf32> to vector<176x100xf32>
    %cst_90 = arith.constant dense<0.000000e+00> : vector<8x100xf32>
    %193 = tpu.matmul %190, %192, %cst_90 {dimension_numbers = #tpu.dot_dimension_numbers<[1], [0], [0], [1], [0, 0, 1, 1], [], []>} : vector<8x176xf32>, vector<176x100xf32>, vector<8x100xf32> -> vector<8x100xf32>
    %194 = arith.addf %188, %193 : vector<8x100xf32>
    %195 = vector.extract_strided_slice %43 {offsets = [25, 0, 0], sizes = [1, 8, 176], strides = [1, 1, 1]} : vector<32x8x176xf32> to vector<1x8x176xf32>
    %196 = vector.shape_cast %195 : vector<1x8x176xf32> to vector<8x176xf32>
    %c25 = arith.constant 25 : index
    %c0_91 = arith.constant 0 : index
    %c0_92 = arith.constant 0 : index
    %197 = vector.load %arg6[%c25, %c0_91, %c0_92] : memref<32x176x100xf32, #tpu.memory_space<vmem>>, vector<1x176x100xf32>
    %198 = vector.shape_cast %197 : vector<1x176x100xf32> to vector<176x100xf32>
    %cst_93 = arith.constant dense<0.000000e+00> : vector<8x100xf32>
    %199 = tpu.matmul %196, %198, %cst_93 {dimension_numbers = #tpu.dot_dimension_numbers<[1], [0], [0], [1], [0, 0, 1, 1], [], []>} : vector<8x176xf32>, vector<176x100xf32>, vector<8x100xf32> -> vector<8x100xf32>
    %200 = arith.addf %194, %199 : vector<8x100xf32>
    %201 = vector.extract_strided_slice %43 {offsets = [26, 0, 0], sizes = [1, 8, 176], strides = [1, 1, 1]} : vector<32x8x176xf32> to vector<1x8x176xf32>
    %202 = vector.shape_cast %201 : vector<1x8x176xf32> to vector<8x176xf32>
    %c26 = arith.constant 26 : index
    %c0_94 = arith.constant 0 : index
    %c0_95 = arith.constant 0 : index
    %203 = vector.load %arg6[%c26, %c0_94, %c0_95] : memref<32x176x100xf32, #tpu.memory_space<vmem>>, vector<1x176x100xf32>
    %204 = vector.shape_cast %203 : vector<1x176x100xf32> to vector<176x100xf32>
    %cst_96 = arith.constant dense<0.000000e+00> : vector<8x100xf32>
    %205 = tpu.matmul %202, %204, %cst_96 {dimension_numbers = #tpu.dot_dimension_numbers<[1], [0], [0], [1], [0, 0, 1, 1], [], []>} : vector<8x176xf32>, vector<176x100xf32>, vector<8x100xf32> -> vector<8x100xf32>
    %206 = arith.addf %200, %205 : vector<8x100xf32>
    %207 = vector.extract_strided_slice %43 {offsets = [27, 0, 0], sizes = [1, 8, 176], strides = [1, 1, 1]} : vector<32x8x176xf32> to vector<1x8x176xf32>
    %208 = vector.shape_cast %207 : vector<1x8x176xf32> to vector<8x176xf32>
    %c27 = arith.constant 27 : index
    %c0_97 = arith.constant 0 : index
    %c0_98 = arith.constant 0 : index
    %209 = vector.load %arg6[%c27, %c0_97, %c0_98] : memref<32x176x100xf32, #tpu.memory_space<vmem>>, vector<1x176x100xf32>
    %210 = vector.shape_cast %209 : vector<1x176x100xf32> to vector<176x100xf32>
    %cst_99 = arith.constant dense<0.000000e+00> : vector<8x100xf32>
    %211 = tpu.matmul %208, %210, %cst_99 {dimension_numbers = #tpu.dot_dimension_numbers<[1], [0], [0], [1], [0, 0, 1, 1], [], []>} : vector<8x176xf32>, vector<176x100xf32>, vector<8x100xf32> -> vector<8x100xf32>
    %212 = arith.addf %206, %211 : vector<8x100xf32>
    %213 = vector.extract_strided_slice %43 {offsets = [28, 0, 0], sizes = [1, 8, 176], strides = [1, 1, 1]} : vector<32x8x176xf32> to vector<1x8x176xf32>
    %214 = vector.shape_cast %213 : vector<1x8x176xf32> to vector<8x176xf32>
    %c28 = arith.constant 28 : index
    %c0_100 = arith.constant 0 : index
    %c0_101 = arith.constant 0 : index
    %215 = vector.load %arg6[%c28, %c0_100, %c0_101] : memref<32x176x100xf32, #tpu.memory_space<vmem>>, vector<1x176x100xf32>
    %216 = vector.shape_cast %215 : vector<1x176x100xf32> to vector<176x100xf32>
    %cst_102 = arith.constant dense<0.000000e+00> : vector<8x100xf32>
    %217 = tpu.matmul %214, %216, %cst_102 {dimension_numbers = #tpu.dot_dimension_numbers<[1], [0], [0], [1], [0, 0, 1, 1], [], []>} : vector<8x176xf32>, vector<176x100xf32>, vector<8x100xf32> -> vector<8x100xf32>
    %218 = arith.addf %212, %217 : vector<8x100xf32>
    %219 = vector.extract_strided_slice %43 {offsets = [29, 0, 0], sizes = [1, 8, 176], strides = [1, 1, 1]} : vector<32x8x176xf32> to vector<1x8x176xf32>
    %220 = vector.shape_cast %219 : vector<1x8x176xf32> to vector<8x176xf32>
    %c29 = arith.constant 29 : index
    %c0_103 = arith.constant 0 : index
    %c0_104 = arith.constant 0 : index
    %221 = vector.load %arg6[%c29, %c0_103, %c0_104] : memref<32x176x100xf32, #tpu.memory_space<vmem>>, vector<1x176x100xf32>
    %222 = vector.shape_cast %221 : vector<1x176x100xf32> to vector<176x100xf32>
    %cst_105 = arith.constant dense<0.000000e+00> : vector<8x100xf32>
    %223 = tpu.matmul %220, %222, %cst_105 {dimension_numbers = #tpu.dot_dimension_numbers<[1], [0], [0], [1], [0, 0, 1, 1], [], []>} : vector<8x176xf32>, vector<176x100xf32>, vector<8x100xf32> -> vector<8x100xf32>
    %224 = arith.addf %218, %223 : vector<8x100xf32>
    %225 = vector.extract_strided_slice %43 {offsets = [30, 0, 0], sizes = [1, 8, 176], strides = [1, 1, 1]} : vector<32x8x176xf32> to vector<1x8x176xf32>
    %226 = vector.shape_cast %225 : vector<1x8x176xf32> to vector<8x176xf32>
    %c30 = arith.constant 30 : index
    %c0_106 = arith.constant 0 : index
    %c0_107 = arith.constant 0 : index
    %227 = vector.load %arg6[%c30, %c0_106, %c0_107] : memref<32x176x100xf32, #tpu.memory_space<vmem>>, vector<1x176x100xf32>
    %228 = vector.shape_cast %227 : vector<1x176x100xf32> to vector<176x100xf32>
    %cst_108 = arith.constant dense<0.000000e+00> : vector<8x100xf32>
    %229 = tpu.matmul %226, %228, %cst_108 {dimension_numbers = #tpu.dot_dimension_numbers<[1], [0], [0], [1], [0, 0, 1, 1], [], []>} : vector<8x176xf32>, vector<176x100xf32>, vector<8x100xf32> -> vector<8x100xf32>
    %230 = arith.addf %224, %229 : vector<8x100xf32>
    %231 = vector.extract_strided_slice %43 {offsets = [31, 0, 0], sizes = [1, 8, 176], strides = [1, 1, 1]} : vector<32x8x176xf32> to vector<1x8x176xf32>
    %232 = vector.shape_cast %231 : vector<1x8x176xf32> to vector<8x176xf32>
    %c31 = arith.constant 31 : index
    %c0_109 = arith.constant 0 : index
    %c0_110 = arith.constant 0 : index
    %233 = vector.load %arg6[%c31, %c0_109, %c0_110] : memref<32x176x100xf32, #tpu.memory_space<vmem>>, vector<1x176x100xf32>
    %234 = vector.shape_cast %233 : vector<1x176x100xf32> to vector<176x100xf32>
    %cst_111 = arith.constant dense<0.000000e+00> : vector<8x100xf32>
    %235 = tpu.matmul %232, %234, %cst_111 {dimension_numbers = #tpu.dot_dimension_numbers<[1], [0], [0], [1], [0, 0, 1, 1], [], []>} : vector<8x176xf32>, vector<176x100xf32>, vector<8x100xf32> -> vector<8x100xf32>
    %236 = arith.addf %230, %235 : vector<8x100xf32>
    %c0_112 = arith.constant 0 : index
    %c0_113 = arith.constant 0 : index
    %237 = vector.load %arg7[%c0_112, %c0_113] : memref<1x100xf32, #tpu.memory_space<vmem>>, vector<1x100xf32>
    %238 = vector.broadcast %237 : vector<1x100xf32> to vector<8x100xf32>
    %239 = arith.addf %236, %238 : vector<8x100xf32>
    %cst_114 = arith.constant 0.000000e+00 : f32
    %240 = vector.broadcast %cst_114 : f32 to vector<8x100xf32>
    %241 = arith.maximumf %239, %240 : vector<8x100xf32>
    %c0_115 = arith.constant 0 : index
    %c0_116 = arith.constant 0 : index
    %242 = vector.load %arg8[%c0_115, %c0_116] : memref<100x14xf32, #tpu.memory_space<vmem>>, vector<100x14xf32>
    %cst_117 = arith.constant dense<0.000000e+00> : vector<8x14xf32>
    %243 = tpu.matmul %241, %242, %cst_117 {dimension_numbers = #tpu.dot_dimension_numbers<[1], [0], [0], [1], [0, 0, 1, 1], [], []>} : vector<8x100xf32>, vector<100x14xf32>, vector<8x14xf32> -> vector<8x14xf32>
    %c0_118 = arith.constant 0 : index
    %c0_119 = arith.constant 0 : index
    %244 = vector.load %arg9[%c0_118, %c0_119] : memref<1x14xf32, #tpu.memory_space<vmem>>, vector<1x14xf32>
    %245 = vector.broadcast %244 : vector<1x14xf32> to vector<8x14xf32>
    %246 = arith.addf %243, %245 : vector<8x14xf32>
    %cst_120 = arith.constant 0.000000e+00 : f32
    %247 = vector.broadcast %cst_120 : f32 to vector<8x14xf32>
    %248 = arith.maximumf %246, %247 : vector<8x14xf32>
    %cst_121 = arith.constant dense<0xFF800000> : vector<8xf32>
    %249 = vector.multi_reduction <maximumf>, %248, %cst_121 [1] : vector<8x14xf32> to vector<8xf32>
    %250 = vector.shape_cast %249 : vector<8xf32> to vector<8x1xf32>
    %251 = vector.broadcast %250 : vector<8x1xf32> to vector<8x14xf32>
    %252 = arith.subf %248, %251 : vector<8x14xf32>
    %253 = math.exp %252 : vector<8x14xf32>
    %cst_122 = arith.constant dense<0.000000e+00> : vector<8xf32>
    %254 = vector.multi_reduction <add>, %253, %cst_122 [1] : vector<8x14xf32> to vector<8xf32>
    %255 = vector.shape_cast %254 : vector<8xf32> to vector<8x1xf32>
    %256 = math.log %255 : vector<8x1xf32>
    %257 = arith.addf %256, %250 : vector<8x1xf32>
    %258 = vector.broadcast %257 : vector<8x1xf32> to vector<8x14xf32>
    %259 = arith.subf %248, %258 : vector<8x14xf32>
    %c0_123 = arith.constant 0 : index
    %c0_124 = arith.constant 0 : index
    %260 = vector.load %arg10[%c0_123, %c0_124] : memref<8x14xf32, #tpu.memory_space<vmem>>, vector<8x14xf32>
    tpu.vector_store %arg10[%c0_123, %c0_124], %259 {strides = array<i32>} : memref<8x14xf32, #tpu.memory_space<vmem>>, vector<8x14xf32>,
    return
  }
  func.func @transform_0(%arg0: i32) -> (i32, i32) {
    %c0_i32 = arith.constant 0 : i32
    %c0_i32_0 = arith.constant 0 : i32
    return %c0_i32, %arg0 : i32, i32
  }
  func.func @transform_1(%arg0: i32) -> (i32, i32) {
    %c0_i32 = arith.constant 0 : i32
    %c0_i32_0 = arith.constant 0 : i32
    %c0_i32_1 = arith.constant 0 : i32
    return %c0_i32, %c0_i32_0 : i32, i32
  }
  func.func @transform_2(%arg0: i32) -> (i32, i32) {
    %c0_i32 = arith.constant 0 : i32
    %c0_i32_0 = arith.constant 0 : i32
    %c0_i32_1 = arith.constant 0 : i32
    return %c0_i32, %c0_i32_0 : i32, i32
  }
  func.func @transform_3(%arg0: i32) -> (i32, i32) {
    %c0_i32 = arith.constant 0 : i32
    %c0_i32_0 = arith.constant 0 : i32
    %c0_i32_1 = arith.constant 0 : i32
    return %c0_i32, %c0_i32_0 : i32, i32
  }
  func.func @transform_4(%arg0: i32) -> (i32, i32) {
    %c0_i32 = arith.constant 0 : i32
    %c0_i32_0 = arith.constant 0 : i32
    %c0_i32_1 = arith.constant 0 : i32
    return %c0_i32, %c0_i32_0 : i32, i32
  }
  func.func @transform_5(%arg0: i32) -> (i32, i32, i32) {
    %c0_i32 = arith.constant 0 : i32
    %c0_i32_0 = arith.constant 0 : i32
    %c0_i32_1 = arith.constant 0 : i32
    %c0_i32_2 = arith.constant 0 : i32
    return %c0_i32, %c0_i32_0, %c0_i32_1 : i32, i32, i32
  }
  func.func @transform_6(%arg0: i32) -> (i32, i32) {
    %c0_i32 = arith.constant 0 : i32
    %c0_i32_0 = arith.constant 0 : i32
    %c0_i32_1 = arith.constant 0 : i32
    return %c0_i32, %c0_i32_0 : i32, i32
  }
  func.func @transform_7(%arg0: i32) -> (i32, i32) {
    %c0_i32 = arith.constant 0 : i32
    %c0_i32_0 = arith.constant 0 : i32
    %c0_i32_1 = arith.constant 0 : i32
    return %c0_i32, %c0_i32_0 : i32, i32
  }
  func.func @transform_8(%arg0: i32) -> (i32, i32) {
    %c0_i32 = arith.constant 0 : i32
    %c0_i32_0 = arith.constant 0 : i32
    %c0_i32_1 = arith.constant 0 : i32
    return %c0_i32, %c0_i32_0 : i32, i32
  }
  func.func @transform_9(%arg0: i32) -> (i32, i32) {
    %c0_i32 = arith.constant 0 : i32
    %c0_i32_0 = arith.constant 0 : i32
    return %arg0, %c0_i32 : i32, i32
  }
}

module attributes {stable_mosaic.version = 11 : i64} {
  func.func @_conv_kernel_split(%arg0: i32, %arg1: memref<1x169x4xf32, #tpu.memory_space<vmem>>, %arg2: memref<1x8xf32, #tpu.memory_space<vmem>>, %arg3: memref<1x8xf32, #tpu.memory_space<vmem>>, %arg4: memref<4x8x32xf32, #tpu.memory_space<vmem>>, %arg5: memref<1x32xf32, #tpu.memory_space<vmem>>, %arg6: memref<1x169x32xf32, #tpu.memory_space<vmem>>) attributes {dimension_semantics = [#tpu.dimension_semantics<parallel>], iteration_bounds = array<i64: 2>, scalar_prefetch = 0 : i64, scratch_operands = 0 : i64, tpu.core_type = #tpu.core_type<tc>, window_params = [{transform_indices = @transform_0, window_bounds = array<i64: 1, 169, 4>}, {pipeline_mode = #tpu.pipeline_mode<synchronous>, transform_indices = @transform_1, window_bounds = array<i64: 1, 8>}, {pipeline_mode = #tpu.pipeline_mode<synchronous>, transform_indices = @transform_2, window_bounds = array<i64: 1, 8>}, {pipeline_mode = #tpu.pipeline_mode<synchronous>, transform_indices = @transform_3, window_bounds = array<i64: 4, 8, 32>}, {pipeline_mode = #tpu.pipeline_mode<synchronous>, transform_indices = @transform_4, window_bounds = array<i64: 1, 32>}, {transform_indices = @transform_5, window_bounds = array<i64: 1, 169, 32>}]} {
    %c0 = arith.constant 0 : index
    %c0_0 = arith.constant 0 : index
    %c0_1 = arith.constant 0 : index
    %0 = vector.load %arg1[%c0, %c0_0, %c0_1] : memref<1x169x4xf32, #tpu.memory_space<vmem>>, vector<1x169x4xf32>
    %1 = vector.shape_cast %0 : vector<1x169x4xf32> to vector<169x4xf32>
    %c0_2 = arith.constant 0 : index
    %c0_3 = arith.constant 0 : index
    %2 = vector.load %arg2[%c0_2, %c0_3] : memref<1x8xf32, #tpu.memory_space<vmem>>, vector<1x8xf32>
    %c0_4 = arith.constant 0 : index
    %c0_5 = arith.constant 0 : index
    %3 = vector.load %arg3[%c0_4, %c0_5] : memref<1x8xf32, #tpu.memory_space<vmem>>, vector<1x8xf32>
    %c0_6 = arith.constant 0 : index
    %c0_7 = arith.constant 0 : index
    %4 = vector.load %arg5[%c0_6, %c0_7] : memref<1x32xf32, #tpu.memory_space<vmem>>, vector<1x32xf32>
    %5 = vector.shape_cast %4 : vector<1x32xf32> to vector<1x32xf32>
    %6 = vector.broadcast %5 : vector<1x32xf32> to vector<169x32xf32>
    %7 = vector.extract_strided_slice %1 {offsets = [0, 0], sizes = [169, 1], strides = [1, 1]} : vector<169x4xf32> to vector<169x1xf32>
    %8 = vector.broadcast %7 : vector<169x1xf32> to vector<169x8xf32>
    %9 = vector.broadcast %2 : vector<1x8xf32> to vector<169x8xf32>
    %10 = arith.mulf %8, %9 : vector<169x8xf32>
    %11 = vector.broadcast %3 : vector<1x8xf32> to vector<169x8xf32>
    %12 = arith.addf %10, %11 : vector<169x8xf32>
    %cst = arith.constant 0.000000e+00 : f32
    %13 = vector.broadcast %cst : f32 to vector<169x8xf32>
    %14 = arith.maximumf %12, %13 : vector<169x8xf32>
    %c0_8 = arith.constant 0 : index
    %c0_9 = arith.constant 0 : index
    %c0_10 = arith.constant 0 : index
    %15 = vector.load %arg4[%c0_8, %c0_9, %c0_10] : memref<4x8x32xf32, #tpu.memory_space<vmem>>, vector<1x8x32xf32>
    %16 = vector.shape_cast %15 : vector<1x8x32xf32> to vector<8x32xf32>
    %cst_11 = arith.constant dense<0.000000e+00> : vector<169x32xf32>
    %17 = tpu.matmul %14, %16, %cst_11 {dimension_numbers = #tpu.dot_dimension_numbers<[1], [0], [0], [1], [0, 0, 1, 1], [], []>} : vector<169x8xf32>, vector<8x32xf32>, vector<169x32xf32> -> vector<169x32xf32>
    %18 = arith.addf %6, %17 : vector<169x32xf32>
    %19 = vector.extract_strided_slice %1 {offsets = [0, 1], sizes = [169, 1], strides = [1, 1]} : vector<169x4xf32> to vector<169x1xf32>
    %20 = vector.broadcast %19 : vector<169x1xf32> to vector<169x8xf32>
    %21 = vector.broadcast %2 : vector<1x8xf32> to vector<169x8xf32>
    %22 = arith.mulf %20, %21 : vector<169x8xf32>
    %23 = vector.broadcast %3 : vector<1x8xf32> to vector<169x8xf32>
    %24 = arith.addf %22, %23 : vector<169x8xf32>
    %cst_12 = arith.constant 0.000000e+00 : f32
    %25 = vector.broadcast %cst_12 : f32 to vector<169x8xf32>
    %26 = arith.maximumf %24, %25 : vector<169x8xf32>
    %c1 = arith.constant 1 : index
    %c0_13 = arith.constant 0 : index
    %c0_14 = arith.constant 0 : index
    %27 = vector.load %arg4[%c1, %c0_13, %c0_14] : memref<4x8x32xf32, #tpu.memory_space<vmem>>, vector<1x8x32xf32>
    %28 = vector.shape_cast %27 : vector<1x8x32xf32> to vector<8x32xf32>
    %cst_15 = arith.constant dense<0.000000e+00> : vector<169x32xf32>
    %29 = tpu.matmul %26, %28, %cst_15 {dimension_numbers = #tpu.dot_dimension_numbers<[1], [0], [0], [1], [0, 0, 1, 1], [], []>} : vector<169x8xf32>, vector<8x32xf32>, vector<169x32xf32> -> vector<169x32xf32>
    %30 = arith.addf %18, %29 : vector<169x32xf32>
    %31 = vector.extract_strided_slice %1 {offsets = [0, 2], sizes = [169, 1], strides = [1, 1]} : vector<169x4xf32> to vector<169x1xf32>
    %32 = vector.broadcast %31 : vector<169x1xf32> to vector<169x8xf32>
    %33 = vector.broadcast %2 : vector<1x8xf32> to vector<169x8xf32>
    %34 = arith.mulf %32, %33 : vector<169x8xf32>
    %35 = vector.broadcast %3 : vector<1x8xf32> to vector<169x8xf32>
    %36 = arith.addf %34, %35 : vector<169x8xf32>
    %cst_16 = arith.constant 0.000000e+00 : f32
    %37 = vector.broadcast %cst_16 : f32 to vector<169x8xf32>
    %38 = arith.maximumf %36, %37 : vector<169x8xf32>
    %c2 = arith.constant 2 : index
    %c0_17 = arith.constant 0 : index
    %c0_18 = arith.constant 0 : index
    %39 = vector.load %arg4[%c2, %c0_17, %c0_18] : memref<4x8x32xf32, #tpu.memory_space<vmem>>, vector<1x8x32xf32>
    %40 = vector.shape_cast %39 : vector<1x8x32xf32> to vector<8x32xf32>
    %cst_19 = arith.constant dense<0.000000e+00> : vector<169x32xf32>
    %41 = tpu.matmul %38, %40, %cst_19 {dimension_numbers = #tpu.dot_dimension_numbers<[1], [0], [0], [1], [0, 0, 1, 1], [], []>} : vector<169x8xf32>, vector<8x32xf32>, vector<169x32xf32> -> vector<169x32xf32>
    %42 = arith.addf %30, %41 : vector<169x32xf32>
    %43 = vector.extract_strided_slice %1 {offsets = [0, 3], sizes = [169, 1], strides = [1, 1]} : vector<169x4xf32> to vector<169x1xf32>
    %44 = vector.broadcast %43 : vector<169x1xf32> to vector<169x8xf32>
    %45 = vector.broadcast %2 : vector<1x8xf32> to vector<169x8xf32>
    %46 = arith.mulf %44, %45 : vector<169x8xf32>
    %47 = vector.broadcast %3 : vector<1x8xf32> to vector<169x8xf32>
    %48 = arith.addf %46, %47 : vector<169x8xf32>
    %cst_20 = arith.constant 0.000000e+00 : f32
    %49 = vector.broadcast %cst_20 : f32 to vector<169x8xf32>
    %50 = arith.maximumf %48, %49 : vector<169x8xf32>
    %c3 = arith.constant 3 : index
    %c0_21 = arith.constant 0 : index
    %c0_22 = arith.constant 0 : index
    %51 = vector.load %arg4[%c3, %c0_21, %c0_22] : memref<4x8x32xf32, #tpu.memory_space<vmem>>, vector<1x8x32xf32>
    %52 = vector.shape_cast %51 : vector<1x8x32xf32> to vector<8x32xf32>
    %cst_23 = arith.constant dense<0.000000e+00> : vector<169x32xf32>
    %53 = tpu.matmul %50, %52, %cst_23 {dimension_numbers = #tpu.dot_dimension_numbers<[1], [0], [0], [1], [0, 0, 1, 1], [], []>} : vector<169x8xf32>, vector<8x32xf32>, vector<169x32xf32> -> vector<169x32xf32>
    %54 = arith.addf %42, %53 : vector<169x32xf32>
    %cst_24 = arith.constant 0.000000e+00 : f32
    %55 = vector.broadcast %cst_24 : f32 to vector<169x32xf32>
    %56 = arith.maximumf %54, %55 : vector<169x32xf32>
    %c0_25 = arith.constant 0 : index
    %c0_26 = arith.constant 0 : index
    %c0_27 = arith.constant 0 : index
    %57 = vector.load %arg6[%c0_25, %c0_26, %c0_27] : memref<1x169x32xf32, #tpu.memory_space<vmem>>, vector<1x169x32xf32>
    %58 = vector.shape_cast %57 : vector<1x169x32xf32> to vector<169x32xf32>
    %59 = vector.shape_cast %56 : vector<169x32xf32> to vector<1x169x32xf32>
    tpu.vector_store %arg6[%c0_25, %c0_26, %c0_27], %59 {strides = array<i32>} : memref<1x169x32xf32, #tpu.memory_space<vmem>>, vector<1x169x32xf32>,
    return
  }
  func.func @transform_0(%arg0: i32) -> (i32, i32, i32) {
    %c0_i32 = arith.constant 0 : i32
    %c0_i32_0 = arith.constant 0 : i32
    %c0_i32_1 = arith.constant 0 : i32
    return %arg0, %c0_i32, %c0_i32_0 : i32, i32, i32
  }
  func.func @transform_1(%arg0: i32) -> (i32, i32) {
    %c0_i32 = arith.constant 0 : i32
    %c0_i32_0 = arith.constant 0 : i32
    %c0_i32_1 = arith.constant 0 : i32
    return %c0_i32, %c0_i32_0 : i32, i32
  }
  func.func @transform_2(%arg0: i32) -> (i32, i32) {
    %c0_i32 = arith.constant 0 : i32
    %c0_i32_0 = arith.constant 0 : i32
    %c0_i32_1 = arith.constant 0 : i32
    return %c0_i32, %c0_i32_0 : i32, i32
  }
  func.func @transform_3(%arg0: i32) -> (i32, i32, i32) {
    %c0_i32 = arith.constant 0 : i32
    %c0_i32_0 = arith.constant 0 : i32
    %c0_i32_1 = arith.constant 0 : i32
    %c0_i32_2 = arith.constant 0 : i32
    return %c0_i32, %c0_i32_0, %c0_i32_1 : i32, i32, i32
  }
  func.func @transform_4(%arg0: i32) -> (i32, i32) {
    %c0_i32 = arith.constant 0 : i32
    %c0_i32_0 = arith.constant 0 : i32
    %c0_i32_1 = arith.constant 0 : i32
    return %c0_i32, %c0_i32_0 : i32, i32
  }
  func.func @transform_5(%arg0: i32) -> (i32, i32, i32) {
    %c0_i32 = arith.constant 0 : i32
    %c0_i32_0 = arith.constant 0 : i32
    %c0_i32_1 = arith.constant 0 : i32
    return %arg0, %c0_i32, %c0_i32_0 : i32, i32, i32
  }
}

</mosaic_0001>

<bundles_post_ra>
// kernel: tpu_custom_call.1
= control target key start
LH: loop header
LB: loop body
LE: loop exit
PB: predicated region body
PF: predicated region fallthrough
CT: control target
= control target key end

     0   :  { %14 = vsyncpa [#allocation3], 0  ;;  %s8552_s0 = inlined_call_operand.hbm [shape: f32[4,1408], index: 0, kind: input, shape index: {}]   ;;  %s8553_s1 = inlined_call_operand.vmem [shape: f32[8,1], index: 1, kind: input, shape index: {}]   ;;  %s8554_s2 = inlined_call_operand.vmem [shape: f32[8,1], index: 2, kind: input, shape index: {}]   ;;  %s8555_s3 = inlined_call_operand.hbm [shape: f32[32,32], index: 3, kind: input, shape index: {}]   ;;  %s8556_s4 = inlined_call_operand.vmem [shape: f32[32,1], index: 4, kind: input, shape index: {}]   ;;  %s8557_s5 = inlined_call_operand.hbm [shape: f32[32,176,100], index: 5, kind: input, shape index: {}]   ;;  %s8558_s6 = inlined_call_operand.hbm [shape: f32[1,100], index: 6, kind: input, shape index: {}]   ;;  %s8559_s7 = inlined_call_operand.vmem [shape: f32[100,14], index: 7, kind: input, shape index: {}]   ;;  %s8560_s8 = inlined_call_operand.hbm [shape: f32[1,14], index: 8, kind: input, shape index: {}]   ;;  %s8561_s9 = inlined_call_operand.hbm [shape: f32[8,14], index: 9, kind: output, shape index: {}]  }
   0x1   :  { %15 = vsyncpa [#allocation6], 0 }
   0x2   :  { %16 = vsyncpa [#allocation9], 0 }
   0x3   :  { %17 = vsyncpa [#allocation4], 0  ;;  %s6136_s30 = smov [#allocation5]  }
   0x4   :  { %s37_s10 = sshll.u32 %s6136_s30, 4  ;;  %s38_s10 = int_to_ptr.vmem [resolvable:$true] %s37_s10 }
   0x5   :  { %s6016_s11 = scalar_lea.vmem %s38_s10, 512  ;;  %p6021_p1 = scmp.lt.s32.totalorder %s38_s10, %s38_s10 }
   0x6   :  { %p6017_p0 = scmp.ne.s32.totalorder %s38_s10, %s6016_s11  ;;  %p6022_p2 = scmp.lt.s32.totalorder %s6016_s11, %s6016_s11 }
   0x8   :  { %p6023_p3 = por %p6022_p2, %p6021_p1 }
   0xa   :  { %p6024_p4 = pnand %p6023_p3, %p6017_p0 }
   0xc   :  { %6027 = shalt.err (!%p6024_p4)
}
   0xd   :  { %s6137_s12 = smov 128   ;;  %s6138_s13 = smov 8  }
   0xe   :  { %43 = dma.hbm_to_vmem [thread:$0]  %s8555_s3, 512, %s38_s10, [#allocation6], %s6137_s12, %s6137_s12, %s6138_s13  }
   0xf   :  { %s6139_s16 = smov [#allocation8]   ;;  %s6140_s18 = smov [#allocation2]  }
  0x10   :  { %s64_s17 = sshll.u32 %s6139_s16, 4  ;;  %s24_s19 = sshll.u32 %s6140_s18, 4  ;;  %s65_s17 = int_to_ptr.vmem [resolvable:$true] %s64_s17  ;;  %s25_s19 = int_to_ptr.vmem [resolvable:$true] %s24_s19 }
  0x11   :  { %s6036_s20 = scalar_lea.vmem %s65_s17, 16  ;;  %s6040_s21 = scalar_lea.vmem %s65_s17, 32 }
  0x12   :  { %p6037_p5 = scmp.ne.s32.totalorder %s65_s17, %s6036_s20  ;;  %p6041_p6 = scmp.lt.s32.totalorder %s65_s17, %s65_s17 }
  0x13   :  { %p6042_p7 = scmp.lt.s32.totalorder %s6040_s21, %s6036_s20 }
  0x15   :  { %p6043_p8 = por %p6042_p7, %p6041_p6 }
  0x17   :  { %p6044_p9 = pnand %p6043_p8, %p6037_p5 }
  0x19   :  { %6047 = shalt.err (!%p6044_p9)
}
  0x1a   :  { %67 = dma.hbm_to_vmem [thread:$0]  %s8558_s6, 16, %s65_s17, [#allocation9]  }
  0x1b   :  { %s6056_s24 = scalar_lea.vmem %s25_s19, 704  ;;  %p6061_p11 = scmp.lt.s32.totalorder %s25_s19, %s25_s19 }
  0x1c   :  { %p6057_p10 = scmp.ne.s32.totalorder %s25_s19, %s6056_s24  ;;  %p6062_p12 = scmp.lt.s32.totalorder %s6056_s24, %s6056_s24 }
  0x1e   :  { %p6063_p13 = por %p6062_p12, %p6061_p11 }
  0x20   :  { %p6064_p0 = pnand %p6063_p13, %p6057_p10 }
  0x22   :  { %6067 = shalt.err (!%p6064_p0)
}
  0x23   :  { %27 = dma.hbm_to_vmem [thread:$0]  %s8552_s0, 704, %s25_s19, [#allocation3]  }
  0x24   :  { %s6141_s26 = smov [#allocation7]   ;;  %s6142_s28 = smov [#allocation10]  }
  0x25   :  { %s51_s27 = sshll.u32 %s6141_s26, 4  ;;  %s76_s29 = sshll.u32 %s6142_s28, 4  ;;  %s52_s27 = int_to_ptr.vmem [resolvable:$true] %s51_s27  ;;  %s77_s29 = int_to_ptr.vmem [resolvable:$true] %s76_s29 }
  0x26   :  { %s6076_s30 = scalar_lea.vmem %s52_s27, 90112  ;;  %p6081_p2 = scmp.lt.s32.totalorder %s52_s27, %s52_s27 }
  0x27   :  { %p6077_p1 = scmp.ne.s32.totalorder %s52_s27, %s6076_s30  ;;  %p6082_p3 = scmp.lt.s32.totalorder %s6076_s30, %s6076_s30 }
  0x29   :  { %p6083_p4 = por %p6082_p3, %p6081_p2 }
  0x2b   :  { %p6084_p5 = pnand %p6083_p4, %p6077_p1 }
  0x2d   :  { %6087 = shalt.err (!%p6084_p5)
}
  0x2e   :  { %57 = dma.hbm_to_vmem [thread:$0]  %s8557_s5, 90112, %s52_s27, [#allocation6], %s6137_s12, %s6137_s12, %s6138_s13  }
  0x2f   :  { %s6096_s0 = scalar_lea.vmem %s77_s29, 16  ;;  %s6100_s11 = scalar_lea.vmem %s77_s29, 32 }
  0x30   :  { %p6097_p6 = scmp.ne.s32.totalorder %s77_s29, %s6096_s0  ;;  %p6101_p7 = scmp.lt.s32.totalorder %s77_s29, %s77_s29 }
  0x31   :  { %p6102_p8 = scmp.lt.s32.totalorder %s6100_s11, %s6096_s0 }
  0x33   :  { %p6103_p9 = por %p6102_p8, %p6101_p7 }
  0x35   :  { %p6104_p10 = pnand %p6103_p9, %p6097_p6 }
  0x37   :  { %6107 = shalt.err (!%p6104_p10)
}
  0x38   :  { %79 = dma.hbm_to_vmem [thread:$0]  %s8560_s8, 16, %s77_s29, [#allocation9]  }
  0x39   :  { %6128 = dma.done.wait [#allocation3], 704  }
  0x3a   :  { %6129 = vsyncadd [#allocation3], 4294966592 }
  0x3b   :  { %6130 = dma.done.wait [#allocation6], 90624  }
  0x3c   :  { %6131 = vsyncadd [#allocation6], 4294876672 }
  0x3d   :  { %6132 = dma.done.wait [#allocation9], 32  }
  0x3e   :  { %6133 = vsyncadd [#allocation9], 4294967264  ;;  %v6143_v0 = vmov 0   ;;  %v101_v1 = vld [vmem:[%s8553_s1] sm:$0xff]  ;;  %v6144_v3 = vmov 0.0   ;;  %v109_v5 = vlaneseq  ;;  %v97_v13 = vld [vmem:[#allocation2 + $0x10] sm:$0xff] }
  0x3f   :  { %6002 = vset.pattern.permute.xlu0 %v6143_v0  ;;  %6003 = vset.pattern.permute.xlu1 %v6143_v0  ;;  %v102_v2 = vld [vmem:[%s8554_s2] sm:$0xff]  ;;  %v96_v27 = vld [vmem:[#allocation2 + $0x8] sm:$0xff]  ;;  %v6324_v61 = vld [vmem:[#allocation2 + $0x18] sm:$0xff]  ;;  %vm675_vm0 = vcmask 261120   ;;  %s6145_s1 = smov 32   ;;  %s6146_s2 = smov 80  }
  0x40   :  { %210 = vperm.xlu0 %6002, %v101_v1   ;;  %752 = vmatprep.mubr.f32.mxu1 %v6144_v3  ;;  %v651_v4 = vld [vmem:[%s8556_s4] sm:$0xff]  ;;  %v6238_v6 = vshrl.u32 %v109_v5, 7  ;;  %s6147_s18 = smov 112   ;;  %s6148_s19 = smov 64   ;;  %vm1367_vm1 = vcmask 916480   ;;  %vm1286_vm2 = vcmask 654336  }
  0x41   :  { %930 = vmatprep.mubr.f32.mxu0 %v6144_v3  ;;  %657 = vperm.xlu1 %6003, %v651_v4   ;;  %v95_v9 = vld [vmem:[#allocation2] sm:$0xff]  ;;  %s6149_s20 = smov 16   ;;  %s6150_s21 = smov 96   ;;  %vm1482_vm3 = vcmask 785408   ;;  %vm1400_vm4 = vcmask 523264   ;;  %vm1445_vm5 = vcmask 130048  }
  0x42   :  { %v6241_v7 = vsub.s32 3, %v6238_v6  ;;  %v6244_v8 = vsub.s32 7, %v6238_v6  ;;  %v6247_v10 = vsub.s32 6, %v6238_v6  ;;  %v6250_v11 = vsub.s32 2, %v6238_v6  ;;  %v99_v28 = vld [vmem:[#allocation2 + $0x20] sm:$0xff]  ;;  %s6151_s22 = smov 48  }
  0x43   :  { %v6255_v15 = vsub.s32 1, %v6238_v6  ;;  %v6259_v17 = vsub.s32 5, %v6238_v6  ;;  %v6263_v19 = vsub.s32 4, %v6238_v6  ;;  %v6266_v20 = vsub.s32 0, %v6238_v6 }
  0x44   :  { %226 = vperm.xlu0 %6002, %v102_v2   ;;  %v522_v12 = vrot.slane %v95_v9, %v6244_v8  ;;  %v518_v14 = vrot.slane %v95_v9, %v6241_v7  ;;  %v390_v16 = vrot.slane %v95_v9, %v6247_v10  ;;  %v386_v18 = vrot.slane %v95_v9, %v6250_v11 }
  0x45   :  { %v538_v21 = vrot.slane %v97_v13, %v6244_v8  ;;  %v534_v22 = vrot.slane %v97_v13, %v6241_v7  ;;  %v406_v25 = vrot.slane %v97_v13, %v6247_v10  ;;  %v402_v26 = vrot.slane %v97_v13, %v6250_v11 }
  0x46   :  { %v6271_v23 = vrot.slane %v522_v12, %v6241_v7  ;;  %v6274_v24 = vrot.slane %v518_v14, %v6241_v7  ;;  %v6279_v29 = vrot.slane %v390_v16, %v6250_v11  ;;  %v258_v30 = vrot.slane %v95_v9, %v6259_v17 }
  0x47   :  { %v274_v31 = vrot.slane %v97_v13, %v6259_v17  ;;  %v254_v32 = vrot.slane %v95_v9, %v6255_v15  ;;  %v6285_v33 = vrot.slane %v386_v18, %v6250_v11  ;;  %v270_v34 = vrot.slane %v97_v13, %v6255_v15 }
  0x48   :  { %v116_v35 = vrot.slane %v95_v9, %v6263_v19  ;;  %v132_v36 = vrot.slane %v97_v13, %v6263_v19  ;;  %v112_v37 = vrot.slane %v95_v9, %v6266_v20  ;;  %v128_v38 = vrot.slane %v97_v13, %v6266_v20 }
  0x49   :  { %v530_v39 = vrot.slane %v96_v27, %v6244_v8  ;;  %v554_v40 = vrot.slane %v99_v28, %v6244_v8  ;;  %v593_v41 = vrot.slane %v538_v21, %v6241_v7  ;;  %v589_v42 = vrot.slane %v534_v22, %v6241_v7 }
  0x4a   :  { %v461_v43 = vrot.slane %v406_v25, %v6250_v11  ;;  %v526_v44 = vrot.slane %v96_v27, %v6241_v7  ;;  %v457_v45 = vrot.slane %v402_v26, %v6250_v11  ;;  %v313_v46 = vrot.slane %v258_v30, %v6255_v15 }
  0x4b   :  { %v329_v47 = vrot.slane %v274_v31, %v6255_v15  ;;  %v309_v48 = vrot.slane %v254_v32, %v6255_v15  ;;  %v325_v49 = vrot.slane %v270_v34, %v6255_v15  ;;  %v171_v50 = vrot.slane %v116_v35, %v6266_v20 }
  0x4c   :  { %v187_v51 = vrot.slane %v132_v36, %v6266_v20  ;;  %v550_v52 = vrot.slane %v99_v28, %v6241_v7  ;;  %v6307_v53 = vrot.slane %v112_v37, %v6266_v20  ;;  %v6310_v54 = vrot.slane %v128_v38, %v6266_v20 }
  0x4d   :  { %v6313_v55 = vrot.slane %v530_v39, %v6241_v7  ;;  %v6316_v56 = vrot.slane %v554_v40, %v6241_v7  ;;  %v6319_v57 = vrot.slane %v526_v44, %v6241_v7  ;;  %v398_v58 = vrot.slane %v96_v27, %v6247_v10 }
  0x4e   :  { %v422_v59 = vrot.slane %v99_v28, %v6247_v10  ;;  %v394_v60 = vrot.slane %v96_v27, %v6250_v11  ;;  %v418_v62 = vrot.slane %v99_v28, %v6250_v11  ;;  %v266_v63 = vrot.slane %v96_v27, %v6259_v17 }
  0x4f   :  { %v290_v0 = vrot.slane %v99_v28, %v6259_v17  ;;  %v262_v1 = vrot.slane %v96_v27, %v6255_v15  ;;  %v6331_v2 = vrot.slane %v550_v52, %v6241_v7  ;;  %v286_v4 = vrot.slane %v99_v28, %v6255_v15 }
  0x50   :  { %v124_v5 = vrot.slane %v96_v27, %v6263_v19  ;;  %v148_v9 = vrot.slane %v99_v28, %v6263_v19  ;;  %v120_v12 = vrot.slane %v96_v27, %v6266_v20  ;;  %v144_v13 = vrot.slane %v99_v28, %v6266_v20 }
  0x51   :  { %v546_v14 = vrot.slane %v6324_v61, %v6244_v8  ;;  %v542_v16 = vrot.slane %v6324_v61, %v6241_v7  ;;  %v6343_v18 = vrot.slane %v398_v58, %v6250_v11  ;;  %v6346_v21 = vrot.slane %v422_v59, %v6250_v11 }
  0x52   :  { %v6349_v22 = vrot.slane %v394_v60, %v6250_v11  ;;  %v414_v25 = vrot.slane %v6324_v61, %v6247_v10  ;;  %v6354_v26 = vrot.slane %v418_v62, %v6250_v11  ;;  %v6357_v8 = vrot.slane %v266_v63, %v6255_v15 }
  0x53   :  { %v6360_v27 = vrot.slane %v290_v0, %v6255_v15  ;;  %v6363_v28 = vrot.slane %v262_v1, %v6255_v15  ;;  %v6366_v30 = vrot.slane %v286_v4, %v6255_v15  ;;  %v6369_v31 = vrot.slane %v124_v5, %v6266_v20 }
  0x54   :  { %v6372_v10 = vrot.slane %v148_v9, %v6266_v20  ;;  %v410_v32 = vrot.slane %v6324_v61, %v6250_v11  ;;  %v6379_v35 = vrot.slane %v120_v12, %v6266_v20  ;;  %v6382_v36 = vrot.slane %v144_v13, %v6266_v20 }
  0x55   :  { %v6385_v37 = vrot.slane %v546_v14, %v6241_v7  ;;  %v6388_v38 = vrot.slane %v542_v16, %v6241_v7  ;;  %v6394_v44 = vrot.slane %v414_v25, %v6250_v11  ;;  %v282_v52 = vrot.slane %v6324_v61, %v6259_v17 }
  0x56   :  { %vm1515_vm6 = vcmask 392192   ;;  %vm5750_vm7 = vcmask 1043456   ;;  %vm6154_vm8 = vmmov 0   ;;  %vm5746_vm9 = vcmask 818176  }
  0x57   :  { %vm5825_vm10 = vcmask 113664  }
  0xbb   :  { %v6376_v34 = vpop.permute.xlu0 %210 }
  0xbc   :  { %v615_v39 = vmul.f32 %v6271_v23, %v6376_v34  ;;  %v619_v40 = vmul.f32 %v593_v41, %v6376_v34  ;;  %v614_v58 = vmul.f32 %v6274_v24, %v6376_v34  ;;  %v618_v59 = vmul.f32 %v589_v42, %v6376_v34 }
  0xbd   :  { %v483_v60 = vmul.f32 %v6279_v29, %v6376_v34  ;;  %v487_v62 = vmul.f32 %v461_v43, %v6376_v34  ;;  %v482_v23 = vmul.f32 %v6285_v33, %v6376_v34  ;;  %v486_v41 = vmul.f32 %v457_v45, %v6376_v34 }
  0xbe   :  { %v351_v63 = vmul.f32 %v313_v46, %v6376_v34  ;;  %v355_v0 = vmul.f32 %v329_v47, %v6376_v34  ;;  %v350_v24 = vmul.f32 %v309_v48, %v6376_v34  ;;  %v354_v42 = vmul.f32 %v325_v49, %v6376_v34 }
  0xbf   :  { %v6409_v1 = vpop.permute.xlu0 %226  ;;  %v214_v4 = vmul.f32 %v6376_v34, %v171_v50  ;;  %v218_v29 = vmul.f32 %v6376_v34, %v187_v51  ;;  %v213_v16 = vmul.f32 %v6376_v34, %v6307_v53  ;;  %v217_v25 = vmul.f32 %v6376_v34, %v6310_v54 }
  0xc0   :  { %v626_v43 = vadd.f32 %v615_v39, %v6409_v1  ;;  %v630_v33 = vadd.f32 %v619_v40, %v6409_v1  ;;  %v625_v45 = vadd.f32 %v614_v58, %v6409_v1  ;;  %v629_v46 = vadd.f32 %v618_v59, %v6409_v1 }
  0xc1   :  { %v494_v47 = vadd.f32 %v483_v60, %v6409_v1  ;;  %v498_v5 = vadd.f32 %v487_v62, %v6409_v1  ;;  %v493_v48 = vadd.f32 %v482_v23, %v6409_v1  ;;  %v497_v49 = vadd.f32 %v486_v41, %v6409_v1 }
  0xc2   :  { %v637_v50 = vmax.f32 %v626_v43, 0.0  ;;  %v641_v9 = vmax.f32 %v630_v33, 0.0  ;;  %v636_v51 = vmax.f32 %v625_v45, 0.0  ;;  %v640_v12 = vmax.f32 %v629_v46, 0.0 }
  0xc3   :  { %v505_v13 = vmax.f32 %v494_v47, 0.0  ;;  %v509_v14 = vmax.f32 %v498_v5, 0.0  ;;  %v504_v39 = vmax.f32 %v493_v48, 0.0  ;;  %v362_v40 = vadd.f32 %v351_v63, %v6409_v1  ;;  %v6441_v5 = vld [vmem:[#allocation5] sm:$0xff] }
  0xc4   :  { %712 = vmatprep.subr.mxu1 %v637_v50  ;;  %890 = vmatprep.subr.mxu0 %v641_v9  ;;  %v366_v58 = vadd.f32 %v355_v0, %v6409_v1  ;;  %v361_v59 = vadd.f32 %v350_v24, %v6409_v1  ;;  %v508_v60 = vmax.f32 %v497_v49, 0.0  ;;  %v365_v62 = vadd.f32 %v354_v42, %v6409_v1 }
  0xc5   :  { %713 = vmatpush1.msra.mxu1 %v636_v51  ;;  %891 = vmatpush1.msra.mxu0 %v640_v12  ;;  %v230_v23 = vadd.f32 %v6409_v1, %v214_v4  ;;  %v234_v53 = vadd.f32 %v6409_v1, %v218_v29  ;;  %v373_v54 = vmax.f32 %v362_v40, 0.0  ;;  %v229_v63 = vadd.f32 %v6409_v1, %v213_v16 }
  0xc6   :  { %714 = vmatprep.subr.mxu1 %v505_v13  ;;  %892 = vmatprep.subr.mxu0 %v509_v14  ;;  %v377_v41 = vmax.f32 %v366_v58, 0.0  ;;  %v372_v43 = vmax.f32 %v361_v59, 0.0  ;;  %v376_v0 = vmax.f32 %v365_v62, 0.0  ;;  %v233_v45 = vadd.f32 %v6409_v1, %v217_v25  ;;  %v6468_v59 = vld [vmem:[#allocation5 + $0x8] sm:$0xff] }
  0xc7   :  { %715 = vmatpush1.msra.mxu1 %v504_v39  ;;  %893 = vmatpush1.msra.mxu0 %v508_v60  ;;  %v241_v24 = vmax.f32 %v230_v23, 0.0  ;;  %v245_v33 = vmax.f32 %v234_v53, 0.0  ;;  %v240_v42 = vmax.f32 %v229_v63, 0.0  ;;  %v617_v4 = vmul.f32 %v6313_v55, %v6376_v34 }
  0xc8   :  { %716 = vmatprep.subr.mxu1 %v373_v54  ;;  %894 = vmatprep.subr.mxu0 %v377_v41  ;;  %v623_v29 = vmul.f32 %v6316_v56, %v6376_v34  ;;  %v616_v46 = vmul.f32 %v6319_v57, %v6376_v34  ;;  %v244_v47 = vmax.f32 %v233_v45, 0.0  ;;  %v622_v48 = vmul.f32 %v6331_v2, %v6376_v34 }
  0xc9   :  { %717 = vmatpush1.msra.mxu1 %v372_v43  ;;  %895 = vmatpush1.msra.mxu0 %v376_v0  ;;  %v485_v49 = vmul.f32 %v6343_v18, %v6376_v34  ;;  %v491_v55 = vmul.f32 %v6346_v21, %v6376_v34  ;;  %v628_v56 = vadd.f32 %v617_v4, %v6409_v1  ;;  %v6499_v4 = vld [vmem:[#allocation5 + $0x10] sm:$0xff] }
  0xca   :  { %718 = vmatprep.subr.mxu1 %v241_v24  ;;  %896 = vmatprep.subr.mxu0 %v245_v33  ;;  %v634_v57 = vadd.f32 %v623_v29, %v6409_v1  ;;  %v627_v50 = vadd.f32 %v616_v46, %v6409_v1  ;;  %v633_v9 = vadd.f32 %v622_v48, %v6409_v1  ;;  %v6501_v29 = vld [vmem:[#allocation2 + $0x28] sm:$0xf] }
  0xcb   :  { %719 = vmatpush1.msra.mxu1 %v240_v42  ;;  %897 = vmatpush1.msra.mxu0 %v244_v47  ;;  %v496_v2 = vadd.f32 %v485_v49, %v6409_v1  ;;  %v502_v51 = vadd.f32 %v491_v55, %v6409_v1  ;;  %v639_v18 = vmax.f32 %v628_v56, 0.0  ;;  %v484_v12 = vmul.f32 %v6349_v22, %v6376_v34 }
  0xcc   :  { %5857 = vmatmul.mubr.msk.f32.vlgmr.msra.gmra.mxu1 %vm675_vm0, %v6441_v5  ;;  %5865 = vmatmul.mubr.msk.f32.vlgmr.msra.gmra.mxu0 %vm675_vm0, %v6441_v5  ;;  %v645_v21 = vmax.f32 %v634_v57, 0.0  ;;  %v278_v13 = vrot.slane %v6324_v61, %v6255_v15  ;;  %v638_v14 = vmax.f32 %v627_v50, 0.0  ;;  %v644_v16 = vmax.f32 %v633_v9, 0.0  ;;  %v6526_v9 = vld [vmem:[#allocation5 + $0x18] sm:$0xff] }
  0xcd   :  { %v507_v25 = vmax.f32 %v496_v2, 0.0  ;;  %758 = vmatprep.mubr.f32.mxu1 %v6144_v3  ;;  %936 = vmatprep.mubr.f32.mxu0 %v6144_v3  ;;  %v490_v39 = vmul.f32 %v6354_v26, %v6376_v34  ;;  %v513_v40 = vmax.f32 %v502_v51, 0.0  ;;  %v495_v58 = vadd.f32 %v484_v12, %v6409_v1 }
  0xce   :  { %801 = vmatprep.subr.mxu1 %v639_v18  ;;  %1068 = vmatprep.subr.mxu0 %v645_v21  ;;  %v353_v22 = vmul.f32 %v6357_v8, %v6376_v34  ;;  %v359_v60 = vmul.f32 %v6360_v27, %v6376_v34  ;;  %v352_v26 = vmul.f32 %v6363_v28, %v6376_v34 }
  0xcf   :  { %802 = vmatpush1.msra.mxu1 %v638_v14  ;;  %1069 = vmatpush1.msra.mxu0 %v644_v16  ;;  %v501_v62 = vadd.f32 %v490_v39, %v6409_v1  ;;  %v358_v23 = vmul.f32 %v6366_v30, %v6376_v34  ;;  %v506_v53 = vmax.f32 %v495_v58, 0.0  ;;  %v216_v27 = vmul.f32 %v6376_v34, %v6369_v31 }
  0xd0   :  { %803 = vmatprep.subr.mxu1 %v507_v25  ;;  %1070 = vmatprep.subr.mxu0 %v513_v40  ;;  %v364_v54 = vadd.f32 %v353_v22, %v6409_v1  ;;  %v370_v8 = vadd.f32 %v359_v60, %v6409_v1  ;;  %v363_v28 = vadd.f32 %v352_v26, %v6409_v1 }
  0xd1   :  { %v512_v41 = vmax.f32 %v501_v62, 0.0  ;;  %5858 = vmatmul.mubr.msk.f32.gmra.mxu1 %vm675_vm0, %v6468_v59  ;;  %5866 = vmatmul.mubr.msk.f32.gmra.mxu0 %vm675_vm0, %v6468_v59  ;;  %v369_v30 = vadd.f32 %v358_v23, %v6409_v1  ;;  %v222_v43 = vmul.f32 %v6376_v34, %v6372_v10  ;;  %v232_v24 = vadd.f32 %v6409_v1, %v216_v27 }
  0xd2   :  { %804 = vmatpush1.msra.mxu1 %v506_v53  ;;  %v375_v63 = vmax.f32 %v364_v54, 0.0  ;;  %v381_v0 = vmax.f32 %v370_v8, 0.0  ;;  %764 = vmatprep.mubr.f32.mxu1 %v6144_v3  ;;  %v215_v31 = vmul.f32 %v6376_v34, %v6379_v35  ;;  %v374_v33 = vmax.f32 %v363_v28, 0.0 }
  0xd3   :  { %1071 = vmatpush1.msra.mxu0 %v512_v41  ;;  %v380_v45 = vmax.f32 %v369_v30, 0.0  ;;  %v238_v42 = vadd.f32 %v6409_v1, %v222_v43  ;;  %942 = vmatprep.mubr.f32.mxu0 %v6144_v3  ;;  %v221_v10 = vmul.f32 %v6376_v34, %v6382_v36  ;;  %v243_v46 = vmax.f32 %v232_v24, 0.0 }
  0xd4   :  { %805 = vmatprep.subr.mxu1 %v375_v63  ;;  %1072 = vmatprep.subr.mxu0 %v381_v0  ;;  %v231_v47 = vadd.f32 %v6409_v1, %v215_v31  ;;  %v621_v35 = vmul.f32 %v6385_v37, %v6376_v34  ;;  %v140_v48 = vrot.slane %v6324_v61, %v6263_v19 }
  0xd5   :  { %806 = vmatpush1.msra.mxu1 %v374_v33  ;;  %1073 = vmatpush1.msra.mxu0 %v380_v45  ;;  %v249_v49 = vmax.f32 %v238_v42, 0.0  ;;  %v237_v36 = vadd.f32 %v6409_v1, %v221_v10  ;;  %v465_v55 = vrot.slane %v410_v32, %v6250_v11  ;;  %v136_v56 = vrot.slane %v6324_v61, %v6266_v20 }
  0xd6   :  { %807 = vmatprep.subr.mxu1 %v243_v46  ;;  %v242_v57 = vmax.f32 %v231_v47, 0.0  ;;  %5859 = vmatmul.mubr.msk.f32.gmra.mxu1 %vm675_vm0, %v6499_v4  ;;  %v632_v19 = vadd.f32 %v621_v35, %v6409_v1  ;;  %v337_v37 = vrot.slane %v282_v52, %v6255_v15  ;;  %v558_v50 = vrot.slane %v6501_v29, %v6241_v7 }
  0xd7   :  { %1074 = vmatprep.subr.mxu0 %v249_v49  ;;  %v248_v32 = vmax.f32 %v237_v36, 0.0  ;;  %5867 = vmatmul.mubr.msk.f32.gmra.mxu0 %vm675_vm0, %v6499_v4  ;;  %v620_v2 = vmul.f32 %v6388_v38, %v6376_v34  ;;  %v333_v51 = vrot.slane %v278_v13, %v6255_v15  ;;  %v489_v52 = vmul.f32 %v6394_v44, %v6376_v34 }
  0xd8   :  { %808 = vmatpush1.msra.mxu1 %v242_v57  ;;  %v643_v17 = vmax.f32 %v632_v19, 0.0  ;;  %770 = vmatprep.mubr.f32.mxu1 %v6144_v3  ;;  %v195_v18 = vrot.slane %v140_v48, %v6266_v20  ;;  %v488_v38 = vmul.f32 %v465_v55, %v6376_v34  ;;  %v191_v12 = vrot.slane %v136_v56, %v6266_v20 }
  0xd9   :  { %1075 = vmatpush1.msra.mxu0 %v248_v32  ;;  %948 = vmatprep.mubr.f32.mxu0 %v6144_v3  ;;  %v631_v21 = vadd.f32 %v620_v2, %v6409_v1  ;;  %v500_v61 = vadd.f32 %v489_v52, %v6409_v1  ;;  %v357_v13 = vmul.f32 %v337_v37, %v6376_v34  ;;  %v2654_v32 = vld [vmem:[#allocation7 + $0x128] sm:$0xff] }
  0xda   :  { %979 = vmatprep.subr.mxu1 %v643_v17  ;;  %5860 = vmatmul.mubr.msk.f32.gmra.mxu1 %vm675_vm0, %v6526_v9  ;;  %v613_v44 = vrot.slane %v558_v50, %v6241_v7  ;;  %v499_v14 = vadd.f32 %v488_v38, %v6409_v1  ;;  %v356_v16 = vmul.f32 %v333_v51, %v6376_v34  ;;  %v2653_v51 = vld [vmem:[#allocation7 + $0x120] sm:$0xff]  ;;  %v2630_v17 = vld [vmem:[#allocation7 + $0x70] sm:$0xff] }
  0xdb   :  { %5868 = vmatmul.mubr.msk.f32.gmra.mxu0 %vm675_vm0, %v6526_v9  ;;  %841 = vmatprep.mubr.f32.mxu1 %v6144_v3  ;;  %v368_v25 = vadd.f32 %v357_v13, %v6409_v1  ;;  %v220_v39 = vmul.f32 %v6376_v34, %v195_v18  ;;  %v642_v40 = vmax.f32 %v631_v21, 0.0  ;;  %v219_v58 = vmul.f32 %v6376_v34, %v191_v12 }
  0xdc   :  { %1108 = vmatprep.mubr.f32.mxu0 %v6144_v3  ;;  %2664 = vmatprep.subr.mxu0 %v6144_v3  ;;  %v367_v7 = vadd.f32 %v356_v16, %v6409_v1  ;;  %v511_v22 = vmax.f32 %v500_v61, 0.0  ;;  %v624_v62 = vmul.f32 %v613_v44, %v6376_v34  ;;  %v510_v26 = vmax.f32 %v499_v14, 0.0  ;;  %v2652_v44 = vld [vmem:[#allocation7 + $0x118] sm:$0xff]  ;;  %v2629_v14 = vld [vmem:[#allocation7 + $0x68] sm:$0xff]  ;;  %v2651_v16 = vld [vmem:[#allocation7 + $0x110] sm:$0xff] }
  0xdd   :  { %v236_v60 = vadd.f32 %v6409_v1, %v220_v39  ;;  %v235_v23 = vadd.f32 %v6409_v1, %v219_v58  ;;  %v379_v53 = vmax.f32 %v368_v25, 0.0  ;;  %v426_v8 = vrot.slane %v6501_v29, %v6250_v11 }
  0xde   :  { %5861 = vmatmul.mubr.msk.f32.vlgmr.msra.gmra.mxu1 %vm675_vm0, %v6441_v5  ;;  %v635_v54 = vadd.f32 %v624_v62, %v6409_v1  ;;  %v378_v27 = vmax.f32 %v367_v7, 0.0  ;;  %v294_v28 = vrot.slane %v6501_v29, %v6255_v15  ;;  %v152_v0 = vrot.slane %v6501_v29, %v6266_v20 }
  0xdf   :  { %980 = vmatpush1.msra.mxu1 %v642_v40  ;;  %5873 = vmatmul.mubr.msk.f32.vlgmr.msra.gmra.mxu0 %vm675_vm0, %v6441_v5  ;;  %v247_v41 = vmax.f32 %v236_v60, 0.0  ;;  %v246_v30 = vmax.f32 %v235_v23, 0.0  ;;  %v481_v63 = vrot.slane %v426_v8, %v6250_v11  ;;  %v2628_v40 = vld [vmem:[#allocation7 + $0x60] sm:$0xff] }
  0xe0   :  { %981 = vmatprep.subr.mxu1 %v511_v22  ;;  %847 = vmatprep.mubr.f32.mxu1 %v6144_v3  ;;  %v646_v43 = vmax.f32 %v635_v54, 0.0  ;;  %v349_v24 = vrot.slane %v294_v28, %v6255_v15  ;;  %v207_v11 = vrot.slane %v152_v0, %v6266_v20  ;;  %v2649_v28 = vld [vmem:[#allocation7 + $0x100] sm:$0xff] }
  0xe1   :  { %982 = vmatpush1.msra.mxu1 %v510_v26  ;;  %1114 = vmatprep.mubr.f32.mxu0 %v6144_v3  ;;  %v492_v31 = vmul.f32 %v481_v63, %v6376_v34 }
  0xe2   :  { %983 = vmatprep.subr.mxu1 %v379_v53  ;;  %5862 = vmatmul.mubr.msk.f32.gmra.mxu1 %vm675_vm0, %v6468_v59  ;;  %v360_v45 = vmul.f32 %v349_v24, %v6376_v34  ;;  %v223_v42 = vmul.f32 %v6376_v34, %v207_v11  ;;  %v2625_v11 = vld [vmem:[#allocation7 + $0x48] sm:$0xff] }
  0xe3   :  { %984 = vmatpush1.msra.mxu1 %v378_v27  ;;  %853 = vmatprep.mubr.f32.mxu1 %v6144_v3  ;;  %v503_v33 = vadd.f32 %v492_v31, %v6409_v1  ;;  %v2650_v27 = vld [vmem:[#allocation7 + $0x108] sm:$0xff]  ;;  %v2648_v31 = vld [vmem:[#allocation7 + $0xf8] sm:$0xff] }
  0xe4   :  { %985 = vmatprep.subr.mxu1 %v247_v41  ;;  %5874 = vmatmul.mubr.msk.f32.gmra.mxu0 %vm675_vm0, %v6468_v59  ;;  %v371_v15 = vadd.f32 %v360_v45, %v6409_v1  ;;  %v239_v10 = vadd.f32 %v6409_v1, %v223_v42  ;;  %v6620_v1 = vpop.permute.xlu1 %657  ;;  %v2627_v41 = vld [vmem:[#allocation7 + $0x58] sm:$0xff]  ;;  %v2647_v45 = vld [vmem:[#allocation7 + $0xf0] sm:$0xff] }
  0xe5   :  { %986 = vmatpush1.msra.mxu1 %v246_v30  ;;  %1120 = vmatprep.mubr.f32.mxu0 %v6144_v3  ;;  %v514_v20 = vmax.f32 %v503_v33, 0.0  ;;  %v2626_v30 = vld [vmem:[#allocation7 + $0x50] sm:$0xff] }
  0xe6   :  { %5939 = vmatprep.subr.mxu1 %v646_v43  ;;  %5863 = vmatmul.mubr.msk.f32.gmra.mxu1 %vm675_vm0, %v6499_v4  ;;  %v382_v29 = vmax.f32 %v371_v15, 0.0  ;;  %v250_v34 = vmax.f32 %v239_v10, 0.0  ;;  %v2624_v15 = vld [vmem:[#allocation7 + $0x40] sm:$0xff]  ;;  %v2623_v10 = vld [vmem:[#allocation7 + $0x38] sm:$0xff] }
  0xe7   :  { %859 = vmatprep.mubr.f32.mxu1 %v6144_v3  ;;  %2665 = vmatpush1.msra.mxu0 %v2654_v32 }
  0xe8   :  { %5875 = vmatmul.mubr.msk.f32.gmra.mxu0 %vm675_vm0, %v6499_v4  ;;  %2666 = vmatprep.subr.mxu0 %v6144_v3 }
  0xe9   :  { %1126 = vmatprep.mubr.f32.mxu0 %v6144_v3  ;;  %2667 = vmatpush1.msra.mxu0 %v2653_v51 }
  0xea   :  { %5864 = vmatmul.mubr.msk.f32.gmra.mxu1 %vm675_vm0, %v6526_v9  ;;  %2668 = vmatprep.subr.mxu0 %v6144_v3 }
  0xeb   :  { %1019 = vmatprep.mubr.f32.mxu1 %v6144_v3  ;;  %2669 = vmatpush1.msra.mxu0 %v2652_v44 }
  0xec   :  { %5876 = vmatmul.mubr.msk.f32.gmra.mxu0 %vm675_vm0, %v6526_v9  ;;  %2670 = vmatprep.subr.mxu0 %v6144_v3 }
  0xed   :  { %2671 = vmatpush1.msra.mxu0 %v2651_v16 }
  0xee   :  { %5869 = vmatmul.mubr.msk.f32.vlgmr.msra.gmra.mxu1 %vm675_vm0, %v6441_v5  ;;  %2672 = vmatprep.subr.mxu0 %v6144_v3 }
  0xef   :  { %5940 = vmatpush3.msra.mxu1 %v646_v43  ;;  %1025 = vmatprep.mubr.f32.mxu1 %v6144_v3 }
  0xf0   :  { %5941 = vmatprep.subr.mxu1 %v514_v20  ;;  %2673 = vmatpush1.msra.mxu0 %v2650_v27  ;;  %v2660_v27 = vld [vmem:[#allocation7 + $0x158] sm:$0xff] }
  0xf1   :  { %5942 = vmatpush3.msra.mxu1 %v514_v20  ;;  %2674 = vmatprep.subr.mxu0 %v6144_v3  ;;  %v2646_v20 = vld [vmem:[#allocation7 + $0xe8] sm:$0xff] }
  0xf2   :  { %5943 = vmatprep.subr.mxu1 %v382_v29  ;;  %5870 = vmatmul.mubr.msk.f32.gmra.mxu1 %vm675_vm0, %v6468_v59 }
  0xf3   :  { %5944 = vmatpush3.msra.mxu1 %v382_v29  ;;  %1031 = vmatprep.mubr.f32.mxu1 %v6144_v3 }
  0xf4   :  { %5945 = vmatprep.subr.mxu1 %v250_v34  ;;  %2675 = vmatpush1.msra.mxu0 %v2649_v28  ;;  %v2637_v28 = vld [vmem:[#allocation7 + $0xa8] sm:$0xff] }
  0xf5   :  { %5946 = vmatpush3.msra.mxu1 %v250_v34  ;;  %2676 = vmatprep.subr.mxu0 %v6144_v3 }
  0xf6   :  { %5871 = vmatmul.mubr.msk.f32.gmra.mxu1 %vm675_vm0, %v6499_v4  ;;  %2737 = vmatprep.subr.mxu1 %v6144_v3 }
  0xf7   :  { %1037 = vmatprep.mubr.f32.mxu1 %v6144_v3  ;;  %2677 = vmatpush1.msra.mxu0 %v2648_v31  ;;  %v2658_v31 = vld [vmem:[#allocation7 + $0x148] sm:$0xff] }
  0xf8   :  { %2678 = vmatprep.subr.mxu0 %v6144_v3 }
  0xf9   :  { %2679 = vmatpush1.msra.mxu0 %v2647_v45  ;;  %v2657_v45 = vld [vmem:[#allocation7 + $0x140] sm:$0xff] }
  0xfa   :  { %5872 = vmatmul.mubr.msk.f32.gmra.mxu1 %vm675_vm0, %v6526_v9  ;;  %2680 = vmatprep.subr.mxu0 %v6144_v3 }
  0xfb   :  { %5947 = vmatprep.mubr.msk.f32.mxu1 %vm675_vm0, %v6441_v5  ;;  %2681 = vmatpush1.msra.mxu0 %v2646_v20  ;;  %v2633_v20 = vld [vmem:[#allocation7 + $0x88] sm:$0xff] }
  0xfc   :  { %2682 = vmatprep.subr.mxu0 %v6144_v3 }
  0xfe   :  { %5948 = vmatmul.mubr.msk.f32.vlgmr.msra.gmra.mxu1 %vm675_vm0, %v6468_v59 }
  0xff   :  { %5950 = vmatprep.mubr.msk.f32.mxu1 %vm675_vm0, %v6499_v4 }
 0x102   :  { %5951 = vmatmul.mubr.msk.f32.gmra.mxu1 %vm675_vm0, %v6526_v9  ;;  %v2631_v9 = vld [vmem:[#allocation7 + $0x78] sm:$0xff] }
 0x103   :  { %2738 = vmatpush1.msra.mxu1 %v2631_v9  ;;  %v2643_v9 = vld [vmem:[#allocation7 + $0xd0] sm:$0xff] }
 0x104   :  { %2739 = vmatprep.subr.mxu1 %v6144_v3 }
 0x105   :  { %2740 = vmatpush1.msra.mxu1 %v2630_v17  ;;  %v2620_v17 = vld [vmem:[#allocation7 + $0x20] sm:$0xff] }
 0x106   :  { %2741 = vmatprep.subr.mxu1 %v6144_v3 }
 0x107   :  { %2742 = vmatpush1.msra.mxu1 %v2629_v14  ;;  %v2619_v14 = vld [vmem:[#allocation7 + $0x18] sm:$0xff] }
 0x108   :  { %2743 = vmatprep.subr.mxu1 %v6144_v3 }
 0x109   :  { %2744 = vmatpush1.msra.mxu1 %v2628_v40 }
 0x10a   :  { %2745 = vmatprep.subr.mxu1 %v6144_v3 }
 0x10b   :  { %2746 = vmatpush1.msra.mxu1 %v2627_v41 }
 0x10c   :  { %2747 = vmatprep.subr.mxu1 %v6144_v3 }
 0x10d   :  { %2748 = vmatpush1.msra.mxu1 %v2626_v30 }
 0x10e   :  { %2749 = vmatprep.subr.mxu1 %v6144_v3 }
 0x10f   :  { %2750 = vmatpush1.msra.mxu1 %v2625_v11  ;;  %v2635_v11 = vld [vmem:[#allocation7 + $0x98] sm:$0xff] }
 0x110   :  { %2751 = vmatprep.subr.mxu1 %v6144_v3 }
 0x111   :  { %2752 = vmatpush1.msra.mxu1 %v2624_v15  ;;  %v2634_v15 = vld [vmem:[#allocation7 + $0x90] sm:$0xff] }
 0x112   :  { %2753 = vmatprep.subr.mxu1 %v6144_v3 }
 0x113   :  { %2754 = vmatpush1.msra.mxu1 %v2623_v10  ;;  %v2655_v10 = vld [vmem:[#allocation7 + $0x130] sm:$0xff] }
 0x114   :  { %2755 = vmatprep.subr.mxu1 %v6144_v3 }
 0x18c   :  { %v6622_v46 = vpop.f32.mrf.mxu1  ;;  %v932_v47 = vpop.f32.mrf.mxu0 }
 0x18d   :  { %v933_v35 = vadd.f32 %v932_v47, %v6620_v1 }
 0x18e   :  { %v756_v48 = vpop.f32.mrf.mxu1  ;;  %v934_v49 = vpop.f32.mrf.mxu0 }
 0x18f   :  { %v757_v5 = vadd.f32 %v756_v48, %v6620_v1  ;;  %v935_v36 = vadd.f32 %v934_v49, %v6620_v1  ;;  %v1222_v59 = vmax.f32 %v933_v35, 0.0  ;;  %v2645_v48 = vld [vmem:[#allocation7 + $0xe0] sm:$0xff]  ;;  %v2622_v49 = vld [vmem:[#allocation7 + $0x30] sm:$0xff] }
 0x190   :  { %2683 = vmatpush1.msra.mxu0 %v2645_v48  ;;  %2756 = vmatpush1.msra.mxu1 %v2622_v49 }
 0x191   :  { %v6627_v55 = vmax.f32 %v757_v5, 0.0  ;;  %v6629_v4 = vpop.f32.mrf.mxu1  ;;  %v6631_v56 = vpop.f32.mrf.mxu0  ;;  %1311 = vrot.lane.b32.xlu0 %v1222_v59, %s6145_s1  ;;  %v1223_v57 = vmax.f32 %v935_v36, 0.0  ;;  %v2644_v36 = vld [vmem:[#allocation7 + $0xd8] sm:$0xff]  ;;  %2684 = vmatprep.subr.mxu0 %v6144_v3 }
 0x192   :  { %2757 = vmatprep.subr.mxu1 %v6144_v3  ;;  %2685 = vmatpush1.msra.mxu0 %v2644_v36  ;;  %v6152_v36 = vmov 1983009808  }
 0x193   :  { %v6634_v19 = vpop.f32.mrf.mxu1  ;;  %v6636_v37 = vpop.f32.mrf.mxu0  ;;  %1270 = vrot.lane.b32.xlu1 %v6627_v55, %s6146_s2  ;;  %2686 = vmatprep.subr.mxu0 %v6144_v3 }
 0x194   :  { %2687 = vmatpush1.msra.mxu0 %v2643_v9 }
 0x195   :  { %1351 = vrot.lane.b32.xlu0 %v1222_v59, %s6147_s18  ;;  %v2621_v59 = vld [vmem:[#allocation7 + $0x28] sm:$0xff]  ;;  %2688 = vmatprep.subr.mxu0 %v6144_v3 }
 0x196   :  { %v6641_v50 = vpop.f32.mrf.mxu1  ;;  %2758 = vmatpush1.msra.mxu1 %v2621_v59  ;;  %v1531_v59 = vunpack.c.l.s4 %v6152_v36 }
 0x197   :  { %v6643_v2 = vpop.f32.mrf.mxu0  ;;  %1353 = vrot.lane.b32.xlu1 %v1223_v57, %s6147_s18  ;;  %2759 = vmatprep.subr.mxu1 %v6144_v3 }
 0x198   :  { %v6646_v52 = vpop.f32.mrf.mxu1  ;;  %2760 = vmatpush1.msra.mxu1 %v2620_v17  ;;  %v1532_v17 = vunpack.c.0.s8 %v1531_v59 }
 0x199   :  { %v6649_v18 = vpop.f32.mrf.mxu0  ;;  %1384 = vrot.lane.b32.xlu0 %v1223_v57, %s6148_s19  ;;  %2761 = vmatprep.subr.mxu1 %v6144_v3 }
 0x19a   :  { %v6653_v21 = vpop.f32.mrf.mxu1  ;;  %2762 = vmatpush1.msra.mxu1 %v2619_v14  ;;  %v755_v14 = vadd.f32 %v6622_v46, %v6620_v1 }
 0x19b   :  { %v6655_v38 = vpop.f32.mrf.mxu0  ;;  %2763 = vmatprep.subr.mxu1 %v6144_v3 }
 0x19c   :  { %v6659_v12 = vpop.f32.mrf.mxu1 }
 0x19d   :  { %v6661_v61 = vpop.f32.mrf.mxu0 }
 0x19e   :  { %v843_v13 = vpop.f32.mrf.mxu1 }
 0x19f   :  { %v844_v25 = vadd.f32 %v843_v13, %v6620_v1  ;;  %v1110_v39 = vpop.f32.mrf.mxu0  ;;  %v2642_v13 = vld [vmem:[#allocation7 + $0xc8] sm:$0xff] }
 0x1a0   :  { %v1111_v7 = vadd.f32 %v1110_v39, %v6620_v1  ;;  %v845_v58 = vpop.f32.mrf.mxu1  ;;  %2689 = vmatpush1.msra.mxu0 %v2642_v13  ;;  %v2618_v39 = vld [vmem:[#allocation7 + $0x10] sm:$0xff] }
 0x1a1   :  { %v1220_v22 = vmax.f32 %v844_v25, 0.0  ;;  %v1112_v26 = vpop.f32.mrf.mxu0  ;;  %v846_v53 = vadd.f32 %v845_v58, %v6620_v1  ;;  %v2641_v25 = vld [vmem:[#allocation7 + $0xc0] sm:$0xff]  ;;  %2690 = vmatprep.subr.mxu0 %v6144_v3  ;;  %v2640_v58 = vld [vmem:[#allocation7 + $0xb8] sm:$0xff]  ;;  %2764 = vmatpush1.msra.mxu1 %v2618_v39 }
 0x1a2   :  { %v1226_v60 = vmax.f32 %v1111_v7, 0.0  ;;  %v6667_v62 = vpop.f32.mrf.mxu1  ;;  %v6677_v54 = vadd.f32 %v1112_v26, %v6620_v1  ;;  %v652_v7 = vld [vmem:[%s8556_s4 + $0x8] sm:$0xff]  ;;  %2691 = vmatpush1.msra.mxu0 %v2641_v25  ;;  %2765 = vmatprep.subr.mxu1 %v6144_v3  ;;  %v2639_v26 = vld [vmem:[#allocation7 + $0xb0] sm:$0xff] }
 0x1a3   :  { %1307 = vrot.lane.b32.xlu1 %v1220_v22, %s6145_s1  ;;  %v1221_v63 = vmax.f32 %v846_v53, 0.0  ;;  %2692 = vmatprep.subr.mxu0 %v6144_v3  ;;  %v2616_v53 = vld [vmem:[#allocation7] sm:$0xff] }
 0x1a4   :  { %1425 = vrot.lane.b32.xlu0 %v1226_v60, %s6149_s20  ;;  %v6673_v23 = vpop.f32.mrf.mxu1  ;;  %v1227_v0 = vmax.f32 %v6677_v54, 0.0  ;;  %2693 = vmatpush1.msra.mxu0 %v2640_v58 }
 0x1a5   :  { %2694 = vmatprep.subr.mxu0 %v6144_v3 }
 0x1a6   :  { %v6679_v8 = vpop.f32.mrf.mxu1  ;;  %2695 = vmatpush1.msra.mxu0 %v2639_v26  ;;  %v6762_v26 = vsub.s32 %v1532_v17, %v6238_v6 }
 0x1a7   :  { %1466 = vrot.lane.b32.xlu1 %v1226_v60, %s6150_s21  ;;  %2716 = vmatprep.subr.mxu0 %v6144_v3 }
 0x1a8   :  { %1272 = vrot.lane.b32.xlu0 %v1220_v22, %s6146_s2  ;;  %v6683_v43 = vpop.f32.mrf.mxu1  ;;  %v2617_v22 = vld [vmem:[#allocation7 + $0x8] sm:$0xff]  ;;  %2717 = vmatpush2.msra.mxu0 %v2660_v27 }
 0x1a9   :  { %2766 = vmatpush1.msra.mxu1 %v2617_v22  ;;  %2718 = vmatprep.subr.mxu0 %v6144_v3 }
 0x1aa   :  { %v6688_v24 = vpop.f32.mrf.mxu1  ;;  %2767 = vmatprep.subr.mxu1 %v6144_v3 }
 0x1ab   :  { %1309 = vrot.lane.b32.xlu1 %v1221_v63, %s6145_s1  ;;  %2768 = vmatpush1.msra.mxu1 %v2616_v53  ;;  %v2659_v63 = vld [vmem:[#allocation7 + $0x150] sm:$0xff] }
 0x1ac   :  { %1468 = vrot.lane.b32.xlu0 %v1227_v0, %s6150_s21  ;;  %v6695_v33 = vpop.f32.mrf.mxu1  ;;  %2789 = vmatprep.subr.mxu1 %v6144_v3 }
 0x1ad   :  { %2790 = vmatpush2.msra.mxu1 %v2637_v28  ;;  %2719 = vmatpush2.msra.mxu0 %v2659_v63 }
 0x1ae   :  { %v1021_v42 = vpop.f32.mrf.mxu1  ;;  %2791 = vmatprep.subr.mxu1 %v6144_v3  ;;  %2720 = vmatprep.subr.mxu0 %v6144_v3 }
 0x1af   :  { %v1022_v29 = vadd.f32 %v1021_v42, %v6620_v1  ;;  %2721 = vmatpush2.msra.mxu0 %v2658_v31  ;;  %v2656_v42 = vld [vmem:[#allocation7 + $0x138] sm:$0xff] }
 0x1b0   :  { %v1023_v34 = vpop.f32.mrf.mxu1  ;;  %2722 = vmatprep.subr.mxu0 %v6144_v3 }
 0x1b1   :  { %v1224_v47 = vmax.f32 %v1022_v29, 0.0  ;;  %v1024_v35 = vadd.f32 %v1023_v34, %v6620_v1  ;;  %2723 = vmatpush2.msra.mxu0 %v2657_v45  ;;  %v2632_v29 = vld [vmem:[#allocation7 + $0x80] sm:$0xff] }
 0x1b2   :  { %v6704_v5 = vpop.f32.mrf.mxu1  ;;  %2724 = vmatprep.subr.mxu0 %v6144_v3 }
 0x1b3   :  { %1421 = vrot.lane.b32.xlu0 %v1224_v47, %s6149_s20  ;;  %1386 = vrot.lane.b32.xlu1 %v1224_v47, %s6148_s19  ;;  %v1225_v32 = vmax.f32 %v1024_v35, 0.0 }
 0x1b4   :  { %v6710_v57 = vpop.f32.mrf.mxu1  ;;  %2725 = vmatpush2.msra.mxu0 %v2656_v42 }
 0x1b5   :  { %2726 = vmatprep.subr.mxu0 %v6144_v3 }
 0x1b6   :  { %v6714_v51 = vpop.f32.mrf.mxu1  ;;  %2727 = vmatpush2.msra.mxu0 %v2655_v10 }
 0x1b7   :  { %1423 = vrot.lane.b32.xlu1 %v1225_v32, %s6149_s20  ;;  %2833 = vmatprep.subr.mxu0 %v6144_v3 }
 0x1b8   :  { %v6718_v44 = vpop.f32.mrf.mxu1 }
 0x1ba   :  { %v6722_v16 = vpop.f32.mrf.mxu1 }
 0x1bb   :  { %1499 = vrot.lane.b32.xlu1 %v1227_v0, %s6151_s22  ;;  %v2636_v0 = vld [vmem:[#allocation7 + $0xa0] sm:$0xff] }
 0x1bc   :  { %v6728_v40 = vpop.f32.mrf.mxu1  ;;  %2792 = vmatpush2.msra.mxu1 %v2636_v0 }
 0x1bd   :  { %2793 = vmatprep.subr.mxu1 %v6144_v3 }
 0x1be   :  { %v6735_v60 = vpop.f32.mrf.mxu1  ;;  %2794 = vmatpush2.msra.mxu1 %v2635_v11 }
 0x1bf   :  { %662 = vperm.xlu1 %6003, %v652_v7   ;;  %2795 = vmatprep.subr.mxu1 %v6144_v3 }
 0x1c0   :  { %v1199_v54 = vpop.f32.mrf.mxu1  ;;  %2796 = vmatpush2.msra.mxu1 %v2634_v15 }
 0x1c1   :  { %v1200_v41 = vadd.f32 %v1199_v54, %v6620_v1  ;;  %2797 = vmatprep.subr.mxu1 %v6144_v3  ;;  %v1218_v54 = vmax.f32 %v755_v14, 0.0 }
 0x1c2   :  { %2798 = vmatpush2.msra.mxu1 %v2633_v20  ;;  %v6153_v20 = vmov 1934713408  }
 0x1c3   :  { %v1228_v30 = vmax.f32 %v1200_v41, 0.0  ;;  %2799 = vmatprep.subr.mxu1 %v6144_v3  ;;  %v1595_v10 = vunpack.c.l.s4 %v6153_v20 }
 0x1c4   :  { %2800 = vmatpush2.msra.mxu1 %v2632_v29 }
 0x1c5   :  { %1501 = vrot.lane.b32.xlu0 %v1228_v30, %s6151_s22  ;;  %2930 = vmatprep.subr.mxu1 %v6144_v3 }
 0x203   :  { %v1312_v34 = vpop.permute.xlu0 %1311 }
 0x205   :  { %v1271_v35 = vpop.permute.xlu1 %1270 }
 0x207   :  { %v1352_v47 = vpop.permute.xlu0 %1351 }
 0x209   :  { %v1354_v48 = vpop.permute.xlu1 %1353 }
 0x20a   :  { %v1368_v39 = vsel %vm1367_vm1, %v1352_v47, %v1354_v48 }
 0x20b   :  { %v1385_v49 = vpop.permute.xlu0 %1384 }
 0x215   :  { %v1308_v32 = vpop.permute.xlu1 %1307 }
 0x216   :  { %v1426_v9 = vpop.permute.xlu0 %1425 }
 0x219   :  { %v1467_v13 = vpop.permute.xlu1 %1466 }
 0x21a   :  { %v1273_v25 = vpop.permute.xlu0 %1272 }
 0x21b   :  { %v1287_v7 = vsel %vm1286_vm2, %v1271_v35, %v1273_v25  ;;  %v2089_v58 = vcombine.high %v1273_v25, %v1354_v48  ;;  %v2088_v59 = vcombine.low %v1273_v25, %v1354_v48 }
 0x21c   :  { %v1545_v22 = vcombine.high %v1287_v7, %v1368_v39  ;;  %v1544_v36 = vcombine.low %v1287_v7, %v1368_v39 }
 0x21d   :  { %v1310_v53 = vpop.permute.xlu1 %1309  ;;  %v6792_v48 = vrot.slane %v2089_v58, %v6762_v26 }
 0x21e   :  { %v1331_v27 = vsel %vm675_vm0, %v1308_v32, %v1310_v53  ;;  %v6766_v28 = vrot.slane %v1545_v22, %v6762_v26  ;;  %v1469_v63 = vpop.permute.xlu0 %1468  ;;  %v1332_v42 = vsel %vm675_vm0, %v1310_v53, %v1312_v34  ;;  %v1596_v32 = vunpack.c.0.s8 %v1595_v10 }
 0x21f   :  { %v1529_v41 = vcombine.high %v1218_v54, %v1331_v27  ;;  %v1483_v31 = vsel %vm1482_vm3, %v1467_v13, %v1469_v63  ;;  %v1528_v29 = vcombine.low %v1218_v54, %v1331_v27  ;;  %v2072_v47 = vcombine.low %v6627_v55, %v1332_v42 }
 0x220   :  { %v2073_v13 = vcombine.high %v6627_v55, %v1332_v42  ;;  %v6785_v34 = vrot.slane %v1544_v36, %v6762_v26  ;;  %v2096_v22 = vrot.slane %v2088_v59, %v6762_v26  ;;  %v6789_v39 = vsub.s32 %v1596_v32, %v6238_v6 }
 0x221   :  { %v6769_v1 = vrot.slane %v1529_v41, %v6762_v26  ;;  %v6780_v17 = vrot.slane %v1528_v29, %v6762_v26 }
 0x222   :  { %v6797_v54 = vrot.slane %v2073_v13, %v6762_v26 }
 0x223   :  { %v1608_v46 = vcombine.low %v6769_v1, %v6766_v28  ;;  %v1609_v30 = vcombine.high %v6769_v1, %v6766_v28  ;;  %v1592_v55 = vcombine.low %v6780_v17, %v6785_v34 }
 0x225   :  { %v1387_v0 = vpop.permute.xlu1 %1386  ;;  %v1422_v14 = vpop.permute.xlu0 %1421 }
 0x226   :  { %v1401_v11 = vsel %vm1400_vm4, %v1385_v49, %v1387_v0  ;;  %v2105_v45 = vcombine.high %v1387_v0, %v1469_v63  ;;  %v2080_v49 = vrot.slane %v2072_v47, %v6762_v26  ;;  %v2104_v53 = vcombine.low %v1387_v0, %v1469_v63 }
 0x227   :  { %v1561_v15 = vcombine.high %v1401_v11, %v1483_v31  ;;  %v1560_v25 = vcombine.low %v1401_v11, %v1483_v31 }
 0x228   :  { %v2136_v27 = vcombine.low %v2080_v49, %v2096_v22  ;;  %v2137_v58 = vcombine.high %v2080_v49, %v2096_v22  ;;  %v2112_v31 = vrot.slane %v2104_v53, %v6762_v26 }
 0x229   :  { %v1424_v35 = vpop.permute.xlu1 %1423  ;;  %v6804_v29 = vrot.slane %v1560_v25, %v6762_v26  ;;  %v6807_v47 = vrot.slane %v1561_v15, %v6762_v26  ;;  %v2119_v25 = vrot.slane %v2105_v45, %v6762_v26  ;;  %v1600_v45 = vrot.slane %v1592_v55, %v6789_v39 }
 0x22a   :  { %v1447_v41 = vsel %vm1445_vm5, %v1424_v35, %v1426_v9  ;;  %v1446_v63 = vsel %vm1445_vm5, %v1422_v14, %v1424_v35  ;;  %v2144_v49 = vrot.slane %v2136_v27, %v6789_v39  ;;  %v2152_v14 = vcombine.low %v6797_v54, %v6792_v48 }
 0x22b   :  { %v2151_v55 = vrot.slane %v2137_v58, %v6789_v39 }
 0x22d   :  { %v1500_v7 = vpop.permute.xlu1 %1499 }
 0x237   :  { %v1502_v42 = vpop.permute.xlu0 %1501 }
 0x238   :  { %v1516_v6 = vsel %vm1515_vm6, %v1500_v7, %v1502_v42  ;;  %v2120_v0 = vcombine.low %v1447_v41, %v1502_v42  ;;  %v2121_v20 = vcombine.high %v1447_v41, %v1502_v42  ;;  %v1116_v42 = vpop.f32.mrf.mxu0 }
 0x239   :  { %v1576_v11 = vcombine.low %v1446_v63, %v1516_v6  ;;  %v1577_v10 = vcombine.high %v1446_v63, %v1516_v6 }
 0x23a   :  { %v2128_v9 = vrot.slane %v2120_v0, %v6762_v26  ;;  %v2135_v36 = vrot.slane %v2121_v20, %v6762_v26  ;;  %v6811_v35 = vpop.permute.xlu1 %662 }
 0x23b   :  { %v6814_v59 = vrot.slane %v1576_v11, %v6762_v26  ;;  %v6817_v32 = vrot.slane %v1577_v10, %v6762_v26  ;;  %v6821_v13 = vadd.f32 %v6631_v56, %v6811_v35  ;;  %v852_v15 = vadd.f32 %v6673_v23, %v6811_v35  ;;  %v2920_v56 = vld [vmem:[#allocation7 + $0x288] sm:$0xff] }
 0x23c   :  { %v2168_v22 = vcombine.low %v2112_v31, %v2128_v9  ;;  %v2169_v53 = vcombine.high %v2112_v31, %v2128_v9  ;;  %v6838_v6 = vadd.f32 %v1116_v42, %v6811_v35  ;;  %v2184_v20 = vcombine.low %v2119_v25, %v2135_v36 }
 0x23d   :  { %v1624_v7 = vcombine.low %v6804_v29, %v6814_v59  ;;  %v1640_v41 = vcombine.low %v6807_v47, %v6817_v32  ;;  %v8562_v23 = vmax.f32 %v6821_v13, 0.0  ;;  %v1232_v27 = vmax.f32 %v852_v15, 0.0 }
 0x23e   :  { %v2176_v63 = vrot.slane %v2168_v22, %v6789_v39  ;;  %v1030_v31 = vadd.f32 %v6710_v57, %v6811_v35  ;;  %v2183_v9 = vrot.slane %v2169_v53, %v6789_v39  ;;  %v2185_v15 = vcombine.high %v2119_v25, %v2135_v36  ;;  %v2822_v53 = vld [vmem:[#allocation7 + $0x1d0] sm:$0xff]  ;;  %v2919_v25 = vld [vmem:[#allocation7 + $0x280] sm:$0xff] }
 0x23f   :  { %v1632_v0 = vrot.slane %v1624_v7, %v6789_v39  ;;  %1317 = vrot.lane.b32.xlu1 %v8562_v23, %s6145_s1  ;;  %1315 = vrot.lane.b32.xlu0 %v1232_v27, %s6145_s1  ;;  %v2153_v7 = vcombine.high %v6797_v54, %v6792_v48  ;;  %v1237_v57 = vmax.f32 %v6838_v6, 0.0  ;;  %v2823_v27 = vld [vmem:[#allocation7 + $0x1d8] sm:$0xff]  ;;  %v850_v58 = vadd.f32 %v6667_v62, %v6811_v35  ;;  %v2907_v6 = vld [vmem:[#allocation7 + $0x220] sm:$0xff] }
 0x240   :  { %v2201_v11 = vcombine.high %v2144_v49, %v2176_v63  ;;  %v2200_v10 = vcombine.low %v2144_v49, %v2176_v63  ;;  %v1236_v23 = vmax.f32 %v1030_v31, 0.0  ;;  %v6856_v49 = vrot.slane %v2152_v14, %v6789_v39  ;;  %v2821_v31 = vld [vmem:[#allocation7 + $0x1c8] sm:$0xff] }
 0x241   :  { %v1657_v22 = vcombine.high %v1600_v45, %v1632_v0  ;;  %v1656_v42 = vcombine.low %v1600_v45, %v1632_v0  ;;  %v763_v48 = vadd.f32 %v6634_v19, %v6811_v35  ;;  %v2202_v54 = vcombine.low %v2151_v55, %v2183_v9 }
 0x242   :  { %5881 = vmatprep.mubr.msk.f32.mxu0 %vm1515_vm6, %v2201_v11  ;;  %5882 = vmatprep.mubr.msk.f32.mxu1 %vm1515_vm6, %v2200_v10  ;;  %v6867_v36 = vrot.slane %v2184_v20, %v6789_v39  ;;  %v6870_v14 = vrot.slane %v1640_v41, %v6789_v39  ;;  %v6876_v62 = vrot.slane %v1608_v46, %v6789_v39  ;;  %v1231_v0 = vmax.f32 %v850_v58, 0.0  ;;  %v2918_v11 = vld [vmem:[#allocation7 + $0x278] sm:$0xff]  ;;  %v2818_v58 = vld [vmem:[#allocation7 + $0x1b0] sm:$0xff] }
 0x243   :  { %2729 = vmatmul.mubr.f32.vlgmr.msra.gmra.mxu0 %v1657_v22  ;;  %2802 = vmatmul.mubr.f32.vlgmr.msra.gmra.mxu1 %v1656_v42  ;;  %v2203_v19 = vcombine.high %v2151_v55, %v2183_v9  ;;  %v6882_v63 = vrot.slane %v2153_v7, %v6789_v39  ;;  %v6896_v20 = vmax.f32 %v763_v48, 0.0  ;;  %v8563_v22 = vcombine.high %v6807_v47, %v6817_v32  ;;  %v2820_v55 = vld [vmem:[#allocation7 + $0x1c0] sm:$0xff]  ;;  %v2917_v7 = vld [vmem:[#allocation7 + $0x270] sm:$0xff]  ;;  %v2916_v47 = vld [vmem:[#allocation7 + $0x268] sm:$0xff] }
 0x244   :  { %1431 = vrot.lane.b32.xlu1 %v1237_v57, %s6149_s20  ;;  %1429 = vrot.lane.b32.xlu0 %v1236_v23, %s6149_s20  ;;  %v6879_v23 = vrot.slane %v2185_v15, %v6789_v39  ;;  %v2204_v41 = vcombine.low %v6856_v49, %v6867_v36  ;;  %v2205_v46 = vcombine.high %v6856_v49, %v6867_v36  ;;  %v2915_v48 = vld [vmem:[#allocation7 + $0x260] sm:$0xff]  ;;  %v3013_v49 = vld [vmem:[#allocation7 + $0x318] sm:$0xff]  ;;  %v3110_v36 = vld [vmem:[#allocation7 + $0x3c8] sm:$0xff] }
 0x245   :  { %2834 = vmatpush1.msra.mxu0 %v2823_v27  ;;  %2931 = vmatpush1.msra.mxu1 %v2920_v56  ;;  %v1660_v56 = vcombine.low %v6876_v62, %v6870_v14  ;;  %v1661_v45 = vcombine.high %v6876_v62, %v6870_v14  ;;  %v6906_v15 = vrot.slane %v1609_v30, %v6789_v39  ;;  %v2819_v30 = vld [vmem:[#allocation7 + $0x1b8] sm:$0xff]  ;;  %v8564_v27 = vmax.f32 %v6821_v13, 0.0  ;;  %v2816_v13 = vld [vmem:[#allocation7 + $0x1a0] sm:$0xff]  ;;  %v3209_v14 = vld [vmem:[#allocation7 + $0x488] sm:$0xff] }
 0x246   :  { %2835 = vmatprep.subr.mxu0 %v6144_v3  ;;  %5883 = vmatprep.mubr.msk.f32.mxu0 %vm1515_vm6, %v2202_v54  ;;  %v2206_v10 = vcombine.low %v6882_v63, %v6879_v23  ;;  %v2207_v9 = vcombine.high %v6882_v63, %v6879_v23  ;;  %v6914_v42 = vrot.slane %v8563_v22, %v6789_v39  ;;  %v2912_v22 = vld [vmem:[#allocation7 + $0x248] sm:$0xff]  ;;  %v3306_v62 = vld [vmem:[#allocation7 + $0x538] sm:$0xff] }
 0x247   :  { %2932 = vmatprep.subr.mxu1 %v6144_v3  ;;  %5884 = vmatprep.mubr.msk.f32.mxu1 %vm1515_vm6, %v2203_v19  ;;  %v941_v32 = vadd.f32 %v6636_v37, %v6811_v35  ;;  %v2817_v19 = vld [vmem:[#allocation7 + $0x1a8] sm:$0xff]  ;;  %v1028_v37 = vadd.f32 %v6704_v5, %v6811_v35  ;;  %v3207_v23 = vld [vmem:[#allocation7 + $0x478] sm:$0xff] }
 0x248   :  { %2836 = vmatpush1.msra.mxu0 %v2822_v53  ;;  %2933 = vmatpush1.msra.mxu1 %v2919_v25  ;;  %v1662_v28 = vcombine.low %v6906_v15, %v6914_v42  ;;  %v1663_v1 = vcombine.high %v6906_v15, %v6914_v42  ;;  %v2914_v53 = vld [vmem:[#allocation7 + $0x258] sm:$0xff]  ;;  %v2913_v25 = vld [vmem:[#allocation7 + $0x250] sm:$0xff]  ;;  %v3304_v63 = vld [vmem:[#allocation7 + $0x528] sm:$0xff] }
 0x249   :  { %2837 = vmatprep.subr.mxu0 %v6144_v3  ;;  %2934 = vmatprep.subr.mxu1 %v6144_v3  ;;  %v1234_v54 = vmax.f32 %v941_v32, 0.0  ;;  %v2910_v32 = vld [vmem:[#allocation7 + $0x238] sm:$0xff]  ;;  %v3403_v42 = vld [vmem:[#allocation7 + $0x5e8] sm:$0xff] }
 0x24a   :  { %1276 = vrot.lane.b32.xlu1 %v1231_v0, %s6146_s2  ;;  %1274 = vrot.lane.b32.xlu0 %v6896_v20, %s6146_s2 }
 0x24b   :  { %2838 = vmatpush1.msra.mxu0 %v2821_v31  ;;  %2935 = vmatpush1.msra.mxu1 %v2918_v11  ;;  %v1235_v31 = vmax.f32 %v1028_v37, 0.0  ;;  %v2815_v11 = vld [vmem:[#allocation7 + $0x198] sm:$0xff]  ;;  %v2809_v37 = vld [vmem:[#allocation7 + $0x168] sm:$0xff] }
 0x24c   :  { %2839 = vmatprep.subr.mxu0 %v6144_v3  ;;  %2936 = vmatprep.subr.mxu1 %v6144_v3 }
 0x24d   :  { %2840 = vmatpush1.msra.mxu0 %v2820_v55  ;;  %2937 = vmatpush1.msra.mxu1 %v2917_v7  ;;  %v2814_v55 = vld [vmem:[#allocation7 + $0x190] sm:$0xff]  ;;  %v2911_v7 = vld [vmem:[#allocation7 + $0x240] sm:$0xff] }
 0x24e   :  { %2841 = vmatprep.subr.mxu0 %v6144_v3  ;;  %2938 = vmatprep.subr.mxu1 %v6144_v3 }
 0x24f   :  { %1355 = vrot.lane.b32.xlu1 %v8564_v27, %s6147_s18  ;;  %1313 = vrot.lane.b32.xlu0 %v1231_v0, %s6145_s1  ;;  %v1118_v0 = vpop.f32.mrf.mxu0  ;;  %v1205_v27 = vadd.f32 %v6735_v60, %v6811_v35  ;;  %v2810_v60 = vld [vmem:[#allocation7 + $0x170] sm:$0xff] }
 0x250   :  { %2842 = vmatpush1.msra.mxu0 %v2819_v30  ;;  %2939 = vmatpush1.msra.mxu1 %v2916_v47  ;;  %v1119_v5 = vadd.f32 %v1118_v0, %v6811_v35  ;;  %v2813_v47 = vld [vmem:[#allocation7 + $0x188] sm:$0xff]  ;;  %v2905_v0 = vld [vmem:[#allocation7 + $0x210] sm:$0xff] }
 0x251   :  { %2843 = vmatprep.subr.mxu0 %v6144_v3  ;;  %2940 = vmatprep.subr.mxu1 %v6144_v3 }
 0x252   :  { %2844 = vmatpush1.msra.mxu0 %v2818_v58  ;;  %2941 = vmatpush1.msra.mxu1 %v2915_v48  ;;  %v1238_v30 = vmax.f32 %v1119_v5, 0.0  ;;  %v2812_v58 = vld [vmem:[#allocation7 + $0x180] sm:$0xff]  ;;  %v2909_v48 = vld [vmem:[#allocation7 + $0x230] sm:$0xff] }
 0x253   :  { %2845 = vmatprep.subr.mxu0 %v6144_v3  ;;  %2942 = vmatprep.subr.mxu1 %v6144_v3  ;;  %v2925_v5 = vld [vmem:[#allocation7 + $0x2b0] sm:$0xff] }
 0x254   :  { %1388 = vrot.lane.b32.xlu1 %v1234_v54, %s6148_s19  ;;  %1357 = vrot.lane.b32.xlu0 %v1234_v54, %s6147_s18  ;;  %v1239_v54 = vmax.f32 %v1205_v27, 0.0  ;;  %v2923_v27 = vld [vmem:[#allocation7 + $0x2a0] sm:$0xff] }
 0x255   :  { %2846 = vmatpush1.msra.mxu0 %v2817_v19  ;;  %2943 = vmatpush1.msra.mxu1 %v2914_v53  ;;  %v2811_v19 = vld [vmem:[#allocation7 + $0x178] sm:$0xff]  ;;  %v2908_v53 = vld [vmem:[#allocation7 + $0x228] sm:$0xff] }
 0x256   :  { %2847 = vmatprep.subr.mxu0 %v6144_v3  ;;  %2944 = vmatprep.subr.mxu1 %v6144_v3 }
 0x257   :  { %2848 = vmatpush1.msra.mxu0 %v2816_v13  ;;  %2945 = vmatpush1.msra.mxu1 %v2913_v25  ;;  %v2906_v13 = vld [vmem:[#allocation7 + $0x218] sm:$0xff]  ;;  %v2808_v25 = vld [vmem:[#allocation7 + $0x160] sm:$0xff] }
 0x258   :  { %2849 = vmatprep.subr.mxu0 %v6144_v3  ;;  %2946 = vmatprep.subr.mxu1 %v6144_v3 }
 0x259   :  { %1427 = vrot.lane.b32.xlu1 %v1235_v31, %s6149_s20  ;;  %1390 = vrot.lane.b32.xlu0 %v1235_v31, %s6148_s19  ;;  %v2829_v31 = vld [vmem:[#allocation7 + $0x208] sm:$0xff] }
 0x25a   :  { %2850 = vmatpush1.msra.mxu0 %v2815_v11  ;;  %2947 = vmatpush1.msra.mxu1 %v2912_v22  ;;  %v2926_v11 = vld [vmem:[#allocation7 + $0x2b8] sm:$0xff]  ;;  %v2828_v22 = vld [vmem:[#allocation7 + $0x200] sm:$0xff] }
 0x25b   :  { %2851 = vmatprep.subr.mxu0 %v6144_v3  ;;  %2948 = vmatprep.subr.mxu1 %v6144_v3 }
 0x25c   :  { %2852 = vmatpush1.msra.mxu0 %v2814_v55  ;;  %2949 = vmatpush1.msra.mxu1 %v2911_v7  ;;  %v1625_v55 = vcombine.high %v6804_v29, %v6814_v59  ;;  %v2827_v7 = vld [vmem:[#allocation7 + $0x1f8] sm:$0xff]  ;;  %v2825_v29 = vld [vmem:[#allocation7 + $0x1e8] sm:$0xff] }
 0x25d   :  { %2853 = vmatprep.subr.mxu0 %v6144_v3  ;;  %2950 = vmatprep.subr.mxu1 %v6144_v3 }
 0x25e   :  { %1472 = vrot.lane.b32.xlu1 %v1238_v30, %s6150_s21  ;;  %1470 = vrot.lane.b32.xlu0 %v1237_v57, %s6150_s21  ;;  %v653_v57 = vld [vmem:[%s8556_s4 + $0x10] sm:$0xff]  ;;  %v1639_v59 = vrot.slane %v1625_v55, %v6789_v39  ;;  %v3009_v55 = vld [vmem:[#allocation7 + $0x2f8] sm:$0xff] }
 0x25f   :  { %2854 = vmatpush1.msra.mxu0 %v2813_v47  ;;  %2951 = vmatpush1.msra.mxu1 %v2910_v32  ;;  %v1593_v47 = vcombine.high %v6780_v17, %v6785_v34  ;;  %v2826_v32 = vld [vmem:[#allocation7 + $0x1f0] sm:$0xff]  ;;  %v2824_v34 = vld [vmem:[#allocation7 + $0x1e0] sm:$0xff] }
 0x260   :  { %2855 = vmatprep.subr.mxu0 %v6144_v3  ;;  %2952 = vmatprep.subr.mxu1 %v6144_v3 }
 0x261   :  { %2856 = vmatpush1.msra.mxu0 %v2812_v58  ;;  %2953 = vmatpush1.msra.mxu1 %v2909_v48  ;;  %v2922_v58 = vld [vmem:[#allocation7 + $0x298] sm:$0xff]  ;;  %v1607_v17 = vrot.slane %v1593_v47, %v6789_v39  ;;  %v2921_v48 = vld [vmem:[#allocation7 + $0x290] sm:$0xff]  ;;  %v3105_v47 = vld [vmem:[#allocation7 + $0x3a0] sm:$0xff] }
 0x262   :  { %2857 = vmatprep.subr.mxu0 %v6144_v3  ;;  %2954 = vmatprep.subr.mxu1 %v6144_v3 }
 0x263   :  { %1505 = vrot.lane.b32.xlu1 %v1239_v54, %s6151_s22  ;;  %1503 = vrot.lane.b32.xlu0 %v1238_v30, %s6151_s22  ;;  %v2924_v30 = vld [vmem:[#allocation7 + $0x2a8] sm:$0xff]  ;;  %v1658_v54 = vcombine.low %v1607_v17, %v1639_v59 }
 0x264   :  { %2858 = vmatpush1.msra.mxu0 %v2811_v19  ;;  %2955 = vmatpush1.msra.mxu1 %v2908_v53  ;;  %v1659_v19 = vcombine.high %v1607_v17, %v1639_v59  ;;  %v3017_v53 = vld [vmem:[#allocation7 + $0x338] sm:$0xff]  ;;  %v3103_v59 = vld [vmem:[#allocation7 + $0x390] sm:$0xff]  ;;  %v3102_v17 = vld [vmem:[#allocation7 + $0x388] sm:$0xff] }
 0x265   :  { %2859 = vmatprep.subr.mxu0 %v6144_v3  ;;  %2956 = vmatprep.subr.mxu1 %v6144_v3 }
 0x266   :  { %2860 = vmatpush1.msra.mxu0 %v2810_v60  ;;  %2957 = vmatpush1.msra.mxu1 %v2907_v6  ;;  %v3114_v60 = vld [vmem:[#allocation7 + $0x3e8] sm:$0xff]  ;;  %v3016_v6 = vld [vmem:[#allocation7 + $0x330] sm:$0xff] }
 0x267   :  { %2861 = vmatprep.subr.mxu0 %v6144_v3  ;;  %2958 = vmatprep.subr.mxu1 %v6144_v3 }
 0x268   :  { %667 = vperm.xlu0 %6002, %v653_v57   ;;  %2862 = vmatpush1.msra.mxu0 %v2809_v37  ;;  %v3113_v57 = vld [vmem:[#allocation7 + $0x3e0] sm:$0xff]  ;;  %v3015_v37 = vld [vmem:[#allocation7 + $0x328] sm:$0xff] }
 0x269   :  { %2959 = vmatpush1.msra.mxu1 %v2906_v13  ;;  %2863 = vmatprep.subr.mxu0 %v6144_v3  ;;  %v3112_v13 = vld [vmem:[#allocation7 + $0x3d8] sm:$0xff] }
 0x26a   :  { %2960 = vmatprep.subr.mxu1 %v6144_v3  ;;  %2864 = vmatpush1.msra.mxu0 %v2808_v25  ;;  %v3014_v25 = vld [vmem:[#allocation7 + $0x320] sm:$0xff] }
 0x26b   :  { %2961 = vmatpush1.msra.mxu1 %v2905_v0  ;;  %2885 = vmatprep.subr.mxu0 %v6144_v3  ;;  %v3109_v0 = vld [vmem:[#allocation7 + $0x3c0] sm:$0xff] }
 0x26c   :  { %2982 = vmatprep.subr.mxu1 %v6144_v3  ;;  %2886 = vmatpush2.msra.mxu0 %v2829_v31  ;;  %v3011_v31 = vld [vmem:[#allocation7 + $0x308] sm:$0xff] }
 0x26d   :  { %2983 = vmatpush2.msra.mxu1 %v2926_v11  ;;  %2887 = vmatprep.subr.mxu0 %v6144_v3  ;;  %v3108_v11 = vld [vmem:[#allocation7 + $0x3b8] sm:$0xff] }
 0x26e   :  { %2984 = vmatprep.subr.mxu1 %v6144_v3  ;;  %2888 = vmatpush2.msra.mxu0 %v2828_v22  ;;  %v3010_v22 = vld [vmem:[#allocation7 + $0x300] sm:$0xff] }
 0x26f   :  { %2985 = vmatpush2.msra.mxu1 %v2925_v5  ;;  %2889 = vmatprep.subr.mxu0 %v6144_v3  ;;  %v3107_v5 = vld [vmem:[#allocation7 + $0x3b0] sm:$0xff] }
 0x270   :  { %2986 = vmatprep.subr.mxu1 %v6144_v3  ;;  %2890 = vmatpush2.msra.mxu0 %v2827_v7  ;;  %v3106_v7 = vld [vmem:[#allocation7 + $0x3a8] sm:$0xff] }
 0x271   :  { %2987 = vmatpush2.msra.mxu1 %v2924_v30  ;;  %2891 = vmatprep.subr.mxu0 %v6144_v3  ;;  %v3008_v30 = vld [vmem:[#allocation7 + $0x2f0] sm:$0xff] }
 0x272   :  { %2988 = vmatprep.subr.mxu1 %v6144_v3  ;;  %2892 = vmatpush2.msra.mxu0 %v2826_v32  ;;  %v3007_v32 = vld [vmem:[#allocation7 + $0x2e8] sm:$0xff] }
 0x273   :  { %2989 = vmatpush2.msra.mxu1 %v2923_v27  ;;  %2893 = vmatprep.subr.mxu0 %v6144_v3  ;;  %v3104_v27 = vld [vmem:[#allocation7 + $0x398] sm:$0xff] }
 0x274   :  { %2990 = vmatprep.subr.mxu1 %v6144_v3  ;;  %2894 = vmatpush2.msra.mxu0 %v2825_v29  ;;  %v3006_v29 = vld [vmem:[#allocation7 + $0x2e0] sm:$0xff] }
 0x275   :  { %2991 = vmatpush2.msra.mxu1 %v2922_v58  ;;  %2895 = vmatprep.subr.mxu0 %v6144_v3  ;;  %v3005_v58 = vld [vmem:[#allocation7 + $0x2d8] sm:$0xff] }
 0x276   :  { %2992 = vmatprep.subr.mxu1 %v6144_v3  ;;  %2896 = vmatpush2.msra.mxu0 %v2824_v34  ;;  %v3004_v34 = vld [vmem:[#allocation7 + $0x2d0] sm:$0xff] }
 0x277   :  { %2993 = vmatpush2.msra.mxu1 %v2921_v48  ;;  %2898 = vmatmul.mubr.f32.vlgmr.msra.gmra.mxu0 %v1658_v54  ;;  %v3101_v48 = vld [vmem:[#allocation7 + $0x380] sm:$0xff]  ;;  %v3003_v54 = vld [vmem:[#allocation7 + $0x2c8] sm:$0xff] }
 0x278   :  { %2995 = vmatmul.mubr.f32.vlgmr.msra.gmra.mxu1 %v1659_v19  ;;  %3027 = vmatprep.subr.mxu0 %v6144_v3  ;;  %v3100_v19 = vld [vmem:[#allocation7 + $0x378] sm:$0xff] }
 0x279   :  { %3124 = vmatprep.subr.mxu1 %v6144_v3  ;;  %3028 = vmatpush1.msra.mxu0 %v3017_v53  ;;  %v3002_v53 = vld [vmem:[#allocation7 + $0x2c0] sm:$0xff] }
 0x27a   :  { %5885 = vmatprep.mubr.msk.f32.mxu0 %vm1515_vm6, %v2204_v41  ;;  %3125 = vmatpush1.msra.mxu1 %v3114_v60  ;;  %v3111_v41 = vld [vmem:[#allocation7 + $0x3d0] sm:$0xff] }
 0x27b   :  { %5886 = vmatprep.mubr.msk.f32.mxu1 %vm1515_vm6, %v2205_v46  ;;  %3029 = vmatprep.subr.mxu0 %v6144_v3  ;;  %v3012_v46 = vld [vmem:[#allocation7 + $0x310] sm:$0xff] }
 0x27c   :  { %3126 = vmatprep.subr.mxu1 %v6144_v3  ;;  %3030 = vmatpush1.msra.mxu0 %v3016_v6  ;;  %v3099_v60 = vld [vmem:[#allocation7 + $0x370] sm:$0xff]  ;;  %v3023_v6 = vld [vmem:[#allocation7 + $0x368] sm:$0xff] }
 0x27d   :  { %3127 = vmatpush1.msra.mxu1 %v3113_v57  ;;  %3031 = vmatprep.subr.mxu0 %v6144_v3  ;;  %v3120_v57 = vld [vmem:[#allocation7 + $0x418] sm:$0xff] }
 0x27e   :  { %3128 = vmatprep.subr.mxu1 %v6144_v3  ;;  %3032 = vmatpush1.msra.mxu0 %v3015_v37  ;;  %v3022_v37 = vld [vmem:[#allocation7 + $0x360] sm:$0xff] }
 0x27f   :  { %3129 = vmatpush1.msra.mxu1 %v3112_v13  ;;  %3033 = vmatprep.subr.mxu0 %v6144_v3  ;;  %v3119_v13 = vld [vmem:[#allocation7 + $0x410] sm:$0xff] }
 0x280   :  { %3130 = vmatprep.subr.mxu1 %v6144_v3  ;;  %3034 = vmatpush1.msra.mxu0 %v3014_v25  ;;  %v3021_v25 = vld [vmem:[#allocation7 + $0x358] sm:$0xff] }
 0x281   :  { %3131 = vmatpush1.msra.mxu1 %v3111_v41  ;;  %3035 = vmatprep.subr.mxu0 %v6144_v3  ;;  %v3118_v41 = vld [vmem:[#allocation7 + $0x408] sm:$0xff] }
 0x282   :  { %3132 = vmatprep.subr.mxu1 %v6144_v3  ;;  %3036 = vmatpush1.msra.mxu0 %v3013_v49  ;;  %v3020_v49 = vld [vmem:[#allocation7 + $0x350] sm:$0xff] }
 0x283   :  { %3133 = vmatpush1.msra.mxu1 %v3110_v36  ;;  %3037 = vmatprep.subr.mxu0 %v6144_v3  ;;  %v3117_v36 = vld [vmem:[#allocation7 + $0x400] sm:$0xff] }
 0x284   :  { %3134 = vmatprep.subr.mxu1 %v6144_v3  ;;  %3038 = vmatpush1.msra.mxu0 %v3012_v46  ;;  %v3019_v46 = vld [vmem:[#allocation7 + $0x348] sm:$0xff] }
 0x285   :  { %3135 = vmatpush1.msra.mxu1 %v3109_v0  ;;  %3039 = vmatprep.subr.mxu0 %v6144_v3  ;;  %v3116_v0 = vld [vmem:[#allocation7 + $0x3f8] sm:$0xff] }
 0x286   :  { %3136 = vmatprep.subr.mxu1 %v6144_v3  ;;  %3040 = vmatpush1.msra.mxu0 %v3011_v31  ;;  %v3018_v31 = vld [vmem:[#allocation7 + $0x340] sm:$0xff] }
 0x287   :  { %3137 = vmatpush1.msra.mxu1 %v3108_v11  ;;  %3041 = vmatprep.subr.mxu0 %v6144_v3  ;;  %v3115_v11 = vld [vmem:[#allocation7 + $0x3f0] sm:$0xff] }
 0x288   :  { %3138 = vmatprep.subr.mxu1 %v6144_v3  ;;  %3042 = vmatpush1.msra.mxu0 %v3010_v22  ;;  %v3211_v22 = vld [vmem:[#allocation7 + $0x498] sm:$0xff] }
 0x289   :  { %3139 = vmatpush1.msra.mxu1 %v3107_v5  ;;  %3043 = vmatprep.subr.mxu0 %v6144_v3  ;;  %v3308_v5 = vld [vmem:[#allocation7 + $0x548] sm:$0xff] }
 0x28a   :  { %3140 = vmatprep.subr.mxu1 %v6144_v3  ;;  %3044 = vmatpush1.msra.mxu0 %v3009_v55  ;;  %v3210_v55 = vld [vmem:[#allocation7 + $0x490] sm:$0xff] }
 0x28b   :  { %3141 = vmatpush1.msra.mxu1 %v3106_v7  ;;  %3045 = vmatprep.subr.mxu0 %v6144_v3  ;;  %v3307_v7 = vld [vmem:[#allocation7 + $0x540] sm:$0xff] }
 0x28c   :  { %3142 = vmatprep.subr.mxu1 %v6144_v3  ;;  %3046 = vmatpush1.msra.mxu0 %v3008_v30  ;;  %v3205_v30 = vld [vmem:[#allocation7 + $0x468] sm:$0xff] }
 0x28d   :  { %3143 = vmatpush1.msra.mxu1 %v3105_v47  ;;  %3047 = vmatprep.subr.mxu0 %v6144_v3  ;;  %v3302_v47 = vld [vmem:[#allocation7 + $0x518] sm:$0xff] }
 0x28e   :  { %3144 = vmatprep.subr.mxu1 %v6144_v3  ;;  %3048 = vmatpush1.msra.mxu0 %v3007_v32 }
 0x28f   :  { %3145 = vmatpush1.msra.mxu1 %v3104_v27  ;;  %3049 = vmatprep.subr.mxu0 %v6144_v3 }
 0x290   :  { %3146 = vmatprep.subr.mxu1 %v6144_v3  ;;  %3050 = vmatpush1.msra.mxu0 %v3006_v29  ;;  %v3204_v29 = vld [vmem:[#allocation7 + $0x460] sm:$0xff] }
 0x291   :  { %3147 = vmatpush1.msra.mxu1 %v3103_v59  ;;  %3051 = vmatprep.subr.mxu0 %v6144_v3  ;;  %v3301_v59 = vld [vmem:[#allocation7 + $0x510] sm:$0xff] }
 0x292   :  { %3148 = vmatprep.subr.mxu1 %v6144_v3  ;;  %3052 = vmatpush1.msra.mxu0 %v3005_v58  ;;  %v3203_v58 = vld [vmem:[#allocation7 + $0x458] sm:$0xff] }
 0x293   :  { %3149 = vmatpush1.msra.mxu1 %v3102_v17  ;;  %3053 = vmatprep.subr.mxu0 %v6144_v3  ;;  %v3300_v17 = vld [vmem:[#allocation7 + $0x508] sm:$0xff] }
 0x294   :  { %3150 = vmatprep.subr.mxu1 %v6144_v3  ;;  %3054 = vmatpush1.msra.mxu0 %v3004_v34 }
 0x295   :  { %3151 = vmatpush1.msra.mxu1 %v3101_v48  ;;  %3055 = vmatprep.subr.mxu0 %v6144_v3 }
 0x296   :  { %3152 = vmatprep.subr.mxu1 %v6144_v3  ;;  %3056 = vmatpush1.msra.mxu0 %v3003_v54  ;;  %v3202_v54 = vld [vmem:[#allocation7 + $0x450] sm:$0xff] }
 0x297   :  { %3153 = vmatpush1.msra.mxu1 %v3100_v19  ;;  %3057 = vmatprep.subr.mxu0 %v6144_v3  ;;  %v3299_v19 = vld [vmem:[#allocation7 + $0x500] sm:$0xff] }
 0x298   :  { %3154 = vmatprep.subr.mxu1 %v6144_v3  ;;  %3058 = vmatpush1.msra.mxu0 %v3002_v53  ;;  %v3201_v53 = vld [vmem:[#allocation7 + $0x448] sm:$0xff] }
 0x299   :  { %3155 = vmatpush1.msra.mxu1 %v3099_v60  ;;  %3079 = vmatprep.subr.mxu0 %v6144_v3  ;;  %v3298_v60 = vld [vmem:[#allocation7 + $0x4f8] sm:$0xff] }
 0x29a   :  { %3176 = vmatprep.subr.mxu1 %v6144_v3  ;;  %3080 = vmatpush2.msra.mxu0 %v3023_v6  ;;  %v3200_v6 = vld [vmem:[#allocation7 + $0x440] sm:$0xff] }
 0x29b   :  { %3177 = vmatpush2.msra.mxu1 %v3120_v57  ;;  %3081 = vmatprep.subr.mxu0 %v6144_v3  ;;  %v3297_v57 = vld [vmem:[#allocation7 + $0x4f0] sm:$0xff] }
 0x29c   :  { %3178 = vmatprep.subr.mxu1 %v6144_v3  ;;  %3082 = vmatpush2.msra.mxu0 %v3022_v37 }
 0x29d   :  { %3179 = vmatpush2.msra.mxu1 %v3119_v13  ;;  %3083 = vmatprep.subr.mxu0 %v6144_v3 }
 0x29e   :  { %3180 = vmatprep.subr.mxu1 %v6144_v3  ;;  %3084 = vmatpush2.msra.mxu0 %v3021_v25  ;;  %v3199_v25 = vld [vmem:[#allocation7 + $0x438] sm:$0xff] }
 0x29f   :  { %3181 = vmatpush2.msra.mxu1 %v3118_v41  ;;  %3085 = vmatprep.subr.mxu0 %v6144_v3  ;;  %v7088_v41 = vadd.f32 %v6629_v4, %v6811_v35 }
 0x2a0   :  { %3182 = vmatprep.subr.mxu1 %v6144_v3  ;;  %3086 = vmatpush2.msra.mxu0 %v3020_v49  ;;  %v3296_v49 = vld [vmem:[#allocation7 + $0x4e8] sm:$0xff] }
 0x2a1   :  { %3183 = vmatpush2.msra.mxu1 %v3117_v36  ;;  %3087 = vmatprep.subr.mxu0 %v6144_v3  ;;  %v3198_v36 = vld [vmem:[#allocation7 + $0x430] sm:$0xff]  ;;  %v1229_v4 = vmax.f32 %v7088_v41, 0.0 }
 0x2a2   :  { %3184 = vmatprep.subr.mxu1 %v6144_v3  ;;  %3088 = vmatpush2.msra.mxu0 %v3019_v46  ;;  %v3295_v46 = vld [vmem:[#allocation7 + $0x4e0] sm:$0xff] }
 0x2a3   :  { %3185 = vmatpush2.msra.mxu1 %v3116_v0  ;;  %3089 = vmatprep.subr.mxu0 %v6144_v3  ;;  %v3197_v0 = vld [vmem:[#allocation7 + $0x428] sm:$0xff] }
 0x2a4   :  { %3186 = vmatprep.subr.mxu1 %v6144_v3  ;;  %3090 = vmatpush2.msra.mxu0 %v3018_v31 }
 0x2a5   :  { %3187 = vmatpush2.msra.mxu1 %v3115_v11  ;;  %3092 = vmatmul.mubr.f32.vlgmr.msra.gmra.mxu0 %v1660_v56  ;;  %v3208_v56 = vld [vmem:[#allocation7 + $0x480] sm:$0xff] }
 0x2a6   :  { %3189 = vmatmul.mubr.f32.vlgmr.msra.gmra.mxu1 %v1661_v45  ;;  %3221 = vmatprep.subr.mxu0 %v6144_v3  ;;  %v3305_v45 = vld [vmem:[#allocation7 + $0x530] sm:$0xff] }
 0x2a7   :  { %3318 = vmatprep.subr.mxu1 %v6144_v3  ;;  %3222 = vmatpush1.msra.mxu0 %v3211_v22  ;;  %v3294_v22 = vld [vmem:[#allocation7 + $0x4d8] sm:$0xff] }
 0x2a8   :  { %5887 = vmatprep.mubr.msk.f32.mxu0 %vm1515_vm6, %v2206_v10  ;;  %3319 = vmatpush1.msra.mxu1 %v3308_v5  ;;  %v3206_v10 = vld [vmem:[#allocation7 + $0x470] sm:$0xff] }
 0x2a9   :  { %5888 = vmatprep.mubr.msk.f32.mxu1 %vm1515_vm6, %v2207_v9  ;;  %3223 = vmatprep.subr.mxu0 %v6144_v3  ;;  %v3303_v9 = vld [vmem:[#allocation7 + $0x520] sm:$0xff] }
 0x2aa   :  { %3320 = vmatprep.subr.mxu1 %v6144_v3  ;;  %3224 = vmatpush1.msra.mxu0 %v3210_v55  ;;  %v3196_v55 = vld [vmem:[#allocation7 + $0x420] sm:$0xff] }
 0x2ab   :  { %3321 = vmatpush1.msra.mxu1 %v3307_v7  ;;  %3225 = vmatprep.subr.mxu0 %v6144_v3 }
 0x2ac   :  { %3322 = vmatprep.subr.mxu1 %v6144_v3  ;;  %3226 = vmatpush1.msra.mxu0 %v3209_v14  ;;  %v3293_v14 = vld [vmem:[#allocation7 + $0x4d0] sm:$0xff] }
 0x2ad   :  { %3323 = vmatpush1.msra.mxu1 %v3306_v62  ;;  %3227 = vmatprep.subr.mxu0 %v6144_v3 }
 0x2ae   :  { %3324 = vmatprep.subr.mxu1 %v6144_v3  ;;  %3228 = vmatpush1.msra.mxu0 %v3208_v56  ;;  %v3217_v56 = vld [vmem:[#allocation7 + $0x4c8] sm:$0xff] }
 0x2af   :  { %3325 = vmatpush1.msra.mxu1 %v3305_v45  ;;  %3229 = vmatprep.subr.mxu0 %v6144_v3  ;;  %v3314_v45 = vld [vmem:[#allocation7 + $0x578] sm:$0xff] }
 0x2b0   :  { %3326 = vmatprep.subr.mxu1 %v6144_v3  ;;  %3230 = vmatpush1.msra.mxu0 %v3207_v23 }
 0x2b1   :  { %3327 = vmatpush1.msra.mxu1 %v3304_v63  ;;  %3231 = vmatprep.subr.mxu0 %v6144_v3  ;;  %v1318_v32 = vpop.permute.xlu1 %1317  ;;  %v1316_v27 = vpop.permute.xlu0 %1315 }
 0x2b2   :  { %3328 = vmatprep.subr.mxu1 %v6144_v3  ;;  %3232 = vmatpush1.msra.mxu0 %v3206_v10  ;;  %v7096_v35 = vsel %vm675_vm0, %v1316_v27, %v1318_v32  ;;  %v3313_v32 = vld [vmem:[#allocation7 + $0x570] sm:$0xff] }
 0x2b3   :  { %3329 = vmatpush1.msra.mxu1 %v3303_v9  ;;  %3233 = vmatprep.subr.mxu0 %v6144_v3  ;;  %v2209_v62 = vcombine.high %v6896_v20, %v7096_v35  ;;  %v3216_v9 = vld [vmem:[#allocation7 + $0x4c0] sm:$0xff] }
 0x2b4   :  { %3330 = vmatprep.subr.mxu1 %v6144_v3  ;;  %3234 = vmatpush1.msra.mxu0 %v3205_v30 }
 0x2b5   :  { %3331 = vmatpush1.msra.mxu1 %v3302_v47  ;;  %3235 = vmatprep.subr.mxu0 %v6144_v3 }
 0x2b6   :  { %3332 = vmatprep.subr.mxu1 %v6144_v3  ;;  %3236 = vmatpush1.msra.mxu0 %v3204_v29  ;;  %v7073_v34 = vpop.permute.xlu1 %1431  ;;  %v7075_v48 = vpop.permute.xlu0 %1429  ;;  %v7128_v29 = vrot.slane %v2209_v62, %v6762_v26 }
 0x2b7   :  { %3333 = vmatpush1.msra.mxu1 %v3301_v59  ;;  %3237 = vmatprep.subr.mxu0 %v6144_v3  ;;  %v3215_v59 = vld [vmem:[#allocation7 + $0x4b8] sm:$0xff] }
 0x2b8   :  { %3334 = vmatprep.subr.mxu1 %v6144_v3  ;;  %3238 = vmatpush1.msra.mxu0 %v3203_v58 }
 0x2b9   :  { %3335 = vmatpush1.msra.mxu1 %v3300_v17  ;;  %3239 = vmatprep.subr.mxu0 %v6144_v3 }
 0x2ba   :  { %3336 = vmatprep.subr.mxu1 %v6144_v3  ;;  %3240 = vmatpush1.msra.mxu0 %v3202_v54  ;;  %v3312_v54 = vld [vmem:[#allocation7 + $0x568] sm:$0xff] }
 0x2bb   :  { %3337 = vmatpush1.msra.mxu1 %v3299_v19  ;;  %3241 = vmatprep.subr.mxu0 %v6144_v3 }
 0x2bc   :  { %3338 = vmatprep.subr.mxu1 %v6144_v3  ;;  %3242 = vmatpush1.msra.mxu0 %v3201_v53  ;;  %v7083_v37 = vpop.permute.xlu1 %1276  ;;  %v1275_v13 = vpop.permute.xlu0 %1274 }
 0x2bd   :  { %3339 = vmatpush1.msra.mxu1 %v3298_v60  ;;  %3243 = vmatprep.subr.mxu0 %v6144_v3  ;;  %v7115_v10 = vsel %vm1286_vm2, %v1275_v13, %v7083_v37  ;;  %v3214_v60 = vld [vmem:[#allocation7 + $0x4b0] sm:$0xff] }
 0x2be   :  { %3340 = vmatprep.subr.mxu1 %v6144_v3  ;;  %3244 = vmatpush1.msra.mxu0 %v3200_v6 }
 0x2bf   :  { %3341 = vmatpush1.msra.mxu1 %v3297_v57  ;;  %3245 = vmatprep.subr.mxu0 %v6144_v3 }
 0x2c0   :  { %3342 = vmatprep.subr.mxu1 %v6144_v3  ;;  %3246 = vmatpush1.msra.mxu0 %v3199_v25  ;;  %v3311_v25 = vld [vmem:[#allocation7 + $0x560] sm:$0xff] }
 0x2c1   :  { %3343 = vmatpush1.msra.mxu1 %v3296_v49  ;;  %3247 = vmatprep.subr.mxu0 %v6144_v3  ;;  %v1356_v31 = vpop.permute.xlu1 %1355  ;;  %v1314_v11 = vpop.permute.xlu0 %1313 }
 0x2c2   :  { %3344 = vmatprep.subr.mxu1 %v6144_v3  ;;  %3248 = vmatpush1.msra.mxu0 %v3198_v36  ;;  %v7100_v5 = vsel %vm675_vm0, %v1314_v11, %v1316_v27  ;;  %v3309_v11 = vld [vmem:[#allocation7 + $0x550] sm:$0xff] }
 0x2c3   :  { %3345 = vmatpush1.msra.mxu1 %v3295_v46  ;;  %3249 = vmatprep.subr.mxu0 %v6144_v3  ;;  %v1665_v7 = vcombine.high %v1229_v4, %v7100_v5  ;;  %v3213_v46 = vld [vmem:[#allocation7 + $0x4a8] sm:$0xff] }
 0x2c4   :  { %3346 = vmatprep.subr.mxu1 %v6144_v3  ;;  %3250 = vmatpush1.msra.mxu0 %v3197_v0  ;;  %v3310_v0 = vld [vmem:[#allocation7 + $0x558] sm:$0xff] }
 0x2c5   :  { %3347 = vmatpush1.msra.mxu1 %v3294_v22  ;;  %3251 = vmatprep.subr.mxu0 %v6144_v3  ;;  %v7136_v17 = vrot.slane %v1665_v7, %v6762_v26 }
 0x2c6   :  { %3348 = vmatprep.subr.mxu1 %v6144_v3  ;;  %3252 = vmatpush1.msra.mxu0 %v3196_v55  ;;  %v1389_v23 = vpop.permute.xlu1 %1388  ;;  %v7111_v63 = vpop.permute.xlu0 %1357 }
 0x2c7   :  { %3349 = vmatpush1.msra.mxu1 %v3293_v14  ;;  %3273 = vmatprep.subr.mxu0 %v6144_v3  ;;  %v7120_v30 = vsel %vm1367_vm1, %v1356_v31, %v7111_v63  ;;  %v2225_v47 = vcombine.high %v7083_v37, %v7111_v63  ;;  %v3212_v31 = vld [vmem:[#allocation7 + $0x4a0] sm:$0xff] }
 0x2c8   :  { %3370 = vmatprep.subr.mxu1 %v6144_v3  ;;  %3274 = vmatpush2.msra.mxu0 %v3217_v56  ;;  %v1681_v27 = vcombine.high %v7115_v10, %v7120_v30  ;;  %v3405_v56 = vld [vmem:[#allocation7 + $0x5f8] sm:$0xff] }
 0x2c9   :  { %3371 = vmatpush2.msra.mxu1 %v3314_v45  ;;  %3275 = vmatprep.subr.mxu0 %v6144_v3  ;;  %v7132_v58 = vrot.slane %v2225_v47, %v6762_v26  ;;  %v2208_v47 = vcombine.low %v6896_v20, %v7096_v35 }
 0x2ca   :  { %3372 = vmatprep.subr.mxu1 %v6144_v3  ;;  %3276 = vmatpush2.msra.mxu0 %v3216_v9  ;;  %v7139_v19 = vrot.slane %v1681_v27, %v6762_v26  ;;  %v2224_v9 = vcombine.low %v7083_v37, %v7111_v63  ;;  %v1449_v37 = vsel %vm1445_vm5, %v7075_v48, %v7073_v34 }
 0x2cb   :  { %3373 = vmatpush2.msra.mxu1 %v3313_v32  ;;  %3277 = vmatprep.subr.mxu0 %v6144_v3  ;;  %v2288_v53 = vcombine.low %v7128_v29, %v7132_v58  ;;  %v1428_v6 = vpop.permute.xlu1 %1427  ;;  %v7144_v57 = vpop.permute.xlu0 %1390  ;;  %v2289_v36 = vcombine.high %v7128_v29, %v7132_v58  ;;  %v3404_v32 = vld [vmem:[#allocation7 + $0x5f0] sm:$0xff] }
 0x2cc   :  { %3374 = vmatprep.subr.mxu1 %v6144_v3  ;;  %3278 = vmatpush2.msra.mxu0 %v3215_v59  ;;  %v1744_v13 = vcombine.low %v7136_v17, %v7139_v19  ;;  %v1745_v49 = vcombine.high %v7136_v17, %v7139_v19  ;;  %v7160_v7 = vsel %vm1400_vm4, %v1389_v23, %v7144_v57  ;;  %v3502_v23 = vld [vmem:[#allocation7 + $0x6a8] sm:$0xff]  ;;  %v3500_v59 = vld [vmem:[#allocation7 + $0x698] sm:$0xff] }
 0x2cd   :  { %3375 = vmatpush2.msra.mxu1 %v3312_v54  ;;  %3279 = vmatprep.subr.mxu0 %v6144_v3  ;;  %v7185_v63 = vsel %vm1445_vm5, %v1428_v6, %v7075_v48  ;;  %v7194_v48 = vrot.slane %v2224_v9, %v6762_v26  ;;  %v3401_v9 = vld [vmem:[#allocation7 + $0x5d8] sm:$0xff] }
 0x2ce   :  { %3376 = vmatprep.subr.mxu1 %v6144_v3  ;;  %3280 = vmatpush2.msra.mxu0 %v3214_v60 }
 0x2cf   :  { %3377 = vmatpush2.msra.mxu1 %v3311_v25  ;;  %3281 = vmatprep.subr.mxu0 %v6144_v3 }
 0x2d0   :  { %3378 = vmatprep.subr.mxu1 %v6144_v3  ;;  %3282 = vmatpush2.msra.mxu0 %v3213_v46  ;;  %v1473_v22 = vpop.permute.xlu1 %1472  ;;  %v1471_v55 = vpop.permute.xlu0 %1470 }
 0x2d1   :  { %3379 = vmatpush2.msra.mxu1 %v3310_v0  ;;  %3283 = vmatprep.subr.mxu0 %v6144_v3  ;;  %v2241_v14 = vcombine.high %v7144_v57, %v1473_v22  ;;  %v7164_v62 = vsel %vm1482_vm3, %v1471_v55, %v1473_v22  ;;  %v2240_v20 = vcombine.low %v7144_v57, %v1473_v22 }
 0x2d2   :  { %3380 = vmatprep.subr.mxu1 %v6144_v3  ;;  %3284 = vmatpush2.msra.mxu0 %v3212_v31  ;;  %v1697_v45 = vcombine.high %v7160_v7, %v7164_v62  ;;  %v3402_v31 = vld [vmem:[#allocation7 + $0x5e0] sm:$0xff]  ;;  %v7216_v22 = vrot.slane %v2208_v47, %v6762_v26 }
 0x2d3   :  { %3381 = vmatpush2.msra.mxu1 %v3309_v11  ;;  %3286 = vmatmul.mubr.f32.vlgmr.msra.gmra.mxu0 %v1662_v28  ;;  %v3501_v28 = vld [vmem:[#allocation7 + $0x6a0] sm:$0xff]  ;;  %v7200_v60 = vrot.slane %v2241_v14, %v6762_v26  ;;  %v7210_v25 = vrot.slane %v2240_v20, %v6762_v26  ;;  %v3499_v11 = vld [vmem:[#allocation7 + $0x690] sm:$0xff] }
 0x2d4   :  { %3383 = vmatmul.mubr.f32.vlgmr.msra.gmra.mxu1 %v1663_v1  ;;  %3415 = vmatprep.subr.mxu0 %v6144_v3  ;;  %v1711_v46 = vrot.slane %v1697_v45, %v6762_v26  ;;  %v2272_v47 = vcombine.low %v7216_v22, %v7194_v48  ;;  %v3400_v20 = vld [vmem:[#allocation7 + $0x5d0] sm:$0xff] }
 0x2d5   :  { %3512 = vmatprep.subr.mxu1 %v6144_v3  ;;  %3416 = vmatpush1.msra.mxu0 %v3405_v56  ;;  %v1506_v35 = vpop.permute.xlu1 %1505  ;;  %v1504_v15 = vpop.permute.xlu0 %1503 }
 0x2d6   :  { %3513 = vmatpush1.msra.mxu1 %v3502_v23  ;;  %3417 = vmatprep.subr.mxu0 %v6144_v3  ;;  %v2256_v1 = vcombine.low %v1449_v37, %v1506_v35  ;;  %v2257_v27 = vcombine.high %v1449_v37, %v1506_v35  ;;  %v7191_v34 = vsel %vm1515_vm6, %v1504_v15, %v1506_v35  ;;  %v3498_v23 = vld [vmem:[#allocation7 + $0x688] sm:$0xff] }
 0x2d7   :  { %3514 = vmatprep.subr.mxu1 %v6144_v3  ;;  %3418 = vmatpush1.msra.mxu0 %v3404_v32  ;;  %v1713_v54 = vcombine.high %v7185_v63, %v7191_v34  ;;  %v3399_v15 = vld [vmem:[#allocation7 + $0x5c8] sm:$0xff] }
 0x2d8   :  { %3515 = vmatpush1.msra.mxu1 %v3501_v28  ;;  %3419 = vmatprep.subr.mxu0 %v6144_v3  ;;  %v7204_v6 = vrot.slane %v2256_v1, %v6762_v26  ;;  %v7207_v57 = vrot.slane %v2257_v27, %v6762_v26  ;;  %v3497_v28 = vld [vmem:[#allocation7 + $0x680] sm:$0xff]  ;;  %v7243_v27 = vrot.slane %v1744_v13, %v6789_v39 }
 0x2d9   :  { %3516 = vmatprep.subr.mxu1 %v6144_v3  ;;  %3420 = vmatpush1.msra.mxu0 %v3403_v42  ;;  %v1727_v0 = vrot.slane %v1713_v54, %v6762_v26  ;;  %v3496_v42 = vld [vmem:[#allocation7 + $0x678] sm:$0xff]  ;;  %v7250_v54 = vrot.slane %v2288_v53, %v6789_v39  ;;  %v3398_v13 = vld [vmem:[#allocation7 + $0x5c0] sm:$0xff] }
 0x2da   :  { %3517 = vmatpush1.msra.mxu1 %v3500_v59  ;;  %3421 = vmatprep.subr.mxu0 %v6144_v3  ;;  %v2320_v55 = vcombine.low %v7200_v60, %v7207_v57  ;;  %v2304_v14 = vcombine.low %v7210_v25, %v7204_v6  ;;  %v2321_v56 = vcombine.high %v7200_v60, %v7207_v57  ;;  %v3495_v57 = vld [vmem:[#allocation7 + $0x670] sm:$0xff] }
 0x2db   :  { %3518 = vmatprep.subr.mxu1 %v6144_v3  ;;  %v1776_v45 = vcombine.low %v1711_v46, %v1727_v0  ;;  %v1777_v32 = vcombine.high %v1711_v46, %v1727_v0  ;;  %3422 = vmatpush1.msra.mxu0 %v3402_v31  ;;  %v2280_v59 = vrot.slane %v2272_v47, %v6789_v39  ;;  %v3494_v31 = vld [vmem:[#allocation7 + $0x668] sm:$0xff]  ;;  %v3396_v47 = vld [vmem:[#allocation7 + $0x5b0] sm:$0xff] }
 0x2dc   :  { %3519 = vmatpush1.msra.mxu1 %v3499_v11  ;;  %3423 = vmatprep.subr.mxu0 %v6144_v3  ;;  %v2312_v1 = vrot.slane %v2304_v14, %v6789_v39  ;;  %v7256_v60 = vrot.slane %v1745_v49, %v6789_v39  ;;  %v7261_v46 = vrot.slane %v2320_v55, %v6789_v39  ;;  %v3397_v49 = vld [vmem:[#allocation7 + $0x5b8] sm:$0xff] }
 0x2dd   :  { %v7229_v37 = vrot.slane %v1776_v45, %v6789_v39  ;;  %3520 = vmatprep.subr.mxu1 %v6144_v3  ;;  %v7234_v35 = vrot.slane %v1777_v32, %v6789_v39  ;;  %3424 = vmatpush1.msra.mxu0 %v3401_v9  ;;  %v3493_v32 = vld [vmem:[#allocation7 + $0x660] sm:$0xff] }
 0x2de   :  { %3521 = vmatpush1.msra.mxu1 %v3498_v23  ;;  %3425 = vmatprep.subr.mxu0 %v6144_v3  ;;  %v2336_v11 = vcombine.low %v2280_v59, %v2312_v1  ;;  %v2340_v55 = vcombine.low %v7250_v54, %v7261_v46  ;;  %v2341_v14 = vcombine.high %v7250_v54, %v7261_v46  ;;  %v3789_v54 = vld [vmem:[#allocation7 + $0x898] sm:$0xff]  ;;  %v3886_v46 = vld [vmem:[#allocation7 + $0x948] sm:$0xff] }
 0x2df   :  { %3522 = vmatprep.subr.mxu1 %v6144_v3  ;;  %3426 = vmatpush1.msra.mxu0 %v3400_v20  ;;  %v1796_v0 = vcombine.low %v7243_v27, %v7229_v37  ;;  %v1797_v53 = vcombine.high %v7243_v27, %v7229_v37  ;;  %v1798_v17 = vcombine.low %v7256_v60, %v7234_v35  ;;  %v3985_v37 = vld [vmem:[#allocation7 + $0xa08] sm:$0xff]  ;;  %v4082_v27 = vld [vmem:[#allocation7 + $0xab8] sm:$0xff] }
 0x2e0   :  { %3523 = vmatpush1.msra.mxu1 %v3497_v28  ;;  %3427 = vmatprep.subr.mxu0 %v6144_v3  ;;  %v1799_v19 = vcombine.high %v7256_v60, %v7234_v35  ;;  %v2337_v45 = vcombine.high %v2280_v59, %v2312_v1  ;;  %v7280_v23 = vrot.slane %v2321_v56, %v6789_v39  ;;  %v1122_v59 = vpop.f32.mrf.mxu0  ;;  %v4180_v35 = vld [vmem:[#allocation7 + $0xb70] sm:$0xff]  ;;  %v4277_v60 = vld [vmem:[#allocation7 + $0xc20] sm:$0xff] }
 0x2e1   :  { %3524 = vmatprep.subr.mxu1 %v6144_v3  ;;  %3428 = vmatpush1.msra.mxu0 %v3399_v15  ;;  %v7288_v20 = vrot.slane %v2289_v36, %v6789_v39  ;;  %v3395_v15 = vld [vmem:[#allocation7 + $0x5a8] sm:$0xff] }
 0x2e2   :  { %3525 = vmatpush1.msra.mxu1 %v3496_v42  ;;  %3429 = vmatprep.subr.mxu0 %v6144_v3  ;;  %v3492_v42 = vld [vmem:[#allocation7 + $0x658] sm:$0xff]  ;;  %v7360_v41 = vpop.f32.mrf.mxu0 }
 0x2e3   :  { %3526 = vmatprep.subr.mxu1 %v6144_v3  ;;  %3430 = vmatpush1.msra.mxu0 %v3398_v13  ;;  %v7277_v9 = vpop.permute.xlu0 %667  ;;  %v2342_v29 = vcombine.low %v7288_v20, %v7280_v23  ;;  %v2343_v58 = vcombine.high %v7288_v20, %v7280_v23  ;;  %v3393_v13 = vld [vmem:[#allocation7 + $0x598] sm:$0xff]  ;;  %v4081_v23 = vld [vmem:[#allocation7 + $0xab0] sm:$0xff] }
 0x2e4   :  { %3527 = vmatpush1.msra.mxu1 %v3495_v57  ;;  %3431 = vmatprep.subr.mxu0 %v6144_v3  ;;  %v7294_v56 = vadd.f32 %v6643_v2, %v7277_v9  ;;  %v858_v28 = vadd.f32 %v6683_v43, %v7277_v9  ;;  %v3394_v2 = vld [vmem:[#allocation7 + $0x5a0] sm:$0xff]  ;;  %v3491_v43 = vld [vmem:[#allocation7 + $0x650] sm:$0xff]  ;;  %v3490_v57 = vld [vmem:[#allocation7 + $0x648] sm:$0xff] }
 0x2e5   :  { %3528 = vmatprep.subr.mxu1 %v6144_v3  ;;  %3432 = vmatpush1.msra.mxu0 %v3397_v49  ;;  %v7312_v49 = vadd.f32 %v1122_v59, %v7277_v9  ;;  %v3983_v20 = vld [vmem:[#allocation7 + $0x9f8] sm:$0xff] }
 0x2e6   :  { %3529 = vmatpush1.msra.mxu1 %v3494_v31  ;;  %3433 = vmatprep.subr.mxu0 %v6144_v3  ;;  %v1244_v36 = vmax.f32 %v7294_v56, 0.0  ;;  %v1243_v1 = vmax.f32 %v858_v28, 0.0  ;;  %v1036_v31 = vadd.f32 %v6718_v44, %v7277_v9  ;;  %v3391_v44 = vld [vmem:[#allocation7 + $0x588] sm:$0xff]  ;;  %v3488_v28 = vld [vmem:[#allocation7 + $0x638] sm:$0xff] }
 0x2e7   :  { %5889 = vmatprep.mubr.msk.f32.mxu0 %vm1515_vm6, %v2336_v11  ;;  %3530 = vmatprep.subr.mxu1 %v6144_v3  ;;  %v3392_v11 = vld [vmem:[#allocation7 + $0x590] sm:$0xff] }
 0x2e8   :  { %5890 = vmatprep.mubr.msk.f32.mxu1 %vm1515_vm6, %v2337_v45  ;;  %3434 = vmatpush1.msra.mxu0 %v3396_v47  ;;  %v3489_v45 = vld [vmem:[#allocation7 + $0x640] sm:$0xff]  ;;  %v1248_v47 = vmax.f32 %v7312_v49, 0.0  ;;  %v3594_v49 = vld [vmem:[#allocation7 + $0x730] sm:$0xff] }
 0x2e9   :  { %3531 = vmatpush1.msra.mxu1 %v3493_v32  ;;  %3435 = vmatprep.subr.mxu0 %v6144_v3  ;;  %v1247_v32 = vmax.f32 %v1036_v31, 0.0  ;;  %v3508_v31 = vld [vmem:[#allocation7 + $0x6d8] sm:$0xff] }
 0x2ea   :  { %3532 = vmatprep.subr.mxu1 %v6144_v3  ;;  %3436 = vmatpush1.msra.mxu0 %v3395_v15  ;;  %v856_v15 = vadd.f32 %v6679_v8, %v7277_v9  ;;  %v1696_v8 = vcombine.low %v7160_v7, %v7164_v62  ;;  %v3507_v7 = vld [vmem:[#allocation7 + $0x6d0] sm:$0xff] }
 0x2eb   :  { %3533 = vmatpush1.msra.mxu1 %v3492_v42  ;;  %3437 = vmatprep.subr.mxu0 %v6144_v3  ;;  %v769_v42 = vadd.f32 %v6646_v52, %v7277_v9  ;;  %v1680_v52 = vcombine.low %v7115_v10, %v7120_v30  ;;  %v3410_v30 = vld [vmem:[#allocation7 + $0x620] sm:$0xff] }
 0x2ec   :  { %3534 = vmatprep.subr.mxu1 %v6144_v3  ;;  %3438 = vmatpush1.msra.mxu0 %v3394_v2  ;;  %v3390_v2 = vld [vmem:[#allocation7 + $0x580] sm:$0xff]  ;;  %v1242_v59 = vmax.f32 %v856_v15, 0.0  ;;  %v3408_v15 = vld [vmem:[#allocation7 + $0x610] sm:$0xff] }
 0x2ed   :  { %3535 = vmatpush1.msra.mxu1 %v3491_v43  ;;  %3439 = vmatprep.subr.mxu0 %v6144_v3  ;;  %v3487_v43 = vld [vmem:[#allocation7 + $0x630] sm:$0xff]  ;;  %v7355_v62 = vrot.slane %v1680_v52, %v6762_v26  ;;  %v3504_v52 = vld [vmem:[#allocation7 + $0x6b8] sm:$0xff] }
 0x2ee   :  { %3536 = vmatprep.subr.mxu1 %v6144_v3  ;;  %1323 = vrot.lane.b32.xlu0 %v1244_v36, %s6145_s1 }
 0x2ef   :  { %1321 = vrot.lane.b32.xlu1 %v1243_v1, %s6145_s1  ;;  %3440 = vmatpush1.msra.mxu0 %v3393_v13  ;;  %v1712_v1 = vcombine.low %v7185_v63, %v7191_v34  ;;  %v7341_v13 = vmax.f32 %v769_v42, 0.0  ;;  %v1664_v63 = vcombine.low %v1229_v4, %v7100_v5  ;;  %v7358_v34 = vrot.slane %v1696_v8, %v6762_v26  ;;  %v3409_v4 = vld [vmem:[#allocation7 + $0x618] sm:$0xff]  ;;  %v3506_v5 = vld [vmem:[#allocation7 + $0x6c8] sm:$0xff]  ;;  %v3505_v42 = vld [vmem:[#allocation7 + $0x6c0] sm:$0xff] }
 0x2f0   :  { %3537 = vmatpush1.msra.mxu1 %v3490_v57  ;;  %3441 = vmatprep.subr.mxu0 %v6144_v3  ;;  %v3411_v57 = vld [vmem:[#allocation7 + $0x628] sm:$0xff] }
 0x2f1   :  { %3538 = vmatprep.subr.mxu1 %v6144_v3  ;;  %3442 = vmatpush1.msra.mxu0 %v3392_v11  ;;  %v7349_v10 = vrot.slane %v1712_v1, %v6762_v26  ;;  %v7365_v11 = vrot.slane %v1664_v63, %v6762_v26  ;;  %v3407_v1 = vld [vmem:[#allocation7 + $0x608] sm:$0xff] }
 0x2f2   :  { %3539 = vmatpush1.msra.mxu1 %v3489_v45  ;;  %3443 = vmatprep.subr.mxu0 %v6144_v3 }
 0x2f3   :  { %3540 = vmatprep.subr.mxu1 %v6144_v3  ;;  %1437 = vrot.lane.b32.xlu0 %v1248_v47, %s6149_s20  ;;  %v1760_v45 = vcombine.low %v7358_v34, %v7349_v10 }
 0x2f4   :  { %1435 = vrot.lane.b32.xlu1 %v1247_v32, %s6149_s20  ;;  %3444 = vmatpush1.msra.mxu0 %v3391_v44  ;;  %v7369_v32 = vpop.f32.mrf.mxu1  ;;  %v947_v44 = vadd.f32 %v6649_v18, %v7277_v9 }
 0x2f5   :  { %3541 = vmatpush1.msra.mxu1 %v3488_v28  ;;  %3445 = vmatprep.subr.mxu0 %v6144_v3  ;;  %v7375_v28 = vpop.f32.mrf.mxu0  ;;  %v1768_v18 = vrot.slane %v1760_v45, %v6789_v39 }
 0x2f6   :  { %3542 = vmatprep.subr.mxu1 %v6144_v3  ;;  %3446 = vmatpush1.msra.mxu0 %v3390_v2  ;;  %v1728_v2 = vcombine.low %v7365_v11, %v7355_v62  ;;  %v1209_v56 = vpop.f32.mrf.mxu1 }
 0x2f7   :  { %3543 = vmatpush1.msra.mxu1 %v3487_v43  ;;  %3467 = vmatprep.subr.mxu0 %v6144_v3  ;;  %v2305_v43 = vcombine.high %v7210_v25, %v7204_v6  ;;  %v7388_v8 = vpop.f32.mrf.mxu0  ;;  %v3406_v6 = vld [vmem:[#allocation7 + $0x600] sm:$0xff]  ;;  %v3503_v25 = vld [vmem:[#allocation7 + $0x6b0] sm:$0xff] }
 0x2f8   :  { %3564 = vmatprep.subr.mxu1 %v6144_v3  ;;  %1280 = vrot.lane.b32.xlu0 %v1242_v59, %s6146_s2 }
 0x2f9   :  { %1278 = vrot.lane.b32.xlu1 %v7341_v13, %s6146_s2  ;;  %3468 = vmatpush2.msra.mxu0 %v3411_v57  ;;  %v1736_v57 = vrot.slane %v1728_v2, %v6789_v39  ;;  %v3696_v2 = vld [vmem:[#allocation7 + $0x808] sm:$0xff] }
 0x2fa   :  { %3565 = vmatpush2.msra.mxu1 %v3508_v31  ;;  %3469 = vmatprep.subr.mxu0 %v6144_v3  ;;  %v1034_v31 = vadd.f32 %v6714_v51, %v7277_v9 }
 0x2fb   :  { %3566 = vmatprep.subr.mxu1 %v6144_v3  ;;  %3470 = vmatpush2.msra.mxu0 %v3410_v30 }
 0x2fc   :  { %3567 = vmatpush2.msra.mxu1 %v3507_v7  ;;  %3471 = vmatprep.subr.mxu0 %v6144_v3  ;;  %v1792_v7 = vcombine.low %v1736_v57, %v1768_v18 }
 0x2fd   :  { %3568 = vmatprep.subr.mxu1 %v6144_v3  ;;  %1359 = vrot.lane.b32.xlu0 %v1244_v36, %s6147_s18  ;;  %v1245_v36 = vmax.f32 %v947_v44, 0.0  ;;  %v1246_v44 = vmax.f32 %v1034_v31, 0.0 }
 0x2fe   :  { %1319 = vrot.lane.b32.xlu1 %v1242_v59, %s6145_s1  ;;  %3472 = vmatpush2.msra.mxu0 %v3409_v4  ;;  %v2273_v59 = vcombine.high %v7216_v22, %v7194_v48  ;;  %v2319_v48 = vrot.slane %v2305_v43, %v6789_v39  ;;  %v1793_v4 = vcombine.high %v1736_v57, %v1768_v18  ;;  %v3693_v57 = vld [vmem:[#allocation7 + $0x7f0] sm:$0xff] }
 0x2ff   :  { %3569 = vmatpush2.msra.mxu1 %v3506_v5  ;;  %3473 = vmatprep.subr.mxu0 %v6144_v3  ;;  %v1125_v18 = vadd.f32 %v7360_v41, %v7277_v9  ;;  %v1210_v41 = vadd.f32 %v1209_v56, %v7277_v9  ;;  %v654_v56 = vld [vmem:[%s8556_s4 + $0x18] sm:$0xff] }
 0x300   :  { %3570 = vmatprep.subr.mxu1 %v6144_v3  ;;  %3474 = vmatpush2.msra.mxu0 %v3408_v15  ;;  %v2287_v51 = vrot.slane %v2273_v59, %v6789_v39  ;;  %v3599_v15 = vld [vmem:[#allocation7 + $0x758] sm:$0xff]  ;;  %v3597_v59 = vld [vmem:[#allocation7 + $0x748] sm:$0xff] }
 0x301   :  { %3571 = vmatpush2.msra.mxu1 %v3505_v42  ;;  %3475 = vmatprep.subr.mxu0 %v6144_v3  ;;  %v1250_v31 = vmax.f32 %v1210_v41, 0.0  ;;  %v3682_v41 = vld [vmem:[#allocation7 + $0x798] sm:$0xff] }
 0x302   :  { %3572 = vmatprep.subr.mxu1 %v6144_v3  ;;  %1392 = vrot.lane.b32.xlu0 %v1245_v36, %s6148_s19  ;;  %v2338_v42 = vcombine.low %v2287_v51, %v2319_v48  ;;  %v2339_v43 = vcombine.high %v2287_v51, %v2319_v48  ;;  %v3593_v48 = vld [vmem:[#allocation7 + $0x728] sm:$0xff] }
 0x303   :  { %1361 = vrot.lane.b32.xlu1 %v1245_v36, %s6147_s18  ;;  %v2730_v63 = vpop.f32.mrf.mxu0  ;;  %v2803_v30 = vpop.f32.mrf.mxu1  ;;  %3476 = vmatpush2.msra.mxu0 %v3407_v1  ;;  %v3598_v36 = vld [vmem:[#allocation7 + $0x750] sm:$0xff]  ;;  %v3695_v1 = vld [vmem:[#allocation7 + $0x800] sm:$0xff]  ;;  %v3688_v51 = vld [vmem:[#allocation7 + $0x7c8] sm:$0xff] }
 0x304   :  { %3573 = vmatpush2.msra.mxu1 %v3504_v52  ;;  %v7400_v22 = vadd.f32 %v2803_v30, %v2730_v63  ;;  %3477 = vmatprep.subr.mxu0 %v6144_v3  ;;  %v1249_v52 = vmax.f32 %v1125_v18, 0.0  ;;  %v3595_v63 = vld [vmem:[#allocation7 + $0x738] sm:$0xff]  ;;  %v3692_v30 = vld [vmem:[#allocation7 + $0x7e8] sm:$0xff]  ;;  %v3685_v18 = vld [vmem:[#allocation7 + $0x7b0] sm:$0xff] }
 0x305   :  { %3574 = vmatprep.subr.mxu1 %v6144_v3  ;;  %v2732_v5 = vpop.f32.mrf.mxu0  ;;  %v2805_v45 = vpop.f32.mrf.mxu1  ;;  %3478 = vmatpush2.msra.mxu0 %v3406_v6  ;;  %v3694_v6 = vld [vmem:[#allocation7 + $0x7f8] sm:$0xff] }
 0x306   :  { %3575 = vmatpush2.msra.mxu1 %v3503_v25  ;;  %3480 = vmatmul.mubr.f32.vlgmr.msra.gmra.mxu0 %v1792_v7  ;;  %v3596_v25 = vld [vmem:[#allocation7 + $0x740] sm:$0xff]  ;;  %v3690_v7 = vld [vmem:[#allocation7 + $0x7d8] sm:$0xff]  ;;  %v3689_v5 = vld [vmem:[#allocation7 + $0x7d0] sm:$0xff] }
 0x307   :  { %3577 = vmatmul.mubr.f32.vlgmr.msra.gmra.mxu1 %v1793_v4  ;;  %3609 = vmatprep.subr.mxu0 %v6144_v3  ;;  %v3592_v4 = vld [vmem:[#allocation7 + $0x720] sm:$0xff]  ;;  %v3591_v45 = vld [vmem:[#allocation7 + $0x718] sm:$0xff] }
 0x308   :  { %3706 = vmatprep.subr.mxu1 %v6144_v3  ;;  %1433 = vrot.lane.b32.xlu0 %v1246_v44, %s6149_s20 }
 0x309   :  { %1394 = vrot.lane.b32.xlu1 %v1246_v44, %s6148_s19  ;;  %3610 = vmatpush1.msra.mxu0 %v3599_v15  ;;  %v3590_v44 = vld [vmem:[#allocation7 + $0x710] sm:$0xff]  ;;  %v3687_v15 = vld [vmem:[#allocation7 + $0x7c0] sm:$0xff] }
 0x30a   :  { %5891 = vmatprep.mubr.msk.f32.mxu0 %vm1515_vm6, %v2338_v42  ;;  %3707 = vmatpush1.msra.mxu1 %v3696_v2  ;;  %v3589_v42 = vld [vmem:[#allocation7 + $0x708] sm:$0xff]  ;;  %v3686_v2 = vld [vmem:[#allocation7 + $0x7b8] sm:$0xff] }
 0x30b   :  { %5892 = vmatprep.mubr.msk.f32.mxu1 %vm1515_vm6, %v2339_v43  ;;  %3611 = vmatprep.subr.mxu0 %v6144_v3  ;;  %v3588_v43 = vld [vmem:[#allocation7 + $0x700] sm:$0xff] }
 0x30c   :  { %3708 = vmatprep.subr.mxu1 %v6144_v3  ;;  %3612 = vmatpush1.msra.mxu0 %v3598_v36  ;;  %v3587_v36 = vld [vmem:[#allocation7 + $0x6f8] sm:$0xff] }
 0x30d   :  { %3709 = vmatpush1.msra.mxu1 %v3695_v1  ;;  %3613 = vmatprep.subr.mxu0 %v6144_v3  ;;  %v3684_v1 = vld [vmem:[#allocation7 + $0x7a8] sm:$0xff] }
 0x30e   :  { %3710 = vmatprep.subr.mxu1 %v6144_v3  ;;  %1476 = vrot.lane.b32.xlu0 %v1249_v52, %s6150_s21 }
 0x30f   :  { %1474 = vrot.lane.b32.xlu1 %v1248_v47, %s6150_s21  ;;  %3614 = vmatpush1.msra.mxu0 %v3597_v59  ;;  %v3691_v47 = vld [vmem:[#allocation7 + $0x7e0] sm:$0xff] }
 0x310   :  { %3711 = vmatpush1.msra.mxu1 %v3694_v6  ;;  %3615 = vmatprep.subr.mxu0 %v6144_v3  ;;  %v3683_v59 = vld [vmem:[#allocation7 + $0x7a0] sm:$0xff]  ;;  %v3585_v6 = vld [vmem:[#allocation7 + $0x6e8] sm:$0xff] }
 0x311   :  { %3712 = vmatprep.subr.mxu1 %v6144_v3  ;;  %3616 = vmatpush1.msra.mxu0 %v3596_v25  ;;  %v3584_v25 = vld [vmem:[#allocation7 + $0x6e0] sm:$0xff] }
 0x312   :  { %3713 = vmatpush1.msra.mxu1 %v3693_v57  ;;  %3617 = vmatprep.subr.mxu0 %v6144_v3  ;;  %v3681_v57 = vld [vmem:[#allocation7 + $0x790] sm:$0xff] }
 0x313   :  { %3714 = vmatprep.subr.mxu1 %v6144_v3  ;;  %1509 = vrot.lane.b32.xlu0 %v1250_v31, %s6151_s22  ;;  %v3605_v31 = vld [vmem:[#allocation7 + $0x788] sm:$0xff] }
 0x314   :  { %1507 = vrot.lane.b32.xlu1 %v1249_v52, %s6151_s22  ;;  %3618 = vmatpush1.msra.mxu0 %v3595_v63  ;;  %v3586_v52 = vld [vmem:[#allocation7 + $0x6f0] sm:$0xff]  ;;  %v3702_v63 = vld [vmem:[#allocation7 + $0x838] sm:$0xff] }
 0x315   :  { %3715 = vmatpush1.msra.mxu1 %v3692_v30  ;;  %3619 = vmatprep.subr.mxu0 %v6144_v3  ;;  %v3604_v30 = vld [vmem:[#allocation7 + $0x780] sm:$0xff] }
 0x316   :  { %3716 = vmatprep.subr.mxu1 %v6144_v3  ;;  %3620 = vmatpush1.msra.mxu0 %v3594_v49  ;;  %v3701_v49 = vld [vmem:[#allocation7 + $0x830] sm:$0xff] }
 0x317   :  { %3717 = vmatpush1.msra.mxu1 %v3691_v47  ;;  %3621 = vmatprep.subr.mxu0 %v6144_v3  ;;  %v1761_v47 = vcombine.high %v7358_v34, %v7349_v10  ;;  %v3601_v34 = vld [vmem:[#allocation7 + $0x768] sm:$0xff] }
 0x318   :  { %3718 = vmatprep.subr.mxu1 %v6144_v3  ;;  %672 = vperm.xlu1 %6003, %v654_v56   ;;  %v3603_v56 = vld [vmem:[#allocation7 + $0x778] sm:$0xff] }
 0x319   :  { %3622 = vmatpush1.msra.mxu0 %v3593_v48  ;;  %3719 = vmatpush1.msra.mxu1 %v3690_v7  ;;  %v3700_v48 = vld [vmem:[#allocation7 + $0x828] sm:$0xff]  ;;  %v1729_v7 = vcombine.high %v7365_v11, %v7355_v62  ;;  %v1775_v10 = vrot.slane %v1761_v47, %v6789_v39  ;;  %v3600_v62 = vld [vmem:[#allocation7 + $0x760] sm:$0xff]  ;;  %v3883_v47 = vld [vmem:[#allocation7 + $0x930] sm:$0xff] }
 0x31a   :  { %3623 = vmatprep.subr.mxu0 %v6144_v3  ;;  %3720 = vmatprep.subr.mxu1 %v6144_v3 }
 0x31b   :  { %3624 = vmatpush1.msra.mxu0 %v3592_v4  ;;  %3721 = vmatpush1.msra.mxu1 %v3689_v5  ;;  %v3602_v4 = vld [vmem:[#allocation7 + $0x770] sm:$0xff]  ;;  %v3699_v5 = vld [vmem:[#allocation7 + $0x820] sm:$0xff]  ;;  %v1743_v11 = vrot.slane %v1729_v7, %v6789_v39 }
 0x31c   :  { %3625 = vmatprep.subr.mxu0 %v6144_v3  ;;  %3722 = vmatprep.subr.mxu1 %v6144_v3  ;;  %v3784_v7 = vld [vmem:[#allocation7 + $0x870] sm:$0xff] }
 0x31d   :  { %3626 = vmatpush1.msra.mxu0 %v3591_v45  ;;  %3723 = vmatpush1.msra.mxu1 %v3688_v51  ;;  %v3698_v45 = vld [vmem:[#allocation7 + $0x818] sm:$0xff]  ;;  %v3697_v51 = vld [vmem:[#allocation7 + $0x810] sm:$0xff] }
 0x31e   :  { %3627 = vmatprep.subr.mxu0 %v6144_v3  ;;  %3724 = vmatprep.subr.mxu1 %v6144_v3 }
 0x31f   :  { %3628 = vmatpush1.msra.mxu0 %v3590_v44  ;;  %3725 = vmatpush1.msra.mxu1 %v3687_v15  ;;  %v1794_v44 = vcombine.low %v1743_v11, %v1775_v10  ;;  %v1795_v15 = vcombine.high %v1743_v11, %v1775_v10  ;;  %v3880_v10 = vld [vmem:[#allocation7 + $0x918] sm:$0xff]  ;;  %v3878_v11 = vld [vmem:[#allocation7 + $0x908] sm:$0xff] }
 0x320   :  { %3629 = vmatprep.subr.mxu0 %v6144_v3  ;;  %3726 = vmatprep.subr.mxu1 %v6144_v3 }
 0x321   :  { %3630 = vmatpush1.msra.mxu0 %v3589_v42  ;;  %3727 = vmatpush1.msra.mxu1 %v3686_v2  ;;  %v3793_v42 = vld [vmem:[#allocation7 + $0x8b8] sm:$0xff] }
 0x322   :  { %3631 = vmatprep.subr.mxu0 %v6144_v3  ;;  %3728 = vmatprep.subr.mxu1 %v6144_v3 }
 0x323   :  { %3632 = vmatpush1.msra.mxu0 %v3588_v43  ;;  %3729 = vmatpush1.msra.mxu1 %v3685_v18  ;;  %v3890_v43 = vld [vmem:[#allocation7 + $0x968] sm:$0xff] }
 0x324   :  { %3633 = vmatprep.subr.mxu0 %v6144_v3  ;;  %3730 = vmatprep.subr.mxu1 %v6144_v3 }
 0x325   :  { %3634 = vmatpush1.msra.mxu0 %v3587_v36  ;;  %3731 = vmatpush1.msra.mxu1 %v3684_v1 }
 0x326   :  { %3635 = vmatprep.subr.mxu0 %v6144_v3  ;;  %3732 = vmatprep.subr.mxu1 %v6144_v3 }
 0x327   :  { %3636 = vmatpush1.msra.mxu0 %v3586_v52  ;;  %3733 = vmatpush1.msra.mxu1 %v3683_v59  ;;  %v3792_v52 = vld [vmem:[#allocation7 + $0x8b0] sm:$0xff] }
 0x328   :  { %3637 = vmatprep.subr.mxu0 %v6144_v3  ;;  %3734 = vmatprep.subr.mxu1 %v6144_v3 }
 0x329   :  { %3638 = vmatpush1.msra.mxu0 %v3585_v6  ;;  %3735 = vmatpush1.msra.mxu1 %v3682_v41  ;;  %v3889_v41 = vld [vmem:[#allocation7 + $0x960] sm:$0xff] }
 0x32a   :  { %3639 = vmatprep.subr.mxu0 %v6144_v3  ;;  %3736 = vmatprep.subr.mxu1 %v6144_v3 }
 0x32b   :  { %3640 = vmatpush1.msra.mxu0 %v3584_v25  ;;  %3737 = vmatpush1.msra.mxu1 %v3681_v57  ;;  %v3888_v25 = vld [vmem:[#allocation7 + $0x958] sm:$0xff]  ;;  %v3790_v57 = vld [vmem:[#allocation7 + $0x8a0] sm:$0xff] }
 0x32c   :  { %3661 = vmatprep.subr.mxu0 %v6144_v3  ;;  %3758 = vmatprep.subr.mxu1 %v6144_v3 }
 0x32d   :  { %3662 = vmatpush2.msra.mxu0 %v3605_v31  ;;  %3759 = vmatpush2.msra.mxu1 %v3702_v63  ;;  %v3885_v31 = vld [vmem:[#allocation7 + $0x940] sm:$0xff]  ;;  %v3787_v63 = vld [vmem:[#allocation7 + $0x888] sm:$0xff] }
 0x32e   :  { %3663 = vmatprep.subr.mxu0 %v6144_v3  ;;  %3760 = vmatprep.subr.mxu1 %v6144_v3 }
 0x32f   :  { %3664 = vmatpush2.msra.mxu0 %v3604_v30  ;;  %3761 = vmatpush2.msra.mxu1 %v3701_v49  ;;  %v3884_v30 = vld [vmem:[#allocation7 + $0x938] sm:$0xff]  ;;  %v3786_v49 = vld [vmem:[#allocation7 + $0x880] sm:$0xff] }
 0x330   :  { %3665 = vmatprep.subr.mxu0 %v6144_v3  ;;  %3762 = vmatprep.subr.mxu1 %v6144_v3 }
 0x331   :  { %3666 = vmatpush2.msra.mxu0 %v3603_v56  ;;  %3763 = vmatpush2.msra.mxu1 %v3700_v48  ;;  %v3785_v56 = vld [vmem:[#allocation7 + $0x878] sm:$0xff]  ;;  %v3882_v48 = vld [vmem:[#allocation7 + $0x928] sm:$0xff] }
 0x332   :  { %3667 = vmatprep.subr.mxu0 %v6144_v3  ;;  %3764 = vmatprep.subr.mxu1 %v6144_v3 }
 0x333   :  { %3668 = vmatpush2.msra.mxu0 %v3602_v4  ;;  %3765 = vmatpush2.msra.mxu1 %v3699_v5  ;;  %v3881_v4 = vld [vmem:[#allocation7 + $0x920] sm:$0xff]  ;;  %v3783_v5 = vld [vmem:[#allocation7 + $0x868] sm:$0xff] }
 0x334   :  { %3669 = vmatprep.subr.mxu0 %v6144_v3  ;;  %3766 = vmatprep.subr.mxu1 %v6144_v3 }
 0x335   :  { %3670 = vmatpush2.msra.mxu0 %v3601_v34  ;;  %3767 = vmatpush2.msra.mxu1 %v3698_v45  ;;  %v3782_v34 = vld [vmem:[#allocation7 + $0x860] sm:$0xff]  ;;  %v3879_v45 = vld [vmem:[#allocation7 + $0x910] sm:$0xff] }
 0x336   :  { %3671 = vmatprep.subr.mxu0 %v6144_v3  ;;  %3768 = vmatprep.subr.mxu1 %v6144_v3 }
 0x337   :  { %3672 = vmatpush2.msra.mxu0 %v3600_v62  ;;  %v2899_v2 = vpop.f32.mrf.mxu0  ;;  %3769 = vmatpush2.msra.mxu1 %v3697_v51  ;;  %v3781_v62 = vld [vmem:[#allocation7 + $0x858] sm:$0xff]  ;;  %v3780_v51 = vld [vmem:[#allocation7 + $0x850] sm:$0xff] }
 0x338   :  { %3674 = vmatmul.mubr.f32.vlgmr.msra.gmra.mxu0 %v1794_v44  ;;  %v2903_v18 = vadd.f32 %v2899_v2, %v7400_v22  ;;  %v2996_v36 = vpop.f32.mrf.mxu1  ;;  %3771 = vmatmul.mubr.f32.vlgmr.msra.gmra.mxu1 %v1795_v15  ;;  %v3791_v22 = vld [vmem:[#allocation7 + $0x8a8] sm:$0xff]  ;;  %v3877_v44 = vld [vmem:[#allocation7 + $0x900] sm:$0xff] }
 0x339   :  { %3803 = vmatprep.subr.mxu0 %v6144_v3  ;;  %v2901_v1 = vpop.f32.mrf.mxu0  ;;  %3900 = vmatprep.subr.mxu1 %v6144_v3  ;;  %v3779_v15 = vld [vmem:[#allocation7 + $0x848] sm:$0xff]  ;;  %v3778_v2 = vld [vmem:[#allocation7 + $0x840] sm:$0xff] }
 0x33a   :  { %3804 = vmatpush1.msra.mxu0 %v3793_v42  ;;  %v7474_v59 = vadd.f32 %v2996_v36, %v2903_v18  ;;  %v2998_v6 = vpop.f32.mrf.mxu1  ;;  %5893 = vmatprep.mubr.msk.f32.mxu0 %vm1515_vm6, %v2340_v55  ;;  %v3887_v55 = vld [vmem:[#allocation7 + $0x950] sm:$0xff]  ;;  %v3876_v42 = vld [vmem:[#allocation7 + $0x8f8] sm:$0xff]  ;;  %v3799_v18 = vld [vmem:[#allocation7 + $0x8e8] sm:$0xff] }
 0x33b   :  { %3901 = vmatpush1.msra.mxu1 %v3890_v43  ;;  %5894 = vmatprep.mubr.msk.f32.mxu1 %vm1515_vm6, %v2341_v14  ;;  %v3788_v14 = vld [vmem:[#allocation7 + $0x890] sm:$0xff]  ;;  %v3896_v36 = vld [vmem:[#allocation7 + $0x998] sm:$0xff]  ;;  %v3798_v1 = vld [vmem:[#allocation7 + $0x8e0] sm:$0xff] }
 0x33c   :  { %3805 = vmatprep.subr.mxu0 %v6144_v3  ;;  %3902 = vmatprep.subr.mxu1 %v6144_v3  ;;  %v3875_v43 = vld [vmem:[#allocation7 + $0x8f0] sm:$0xff]  ;;  %v3797_v6 = vld [vmem:[#allocation7 + $0x8d8] sm:$0xff] }
 0x33d   :  { %3806 = vmatpush1.msra.mxu0 %v3792_v52  ;;  %3903 = vmatpush1.msra.mxu1 %v3889_v41  ;;  %v3895_v52 = vld [vmem:[#allocation7 + $0x990] sm:$0xff]  ;;  %v3894_v41 = vld [vmem:[#allocation7 + $0x988] sm:$0xff] }
 0x33e   :  { %3807 = vmatprep.subr.mxu0 %v6144_v3  ;;  %3904 = vmatprep.subr.mxu1 %v6144_v3 }
 0x33f   :  { %3808 = vmatpush1.msra.mxu0 %v3791_v22  ;;  %3905 = vmatpush1.msra.mxu1 %v3888_v25  ;;  %v3796_v22 = vld [vmem:[#allocation7 + $0x8d0] sm:$0xff]  ;;  %v3893_v25 = vld [vmem:[#allocation7 + $0x980] sm:$0xff] }
 0x340   :  { %3809 = vmatprep.subr.mxu0 %v6144_v3  ;;  %3906 = vmatprep.subr.mxu1 %v6144_v3 }
 0x341   :  { %3810 = vmatpush1.msra.mxu0 %v3790_v57  ;;  %3907 = vmatpush1.msra.mxu1 %v3887_v55  ;;  %v3795_v57 = vld [vmem:[#allocation7 + $0x8c8] sm:$0xff]  ;;  %v3892_v55 = vld [vmem:[#allocation7 + $0x978] sm:$0xff] }
 0x342   :  { %3811 = vmatprep.subr.mxu0 %v6144_v3  ;;  %3908 = vmatprep.subr.mxu1 %v6144_v3 }
 0x343   :  { %3812 = vmatpush1.msra.mxu0 %v3789_v54  ;;  %3909 = vmatpush1.msra.mxu1 %v3886_v46 }
 0x344   :  { %3813 = vmatprep.subr.mxu0 %v6144_v3  ;;  %3910 = vmatprep.subr.mxu1 %v6144_v3 }
 0x345   :  { %3814 = vmatpush1.msra.mxu0 %v3788_v14  ;;  %3911 = vmatpush1.msra.mxu1 %v3885_v31  ;;  %v3794_v14 = vld [vmem:[#allocation7 + $0x8c0] sm:$0xff]  ;;  %v3891_v31 = vld [vmem:[#allocation7 + $0x970] sm:$0xff] }
 0x346   :  { %3815 = vmatprep.subr.mxu0 %v6144_v3  ;;  %3912 = vmatprep.subr.mxu1 %v6144_v3 }
 0x347   :  { %3816 = vmatpush1.msra.mxu0 %v3787_v63  ;;  %3913 = vmatpush1.msra.mxu1 %v3884_v30  ;;  %v3987_v63 = vld [vmem:[#allocation7 + $0xa18] sm:$0xff] }
 0x348   :  { %3817 = vmatprep.subr.mxu0 %v6144_v3  ;;  %3914 = vmatprep.subr.mxu1 %v6144_v3 }
 0x349   :  { %3818 = vmatpush1.msra.mxu0 %v3786_v49  ;;  %3915 = vmatpush1.msra.mxu1 %v3883_v47  ;;  %v4084_v49 = vld [vmem:[#allocation7 + $0xac8] sm:$0xff] }
 0x34a   :  { %3819 = vmatprep.subr.mxu0 %v6144_v3  ;;  %3916 = vmatprep.subr.mxu1 %v6144_v3 }
 0x34b   :  { %3820 = vmatpush1.msra.mxu0 %v3785_v56  ;;  %3917 = vmatpush1.msra.mxu1 %v3882_v48 }
 0x34c   :  { %3821 = vmatprep.subr.mxu0 %v6144_v3  ;;  %3918 = vmatprep.subr.mxu1 %v6144_v3 }
 0x34d   :  { %3822 = vmatpush1.msra.mxu0 %v3784_v7  ;;  %3919 = vmatpush1.msra.mxu1 %v3881_v4 }
 0x34e   :  { %3823 = vmatprep.subr.mxu0 %v6144_v3  ;;  %3920 = vmatprep.subr.mxu1 %v6144_v3 }
 0x34f   :  { %3824 = vmatpush1.msra.mxu0 %v3783_v5  ;;  %3921 = vmatpush1.msra.mxu1 %v3880_v10  ;;  %v3986_v5 = vld [vmem:[#allocation7 + $0xa10] sm:$0xff] }
 0x350   :  { %3825 = vmatprep.subr.mxu0 %v6144_v3  ;;  %3922 = vmatprep.subr.mxu1 %v6144_v3 }
 0x351   :  { %3826 = vmatpush1.msra.mxu0 %v3782_v34  ;;  %3923 = vmatpush1.msra.mxu1 %v3879_v45  ;;  %v767_v45 = vadd.f32 %v6641_v50, %v7277_v9  ;;  %v4079_v9 = vld [vmem:[#allocation7 + $0xaa0] sm:$0xff] }
 0x352   :  { %3827 = vmatprep.subr.mxu0 %v6144_v3  ;;  %3924 = vmatprep.subr.mxu1 %v6144_v3 }
 0x353   :  { %3828 = vmatpush1.msra.mxu0 %v3781_v62  ;;  %3925 = vmatpush1.msra.mxu1 %v3878_v11  ;;  %v3982_v62 = vld [vmem:[#allocation7 + $0x9f0] sm:$0xff] }
 0x354   :  { %3829 = vmatprep.subr.mxu0 %v6144_v3  ;;  %3926 = vmatprep.subr.mxu1 %v6144_v3 }
 0x355   :  { %3830 = vmatpush1.msra.mxu0 %v3780_v51  ;;  %3927 = vmatpush1.msra.mxu1 %v3877_v44  ;;  %v1240_v44 = vmax.f32 %v767_v45, 0.0 }
 0x356   :  { %3831 = vmatprep.subr.mxu0 %v6144_v3  ;;  %3928 = vmatprep.subr.mxu1 %v6144_v3 }
 0x357   :  { %3832 = vmatpush1.msra.mxu0 %v3779_v15  ;;  %3929 = vmatpush1.msra.mxu1 %v3876_v42  ;;  %v3981_v42 = vld [vmem:[#allocation7 + $0x9e8] sm:$0xff] }
 0x358   :  { %3833 = vmatprep.subr.mxu0 %v6144_v3  ;;  %3930 = vmatprep.subr.mxu1 %v6144_v3 }
 0x359   :  { %3834 = vmatpush1.msra.mxu0 %v3778_v2  ;;  %3931 = vmatpush1.msra.mxu1 %v3875_v43  ;;  %v4078_v43 = vld [vmem:[#allocation7 + $0xa98] sm:$0xff] }
 0x35a   :  { %3855 = vmatprep.subr.mxu0 %v6144_v3  ;;  %3952 = vmatprep.subr.mxu1 %v6144_v3 }
 0x35b   :  { %3856 = vmatpush2.msra.mxu0 %v3799_v18  ;;  %3953 = vmatpush2.msra.mxu1 %v3896_v36  ;;  %v3980_v36 = vld [vmem:[#allocation7 + $0x9e0] sm:$0xff] }
 0x35c   :  { %3857 = vmatprep.subr.mxu0 %v6144_v3  ;;  %3954 = vmatprep.subr.mxu1 %v6144_v3 }
 0x35d   :  { %3858 = vmatpush2.msra.mxu0 %v3798_v1  ;;  %3955 = vmatpush2.msra.mxu1 %v3895_v52  ;;  %v4077_v52 = vld [vmem:[#allocation7 + $0xa90] sm:$0xff] }
 0x35e   :  { %3859 = vmatprep.subr.mxu0 %v6144_v3  ;;  %3956 = vmatprep.subr.mxu1 %v6144_v3 }
 0x35f   :  { %3860 = vmatpush2.msra.mxu0 %v3797_v6  ;;  %3957 = vmatpush2.msra.mxu1 %v3894_v41 }
 0x360   :  { %3861 = vmatprep.subr.mxu0 %v6144_v3  ;;  %3958 = vmatprep.subr.mxu1 %v6144_v3  ;;  %v1324_v54 = vpop.permute.xlu0 %1323 }
 0x361   :  { %3862 = vmatpush2.msra.mxu0 %v3796_v22  ;;  %v7522_v46 = vpop.permute.xlu1 %1321  ;;  %3959 = vmatpush2.msra.mxu1 %v3893_v25  ;;  %v3979_v25 = vld [vmem:[#allocation7 + $0x9d8] sm:$0xff] }
 0x362   :  { %3863 = vmatprep.subr.mxu0 %v6144_v3  ;;  %3960 = vmatprep.subr.mxu1 %v6144_v3  ;;  %v7564_v50 = vsel %vm675_vm0, %v7522_v46, %v1324_v54  ;;  %v4076_v54 = vld [vmem:[#allocation7 + $0xa88] sm:$0xff] }
 0x363   :  { %3864 = vmatpush2.msra.mxu0 %v3795_v57  ;;  %3961 = vmatpush2.msra.mxu1 %v3892_v55  ;;  %v2345_v18 = vcombine.high %v7341_v13, %v7564_v50 }
 0x364   :  { %3865 = vmatprep.subr.mxu0 %v6144_v3  ;;  %3962 = vmatprep.subr.mxu1 %v6144_v3 }
 0x365   :  { %3866 = vmatpush2.msra.mxu0 %v3794_v14  ;;  %v3093_v30 = vpop.f32.mrf.mxu0  ;;  %3963 = vmatpush2.msra.mxu1 %v3891_v31  ;;  %v7531_v47 = vpop.permute.xlu0 %1437  ;;  %v7586_v31 = vrot.slane %v2345_v18, %v6762_v26 }
 0x366   :  { %3868 = vmatmul.mubr.f32.vlgmr.msra.gmra.mxu0 %v1796_v0  ;;  %v7533_v56 = vpop.permute.xlu1 %1435  ;;  %v3097_v48 = vadd.f32 %v3093_v30, %v7474_v59  ;;  %3965 = vmatmul.mubr.f32.vlgmr.msra.gmra.mxu1 %v1797_v53  ;;  %v3190_v7 = vpop.f32.mrf.mxu1  ;;  %v4083_v59 = vld [vmem:[#allocation7 + $0xac0] sm:$0xff]  ;;  %v3978_v30 = vld [vmem:[#allocation7 + $0x9d0] sm:$0xff] }
 0x367   :  { %3997 = vmatprep.subr.mxu0 %v6144_v3  ;;  %v3095_v4 = vpop.f32.mrf.mxu0  ;;  %4094 = vmatprep.subr.mxu1 %v6144_v3 }
 0x368   :  { %3998 = vmatpush1.msra.mxu0 %v3987_v63  ;;  %v7541_v0 = vadd.f32 %v3190_v7, %v3097_v48  ;;  %5895 = vmatprep.mubr.msk.f32.mxu0 %vm1515_vm6, %v2342_v29  ;;  %v3192_v10 = vpop.f32.mrf.mxu1  ;;  %v3984_v29 = vld [vmem:[#allocation7 + $0xa00] sm:$0xff] }
 0x369   :  { %4095 = vmatpush1.msra.mxu1 %v4084_v49  ;;  %5896 = vmatprep.mubr.msk.f32.mxu1 %vm1515_vm6, %v2343_v58  ;;  %v4080_v58 = vld [vmem:[#allocation7 + $0xaa8] sm:$0xff]  ;;  %v4075_v7 = vld [vmem:[#allocation7 + $0xa80] sm:$0xff] }
 0x36a   :  { %3999 = vmatprep.subr.mxu0 %v6144_v3  ;;  %4096 = vmatprep.subr.mxu1 %v6144_v3  ;;  %v7553_v53 = vpop.permute.xlu0 %1280 }
 0x36b   :  { %4000 = vmatpush1.msra.mxu0 %v3986_v5  ;;  %v1279_v34 = vpop.permute.xlu1 %1278  ;;  %4097 = vmatpush1.msra.mxu1 %v4083_v59  ;;  %v3977_v59 = vld [vmem:[#allocation7 + $0x9c8] sm:$0xff] }
 0x36c   :  { %4001 = vmatprep.subr.mxu0 %v6144_v3  ;;  %4098 = vmatprep.subr.mxu1 %v6144_v3  ;;  %v1289_v22 = vsel %vm1286_vm2, %v1279_v34, %v7553_v53 }
 0x36d   :  { %4002 = vmatpush1.msra.mxu0 %v3985_v37  ;;  %4099 = vmatpush1.msra.mxu1 %v4082_v27  ;;  %v4074_v37 = vld [vmem:[#allocation7 + $0xa78] sm:$0xff] }
 0x36e   :  { %4003 = vmatprep.subr.mxu0 %v6144_v3  ;;  %4100 = vmatprep.subr.mxu1 %v6144_v3 }
 0x36f   :  { %4004 = vmatpush1.msra.mxu0 %v3984_v29  ;;  %4101 = vmatpush1.msra.mxu1 %v4081_v23  ;;  %v1360_v11 = vpop.permute.xlu0 %1359 }
 0x370   :  { %4005 = vmatprep.subr.mxu0 %v6144_v3  ;;  %v1320_v51 = vpop.permute.xlu1 %1319  ;;  %4102 = vmatprep.subr.mxu1 %v6144_v3 }
 0x371   :  { %4006 = vmatpush1.msra.mxu0 %v3983_v20  ;;  %v1335_v15 = vsel %vm675_vm0, %v1320_v51, %v7522_v46  ;;  %4103 = vmatpush1.msra.mxu1 %v4080_v58  ;;  %v3975_v51 = vld [vmem:[#allocation7 + $0x9b8] sm:$0xff] }
 0x372   :  { %4007 = vmatprep.subr.mxu0 %v6144_v3  ;;  %v1801_v2 = vcombine.high %v1240_v44, %v1335_v15  ;;  %4104 = vmatprep.subr.mxu1 %v6144_v3  ;;  %v1800_v1 = vcombine.low %v1240_v44, %v1335_v15  ;;  %v4072_v44 = vld [vmem:[#allocation7 + $0xa68] sm:$0xff]  ;;  %v2344_v15 = vcombine.low %v7341_v13, %v7564_v50  ;;  %v4070_v13 = vld [vmem:[#allocation7 + $0xa58] sm:$0xff]  ;;  %v3972_v50 = vld [vmem:[#allocation7 + $0x9a0] sm:$0xff] }
 0x373   :  { %4008 = vmatpush1.msra.mxu0 %v3982_v62  ;;  %4105 = vmatpush1.msra.mxu1 %v4079_v9  ;;  %v3976_v62 = vld [vmem:[#allocation7 + $0x9c0] sm:$0xff]  ;;  %v3974_v9 = vld [vmem:[#allocation7 + $0x9b0] sm:$0xff] }
 0x374   :  { %4009 = vmatprep.subr.mxu0 %v6144_v3  ;;  %4106 = vmatprep.subr.mxu1 %v6144_v3  ;;  %v1393_v6 = vpop.permute.xlu0 %1392  ;;  %v7590_v63 = vrot.slane %v1800_v1, %v6762_v26  ;;  %v7597_v48 = vrot.slane %v1801_v2, %v6762_v26  ;;  %v3973_v1 = vld [vmem:[#allocation7 + $0x9a8] sm:$0xff] }
 0x375   :  { %4010 = vmatpush1.msra.mxu0 %v3981_v42  ;;  %v7575_v41 = vpop.permute.xlu1 %1361  ;;  %4107 = vmatpush1.msra.mxu1 %v4078_v43  ;;  %v4071_v43 = vld [vmem:[#allocation7 + $0xa60] sm:$0xff] }
 0x376   :  { %4011 = vmatprep.subr.mxu0 %v6144_v3  ;;  %v1370_v57 = vsel %vm1367_vm1, %v1360_v11, %v7575_v41  ;;  %v2361_v55 = vcombine.high %v7553_v53, %v7575_v41  ;;  %4108 = vmatprep.subr.mxu1 %v6144_v3  ;;  %v4073_v11 = vld [vmem:[#allocation7 + $0xa70] sm:$0xff]  ;;  %v2360_v42 = vcombine.low %v7553_v53, %v7575_v41 }
 0x377   :  { %4012 = vmatpush1.msra.mxu0 %v3980_v36  ;;  %v1816_v46 = vcombine.low %v1289_v22, %v1370_v57  ;;  %v1817_v14 = vcombine.high %v1289_v22, %v1370_v57  ;;  %4109 = vmatpush1.msra.mxu1 %v4077_v52  ;;  %v1451_v41 = vsel %vm1445_vm5, %v7533_v56, %v7531_v47 }
 0x378   :  { %4013 = vmatprep.subr.mxu0 %v6144_v3  ;;  %v7593_v49 = vrot.slane %v2361_v55, %v6762_v26  ;;  %4110 = vmatprep.subr.mxu1 %v6144_v3  ;;  %v4069_v55 = vld [vmem:[#allocation7 + $0xa50] sm:$0xff] }
 0x379   :  { %4014 = vmatpush1.msra.mxu0 %v3979_v25  ;;  %v7600_v4 = vrot.slane %v1816_v46, %v6762_v26  ;;  %v7603_v5 = vrot.slane %v1817_v14, %v6762_v26  ;;  %4111 = vmatpush1.msra.mxu1 %v4076_v54  ;;  %v7642_v54 = vrot.slane %v2360_v42, %v6762_v26 }
 0x37a   :  { %4015 = vmatprep.subr.mxu0 %v6144_v3  ;;  %v2424_v10 = vcombine.low %v7586_v31, %v7593_v49  ;;  %4112 = vmatprep.subr.mxu1 %v6144_v3  ;;  %v1434_v45 = vpop.permute.xlu0 %1433  ;;  %v2425_v58 = vcombine.high %v7586_v31, %v7593_v49  ;;  %v4179_v49 = vld [vmem:[#allocation7 + $0xb68] sm:$0xff] }
 0x37b   :  { %4016 = vmatpush1.msra.mxu0 %v3978_v30  ;;  %v1864_v27 = vcombine.low %v7590_v63, %v7600_v4  ;;  %v1865_v34 = vcombine.high %v7590_v63, %v7600_v4  ;;  %v1880_v29 = vcombine.low %v7597_v48, %v7603_v5  ;;  %v1395_v23 = vpop.permute.xlu1 %1394  ;;  %4113 = vmatpush1.msra.mxu1 %v4075_v7  ;;  %v3993_v30 = vld [vmem:[#allocation7 + $0xa48] sm:$0xff] }
 0x37c   :  { %4017 = vmatprep.subr.mxu0 %v6144_v3  ;;  %v1881_v20 = vcombine.high %v7597_v48, %v7603_v5  ;;  %4114 = vmatprep.subr.mxu1 %v6144_v3  ;;  %v1403_v2 = vsel %vm1400_vm4, %v1393_v6, %v1395_v23  ;;  %v7635_v6 = vrot.slane %v2344_v15, %v6762_v26  ;;  %v3992_v15 = vld [vmem:[#allocation7 + $0xa40] sm:$0xff] }
 0x37d   :  { %4018 = vmatpush1.msra.mxu0 %v3977_v59  ;;  %4115 = vmatpush1.msra.mxu1 %v4074_v37  ;;  %v1450_v46 = vsel %vm1445_vm5, %v1434_v45, %v7533_v56  ;;  %v4090_v59 = vld [vmem:[#allocation7 + $0xaf8] sm:$0xff]  ;;  %v7707_v63 = vrot.slane %v2424_v10, %v6789_v39  ;;  %v3989_v10 = vld [vmem:[#allocation7 + $0xa28] sm:$0xff] }
 0x37e   :  { %4019 = vmatprep.subr.mxu0 %v6144_v3  ;;  %4116 = vmatprep.subr.mxu1 %v6144_v3 }
 0x37f   :  { %4020 = vmatpush1.msra.mxu0 %v3976_v62  ;;  %4117 = vmatpush1.msra.mxu1 %v4073_v11 }
 0x380   :  { %4021 = vmatprep.subr.mxu0 %v6144_v3  ;;  %4118 = vmatprep.subr.mxu1 %v6144_v3  ;;  %v1477_v18 = vpop.permute.xlu0 %1476 }
 0x381   :  { %4022 = vmatpush1.msra.mxu0 %v3975_v51  ;;  %v1475_v36 = vpop.permute.xlu1 %1474  ;;  %4119 = vmatpush1.msra.mxu1 %v4072_v44  ;;  %v2376_v52 = vcombine.low %v1395_v23, %v1477_v18  ;;  %v2377_v22 = vcombine.high %v1395_v23, %v1477_v18 }
 0x382   :  { %4023 = vmatprep.subr.mxu0 %v6144_v3  ;;  %v1485_v25 = vsel %vm1482_vm3, %v1475_v36, %v1477_v18  ;;  %4120 = vmatprep.subr.mxu1 %v6144_v3  ;;  %v4089_v18 = vld [vmem:[#allocation7 + $0xaf0] sm:$0xff]  ;;  %v2408_v36 = vcombine.low %v7635_v6, %v7642_v54 }
 0x383   :  { %4024 = vmatpush1.msra.mxu0 %v3974_v9  ;;  %v1833_v53 = vcombine.high %v1403_v2, %v1485_v25  ;;  %4121 = vmatpush1.msra.mxu1 %v4071_v43  ;;  %v1832_v57 = vcombine.low %v1403_v2, %v1485_v25  ;;  %v7648_v14 = vrot.slane %v2376_v52, %v6762_v26 }
 0x384   :  { %4025 = vmatprep.subr.mxu0 %v6144_v3  ;;  %4122 = vmatprep.subr.mxu1 %v6144_v3  ;;  %v7653_v11 = vrot.slane %v2377_v22, %v6762_v26 }
 0x385   :  { %4026 = vmatpush1.msra.mxu0 %v3973_v1  ;;  %4123 = vmatpush1.msra.mxu1 %v4070_v13  ;;  %v1510_v7 = vpop.permute.xlu0 %1509  ;;  %v1840_v51 = vrot.slane %v1832_v57, %v6762_v26  ;;  %v1847_v42 = vrot.slane %v1833_v53, %v6762_v26  ;;  %v4088_v57 = vld [vmem:[#allocation7 + $0xae8] sm:$0xff] }
 0x386   :  { %4027 = vmatprep.subr.mxu0 %v6144_v3  ;;  %v1508_v47 = vpop.permute.xlu1 %1507  ;;  %4124 = vmatprep.subr.mxu1 %v6144_v3  ;;  %v2392_v37 = vcombine.low %v1451_v41, %v1510_v7  ;;  %v2393_v23 = vcombine.high %v1451_v41, %v1510_v7  ;;  %v3991_v41 = vld [vmem:[#allocation7 + $0xa38] sm:$0xff] }
 0x387   :  { %4028 = vmatpush1.msra.mxu0 %v3972_v50  ;;  %v1518_v62 = vsel %vm1515_vm6, %v1508_v47, %v1510_v7  ;;  %4125 = vmatpush1.msra.mxu1 %v4069_v55  ;;  %v7682_v55 = vrot.slane %v1864_v27, %v6789_v39  ;;  %v3990_v27 = vld [vmem:[#allocation7 + $0xa30] sm:$0xff] }
 0x388   :  { %4049 = vmatprep.subr.mxu0 %v6144_v3  ;;  %v1848_v56 = vcombine.low %v1450_v46, %v1518_v62  ;;  %v1849_v45 = vcombine.high %v1450_v46, %v1518_v62  ;;  %4146 = vmatprep.subr.mxu1 %v6144_v3  ;;  %v7659_v44 = vrot.slane %v2392_v37, %v6762_v26  ;;  %v4087_v37 = vld [vmem:[#allocation7 + $0xae0] sm:$0xff]  ;;  %v4086_v62 = vld [vmem:[#allocation7 + $0xad8] sm:$0xff] }
 0x389   :  { %4050 = vmatpush2.msra.mxu0 %v3993_v30  ;;  %v7662_v9 = vrot.slane %v2393_v23, %v6762_v26  ;;  %4147 = vmatpush2.msra.mxu1 %v4090_v59  ;;  %v7688_v46 = vrot.slane %v1865_v34, %v6789_v39  ;;  %v7716_v34 = vrot.slane %v1880_v29, %v6789_v39 }
 0x38a   :  { %4051 = vmatprep.subr.mxu0 %v6144_v3  ;;  %v1856_v2 = vrot.slane %v1848_v56, %v6762_v26  ;;  %v1863_v43 = vrot.slane %v1849_v45, %v6762_v26  ;;  %4148 = vmatprep.subr.mxu1 %v6144_v3  ;;  %v2440_v1 = vcombine.low %v7648_v14, %v7659_v44  ;;  %v3988_v45 = vld [vmem:[#allocation7 + $0xa20] sm:$0xff] }
 0x38b   :  { %v2456_v52 = vcombine.low %v7653_v11, %v7662_v9  ;;  %v2457_v22 = vcombine.high %v7653_v11, %v7662_v9  ;;  %4052 = vmatpush2.msra.mxu0 %v3992_v15  ;;  %4149 = vmatpush2.msra.mxu1 %v4089_v18  ;;  %v7722_v23 = vrot.slane %v1881_v20, %v6789_v39 }
 0x38c   :  { %v1896_v25 = vcombine.low %v1840_v51, %v1856_v2  ;;  %v1897_v13 = vcombine.high %v1840_v51, %v1856_v2  ;;  %v1912_v53 = vcombine.low %v1847_v42, %v1863_v43  ;;  %v1913_v50 = vcombine.high %v1847_v42, %v1863_v43  ;;  %4053 = vmatprep.subr.mxu0 %v6144_v3  ;;  %v4085_v51 = vld [vmem:[#allocation7 + $0xad0] sm:$0xff] }
 0x38d   :  { %v7691_v30 = vrot.slane %v2456_v52, %v6789_v39  ;;  %4150 = vmatprep.subr.mxu1 %v6144_v3  ;;  %4054 = vmatpush2.msra.mxu0 %v3991_v41  ;;  %v2448_v11 = vrot.slane %v2440_v1, %v6789_v39  ;;  %v2416_v2 = vrot.slane %v2408_v36, %v6789_v39 }
 0x38e   :  { %v7694_v7 = vrot.slane %v1896_v25, %v6789_v39  ;;  %v7697_v47 = vrot.slane %v1897_v13, %v6789_v39  ;;  %v7700_v59 = vrot.slane %v1912_v53, %v6789_v39  ;;  %v7710_v4 = vrot.slane %v1913_v50, %v6789_v39  ;;  %4151 = vmatpush2.msra.mxu1 %v4088_v57  ;;  %v4181_v13 = vld [vmem:[#allocation7 + $0xb78] sm:$0xff]  ;;  %v4278_v53 = vld [vmem:[#allocation7 + $0xc28] sm:$0xff] }
 0x38f   :  { %4055 = vmatprep.subr.mxu0 %v6144_v3  ;;  %4152 = vmatprep.subr.mxu1 %v6144_v3  ;;  %v2476_v20 = vcombine.low %v7707_v63, %v7691_v30  ;;  %v2477_v9 = vcombine.high %v7707_v63, %v7691_v30  ;;  %v2472_v50 = vcombine.low %v2416_v2, %v2448_v11  ;;  %v4565_v30 = vld [vmem:[#allocation7 + $0xe18] sm:$0xff]  ;;  %v4662_v63 = vld [vmem:[#allocation7 + $0xec8] sm:$0xff] }
 0x390   :  { %v1928_v56 = vcombine.low %v7682_v55, %v7694_v7  ;;  %v1929_v29 = vcombine.high %v7682_v55, %v7694_v7  ;;  %4056 = vmatpush2.msra.mxu0 %v3990_v27  ;;  %4153 = vmatpush2.msra.mxu1 %v4087_v37  ;;  %v1930_v48 = vcombine.low %v7688_v46, %v7697_v47  ;;  %v4373_v55 = vld [vmem:[#allocation7 + $0xcc8] sm:$0xff]  ;;  %v4470_v7 = vld [vmem:[#allocation7 + $0xd78] sm:$0xff] }
 0x391   :  { %v1931_v5 = vcombine.high %v7688_v46, %v7697_v47  ;;  %4057 = vmatprep.subr.mxu0 %v6144_v3  ;;  %4154 = vmatprep.subr.mxu1 %v6144_v3  ;;  %v1932_v15 = vcombine.low %v7716_v34, %v7700_v59  ;;  %v1933_v42 = vcombine.high %v7716_v34, %v7700_v59  ;;  %v4567_v46 = vld [vmem:[#allocation7 + $0xe28] sm:$0xff]  ;;  %v4664_v47 = vld [vmem:[#allocation7 + $0xed8] sm:$0xff]  ;;  %v4762_v34 = vld [vmem:[#allocation7 + $0xf90] sm:$0xff] }
 0x392   :  { %4058 = vmatpush2.msra.mxu0 %v3989_v10  ;;  %4155 = vmatpush2.msra.mxu1 %v4086_v62  ;;  %v1934_v18 = vcombine.low %v7722_v23, %v7710_v4  ;;  %v1935_v1 = vcombine.high %v7722_v23, %v7710_v4  ;;  %v7754_v41 = vrot.slane %v2457_v22, %v6789_v39  ;;  %v4955_v23 = vld [vmem:[#allocation7 + $0x10e8] sm:$0xff] }
 0x393   :  { %v3287_v43 = vpop.f32.mrf.mxu0  ;;  %4059 = vmatprep.subr.mxu0 %v6144_v3  ;;  %4156 = vmatprep.subr.mxu1 %v6144_v3  ;;  %v2473_v57 = vcombine.high %v2416_v2, %v2448_v11  ;;  %v7772_v22 = vrot.slane %v2425_v58, %v6789_v39  ;;  %v4276_v58 = vld [vmem:[#allocation7 + $0xc18] sm:$0xff] }
 0x394   :  { %v3291_v52 = vadd.f32 %v3287_v43, %v7541_v0  ;;  %v3384_v25 = vpop.f32.mrf.mxu1  ;;  %4060 = vmatpush2.msra.mxu0 %v3988_v45  ;;  %4157 = vmatpush2.msra.mxu1 %v4085_v51  ;;  %v7762_v0 = vpop.permute.xlu1 %672  ;;  %v4177_v45 = vld [vmem:[#allocation7 + $0xb58] sm:$0xff]  ;;  %v4274_v51 = vld [vmem:[#allocation7 + $0xc08] sm:$0xff] }
 0x395   :  { %v3289_v36 = vpop.f32.mrf.mxu0  ;;  %4062 = vmatmul.mubr.f32.vlgmr.msra.gmra.mxu0 %v1798_v17  ;;  %4159 = vmatmul.mubr.f32.vlgmr.msra.gmra.mxu1 %v1799_v19  ;;  %v7778_v17 = vadd.f32 %v6655_v38, %v7762_v0  ;;  %v864_v19 = vadd.f32 %v6695_v33, %v7762_v0  ;;  %v2478_v31 = vcombine.low %v7772_v22, %v7754_v41  ;;  %v4178_v38 = vld [vmem:[#allocation7 + $0xb60] sm:$0xff]  ;;  %v4275_v33 = vld [vmem:[#allocation7 + $0xc10] sm:$0xff] }
 0x396   :  { %v7764_v27 = vadd.f32 %v3384_v25, %v3291_v52  ;;  %v3386_v37 = vpop.f32.mrf.mxu1  ;;  %4191 = vmatprep.subr.mxu0 %v6144_v3  ;;  %4288 = vmatprep.subr.mxu1 %v6144_v3  ;;  %v2479_v10 = vcombine.high %v7772_v22, %v7754_v41  ;;  %v7797_v2 = vadd.f32 %v7375_v28, %v7762_v0  ;;  %v4176_v52 = vld [vmem:[#allocation7 + $0xb50] sm:$0xff]  ;;  %v4273_v25 = vld [vmem:[#allocation7 + $0xc00] sm:$0xff] }
 0x397   :  { %4192 = vmatpush1.msra.mxu0 %v4181_v13  ;;  %4289 = vmatpush1.msra.mxu1 %v4278_v53  ;;  %v1255_v62 = vmax.f32 %v7778_v17, 0.0  ;;  %v1254_v11 = vmax.f32 %v864_v19, 0.0  ;;  %v1042_v43 = vadd.f32 %v6728_v40, %v7762_v0  ;;  %v4175_v53 = vld [vmem:[#allocation7 + $0xb48] sm:$0xff]  ;;  %v862_v40 = vadd.f32 %v6688_v24, %v7762_v0  ;;  %v4271_v37 = vld [vmem:[#allocation7 + $0xbf0] sm:$0xff]  ;;  %v4269_v19 = vld [vmem:[#allocation7 + $0xbe0] sm:$0xff] }
 0x398   :  { %4193 = vmatprep.subr.mxu0 %v6144_v3  ;;  %5897 = vmatprep.mubr.msk.f32.mxu0 %vm1515_vm6, %v2472_v50  ;;  %v1259_v28 = vmax.f32 %v7797_v2, 0.0  ;;  %v4272_v50 = vld [vmem:[#allocation7 + $0xbf8] sm:$0xff]  ;;  %v775_v36 = vadd.f32 %v6659_v12, %v7762_v0  ;;  %v4172_v17 = vld [vmem:[#allocation7 + $0xb30] sm:$0xff] }
 0x399   :  { %4290 = vmatprep.subr.mxu1 %v6144_v3  ;;  %5898 = vmatprep.mubr.msk.f32.mxu1 %vm1515_vm6, %v2473_v57  ;;  %v1258_v13 = vmax.f32 %v1042_v43, 0.0  ;;  %v4174_v57 = vld [vmem:[#allocation7 + $0xb40] sm:$0xff]  ;;  %v1253_v24 = vmax.f32 %v862_v40, 0.0  ;;  %v4173_v12 = vld [vmem:[#allocation7 + $0xb38] sm:$0xff]  ;;  %v4266_v43 = vld [vmem:[#allocation7 + $0xbc8] sm:$0xff] }
 0x39a   :  { %4194 = vmatpush1.msra.mxu0 %v4180_v35  ;;  %4291 = vmatpush1.msra.mxu1 %v4277_v60  ;;  %v7818_v35 = vmax.f32 %v775_v36, 0.0  ;;  %v4270_v60 = vld [vmem:[#allocation7 + $0xbe8] sm:$0xff]  ;;  %v4263_v40 = vld [vmem:[#allocation7 + $0xbb0] sm:$0xff] }
 0x39b   :  { %4195 = vmatprep.subr.mxu0 %v6144_v3  ;;  %4292 = vmatprep.subr.mxu1 %v6144_v3  ;;  %v4184_v2 = vld [vmem:[#allocation7 + $0xb90] sm:$0xff] }
 0x39c   :  { %4196 = vmatpush1.msra.mxu0 %v4179_v49  ;;  %4293 = vmatpush1.msra.mxu1 %v4276_v58  ;;  %v4171_v49 = vld [vmem:[#allocation7 + $0xb28] sm:$0xff]  ;;  %v4268_v58 = vld [vmem:[#allocation7 + $0xbd8] sm:$0xff] }
 0x39d   :  { %4197 = vmatprep.subr.mxu0 %v6144_v3  ;;  %4294 = vmatprep.subr.mxu1 %v6144_v3 }
 0x39e   :  { %4198 = vmatpush1.msra.mxu0 %v4178_v38  ;;  %4295 = vmatpush1.msra.mxu1 %v4275_v33  ;;  %v953_v38 = vadd.f32 %v6661_v61, %v7762_v0  ;;  %v4170_v33 = vld [vmem:[#allocation7 + $0xb20] sm:$0xff]  ;;  %v1040_v61 = vadd.f32 %v6722_v16, %v7762_v0  ;;  %v1131_v16 = vadd.f32 %v7388_v8, %v7762_v0 }
 0x39f   :  { %4199 = vmatprep.subr.mxu0 %v6144_v3  ;;  %4296 = vmatprep.subr.mxu1 %v6144_v3  ;;  %v1215_v8 = vadd.f32 %v7369_v32, %v7762_v0  ;;  %v2441_v32 = vcombine.high %v7648_v14, %v7659_v44 }
 0x3a0   :  { %1329 = vrot.lane.b32.xlu1 %v1255_v62, %s6145_s1  ;;  %1327 = vrot.lane.b32.xlu0 %v1254_v11, %s6145_s1  ;;  %v4267_v11 = vld [vmem:[#allocation7 + $0xbd0] sm:$0xff]  ;;  %v1260_v36 = vmax.f32 %v1131_v16, 0.0  ;;  %v4371_v16 = vld [vmem:[#allocation7 + $0xcb8] sm:$0xff] }
 0x3a1   :  { %4200 = vmatpush1.msra.mxu0 %v4177_v45  ;;  %4297 = vmatpush1.msra.mxu1 %v4274_v51  ;;  %v1256_v45 = vmax.f32 %v953_v38, 0.0  ;;  %v4169_v51 = vld [vmem:[#allocation7 + $0xb18] sm:$0xff] }
 0x3a2   :  { %4201 = vmatprep.subr.mxu0 %v6144_v3  ;;  %4298 = vmatprep.subr.mxu1 %v6144_v3  ;;  %v4280_v38 = vld [vmem:[#allocation7 + $0xc38] sm:$0xff] }
 0x3a3   :  { %4202 = vmatpush1.msra.mxu0 %v4176_v52  ;;  %4299 = vmatpush1.msra.mxu1 %v4273_v25  ;;  %v4265_v52 = vld [vmem:[#allocation7 + $0xbc0] sm:$0xff]  ;;  %v1257_v25 = vmax.f32 %v1040_v61, 0.0 }
 0x3a4   :  { %4203 = vmatprep.subr.mxu0 %v6144_v3  ;;  %4300 = vmatprep.subr.mxu1 %v6144_v3 }
 0x3a5   :  { %1443 = vrot.lane.b32.xlu1 %v1259_v28, %s6149_s20  ;;  %1441 = vrot.lane.b32.xlu0 %v1258_v13, %s6149_s20  ;;  %v4167_v13 = vld [vmem:[#allocation7 + $0xb08] sm:$0xff] }
 0x3a6   :  { %4204 = vmatpush1.msra.mxu0 %v4175_v53  ;;  %4301 = vmatpush1.msra.mxu1 %v4272_v50  ;;  %v4264_v53 = vld [vmem:[#allocation7 + $0xbb8] sm:$0xff]  ;;  %v4166_v50 = vld [vmem:[#allocation7 + $0xb00] sm:$0xff] }
 0x3a7   :  { %4205 = vmatprep.subr.mxu0 %v6144_v3  ;;  %4302 = vmatprep.subr.mxu1 %v6144_v3 }
 0x3a8   :  { %4206 = vmatpush1.msra.mxu0 %v4174_v57  ;;  %4303 = vmatpush1.msra.mxu1 %v4271_v37  ;;  %v4187_v57 = vld [vmem:[#allocation7 + $0xba8] sm:$0xff]  ;;  %v4284_v37 = vld [vmem:[#allocation7 + $0xc58] sm:$0xff] }
 0x3a9   :  { %4207 = vmatprep.subr.mxu0 %v6144_v3  ;;  %4304 = vmatprep.subr.mxu1 %v6144_v3 }
 0x3aa   :  { %1284 = vrot.lane.b32.xlu1 %v1253_v24, %s6146_s2  ;;  %1282 = vrot.lane.b32.xlu0 %v7818_v35, %s6146_s2 }
 0x3ab   :  { %4208 = vmatpush1.msra.mxu0 %v4173_v12  ;;  %4305 = vmatpush1.msra.mxu1 %v4270_v60  ;;  %v4283_v12 = vld [vmem:[#allocation7 + $0xc50] sm:$0xff]  ;;  %v1261_v60 = vmax.f32 %v1215_v8, 0.0  ;;  %v4368_v8 = vld [vmem:[#allocation7 + $0xca0] sm:$0xff] }
 0x3ac   :  { %4209 = vmatprep.subr.mxu0 %v6144_v3  ;;  %4306 = vmatprep.subr.mxu1 %v6144_v3 }
 0x3ad   :  { %4210 = vmatpush1.msra.mxu0 %v4172_v17  ;;  %4307 = vmatpush1.msra.mxu1 %v4269_v19  ;;  %v4185_v17 = vld [vmem:[#allocation7 + $0xb98] sm:$0xff]  ;;  %v4282_v19 = vld [vmem:[#allocation7 + $0xc48] sm:$0xff] }
 0x3ae   :  { %4211 = vmatprep.subr.mxu0 %v6144_v3  ;;  %4308 = vmatprep.subr.mxu1 %v6144_v3 }
 0x3af   :  { %1363 = vrot.lane.b32.xlu1 %v1255_v62, %s6147_s18  ;;  %1325 = vrot.lane.b32.xlu0 %v1253_v24, %s6145_s1  ;;  %v4168_v62 = vld [vmem:[#allocation7 + $0xb10] sm:$0xff]  ;;  %v4186_v24 = vld [vmem:[#allocation7 + $0xba0] sm:$0xff] }
 0x3b0   :  { %4212 = vmatpush1.msra.mxu0 %v4171_v49  ;;  %4309 = vmatpush1.msra.mxu1 %v4268_v58  ;;  %v2409_v49 = vcombine.high %v7635_v6, %v7642_v54  ;;  %v4183_v58 = vld [vmem:[#allocation7 + $0xb88] sm:$0xff] }
 0x3b1   :  { %4213 = vmatprep.subr.mxu0 %v6144_v3  ;;  %4310 = vmatprep.subr.mxu1 %v6144_v3 }
 0x3b2   :  { %4214 = vmatpush1.msra.mxu0 %v4170_v33  ;;  %4311 = vmatpush1.msra.mxu1 %v4267_v11  ;;  %v4182_v33 = vld [vmem:[#allocation7 + $0xb80] sm:$0xff]  ;;  %v4279_v11 = vld [vmem:[#allocation7 + $0xc30] sm:$0xff] }
 0x3b3   :  { %4215 = vmatprep.subr.mxu0 %v6144_v3  ;;  %4312 = vmatprep.subr.mxu1 %v6144_v3 }
 0x3b4   :  { %1396 = vrot.lane.b32.xlu1 %v1256_v45, %s6148_s19  ;;  %1365 = vrot.lane.b32.xlu0 %v1256_v45, %s6147_s18  ;;  %v2455_v45 = vrot.slane %v2441_v32, %v6789_v39  ;;  %v4365_v32 = vld [vmem:[#allocation7 + $0xc88] sm:$0xff] }
 0x3b5   :  { %4216 = vmatpush1.msra.mxu0 %v4169_v51  ;;  %4313 = vmatpush1.msra.mxu1 %v4266_v43  ;;  %v2423_v43 = vrot.slane %v2409_v49, %v6789_v39  ;;  %v4461_v49 = vld [vmem:[#allocation7 + $0xd30] sm:$0xff] }
 0x3b6   :  { %4217 = vmatprep.subr.mxu0 %v6144_v3  ;;  %4314 = vmatprep.subr.mxu1 %v6144_v3 }
 0x3b7   :  { %4218 = vmatpush1.msra.mxu0 %v4168_v62  ;;  %4315 = vmatpush1.msra.mxu1 %v4265_v52  ;;  %v4375_v62 = vld [vmem:[#allocation7 + $0xcd8] sm:$0xff]  ;;  %v4472_v52 = vld [vmem:[#allocation7 + $0xd88] sm:$0xff] }
 0x3b8   :  { %4219 = vmatprep.subr.mxu0 %v6144_v3  ;;  %4316 = vmatprep.subr.mxu1 %v6144_v3 }
 0x3b9   :  { %1439 = vrot.lane.b32.xlu1 %v1257_v25, %s6149_s20  ;;  %1398 = vrot.lane.b32.xlu0 %v1257_v25, %s6148_s19  ;;  %v2475_v25 = vcombine.high %v2423_v43, %v2455_v45 }
 0x3ba   :  { %4220 = vmatpush1.msra.mxu0 %v4167_v13  ;;  %4317 = vmatpush1.msra.mxu1 %v4264_v53  ;;  %v4374_v13 = vld [vmem:[#allocation7 + $0xcd0] sm:$0xff]  ;;  %v4471_v53 = vld [vmem:[#allocation7 + $0xd80] sm:$0xff] }
 0x3bb   :  { %4221 = vmatprep.subr.mxu0 %v6144_v3  ;;  %4318 = vmatprep.subr.mxu1 %v6144_v3 }
 0x3bc   :  { %4222 = vmatpush1.msra.mxu0 %v4166_v50  ;;  %4319 = vmatpush1.msra.mxu1 %v4263_v40  ;;  %v4468_v50 = vld [vmem:[#allocation7 + $0xd68] sm:$0xff]  ;;  %v4370_v40 = vld [vmem:[#allocation7 + $0xcb0] sm:$0xff] }
 0x3bd   :  { %4243 = vmatprep.subr.mxu0 %v6144_v3  ;;  %4340 = vmatprep.subr.mxu1 %v6144_v3 }
 0x3be   :  { %1480 = vrot.lane.b32.xlu1 %v1260_v36, %s6150_s21  ;;  %1478 = vrot.lane.b32.xlu0 %v1259_v28, %s6150_s21  ;;  %v4281_v28 = vld [vmem:[#allocation7 + $0xc40] sm:$0xff] }
 0x3bf   :  { %4244 = vmatpush2.msra.mxu0 %v4187_v57  ;;  %4341 = vmatpush2.msra.mxu1 %v4284_v37  ;;  %v4369_v57 = vld [vmem:[#allocation7 + $0xca8] sm:$0xff]  ;;  %v4466_v37 = vld [vmem:[#allocation7 + $0xd58] sm:$0xff] }
 0x3c0   :  { %4245 = vmatprep.subr.mxu0 %v6144_v3  ;;  %4342 = vmatprep.subr.mxu1 %v6144_v3 }
 0x3c1   :  { %4246 = vmatpush2.msra.mxu0 %v4186_v24  ;;  %4343 = vmatpush2.msra.mxu1 %v4283_v12  ;;  %v4465_v24 = vld [vmem:[#allocation7 + $0xd50] sm:$0xff]  ;;  %v4367_v12 = vld [vmem:[#allocation7 + $0xc98] sm:$0xff] }
 0x3c2   :  { %4247 = vmatprep.subr.mxu0 %v6144_v3  ;;  %4344 = vmatprep.subr.mxu1 %v6144_v3 }
 0x3c3   :  { %1513 = vrot.lane.b32.xlu1 %v1261_v60, %s6151_s22  ;;  %1511 = vrot.lane.b32.xlu0 %v1260_v36, %s6151_s22  ;;  %v4467_v36 = vld [vmem:[#allocation7 + $0xd60] sm:$0xff]  ;;  %v4464_v60 = vld [vmem:[#allocation7 + $0xd48] sm:$0xff] }
 0x3c4   :  { %4248 = vmatpush2.msra.mxu0 %v4185_v17  ;;  %4345 = vmatpush2.msra.mxu1 %v4282_v19  ;;  %v4366_v17 = vld [vmem:[#allocation7 + $0xc90] sm:$0xff]  ;;  %v4463_v19 = vld [vmem:[#allocation7 + $0xd40] sm:$0xff] }
 0x3c5   :  { %4249 = vmatprep.subr.mxu0 %v6144_v3  ;;  %4346 = vmatprep.subr.mxu1 %v6144_v3 }
 0x3c6   :  { %4250 = vmatpush2.msra.mxu0 %v4184_v2  ;;  %4347 = vmatpush2.msra.mxu1 %v4281_v28  ;;  %v3481_v14 = vpop.f32.mrf.mxu0  ;;  %v4462_v2 = vld [vmem:[#allocation7 + $0xd38] sm:$0xff]  ;;  %v4364_v28 = vld [vmem:[#allocation7 + $0xc80] sm:$0xff] }
 0x3c7   :  { %v3578_v44 = vpop.f32.mrf.mxu1  ;;  %4251 = vmatprep.subr.mxu0 %v6144_v3  ;;  %4348 = vmatprep.subr.mxu1 %v6144_v3  ;;  %v3485_v6 = vadd.f32 %v3481_v14, %v7764_v27  ;;  %v2474_v27 = vcombine.low %v2423_v43, %v2455_v45  ;;  %v4362_v14 = vld [vmem:[#allocation7 + $0xc70] sm:$0xff]  ;;  %v4360_v45 = vld [vmem:[#allocation7 + $0xc60] sm:$0xff] }
 0x3c8   :  { %4252 = vmatpush2.msra.mxu0 %v4183_v58  ;;  %4349 = vmatpush2.msra.mxu1 %v4280_v38  ;;  %v3483_v54 = vpop.f32.mrf.mxu0  ;;  %v4363_v58 = vld [vmem:[#allocation7 + $0xc78] sm:$0xff]  ;;  %v4460_v38 = vld [vmem:[#allocation7 + $0xd28] sm:$0xff]  ;;  %v4380_v43 = vld [vmem:[#allocation7 + $0xd00] sm:$0xff] }
 0x3c9   :  { %v3580_v51 = vpop.f32.mrf.mxu1  ;;  %4253 = vmatprep.subr.mxu0 %v6144_v3  ;;  %4350 = vmatprep.subr.mxu1 %v6144_v3  ;;  %v7878_v61 = vadd.f32 %v3578_v44, %v3485_v6  ;;  %v4459_v44 = vld [vmem:[#allocation7 + $0xd20] sm:$0xff]  ;;  %v4457_v6 = vld [vmem:[#allocation7 + $0xd10] sm:$0xff]  ;;  %v4381_v54 = vld [vmem:[#allocation7 + $0xd08] sm:$0xff] }
 0x3ca   :  { %4254 = vmatpush2.msra.mxu0 %v4182_v33  ;;  %4351 = vmatpush2.msra.mxu1 %v4279_v11  ;;  %v4361_v33 = vld [vmem:[#allocation7 + $0xc68] sm:$0xff]  ;;  %v4458_v11 = vld [vmem:[#allocation7 + $0xd18] sm:$0xff] }
 0x3cb   :  { %4256 = vmatmul.mubr.f32.vlgmr.msra.gmra.mxu0 %v1928_v56  ;;  %4353 = vmatmul.mubr.f32.vlgmr.msra.gmra.mxu1 %v1929_v29  ;;  %v4372_v56 = vld [vmem:[#allocation7 + $0xcc0] sm:$0xff]  ;;  %v4469_v29 = vld [vmem:[#allocation7 + $0xd70] sm:$0xff]  ;;  %v4478_v51 = vld [vmem:[#allocation7 + $0xdb8] sm:$0xff] }
 0x3cc   :  { %4385 = vmatprep.subr.mxu0 %v6144_v3  ;;  %4482 = vmatprep.subr.mxu1 %v6144_v3 }
 0x3cd   :  { %4386 = vmatpush1.msra.mxu0 %v4375_v62  ;;  %5899 = vmatprep.mubr.msk.f32.mxu0 %vm1515_vm6, %v2474_v27  ;;  %v4477_v62 = vld [vmem:[#allocation7 + $0xdb0] sm:$0xff]  ;;  %v4379_v27 = vld [vmem:[#allocation7 + $0xcf8] sm:$0xff] }
 0x3ce   :  { %4483 = vmatpush1.msra.mxu1 %v4472_v52  ;;  %5900 = vmatprep.mubr.msk.f32.mxu1 %vm1515_vm6, %v2475_v25  ;;  %v4476_v52 = vld [vmem:[#allocation7 + $0xda8] sm:$0xff]  ;;  %v4378_v25 = vld [vmem:[#allocation7 + $0xcf0] sm:$0xff] }
 0x3cf   :  { %4387 = vmatprep.subr.mxu0 %v6144_v3  ;;  %4484 = vmatprep.subr.mxu1 %v6144_v3 }
 0x3d0   :  { %4388 = vmatpush1.msra.mxu0 %v4374_v13  ;;  %4485 = vmatpush1.msra.mxu1 %v4471_v53  ;;  %v4475_v13 = vld [vmem:[#allocation7 + $0xda0] sm:$0xff]  ;;  %v4377_v53 = vld [vmem:[#allocation7 + $0xce8] sm:$0xff] }
 0x3d1   :  { %4389 = vmatprep.subr.mxu0 %v6144_v3  ;;  %4486 = vmatprep.subr.mxu1 %v6144_v3 }
 0x3d2   :  { %4390 = vmatpush1.msra.mxu0 %v4373_v55  ;;  %4487 = vmatpush1.msra.mxu1 %v4470_v7  ;;  %v4474_v55 = vld [vmem:[#allocation7 + $0xd98] sm:$0xff]  ;;  %v4376_v7 = vld [vmem:[#allocation7 + $0xce0] sm:$0xff] }
 0x3d3   :  { %4391 = vmatprep.subr.mxu0 %v6144_v3  ;;  %4488 = vmatprep.subr.mxu1 %v6144_v3 }
 0x3d4   :  { %4392 = vmatpush1.msra.mxu0 %v4372_v56  ;;  %4489 = vmatpush1.msra.mxu1 %v4469_v29  ;;  %v4473_v56 = vld [vmem:[#allocation7 + $0xd90] sm:$0xff] }
 0x3d5   :  { %4393 = vmatprep.subr.mxu0 %v6144_v3  ;;  %4490 = vmatprep.subr.mxu1 %v6144_v3 }
 0x3d6   :  { %4394 = vmatpush1.msra.mxu0 %v4371_v16  ;;  %4491 = vmatpush1.msra.mxu1 %v4468_v50  ;;  %v4569_v16 = vld [vmem:[#allocation7 + $0xe38] sm:$0xff] }
 0x3d7   :  { %4395 = vmatprep.subr.mxu0 %v6144_v3  ;;  %4492 = vmatprep.subr.mxu1 %v6144_v3 }
 0x3d8   :  { %4396 = vmatpush1.msra.mxu0 %v4370_v40  ;;  %4493 = vmatpush1.msra.mxu1 %v4467_v36  ;;  %v4666_v36 = vld [vmem:[#allocation7 + $0xee8] sm:$0xff] }
 0x3d9   :  { %4397 = vmatprep.subr.mxu0 %v6144_v3  ;;  %4494 = vmatprep.subr.mxu1 %v6144_v3 }
 0x3da   :  { %4398 = vmatpush1.msra.mxu0 %v4369_v57  ;;  %4495 = vmatpush1.msra.mxu1 %v4466_v37 }
 0x3db   :  { %4399 = vmatprep.subr.mxu0 %v6144_v3  ;;  %4496 = vmatprep.subr.mxu1 %v6144_v3 }
 0x3dc   :  { %4400 = vmatpush1.msra.mxu0 %v4368_v8  ;;  %4497 = vmatpush1.msra.mxu1 %v4465_v24  ;;  %v4661_v24 = vld [vmem:[#allocation7 + $0xec0] sm:$0xff] }
 0x3dd   :  { %4401 = vmatprep.subr.mxu0 %v6144_v3  ;;  %4498 = vmatprep.subr.mxu1 %v6144_v3 }
 0x3de   :  { %4402 = vmatpush1.msra.mxu0 %v4367_v12  ;;  %4499 = vmatpush1.msra.mxu1 %v4464_v60  ;;  %v4563_v12 = vld [vmem:[#allocation7 + $0xe08] sm:$0xff]  ;;  %v4660_v60 = vld [vmem:[#allocation7 + $0xeb8] sm:$0xff] }
 0x3df   :  { %4403 = vmatprep.subr.mxu0 %v6144_v3  ;;  %4500 = vmatprep.subr.mxu1 %v6144_v3 }
 0x3e0   :  { %4404 = vmatpush1.msra.mxu0 %v4366_v17  ;;  %4501 = vmatpush1.msra.mxu1 %v4463_v19  ;;  %v4562_v17 = vld [vmem:[#allocation7 + $0xe00] sm:$0xff]  ;;  %v4659_v19 = vld [vmem:[#allocation7 + $0xeb0] sm:$0xff] }
 0x3e1   :  { %4405 = vmatprep.subr.mxu0 %v6144_v3  ;;  %4502 = vmatprep.subr.mxu1 %v6144_v3 }
 0x3e2   :  { %4406 = vmatpush1.msra.mxu0 %v4365_v32  ;;  %4503 = vmatpush1.msra.mxu1 %v4462_v2  ;;  %v4561_v32 = vld [vmem:[#allocation7 + $0xdf8] sm:$0xff]  ;;  %v4658_v2 = vld [vmem:[#allocation7 + $0xea8] sm:$0xff] }
 0x3e3   :  { %4407 = vmatprep.subr.mxu0 %v6144_v3  ;;  %4504 = vmatprep.subr.mxu1 %v6144_v3 }
 0x3e4   :  { %4408 = vmatpush1.msra.mxu0 %v4364_v28  ;;  %4505 = vmatpush1.msra.mxu1 %v4461_v49  ;;  %v4560_v28 = vld [vmem:[#allocation7 + $0xdf0] sm:$0xff]  ;;  %v4657_v49 = vld [vmem:[#allocation7 + $0xea0] sm:$0xff] }
 0x3e5   :  { %4409 = vmatprep.subr.mxu0 %v6144_v3  ;;  %4506 = vmatprep.subr.mxu1 %v6144_v3 }
 0x3e6   :  { %4410 = vmatpush1.msra.mxu0 %v4363_v58  ;;  %4507 = vmatpush1.msra.mxu1 %v4460_v38  ;;  %v4559_v58 = vld [vmem:[#allocation7 + $0xde8] sm:$0xff]  ;;  %v4656_v38 = vld [vmem:[#allocation7 + $0xe98] sm:$0xff] }
 0x3e7   :  { %4411 = vmatprep.subr.mxu0 %v6144_v3  ;;  %4508 = vmatprep.subr.mxu1 %v6144_v3 }
 0x3e8   :  { %4412 = vmatpush1.msra.mxu0 %v4362_v14  ;;  %4509 = vmatpush1.msra.mxu1 %v4459_v44  ;;  %v4558_v14 = vld [vmem:[#allocation7 + $0xde0] sm:$0xff]  ;;  %v4655_v44 = vld [vmem:[#allocation7 + $0xe90] sm:$0xff] }
 0x3e9   :  { %4413 = vmatprep.subr.mxu0 %v6144_v3  ;;  %4510 = vmatprep.subr.mxu1 %v6144_v3 }
 0x3ea   :  { %4414 = vmatpush1.msra.mxu0 %v4361_v33  ;;  %4511 = vmatpush1.msra.mxu1 %v4458_v11  ;;  %v4557_v33 = vld [vmem:[#allocation7 + $0xdd8] sm:$0xff]  ;;  %v4654_v11 = vld [vmem:[#allocation7 + $0xe88] sm:$0xff] }
 0x3eb   :  { %4415 = vmatprep.subr.mxu0 %v6144_v3  ;;  %4512 = vmatprep.subr.mxu1 %v6144_v3 }
 0x3ec   :  { %4416 = vmatpush1.msra.mxu0 %v4360_v45  ;;  %4513 = vmatpush1.msra.mxu1 %v4457_v6 }
 0x3ed   :  { %4437 = vmatprep.subr.mxu0 %v6144_v3  ;;  %4534 = vmatprep.subr.mxu1 %v6144_v3 }
 0x3ee   :  { %4438 = vmatpush2.msra.mxu0 %v4381_v54  ;;  %4535 = vmatpush2.msra.mxu1 %v4478_v51  ;;  %v4556_v54 = vld [vmem:[#allocation7 + $0xdd0] sm:$0xff]  ;;  %v4653_v51 = vld [vmem:[#allocation7 + $0xe80] sm:$0xff] }
 0x3ef   :  { %4439 = vmatprep.subr.mxu0 %v6144_v3  ;;  %4536 = vmatprep.subr.mxu1 %v6144_v3 }
 0x3f0   :  { %4440 = vmatpush2.msra.mxu0 %v4380_v43  ;;  %4537 = vmatpush2.msra.mxu1 %v4477_v62  ;;  %v4555_v43 = vld [vmem:[#allocation7 + $0xdc8] sm:$0xff]  ;;  %v4652_v62 = vld [vmem:[#allocation7 + $0xe78] sm:$0xff] }
 0x3f1   :  { %4441 = vmatprep.subr.mxu0 %v6144_v3  ;;  %4538 = vmatprep.subr.mxu1 %v6144_v3 }
 0x3f2   :  { %4442 = vmatpush2.msra.mxu0 %v4379_v27  ;;  %4539 = vmatpush2.msra.mxu1 %v4476_v52  ;;  %v4554_v27 = vld [vmem:[#allocation7 + $0xdc0] sm:$0xff]  ;;  %v4651_v52 = vld [vmem:[#allocation7 + $0xe70] sm:$0xff] }
 0x3f3   :  { %4443 = vmatprep.subr.mxu0 %v6144_v3  ;;  %4540 = vmatprep.subr.mxu1 %v6144_v3 }
 0x3f4   :  { %4444 = vmatpush2.msra.mxu0 %v4378_v25  ;;  %4541 = vmatpush2.msra.mxu1 %v4475_v13 }
 0x3f5   :  { %4445 = vmatprep.subr.mxu0 %v6144_v3  ;;  %4542 = vmatprep.subr.mxu1 %v6144_v3 }
 0x3f6   :  { %4446 = vmatpush2.msra.mxu0 %v4377_v53  ;;  %4543 = vmatpush2.msra.mxu1 %v4474_v55  ;;  %v4575_v53 = vld [vmem:[#allocation7 + $0xe68] sm:$0xff]  ;;  %v4672_v55 = vld [vmem:[#allocation7 + $0xf18] sm:$0xff] }
 0x3f7   :  { %4447 = vmatprep.subr.mxu0 %v6144_v3  ;;  %4544 = vmatprep.subr.mxu1 %v6144_v3 }
 0x3f8   :  { %v3675_v29 = vpop.f32.mrf.mxu0  ;;  %4448 = vmatpush2.msra.mxu0 %v4376_v7  ;;  %4545 = vmatpush2.msra.mxu1 %v4473_v56  ;;  %v3772_v40 = vpop.f32.mrf.mxu1  ;;  %v4574_v7 = vld [vmem:[#allocation7 + $0xe60] sm:$0xff]  ;;  %v4671_v56 = vld [vmem:[#allocation7 + $0xf10] sm:$0xff] }
 0x3f9   :  { %v3679_v50 = vadd.f32 %v3675_v29, %v7878_v61  ;;  %4450 = vmatmul.mubr.f32.vlgmr.msra.gmra.mxu0 %v1930_v48  ;;  %4547 = vmatmul.mubr.f32.vlgmr.msra.gmra.mxu1 %v1931_v5  ;;  %v4568_v48 = vld [vmem:[#allocation7 + $0xe30] sm:$0xff]  ;;  %v4665_v61 = vld [vmem:[#allocation7 + $0xee0] sm:$0xff] }
 0x3fa   :  { %v3677_v57 = vpop.f32.mrf.mxu0  ;;  %4579 = vmatprep.subr.mxu0 %v6144_v3  ;;  %4676 = vmatprep.subr.mxu1 %v6144_v3  ;;  %v3774_v8 = vpop.f32.mrf.mxu1  ;;  %v4566_v5 = vld [vmem:[#allocation7 + $0xe20] sm:$0xff] }
 0x3fb   :  { %v7941_v37 = vadd.f32 %v3772_v40, %v3679_v50  ;;  %4580 = vmatpush1.msra.mxu0 %v4569_v16  ;;  %5901 = vmatprep.mubr.msk.f32.mxu0 %vm1515_vm6, %v2476_v20  ;;  %v4663_v20 = vld [vmem:[#allocation7 + $0xed0] sm:$0xff]  ;;  %v4573_v50 = vld [vmem:[#allocation7 + $0xe58] sm:$0xff]  ;;  %v4670_v40 = vld [vmem:[#allocation7 + $0xf08] sm:$0xff] }
 0x3fc   :  { %4677 = vmatpush1.msra.mxu1 %v4666_v36  ;;  %5902 = vmatprep.mubr.msk.f32.mxu1 %vm1515_vm6, %v2477_v9  ;;  %v4564_v9 = vld [vmem:[#allocation7 + $0xe10] sm:$0xff]  ;;  %v7993_v36 = vadd.f32 %v6653_v21, %v7762_v0  ;;  %v4669_v8 = vld [vmem:[#allocation7 + $0xf00] sm:$0xff] }
 0x3fd   :  { %4581 = vmatprep.subr.mxu0 %v6144_v3  ;;  %4678 = vmatprep.subr.mxu1 %v6144_v3  ;;  %v4572_v57 = vld [vmem:[#allocation7 + $0xe50] sm:$0xff] }
 0x3fe   :  { %4582 = vmatpush1.msra.mxu0 %v4568_v48  ;;  %4679 = vmatpush1.msra.mxu1 %v4665_v61  ;;  %v4571_v48 = vld [vmem:[#allocation7 + $0xe48] sm:$0xff]  ;;  %v4668_v61 = vld [vmem:[#allocation7 + $0xef8] sm:$0xff]  ;;  %v1251_v21 = vmax.f32 %v7993_v36, 0.0  ;;  %v4962_v36 = vld [vmem:[#allocation7 + $0x1120] sm:$0xff] }
 0x3ff   :  { %4583 = vmatprep.subr.mxu0 %v6144_v3  ;;  %4680 = vmatprep.subr.mxu1 %v6144_v3 }
 0x400   :  { %4584 = vmatpush1.msra.mxu0 %v4567_v46  ;;  %4681 = vmatpush1.msra.mxu1 %v4664_v47 }
 0x401   :  { %4585 = vmatprep.subr.mxu0 %v6144_v3  ;;  %4682 = vmatprep.subr.mxu1 %v6144_v3 }
 0x402   :  { %4586 = vmatpush1.msra.mxu0 %v4566_v5  ;;  %4683 = vmatpush1.msra.mxu1 %v4663_v20  ;;  %v4570_v20 = vld [vmem:[#allocation7 + $0xe40] sm:$0xff] }
 0x403   :  { %4587 = vmatprep.subr.mxu0 %v6144_v3  ;;  %4684 = vmatprep.subr.mxu1 %v6144_v3 }
 0x404   :  { %4588 = vmatpush1.msra.mxu0 %v4565_v30  ;;  %4685 = vmatpush1.msra.mxu1 %v4662_v63  ;;  %v4667_v30 = vld [vmem:[#allocation7 + $0xef0] sm:$0xff] }
 0x405   :  { %4589 = vmatprep.subr.mxu0 %v6144_v3  ;;  %4686 = vmatprep.subr.mxu1 %v6144_v3 }
 0x406   :  { %4590 = vmatpush1.msra.mxu0 %v4564_v9  ;;  %4687 = vmatpush1.msra.mxu1 %v4661_v24 }
 0x407   :  { %4591 = vmatprep.subr.mxu0 %v6144_v3  ;;  %4688 = vmatprep.subr.mxu1 %v6144_v3 }
 0x408   :  { %4592 = vmatpush1.msra.mxu0 %v4563_v12  ;;  %4689 = vmatpush1.msra.mxu1 %v4660_v60  ;;  %v4763_v12 = vld [vmem:[#allocation7 + $0xf98] sm:$0xff] }
 0x409   :  { %4593 = vmatprep.subr.mxu0 %v6144_v3  ;;  %4690 = vmatprep.subr.mxu1 %v6144_v3 }
 0x40a   :  { %4594 = vmatpush1.msra.mxu0 %v4562_v17  ;;  %4691 = vmatpush1.msra.mxu1 %v4659_v19 }
 0x40b   :  { %4595 = vmatprep.subr.mxu0 %v6144_v3  ;;  %4692 = vmatprep.subr.mxu1 %v6144_v3 }
 0x40c   :  { %4596 = vmatpush1.msra.mxu0 %v4561_v32  ;;  %4693 = vmatpush1.msra.mxu1 %v4658_v2  ;;  %v4860_v2 = vld [vmem:[#allocation7 + $0x1048] sm:$0xff] }
 0x40d   :  { %4597 = vmatprep.subr.mxu0 %v6144_v3  ;;  %4694 = vmatprep.subr.mxu1 %v6144_v3 }
 0x40e   :  { %4598 = vmatpush1.msra.mxu0 %v4560_v28  ;;  %4695 = vmatpush1.msra.mxu1 %v4657_v49 }
 0x40f   :  { %4599 = vmatprep.subr.mxu0 %v6144_v3  ;;  %4696 = vmatprep.subr.mxu1 %v6144_v3 }
 0x410   :  { %4600 = vmatpush1.msra.mxu0 %v4559_v58  ;;  %4697 = vmatpush1.msra.mxu1 %v4656_v38 }
 0x411   :  { %4601 = vmatprep.subr.mxu0 %v6144_v3  ;;  %4698 = vmatprep.subr.mxu1 %v6144_v3 }
 0x412   :  { %4602 = vmatpush1.msra.mxu0 %v4558_v14  ;;  %4699 = vmatpush1.msra.mxu1 %v4655_v44  ;;  %v1330_v45 = vpop.permute.xlu1 %1329  ;;  %v1328_v6 = vpop.permute.xlu0 %1327 }
 0x413   :  { %4603 = vmatprep.subr.mxu0 %v6144_v3  ;;  %4700 = vmatprep.subr.mxu1 %v6144_v3  ;;  %v8001_v0 = vsel %vm675_vm0, %v1328_v6, %v1330_v45  ;;  %v4858_v45 = vld [vmem:[#allocation7 + $0x1038] sm:$0xff] }
 0x414   :  { %4604 = vmatpush1.msra.mxu0 %v4557_v33  ;;  %4701 = vmatpush1.msra.mxu1 %v4654_v11  ;;  %v2481_v9 = vcombine.high %v7818_v35, %v8001_v0 }
 0x415   :  { %4605 = vmatprep.subr.mxu0 %v6144_v3  ;;  %4702 = vmatprep.subr.mxu1 %v6144_v3 }
 0x416   :  { %4606 = vmatpush1.msra.mxu0 %v4556_v54  ;;  %4703 = vmatpush1.msra.mxu1 %v4653_v51  ;;  %v8041_v59 = vrot.slane %v2481_v9, %v6762_v26 }
 0x417   :  { %4607 = vmatprep.subr.mxu0 %v6144_v3  ;;  %4704 = vmatprep.subr.mxu1 %v6144_v3  ;;  %v7979_v25 = vpop.permute.xlu1 %1443  ;;  %v7981_v13 = vpop.permute.xlu0 %1441 }
 0x418   :  { %4608 = vmatpush1.msra.mxu0 %v4555_v43  ;;  %4705 = vmatpush1.msra.mxu1 %v4652_v62  ;;  %v4760_v43 = vld [vmem:[#allocation7 + $0xf80] sm:$0xff]  ;;  %v4857_v62 = vld [vmem:[#allocation7 + $0x1030] sm:$0xff] }
 0x419   :  { %4609 = vmatprep.subr.mxu0 %v6144_v3  ;;  %4706 = vmatprep.subr.mxu1 %v6144_v3 }
 0x41a   :  { %4610 = vmatpush1.msra.mxu0 %v4554_v27  ;;  %4707 = vmatpush1.msra.mxu1 %v4651_v52  ;;  %v4759_v27 = vld [vmem:[#allocation7 + $0xf78] sm:$0xff]  ;;  %v4856_v52 = vld [vmem:[#allocation7 + $0x1028] sm:$0xff] }
 0x41b   :  { %4631 = vmatprep.subr.mxu0 %v6144_v3  ;;  %4728 = vmatprep.subr.mxu1 %v6144_v3 }
 0x41c   :  { %4632 = vmatpush2.msra.mxu0 %v4575_v53  ;;  %4729 = vmatpush2.msra.mxu1 %v4672_v55  ;;  %v7987_v29 = vpop.permute.xlu1 %1284  ;;  %v1283_v16 = vpop.permute.xlu0 %1282 }
 0x41d   :  { %4633 = vmatprep.subr.mxu0 %v6144_v3  ;;  %4730 = vmatprep.subr.mxu1 %v6144_v3  ;;  %v8020_v32 = vsel %vm1286_vm2, %v1283_v16, %v7987_v29  ;;  %v4855_v16 = vld [vmem:[#allocation7 + $0x1020] sm:$0xff] }
 0x41e   :  { %4634 = vmatpush2.msra.mxu0 %v4574_v7  ;;  %4731 = vmatpush2.msra.mxu1 %v4671_v56  ;;  %v4758_v56 = vld [vmem:[#allocation7 + $0xf70] sm:$0xff] }
 0x41f   :  { %4635 = vmatprep.subr.mxu0 %v6144_v3  ;;  %4732 = vmatprep.subr.mxu1 %v6144_v3 }
 0x420   :  { %4636 = vmatpush2.msra.mxu0 %v4573_v50  ;;  %4733 = vmatpush2.msra.mxu1 %v4670_v40 }
 0x421   :  { %4637 = vmatprep.subr.mxu0 %v6144_v3  ;;  %4734 = vmatprep.subr.mxu1 %v6144_v3  ;;  %v1364_v46 = vpop.permute.xlu1 %1363  ;;  %v1326_v47 = vpop.permute.xlu0 %1325 }
 0x422   :  { %4638 = vmatpush2.msra.mxu0 %v4572_v57  ;;  %4735 = vmatpush2.msra.mxu1 %v4669_v8  ;;  %v8004_v5 = vsel %vm675_vm0, %v1326_v47, %v1328_v6  ;;  %v4757_v8 = vld [vmem:[#allocation7 + $0xf68] sm:$0xff]  ;;  %v4853_v47 = vld [vmem:[#allocation7 + $0x1010] sm:$0xff] }
 0x423   :  { %4639 = vmatprep.subr.mxu0 %v6144_v3  ;;  %4736 = vmatprep.subr.mxu1 %v6144_v3  ;;  %v1937_v63 = vcombine.high %v1251_v21, %v8004_v5 }
 0x424   :  { %4640 = vmatpush2.msra.mxu0 %v4571_v48  ;;  %4737 = vmatpush2.msra.mxu1 %v4668_v61  ;;  %v4854_v48 = vld [vmem:[#allocation7 + $0x1018] sm:$0xff]  ;;  %v8097_v61 = vsel %vm1445_vm5, %v7981_v13, %v7979_v25 }
 0x425   :  { %4641 = vmatprep.subr.mxu0 %v6144_v3  ;;  %4738 = vmatprep.subr.mxu1 %v6144_v3  ;;  %v8055_v33 = vrot.slane %v1937_v63, %v6762_v26 }
 0x426   :  { %v3869_v24 = vpop.f32.mrf.mxu0  ;;  %4642 = vmatpush2.msra.mxu0 %v4570_v20  ;;  %4739 = vmatpush2.msra.mxu1 %v4667_v30  ;;  %v1397_v60 = vpop.permute.xlu1 %1396 }
 0x427   :  { %v8015_v17 = vpop.permute.xlu0 %1365  ;;  %v3873_v19 = vadd.f32 %v3869_v24, %v7941_v37  ;;  %4644 = vmatmul.mubr.f32.vlgmr.msra.gmra.mxu0 %v1932_v15  ;;  %4741 = vmatmul.mubr.f32.vlgmr.msra.gmra.mxu1 %v1933_v42  ;;  %v3966_v49 = vpop.f32.mrf.mxu1  ;;  %v4859_v42 = vld [vmem:[#allocation7 + $0x1040] sm:$0xff]  ;;  %v4755_v24 = vld [vmem:[#allocation7 + $0xf58] sm:$0xff] }
 0x428   :  { %v8030_v28 = vsel %vm1367_vm1, %v1364_v46, %v8015_v17  ;;  %v2497_v37 = vcombine.high %v7987_v29, %v8015_v17  ;;  %v3871_v58 = vpop.f32.mrf.mxu0  ;;  %4773 = vmatprep.subr.mxu0 %v6144_v3  ;;  %4870 = vmatprep.subr.mxu1 %v6144_v3  ;;  %v4756_v46 = vld [vmem:[#allocation7 + $0xf60] sm:$0xff] }
 0x429   :  { %v1953_v15 = vcombine.high %v8020_v32, %v8030_v28  ;;  %v8038_v38 = vadd.f32 %v3966_v49, %v3873_v19  ;;  %4774 = vmatpush1.msra.mxu0 %v4763_v12  ;;  %5903 = vmatprep.mubr.msk.f32.mxu0 %vm1515_vm6, %v2478_v31  ;;  %v3968_v44 = vpop.f32.mrf.mxu1  ;;  %v4761_v31 = vld [vmem:[#allocation7 + $0xf88] sm:$0xff]  ;;  %v4851_v49 = vld [vmem:[#allocation7 + $0x1000] sm:$0xff] }
 0x42a   :  { %v8048_v14 = vrot.slane %v2497_v37, %v6762_v26  ;;  %4871 = vmatpush1.msra.mxu1 %v4860_v2  ;;  %5904 = vmatprep.mubr.msk.f32.mxu1 %vm1515_vm6, %v2479_v10  ;;  %v4852_v12 = vld [vmem:[#allocation7 + $0x1008] sm:$0xff]  ;;  %v4754_v37 = vld [vmem:[#allocation7 + $0xf50] sm:$0xff]  ;;  %v4850_v44 = vld [vmem:[#allocation7 + $0xff8] sm:$0xff] }
 0x42b   :  { %v8058_v11 = vrot.slane %v1953_v15, %v6762_v26  ;;  %4775 = vmatprep.subr.mxu0 %v6144_v3  ;;  %4872 = vmatprep.subr.mxu1 %v6144_v3  ;;  %v1440_v54 = vpop.permute.xlu1 %1439  ;;  %v8064_v51 = vpop.permute.xlu0 %1398 }
 0x42c   :  { %v2560_v6 = vcombine.low %v8041_v59, %v8048_v14  ;;  %4776 = vmatpush1.msra.mxu0 %v4762_v34  ;;  %4873 = vmatpush1.msra.mxu1 %v4859_v42  ;;  %v2561_v10 = vcombine.high %v8041_v59, %v8048_v14  ;;  %v8082_v7 = vsel %vm1400_vm4, %v1397_v60, %v8064_v51  ;;  %v4753_v42 = vld [vmem:[#allocation7 + $0xf48] sm:$0xff] }
 0x42d   :  { %v2016_v41 = vcombine.low %v8055_v33, %v8058_v11  ;;  %4777 = vmatprep.subr.mxu0 %v6144_v3  ;;  %4874 = vmatprep.subr.mxu1 %v6144_v3  ;;  %v2017_v22 = vcombine.high %v8055_v33, %v8058_v11  ;;  %v8105_v63 = vsel %vm1445_vm5, %v1440_v54, %v7981_v13  ;;  %v4752_v54 = vld [vmem:[#allocation7 + $0xf40] sm:$0xff] }
 0x42e   :  { %4778 = vmatpush1.msra.mxu0 %v4761_v31  ;;  %4875 = vmatpush1.msra.mxu1 %v4858_v45 }
 0x42f   :  { %4779 = vmatprep.subr.mxu0 %v6144_v3  ;;  %4876 = vmatprep.subr.mxu1 %v6144_v3 }
 0x430   :  { %4780 = vmatpush1.msra.mxu0 %v4760_v43  ;;  %4877 = vmatpush1.msra.mxu1 %v4857_v62  ;;  %v8076_v53 = vpop.permute.xlu1 %1480  ;;  %v1479_v55 = vpop.permute.xlu0 %1478  ;;  %v4849_v43 = vld [vmem:[#allocation7 + $0xff0] sm:$0xff] }
 0x431   :  { %4781 = vmatprep.subr.mxu0 %v6144_v3  ;;  %4878 = vmatprep.subr.mxu1 %v6144_v3  ;;  %v2513_v50 = vcombine.high %v8064_v51, %v8076_v53  ;;  %v8088_v40 = vsel %vm1482_vm3, %v1479_v55, %v8076_v53  ;;  %v4848_v55 = vld [vmem:[#allocation7 + $0xfe8] sm:$0xff] }
 0x432   :  { %4782 = vmatpush1.msra.mxu0 %v4759_v27  ;;  %4879 = vmatpush1.msra.mxu1 %v4856_v52  ;;  %v1969_v57 = vcombine.high %v8082_v7, %v8088_v40  ;;  %v4751_v52 = vld [vmem:[#allocation7 + $0xf38] sm:$0xff] }
 0x433   :  { %4783 = vmatprep.subr.mxu0 %v6144_v3  ;;  %4880 = vmatprep.subr.mxu1 %v6144_v3  ;;  %v2527_v13 = vrot.slane %v2513_v50, %v6762_v26  ;;  %v8151_v50 = vrot.slane %v2017_v22, %v6789_v39 }
 0x434   :  { %4784 = vmatpush1.msra.mxu0 %v4758_v56  ;;  %4881 = vmatpush1.msra.mxu1 %v4855_v16  ;;  %v1983_v58 = vrot.slane %v1969_v57, %v6762_v26  ;;  %v8139_v56 = vrot.slane %v2016_v41, %v6789_v39  ;;  %v8145_v16 = vrot.slane %v2560_v6, %v6789_v39  ;;  %v4750_v41 = vld [vmem:[#allocation7 + $0xf30] sm:$0xff]  ;;  %v4847_v57 = vld [vmem:[#allocation7 + $0xfe0] sm:$0xff] }
 0x435   :  { %4785 = vmatprep.subr.mxu0 %v6144_v3  ;;  %4882 = vmatprep.subr.mxu1 %v6144_v3  ;;  %v8101_v20 = vpop.permute.xlu1 %1513  ;;  %v1512_v30 = vpop.permute.xlu0 %1511  ;;  %v8164_v6 = vrot.slane %v2561_v10, %v6789_v39 }
 0x436   :  { %4786 = vmatpush1.msra.mxu0 %v4757_v8  ;;  %4883 = vmatpush1.msra.mxu1 %v4854_v48  ;;  %v2529_v9 = vcombine.high %v8097_v61, %v8101_v20  ;;  %v8111_v25 = vsel %vm1515_vm6, %v1512_v30, %v8101_v20 }
 0x437   :  { %4787 = vmatprep.subr.mxu0 %v6144_v3  ;;  %4884 = vmatprep.subr.mxu1 %v6144_v3  ;;  %v1985_v60 = vcombine.high %v8105_v63, %v8111_v25 }
 0x438   :  { %4788 = vmatpush1.msra.mxu0 %v4756_v46  ;;  %4885 = vmatpush1.msra.mxu1 %v4853_v47  ;;  %v2543_v19 = vrot.slane %v2529_v9, %v6762_v26  ;;  %v4749_v46 = vld [vmem:[#allocation7 + $0xf28] sm:$0xff]  ;;  %v4846_v47 = vld [vmem:[#allocation7 + $0xfd8] sm:$0xff] }
 0x439   :  { %4789 = vmatprep.subr.mxu0 %v6144_v3  ;;  %4886 = vmatprep.subr.mxu1 %v6144_v3  ;;  %v1999_v2 = vrot.slane %v1985_v60, %v6762_v26  ;;  %v4845_v60 = vld [vmem:[#allocation7 + $0xfd0] sm:$0xff] }
 0x43a   :  { %4790 = vmatpush1.msra.mxu0 %v4755_v24  ;;  %4887 = vmatpush1.msra.mxu1 %v4852_v12  ;;  %v2592_v15 = vcombine.low %v2527_v13, %v2543_v19  ;;  %v2593_v34 = vcombine.high %v2527_v13, %v2543_v19  ;;  %v2528_v24 = vcombine.low %v8097_v61, %v8101_v20  ;;  %v4748_v12 = vld [vmem:[#allocation7 + $0xf20] sm:$0xff]  ;;  %v4866_v61 = vld [vmem:[#allocation7 + $0x1078] sm:$0xff] }
 0x43b   :  { %4791 = vmatprep.subr.mxu0 %v6144_v3  ;;  %4888 = vmatprep.subr.mxu1 %v6144_v3  ;;  %v2048_v31 = vcombine.low %v1983_v58, %v1999_v2  ;;  %v2049_v45 = vcombine.high %v1983_v58, %v1999_v2  ;;  %v2496_v13 = vcombine.low %v7987_v29, %v8015_v17  ;;  %v4769_v2 = vld [vmem:[#allocation7 + $0xfc8] sm:$0xff]  ;;  %v4768_v29 = vld [vmem:[#allocation7 + $0xfc0] sm:$0xff]  ;;  %v4865_v17 = vld [vmem:[#allocation7 + $0x1070] sm:$0xff] }
 0x43c   :  { %4792 = vmatpush1.msra.mxu0 %v4754_v37  ;;  %4889 = vmatpush1.msra.mxu1 %v4851_v49  ;;  %v8156_v8 = vrot.slane %v2592_v15, %v6789_v39  ;;  %v8169_v11 = vrot.slane %v2593_v34, %v6789_v39  ;;  %v2512_v19 = vcombine.low %v8064_v51, %v8076_v53  ;;  %v4766_v15 = vld [vmem:[#allocation7 + $0xfb0] sm:$0xff]  ;;  %v4863_v34 = vld [vmem:[#allocation7 + $0x1060] sm:$0xff] }
 0x43d   :  { %4793 = vmatprep.subr.mxu0 %v6144_v3  ;;  %4890 = vmatprep.subr.mxu1 %v6144_v3  ;;  %v8128_v62 = vrot.slane %v2048_v31, %v6789_v39  ;;  %v8131_v27 = vrot.slane %v2049_v45, %v6789_v39  ;;  %v2480_v20 = vcombine.low %v7818_v35, %v8001_v0  ;;  %v4767_v35 = vld [vmem:[#allocation7 + $0xfb8] sm:$0xff]  ;;  %v4864_v0 = vld [vmem:[#allocation7 + $0x1068] sm:$0xff]  ;;  %v4764_v45 = vld [vmem:[#allocation7 + $0xfa0] sm:$0xff] }
 0x43e   :  { %4794 = vmatpush1.msra.mxu0 %v4753_v42  ;;  %4891 = vmatpush1.msra.mxu1 %v4850_v44  ;;  %v2612_v59 = vcombine.low %v8145_v16, %v8156_v8  ;;  %v2613_v14 = vcombine.high %v8145_v16, %v8156_v8  ;;  %v2614_v30 = vcombine.low %v8164_v6, %v8169_v11  ;;  %v4765_v44 = vld [vmem:[#allocation7 + $0xfa8] sm:$0xff]  ;;  %v4862_v31 = vld [vmem:[#allocation7 + $0x1058] sm:$0xff] }
 0x43f   :  { %4795 = vmatprep.subr.mxu0 %v6144_v3  ;;  %4892 = vmatprep.subr.mxu1 %v6144_v3  ;;  %v2068_v48 = vcombine.low %v8139_v56, %v8128_v62  ;;  %v2069_v33 = vcombine.high %v8139_v56, %v8128_v62  ;;  %v2070_v22 = vcombine.low %v8151_v50, %v8131_v27  ;;  %v5341_v16 = vld [vmem:[#allocation7 + $0x1398] sm:$0xff]  ;;  %v5438_v8 = vld [vmem:[#allocation7 + $0x1448] sm:$0xff] }
 0x440   :  { %4796 = vmatpush1.msra.mxu0 %v4752_v54  ;;  %4893 = vmatpush1.msra.mxu1 %v4849_v43  ;;  %v2071_v10 = vcombine.high %v8151_v50, %v8131_v27  ;;  %v2615_v9 = vcombine.high %v8164_v6, %v8169_v11  ;;  %v8198_v37 = vrot.slane %v2528_v24, %v6762_v26  ;;  %v4861_v54 = vld [vmem:[#allocation7 + $0x1050] sm:$0xff]  ;;  %v5537_v62 = vld [vmem:[#allocation7 + $0x1508] sm:$0xff]  ;;  %v5634_v56 = vld [vmem:[#allocation7 + $0x15b8] sm:$0xff] }
 0x441   :  { %4797 = vmatprep.subr.mxu0 %v6144_v3  ;;  %4894 = vmatprep.subr.mxu1 %v6144_v3  ;;  %v8203_v51 = vrot.slane %v2496_v13, %v6762_v26  ;;  %v8206_v53 = vrot.slane %v2512_v19, %v6762_v26  ;;  %v8211_v49 = vrot.slane %v2480_v20, %v6762_v26  ;;  %v5050_v20 = vld [vmem:[#allocation7 + $0x1188] sm:$0xff]  ;;  %v5535_v6 = vld [vmem:[#allocation7 + $0x14f8] sm:$0xff] }
 0x442   :  { %4798 = vmatpush1.msra.mxu0 %v4751_v52  ;;  %4895 = vmatpush1.msra.mxu1 %v4848_v55  ;;  %v4957_v55 = vld [vmem:[#allocation7 + $0x10f8] sm:$0xff]  ;;  %v5632_v11 = vld [vmem:[#allocation7 + $0x15a8] sm:$0xff] }
 0x443   :  { %4799 = vmatprep.subr.mxu0 %v6144_v3  ;;  %4896 = vmatprep.subr.mxu1 %v6144_v3  ;;  %v2576_v58 = vcombine.low %v8206_v53, %v8198_v37  ;;  %v2544_v42 = vcombine.low %v8211_v49, %v8203_v51  ;;  %v5736_v27 = vld [vmem:[%s8559_s7 + $0x50] sm:$0xff]  ;;  %v5735_v50 = vld [vmem:[%s8559_s7 + $0x48] sm:$0xff] }
 0x444   :  { %4800 = vmatpush1.msra.mxu0 %v4750_v41  ;;  %4897 = vmatpush1.msra.mxu1 %v4847_v57  ;;  %v5054_v57 = vld [vmem:[#allocation7 + $0x11a8] sm:$0xff] }
 0x445   :  { %4801 = vmatprep.subr.mxu0 %v6144_v3  ;;  %4898 = vmatprep.subr.mxu1 %v6144_v3  ;;  %v2584_v43 = vrot.slane %v2576_v58, %v6789_v39  ;;  %v2552_v52 = vrot.slane %v2544_v42, %v6789_v39  ;;  %v4950_v58 = vld [vmem:[#allocation7 + $0x10c0] sm:$0xff]  ;;  %v5046_v42 = vld [vmem:[#allocation7 + $0x1168] sm:$0xff] }
 0x446   :  { %4802 = vmatpush1.msra.mxu0 %v4749_v46  ;;  %4899 = vmatpush1.msra.mxu1 %v4846_v47 }
 0x447   :  { %4803 = vmatprep.subr.mxu0 %v6144_v3  ;;  %4900 = vmatprep.subr.mxu1 %v6144_v3  ;;  %v2608_v41 = vcombine.low %v2552_v52, %v2584_v43  ;;  %v2609_v24 = vcombine.high %v2552_v52, %v2584_v43  ;;  %v4946_v43 = vld [vmem:[#allocation7 + $0x10a0] sm:$0xff]  ;;  %v5043_v52 = vld [vmem:[#allocation7 + $0x1150] sm:$0xff] }
 0x448   :  { %4804 = vmatpush1.msra.mxu0 %v4748_v12  ;;  %4901 = vmatpush1.msra.mxu1 %v4845_v60  ;;  %v4956_v60 = vld [vmem:[#allocation7 + $0x10f0] sm:$0xff] }
 0x449   :  { %4825 = vmatprep.subr.mxu0 %v6144_v3  ;;  %4922 = vmatprep.subr.mxu1 %v6144_v3 }
 0x44a   :  { %4826 = vmatpush2.msra.mxu0 %v4769_v2  ;;  %4923 = vmatpush2.msra.mxu1 %v4866_v61  ;;  %v5051_v2 = vld [vmem:[#allocation7 + $0x1190] sm:$0xff]  ;;  %v4953_v61 = vld [vmem:[#allocation7 + $0x10d8] sm:$0xff] }
 0x44b   :  { %4827 = vmatprep.subr.mxu0 %v6144_v3  ;;  %4924 = vmatprep.subr.mxu1 %v6144_v3 }
 0x44c   :  { %4828 = vmatpush2.msra.mxu0 %v4768_v29  ;;  %4925 = vmatpush2.msra.mxu1 %v4865_v17  ;;  %v4952_v29 = vld [vmem:[#allocation7 + $0x10d0] sm:$0xff]  ;;  %v5049_v17 = vld [vmem:[#allocation7 + $0x1180] sm:$0xff] }
 0x44d   :  { %4829 = vmatprep.subr.mxu0 %v6144_v3  ;;  %4926 = vmatprep.subr.mxu1 %v6144_v3 }
 0x44e   :  { %4830 = vmatpush2.msra.mxu0 %v4767_v35  ;;  %4927 = vmatpush2.msra.mxu1 %v4864_v0  ;;  %v4951_v35 = vld [vmem:[#allocation7 + $0x10c8] sm:$0xff]  ;;  %v5048_v0 = vld [vmem:[#allocation7 + $0x1178] sm:$0xff] }
 0x44f   :  { %4831 = vmatprep.subr.mxu0 %v6144_v3  ;;  %4928 = vmatprep.subr.mxu1 %v6144_v3 }
 0x450   :  { %4832 = vmatpush2.msra.mxu0 %v4766_v15  ;;  %4929 = vmatpush2.msra.mxu1 %v4863_v34  ;;  %v5047_v15 = vld [vmem:[#allocation7 + $0x1170] sm:$0xff]  ;;  %v4949_v34 = vld [vmem:[#allocation7 + $0x10b8] sm:$0xff] }
 0x451   :  { %4833 = vmatprep.subr.mxu0 %v6144_v3  ;;  %4930 = vmatprep.subr.mxu1 %v6144_v3 }
 0x452   :  { %4834 = vmatpush2.msra.mxu0 %v4765_v44  ;;  %4931 = vmatpush2.msra.mxu1 %v4862_v31  ;;  %v4948_v44 = vld [vmem:[#allocation7 + $0x10b0] sm:$0xff]  ;;  %v5045_v31 = vld [vmem:[#allocation7 + $0x1160] sm:$0xff] }
 0x453   :  { %4835 = vmatprep.subr.mxu0 %v6144_v3  ;;  %4932 = vmatprep.subr.mxu1 %v6144_v3 }
 0x454   :  { %4836 = vmatpush2.msra.mxu0 %v4764_v45  ;;  %4933 = vmatpush2.msra.mxu1 %v4861_v54  ;;  %v4947_v45 = vld [vmem:[#allocation7 + $0x10a8] sm:$0xff]  ;;  %v5044_v54 = vld [vmem:[#allocation7 + $0x1158] sm:$0xff] }
 0x455   :  { %4838 = vmatmul.mubr.f32.vlgmr.msra.gmra.mxu0 %v1934_v18  ;;  %4935 = vmatmul.mubr.f32.vlgmr.msra.gmra.mxu1 %v1935_v1  ;;  %v4063_v46 = vpop.f32.mrf.mxu0  ;;  %v4160_v47 = vpop.f32.mrf.mxu1  ;;  %v5053_v18 = vld [vmem:[#allocation7 + $0x11a0] sm:$0xff]  ;;  %v5052_v1 = vld [vmem:[#allocation7 + $0x1198] sm:$0xff] }
 0x456   :  { %4967 = vmatprep.subr.mxu0 %v6144_v3  ;;  %5064 = vmatprep.subr.mxu1 %v6144_v3  ;;  %v4067_v12 = vadd.f32 %v4063_v46, %v8038_v38  ;;  %v4954_v38 = vld [vmem:[#allocation7 + $0x10e0] sm:$0xff] }
 0x457   :  { %4968 = vmatpush1.msra.mxu0 %v4957_v55  ;;  %5905 = vmatprep.mubr.msk.f32.mxu0 %vm1515_vm6, %v2608_v41  ;;  %v4065_v13 = vpop.f32.mrf.mxu0  ;;  %v4162_v19 = vpop.f32.mrf.mxu1  ;;  %v4945_v55 = vld [vmem:[#allocation7 + $0x1098] sm:$0xff]  ;;  %v5042_v41 = vld [vmem:[#allocation7 + $0x1148] sm:$0xff]  ;;  %v5041_v46 = vld [vmem:[#allocation7 + $0x1140] sm:$0xff] }
 0x458   :  { %5065 = vmatpush1.msra.mxu1 %v5054_v57  ;;  %5906 = vmatprep.mubr.msk.f32.mxu1 %vm1515_vm6, %v2609_v24  ;;  %v8238_v4 = vadd.f32 %v4160_v47, %v4067_v12  ;;  %v4944_v57 = vld [vmem:[#allocation7 + $0x1090] sm:$0xff]  ;;  %v1984_v47 = vcombine.low %v8105_v63, %v8111_v25  ;;  %v4943_v24 = vld [vmem:[#allocation7 + $0x1088] sm:$0xff]  ;;  %v5040_v12 = vld [vmem:[#allocation7 + $0x1138] sm:$0xff]  ;;  %v1936_v25 = vcombine.low %v1251_v21, %v8004_v5 }
 0x459   :  { %4969 = vmatprep.subr.mxu0 %v6144_v3  ;;  %5066 = vmatprep.subr.mxu1 %v6144_v3  ;;  %v4942_v13 = vld [vmem:[#allocation7 + $0x1080] sm:$0xff]  ;;  %v5039_v63 = vld [vmem:[#allocation7 + $0x1130] sm:$0xff] }
 0x45a   :  { %4970 = vmatpush1.msra.mxu0 %v4956_v60  ;;  %5067 = vmatpush1.msra.mxu1 %v5053_v18  ;;  %v1952_v60 = vcombine.low %v8020_v32, %v8030_v28  ;;  %v1968_v18 = vcombine.low %v8082_v7, %v8088_v40  ;;  %v8278_v19 = vrot.slane %v1984_v47, %v6762_v26  ;;  %v4963_v32 = vld [vmem:[#allocation7 + $0x1128] sm:$0xff]  ;;  %v5060_v28 = vld [vmem:[#allocation7 + $0x11d8] sm:$0xff]  ;;  %v5059_v21 = vld [vmem:[#allocation7 + $0x11d0] sm:$0xff] }
 0x45b   :  { %4971 = vmatprep.subr.mxu0 %v6144_v3  ;;  %5068 = vmatprep.subr.mxu1 %v6144_v3  ;;  %v8291_v5 = vrot.slane %v1936_v25, %v6762_v26  ;;  %v5244_v47 = vld [vmem:[#allocation7 + $0x12e8] sm:$0xff] }
 0x45c   :  { %4972 = vmatpush1.msra.mxu0 %v4955_v23  ;;  %5069 = vmatpush1.msra.mxu1 %v5052_v1  ;;  %v8283_v7 = vrot.slane %v1952_v60, %v6762_v26  ;;  %v8286_v40 = vrot.slane %v1968_v18, %v6762_v26  ;;  %v4961_v1 = vld [vmem:[#allocation7 + $0x1118] sm:$0xff]  ;;  %v4960_v26 = vld [vmem:[#allocation7 + $0x1110] sm:$0xff] }
 0x45d   :  { %4973 = vmatprep.subr.mxu0 %v6144_v3  ;;  %5070 = vmatprep.subr.mxu1 %v6144_v3  ;;  %v5146_v18 = vld [vmem:[#allocation7 + $0x1230] sm:$0xff] }
 0x45e   :  { %4974 = vmatpush1.msra.mxu0 %v4954_v38  ;;  %5071 = vmatpush1.msra.mxu1 %v5051_v2  ;;  %v2032_v23 = vcombine.low %v8286_v40, %v8278_v19  ;;  %v5058_v38 = vld [vmem:[#allocation7 + $0x11c8] sm:$0xff]  ;;  %v2000_v2 = vcombine.low %v8291_v5, %v8283_v7 }
 0x45f   :  { %4975 = vmatprep.subr.mxu0 %v6144_v3  ;;  %5072 = vmatprep.subr.mxu1 %v6144_v3 }
 0x460   :  { %4976 = vmatpush1.msra.mxu0 %v4953_v61  ;;  %5073 = vmatpush1.msra.mxu1 %v5050_v20  ;;  %v2577_v61 = vcombine.high %v8206_v53, %v8198_v37  ;;  %v5057_v20 = vld [vmem:[#allocation7 + $0x11c0] sm:$0xff]  ;;  %v5055_v53 = vld [vmem:[#allocation7 + $0x11b0] sm:$0xff] }
 0x461   :  { %4977 = vmatprep.subr.mxu0 %v6144_v3  ;;  %5074 = vmatprep.subr.mxu1 %v6144_v3  ;;  %v4958_v37 = vld [vmem:[#allocation7 + $0x1100] sm:$0xff] }
 0x462   :  { %4978 = vmatpush1.msra.mxu0 %v4952_v29  ;;  %5075 = vmatpush1.msra.mxu1 %v5049_v17  ;;  %v2545_v29 = vcombine.high %v8211_v49, %v8203_v51  ;;  %v2040_v17 = vrot.slane %v2032_v23, %v6789_v39  ;;  %v2591_v51 = vrot.slane %v2577_v61, %v6789_v39  ;;  %v5143_v23 = vld [vmem:[#allocation7 + $0x1218] sm:$0xff]  ;;  %v5141_v61 = vld [vmem:[#allocation7 + $0x1208] sm:$0xff] }
 0x463   :  { %4979 = vmatprep.subr.mxu0 %v6144_v3  ;;  %5076 = vmatprep.subr.mxu1 %v6144_v3 }
 0x464   :  { %4980 = vmatpush1.msra.mxu0 %v4951_v35  ;;  %5077 = vmatpush1.msra.mxu1 %v5048_v0  ;;  %v4959_v35 = vld [vmem:[#allocation7 + $0x1108] sm:$0xff]  ;;  %v5056_v0 = vld [vmem:[#allocation7 + $0x11b8] sm:$0xff] }
 0x465   :  { %4981 = vmatprep.subr.mxu0 %v6144_v3  ;;  %5078 = vmatprep.subr.mxu1 %v6144_v3 }
 0x466   :  { %4982 = vmatpush1.msra.mxu0 %v4950_v58  ;;  %5079 = vmatpush1.msra.mxu1 %v5047_v15  ;;  %v2008_v58 = vrot.slane %v2000_v2, %v6789_v39  ;;  %v5239_v2 = vld [vmem:[#allocation7 + $0x12c0] sm:$0xff] }
 0x467   :  { %4983 = vmatprep.subr.mxu0 %v6144_v3  ;;  %5080 = vmatprep.subr.mxu1 %v6144_v3 }
 0x468   :  { %4984 = vmatpush1.msra.mxu0 %v4949_v34  ;;  %5081 = vmatpush1.msra.mxu1 %v5046_v42  ;;  %v2064_v49 = vcombine.low %v2008_v58, %v2040_v17  ;;  %v2065_v15 = vcombine.high %v2008_v58, %v2040_v17  ;;  %v2559_v34 = vrot.slane %v2545_v29, %v6789_v39  ;;  %v5151_v42 = vld [vmem:[#allocation7 + $0x1258] sm:$0xff]  ;;  %v5237_v29 = vld [vmem:[#allocation7 + $0x12b0] sm:$0xff] }
 0x469   :  { %4985 = vmatprep.subr.mxu0 %v6144_v3  ;;  %5082 = vmatprep.subr.mxu1 %v6144_v3  ;;  %v5139_v17 = vld [vmem:[#allocation7 + $0x11f8] sm:$0xff] }
 0x46a   :  { %4986 = vmatpush1.msra.mxu0 %v4948_v44  ;;  %5083 = vmatpush1.msra.mxu1 %v5045_v31  ;;  %v2610_v44 = vcombine.low %v2559_v34, %v2591_v51  ;;  %v5248_v31 = vld [vmem:[#allocation7 + $0x1308] sm:$0xff]  ;;  %v5234_v58 = vld [vmem:[#allocation7 + $0x1298] sm:$0xff] }
 0x46b   :  { %4987 = vmatprep.subr.mxu0 %v6144_v3  ;;  %5084 = vmatprep.subr.mxu1 %v6144_v3 }
 0x46c   :  { %4988 = vmatpush1.msra.mxu0 %v4947_v45  ;;  %5085 = vmatpush1.msra.mxu1 %v5044_v54  ;;  %v2611_v45 = vcombine.high %v2559_v34, %v2591_v51  ;;  %v5150_v54 = vld [vmem:[#allocation7 + $0x1250] sm:$0xff]  ;;  %v5136_v51 = vld [vmem:[#allocation7 + $0x11e0] sm:$0xff]  ;;  %v5254_v34 = vld [vmem:[#allocation7 + $0x1338] sm:$0xff] }
 0x46d   :  { %4989 = vmatprep.subr.mxu0 %v6144_v3  ;;  %5086 = vmatprep.subr.mxu1 %v6144_v3 }
 0x46e   :  { %4990 = vmatpush1.msra.mxu0 %v4946_v43  ;;  %5087 = vmatpush1.msra.mxu1 %v5043_v52  ;;  %v5247_v43 = vld [vmem:[#allocation7 + $0x1300] sm:$0xff]  ;;  %v5149_v52 = vld [vmem:[#allocation7 + $0x1248] sm:$0xff] }
 0x46f   :  { %4991 = vmatprep.subr.mxu0 %v6144_v3  ;;  %5088 = vmatprep.subr.mxu1 %v6144_v3 }
 0x470   :  { %4992 = vmatpush1.msra.mxu0 %v4945_v55  ;;  %5089 = vmatpush1.msra.mxu1 %v5042_v41  ;;  %v5246_v55 = vld [vmem:[#allocation7 + $0x12f8] sm:$0xff]  ;;  %v5148_v41 = vld [vmem:[#allocation7 + $0x1240] sm:$0xff] }
 0x471   :  { %4993 = vmatprep.subr.mxu0 %v6144_v3  ;;  %5090 = vmatprep.subr.mxu1 %v6144_v3 }
 0x472   :  { %4994 = vmatpush1.msra.mxu0 %v4944_v57  ;;  %5091 = vmatpush1.msra.mxu1 %v5041_v46  ;;  %v5245_v57 = vld [vmem:[#allocation7 + $0x12f0] sm:$0xff]  ;;  %v5147_v46 = vld [vmem:[#allocation7 + $0x1238] sm:$0xff] }
 0x473   :  { %4995 = vmatprep.subr.mxu0 %v6144_v3  ;;  %5092 = vmatprep.subr.mxu1 %v6144_v3 }
 0x474   :  { %4996 = vmatpush1.msra.mxu0 %v4943_v24  ;;  %5093 = vmatpush1.msra.mxu1 %v5040_v12 }
 0x475   :  { %4997 = vmatprep.subr.mxu0 %v6144_v3  ;;  %5094 = vmatprep.subr.mxu1 %v6144_v3 }
 0x476   :  { %4998 = vmatpush1.msra.mxu0 %v4942_v13  ;;  %5095 = vmatpush1.msra.mxu1 %v5039_v63  ;;  %v5243_v13 = vld [vmem:[#allocation7 + $0x12e0] sm:$0xff] }
 0x477   :  { %5019 = vmatprep.subr.mxu0 %v6144_v3  ;;  %5116 = vmatprep.subr.mxu1 %v6144_v3 }
 0x478   :  { %5020 = vmatpush2.msra.mxu0 %v4963_v32  ;;  %5117 = vmatpush2.msra.mxu1 %v5060_v28  ;;  %v5145_v28 = vld [vmem:[#allocation7 + $0x1228] sm:$0xff] }
 0x479   :  { %5021 = vmatprep.subr.mxu0 %v6144_v3  ;;  %5118 = vmatprep.subr.mxu1 %v6144_v3 }
 0x47a   :  { %5022 = vmatpush2.msra.mxu0 %v4962_v36  ;;  %5119 = vmatpush2.msra.mxu1 %v5059_v21  ;;  %v5242_v36 = vld [vmem:[#allocation7 + $0x12d8] sm:$0xff]  ;;  %v5241_v21 = vld [vmem:[#allocation7 + $0x12d0] sm:$0xff] }
 0x47b   :  { %5023 = vmatprep.subr.mxu0 %v6144_v3  ;;  %5120 = vmatprep.subr.mxu1 %v6144_v3 }
 0x47c   :  { %5024 = vmatpush2.msra.mxu0 %v4961_v1  ;;  %5121 = vmatpush2.msra.mxu1 %v5058_v38  ;;  %v5240_v1 = vld [vmem:[#allocation7 + $0x12c8] sm:$0xff]  ;;  %v5142_v38 = vld [vmem:[#allocation7 + $0x1210] sm:$0xff] }
 0x47d   :  { %5025 = vmatprep.subr.mxu0 %v6144_v3  ;;  %5122 = vmatprep.subr.mxu1 %v6144_v3 }
 0x47e   :  { %5026 = vmatpush2.msra.mxu0 %v4960_v26  ;;  %5123 = vmatpush2.msra.mxu1 %v5057_v20  ;;  %v5238_v26 = vld [vmem:[#allocation7 + $0x12b8] sm:$0xff]  ;;  %v5140_v20 = vld [vmem:[#allocation7 + $0x1200] sm:$0xff] }
 0x47f   :  { %5027 = vmatprep.subr.mxu0 %v6144_v3  ;;  %5124 = vmatprep.subr.mxu1 %v6144_v3 }
 0x480   :  { %5028 = vmatpush2.msra.mxu0 %v4959_v35  ;;  %5125 = vmatpush2.msra.mxu1 %v5056_v0  ;;  %v5236_v35 = vld [vmem:[#allocation7 + $0x12a8] sm:$0xff]  ;;  %v5138_v0 = vld [vmem:[#allocation7 + $0x11f0] sm:$0xff] }
 0x481   :  { %5029 = vmatprep.subr.mxu0 %v6144_v3  ;;  %5126 = vmatprep.subr.mxu1 %v6144_v3 }
 0x482   :  { %5030 = vmatpush2.msra.mxu0 %v4958_v37  ;;  %5127 = vmatpush2.msra.mxu1 %v5055_v53  ;;  %v5235_v37 = vld [vmem:[#allocation7 + $0x12a0] sm:$0xff]  ;;  %v5137_v53 = vld [vmem:[#allocation7 + $0x11e8] sm:$0xff] }
 0x483   :  { %5032 = vmatmul.mubr.f32.vlgmr.msra.gmra.mxu0 %v2064_v49  ;;  %5129 = vmatmul.mubr.f32.vlgmr.msra.gmra.mxu1 %v2065_v15  ;;  %v5233_v49 = vld [vmem:[#allocation7 + $0x1290] sm:$0xff]  ;;  %v5157_v15 = vld [vmem:[#allocation7 + $0x1288] sm:$0xff] }
 0x484   :  { %5161 = vmatprep.subr.mxu0 %v6144_v3  ;;  %5258 = vmatprep.subr.mxu1 %v6144_v3 }
 0x485   :  { %5162 = vmatpush1.msra.mxu0 %v5151_v42  ;;  %5907 = vmatprep.mubr.msk.f32.mxu0 %vm1515_vm6, %v2610_v44  ;;  %v5156_v42 = vld [vmem:[#allocation7 + $0x1280] sm:$0xff]  ;;  %v5253_v44 = vld [vmem:[#allocation7 + $0x1330] sm:$0xff] }
 0x486   :  { %5259 = vmatpush1.msra.mxu1 %v5248_v31  ;;  %5908 = vmatprep.mubr.msk.f32.mxu1 %vm1515_vm6, %v2611_v45  ;;  %v2033_v31 = vcombine.high %v8286_v40, %v8278_v19  ;;  %v5155_v45 = vld [vmem:[#allocation7 + $0x1278] sm:$0xff]  ;;  %v5153_v40 = vld [vmem:[#allocation7 + $0x1268] sm:$0xff] }
 0x487   :  { %5163 = vmatprep.subr.mxu0 %v6144_v3  ;;  %5260 = vmatprep.subr.mxu1 %v6144_v3 }
 0x488   :  { %5164 = vmatpush1.msra.mxu0 %v5150_v54  ;;  %5261 = vmatpush1.msra.mxu1 %v5247_v43  ;;  %v5252_v54 = vld [vmem:[#allocation7 + $0x1328] sm:$0xff]  ;;  %v2001_v43 = vcombine.high %v8291_v5, %v8283_v7  ;;  %v2047_v19 = vrot.slane %v2033_v31, %v6789_v39  ;;  %v5152_v7 = vld [vmem:[#allocation7 + $0x1260] sm:$0xff]  ;;  %v5249_v5 = vld [vmem:[#allocation7 + $0x1310] sm:$0xff] }
 0x489   :  { %5165 = vmatprep.subr.mxu0 %v6144_v3  ;;  %5262 = vmatprep.subr.mxu1 %v6144_v3  ;;  %v5427_v31 = vld [vmem:[#allocation7 + $0x13f0] sm:$0xff] }
 0x48a   :  { %5166 = vmatpush1.msra.mxu0 %v5149_v52  ;;  %5263 = vmatpush1.msra.mxu1 %v5246_v55  ;;  %v5154_v52 = vld [vmem:[#allocation7 + $0x1270] sm:$0xff]  ;;  %v5251_v55 = vld [vmem:[#allocation7 + $0x1320] sm:$0xff] }
 0x48b   :  { %5167 = vmatprep.subr.mxu0 %v6144_v3  ;;  %5264 = vmatprep.subr.mxu1 %v6144_v3  ;;  %v4257_v24 = vpop.f32.mrf.mxu0  ;;  %v4354_v12 = vpop.f32.mrf.mxu1 }
 0x48c   :  { %5168 = vmatpush1.msra.mxu0 %v5148_v41  ;;  %5265 = vmatpush1.msra.mxu1 %v5245_v57  ;;  %v4261_v60 = vadd.f32 %v4257_v24, %v8238_v4  ;;  %v5144_v4 = vld [vmem:[#allocation7 + $0x1220] sm:$0xff]  ;;  %v5250_v41 = vld [vmem:[#allocation7 + $0x1318] sm:$0xff]  ;;  %v2015_v57 = vrot.slane %v2001_v43, %v6789_v39  ;;  %v5344_v39 = vld [vmem:[#allocation7 + $0x13b0] sm:$0xff] }
 0x48d   :  { %5169 = vmatprep.subr.mxu0 %v6144_v3  ;;  %5266 = vmatprep.subr.mxu1 %v6144_v3  ;;  %v4259_v63 = vpop.f32.mrf.mxu0  ;;  %v4356_v25 = vpop.f32.mrf.mxu1  ;;  %v5345_v24 = vld [vmem:[#allocation7 + $0x13b8] sm:$0xff]  ;;  %v5350_v43 = vld [vmem:[#allocation7 + $0x13e0] sm:$0xff] }
 0x48e   :  { %5170 = vmatpush1.msra.mxu0 %v5147_v46  ;;  %5267 = vmatpush1.msra.mxu1 %v5244_v47  ;;  %v8328_v32 = vadd.f32 %v4354_v12, %v4261_v60  ;;  %v2066_v46 = vcombine.low %v2015_v57, %v2047_v19  ;;  %v2067_v47 = vcombine.high %v2015_v57, %v2047_v19  ;;  %v5442_v12 = vld [vmem:[#allocation7 + $0x1468] sm:$0xff]  ;;  %v5441_v60 = vld [vmem:[#allocation7 + $0x1460] sm:$0xff]  ;;  %v5439_v63 = vld [vmem:[#allocation7 + $0x1450] sm:$0xff] }
 0x48f   :  { %5171 = vmatprep.subr.mxu0 %v6144_v3  ;;  %5268 = vmatprep.subr.mxu1 %v6144_v3  ;;  %v5446_v19 = vld [vmem:[#allocation7 + $0x1488] sm:$0xff]  ;;  %v5346_v57 = vld [vmem:[#allocation7 + $0x13c0] sm:$0xff] }
 0x490   :  { %5172 = vmatpush1.msra.mxu0 %v5146_v18  ;;  %5269 = vmatpush1.msra.mxu1 %v5243_v13  ;;  %v5343_v18 = vld [vmem:[#allocation7 + $0x13a8] sm:$0xff]  ;;  %v5440_v13 = vld [vmem:[#allocation7 + $0x1458] sm:$0xff] }
 0x491   :  { %5173 = vmatprep.subr.mxu0 %v6144_v3  ;;  %5270 = vmatprep.subr.mxu1 %v6144_v3 }
 0x492   :  { %5174 = vmatpush1.msra.mxu0 %v5145_v28  ;;  %5271 = vmatpush1.msra.mxu1 %v5242_v36  ;;  %v5340_v36 = vld [vmem:[#allocation7 + $0x1390] sm:$0xff] }
 0x493   :  { %5175 = vmatprep.subr.mxu0 %v6144_v3  ;;  %5272 = vmatprep.subr.mxu1 %v6144_v3 }
 0x494   :  { %5176 = vmatpush1.msra.mxu0 %v5144_v4  ;;  %5273 = vmatpush1.msra.mxu1 %v5241_v21  ;;  %v5437_v4 = vld [vmem:[#allocation7 + $0x1440] sm:$0xff] }
 0x495   :  { %5177 = vmatprep.subr.mxu0 %v6144_v3  ;;  %5274 = vmatprep.subr.mxu1 %v6144_v3 }
 0x496   :  { %5178 = vmatpush1.msra.mxu0 %v5143_v23  ;;  %5275 = vmatpush1.msra.mxu1 %v5240_v1 }
 0x497   :  { %5179 = vmatprep.subr.mxu0 %v6144_v3  ;;  %5276 = vmatprep.subr.mxu1 %v6144_v3 }
 0x498   :  { %5180 = vmatpush1.msra.mxu0 %v5142_v38  ;;  %5277 = vmatpush1.msra.mxu1 %v5239_v2  ;;  %v5339_v38 = vld [vmem:[#allocation7 + $0x1388] sm:$0xff]  ;;  %v5436_v2 = vld [vmem:[#allocation7 + $0x1438] sm:$0xff] }
 0x499   :  { %5181 = vmatprep.subr.mxu0 %v6144_v3  ;;  %5278 = vmatprep.subr.mxu1 %v6144_v3 }
 0x49a   :  { %5182 = vmatpush1.msra.mxu0 %v5141_v61  ;;  %5279 = vmatpush1.msra.mxu1 %v5238_v26  ;;  %v5435_v61 = vld [vmem:[#allocation7 + $0x1430] sm:$0xff]  ;;  %v5337_v26 = vld [vmem:[#allocation7 + $0x1378] sm:$0xff] }
 0x49b   :  { %5183 = vmatprep.subr.mxu0 %v6144_v3  ;;  %5280 = vmatprep.subr.mxu1 %v6144_v3 }
 0x49c   :  { %5184 = vmatpush1.msra.mxu0 %v5140_v20  ;;  %5281 = vmatpush1.msra.mxu1 %v5237_v29  ;;  %v5434_v20 = vld [vmem:[#allocation7 + $0x1428] sm:$0xff]  ;;  %v5336_v29 = vld [vmem:[#allocation7 + $0x1370] sm:$0xff] }
 0x49d   :  { %5185 = vmatprep.subr.mxu0 %v6144_v3  ;;  %5282 = vmatprep.subr.mxu1 %v6144_v3 }
 0x49e   :  { %5186 = vmatpush1.msra.mxu0 %v5139_v17  ;;  %5283 = vmatpush1.msra.mxu1 %v5236_v35  ;;  %v5433_v17 = vld [vmem:[#allocation7 + $0x1420] sm:$0xff]  ;;  %v5335_v35 = vld [vmem:[#allocation7 + $0x1368] sm:$0xff] }
 0x49f   :  { %5187 = vmatprep.subr.mxu0 %v6144_v3  ;;  %5284 = vmatprep.subr.mxu1 %v6144_v3 }
 0x4a0   :  { %5188 = vmatpush1.msra.mxu0 %v5138_v0  ;;  %5285 = vmatpush1.msra.mxu1 %v5235_v37  ;;  %v5432_v0 = vld [vmem:[#allocation7 + $0x1418] sm:$0xff]  ;;  %v5334_v37 = vld [vmem:[#allocation7 + $0x1360] sm:$0xff] }
 0x4a1   :  { %5189 = vmatprep.subr.mxu0 %v6144_v3  ;;  %5286 = vmatprep.subr.mxu1 %v6144_v3 }
 0x4a2   :  { %5190 = vmatpush1.msra.mxu0 %v5137_v53  ;;  %5287 = vmatpush1.msra.mxu1 %v5234_v58  ;;  %v5431_v53 = vld [vmem:[#allocation7 + $0x1410] sm:$0xff]  ;;  %v5333_v58 = vld [vmem:[#allocation7 + $0x1358] sm:$0xff] }
 0x4a3   :  { %5191 = vmatprep.subr.mxu0 %v6144_v3  ;;  %5288 = vmatprep.subr.mxu1 %v6144_v3 }
 0x4a4   :  { %5192 = vmatpush1.msra.mxu0 %v5136_v51  ;;  %5289 = vmatpush1.msra.mxu1 %v5233_v49  ;;  %v5430_v51 = vld [vmem:[#allocation7 + $0x1408] sm:$0xff]  ;;  %v5332_v49 = vld [vmem:[#allocation7 + $0x1350] sm:$0xff] }
 0x4a5   :  { %5213 = vmatprep.subr.mxu0 %v6144_v3  ;;  %5310 = vmatprep.subr.mxu1 %v6144_v3 }
 0x4a6   :  { %5214 = vmatpush2.msra.mxu0 %v5157_v15  ;;  %5311 = vmatpush2.msra.mxu1 %v5254_v34  ;;  %v5429_v15 = vld [vmem:[#allocation7 + $0x1400] sm:$0xff]  ;;  %v5331_v34 = vld [vmem:[#allocation7 + $0x1348] sm:$0xff] }
 0x4a7   :  { %5215 = vmatprep.subr.mxu0 %v6144_v3  ;;  %5312 = vmatprep.subr.mxu1 %v6144_v3 }
 0x4a8   :  { %5216 = vmatpush2.msra.mxu0 %v5156_v42  ;;  %5313 = vmatpush2.msra.mxu1 %v5253_v44  ;;  %v5428_v42 = vld [vmem:[#allocation7 + $0x13f8] sm:$0xff]  ;;  %v5330_v44 = vld [vmem:[#allocation7 + $0x1340] sm:$0xff] }
 0x4a9   :  { %5217 = vmatprep.subr.mxu0 %v6144_v3  ;;  %5314 = vmatprep.subr.mxu1 %v6144_v3 }
 0x4aa   :  { %5218 = vmatpush2.msra.mxu0 %v5155_v45  ;;  %5315 = vmatpush2.msra.mxu1 %v5252_v54  ;;  %v5351_v45 = vld [vmem:[#allocation7 + $0x13e8] sm:$0xff]  ;;  %v5448_v54 = vld [vmem:[#allocation7 + $0x1498] sm:$0xff] }
 0x4ab   :  { %5219 = vmatprep.subr.mxu0 %v6144_v3  ;;  %5316 = vmatprep.subr.mxu1 %v6144_v3 }
 0x4ac   :  { %5220 = vmatpush2.msra.mxu0 %v5154_v52  ;;  %5317 = vmatpush2.msra.mxu1 %v5251_v55  ;;  %v5447_v52 = vld [vmem:[#allocation7 + $0x1490] sm:$0xff]  ;;  %v5349_v55 = vld [vmem:[#allocation7 + $0x13d8] sm:$0xff] }
 0x4ad   :  { %5221 = vmatprep.subr.mxu0 %v6144_v3  ;;  %5318 = vmatprep.subr.mxu1 %v6144_v3 }
 0x4ae   :  { %5222 = vmatpush2.msra.mxu0 %v5153_v40  ;;  %5319 = vmatpush2.msra.mxu1 %v5250_v41  ;;  %v5348_v40 = vld [vmem:[#allocation7 + $0x13d0] sm:$0xff]  ;;  %v5445_v41 = vld [vmem:[#allocation7 + $0x1480] sm:$0xff] }
 0x4af   :  { %5223 = vmatprep.subr.mxu0 %v6144_v3  ;;  %5320 = vmatprep.subr.mxu1 %v6144_v3 }
 0x4b0   :  { %5224 = vmatpush2.msra.mxu0 %v5152_v7  ;;  %5321 = vmatpush2.msra.mxu1 %v5249_v5  ;;  %v5347_v7 = vld [vmem:[#allocation7 + $0x13c8] sm:$0xff]  ;;  %v5444_v5 = vld [vmem:[#allocation7 + $0x1478] sm:$0xff] }
 0x4b1   :  { %5226 = vmatmul.mubr.f32.vlgmr.msra.gmra.mxu0 %v2066_v46  ;;  %5323 = vmatmul.mubr.f32.vlgmr.msra.gmra.mxu1 %v2067_v47  ;;  %v5443_v46 = vld [vmem:[#allocation7 + $0x1470] sm:$0xff]  ;;  %v5539_v47 = vld [vmem:[#allocation7 + $0x1518] sm:$0xff] }
 0x4b2   :  { %5355 = vmatprep.subr.mxu0 %v6144_v3  ;;  %5452 = vmatprep.subr.mxu1 %v6144_v3 }
 0x4b3   :  { %5356 = vmatpush1.msra.mxu0 %v5345_v24  ;;  %5909 = vmatprep.mubr.msk.f32.mxu0 %vm1515_vm6, %v2612_v59  ;;  %v5342_v59 = vld [vmem:[#allocation7 + $0x13a0] sm:$0xff]  ;;  %v5636_v24 = vld [vmem:[#allocation7 + $0x15c8] sm:$0xff] }
 0x4b4   :  { %5453 = vmatpush1.msra.mxu1 %v5442_v12  ;;  %5910 = vmatprep.mubr.msk.f32.mxu1 %vm1515_vm6, %v2613_v14  ;;  %v5538_v12 = vld [vmem:[#allocation7 + $0x1510] sm:$0xff] }
 0x4b5   :  { %5357 = vmatprep.subr.mxu0 %v6144_v3  ;;  %5454 = vmatprep.subr.mxu1 %v6144_v3 }
 0x4b6   :  { %5358 = vmatpush1.msra.mxu0 %v5344_v39  ;;  %5455 = vmatpush1.msra.mxu1 %v5441_v60  ;;  %v5635_v39 = vld [vmem:[#allocation7 + $0x15c0] sm:$0xff] }
 0x4b7   :  { %5359 = vmatprep.subr.mxu0 %v6144_v3  ;;  %5456 = vmatprep.subr.mxu1 %v6144_v3 }
 0x4b8   :  { %5360 = vmatpush1.msra.mxu0 %v5343_v18  ;;  %5457 = vmatpush1.msra.mxu1 %v5440_v13  ;;  %v5534_v18 = vld [vmem:[#allocation7 + $0x14f0] sm:$0xff]  ;;  %v5631_v13 = vld [vmem:[#allocation7 + $0x15a0] sm:$0xff] }
 0x4b9   :  { %5361 = vmatprep.subr.mxu0 %v6144_v3  ;;  %5458 = vmatprep.subr.mxu1 %v6144_v3  ;;  %v4451_v14 = vpop.f32.mrf.mxu0  ;;  %v4548_v25 = vpop.f32.mrf.mxu1 }
 0x4ba   :  { %5362 = vmatpush1.msra.mxu0 %v5342_v59  ;;  %5459 = vmatpush1.msra.mxu1 %v5439_v63  ;;  %v4455_v28 = vadd.f32 %v4451_v14, %v8328_v32  ;;  %v5338_v32 = vld [vmem:[#allocation7 + $0x1380] sm:$0xff]  ;;  %v5630_v14 = vld [vmem:[#allocation7 + $0x1598] sm:$0xff] }
 0x4bb   :  { %5363 = vmatprep.subr.mxu0 %v6144_v3  ;;  %5460 = vmatprep.subr.mxu1 %v6144_v3  ;;  %v4453_v21 = vpop.f32.mrf.mxu0  ;;  %v4550_v23 = vpop.f32.mrf.mxu1 }
 0x4bc   :  { %5364 = vmatpush1.msra.mxu0 %v5341_v16  ;;  %5461 = vmatpush1.msra.mxu1 %v5438_v8  ;;  %v8389_v1 = vadd.f32 %v4548_v25, %v4455_v28  ;;  %v5533_v8 = vld [vmem:[#allocation7 + $0x14e8] sm:$0xff]  ;;  %v5532_v25 = vld [vmem:[#allocation7 + $0x14e0] sm:$0xff]  ;;  %v5629_v28 = vld [vmem:[#allocation7 + $0x1590] sm:$0xff] }
 0x4bd   :  { %5365 = vmatprep.subr.mxu0 %v6144_v3  ;;  %5462 = vmatprep.subr.mxu1 %v6144_v3  ;;  %v5530_v21 = vld [vmem:[#allocation7 + $0x14d0] sm:$0xff]  ;;  %v5627_v23 = vld [vmem:[#allocation7 + $0x1580] sm:$0xff] }
 0x4be   :  { %5366 = vmatpush1.msra.mxu0 %v5340_v36  ;;  %5463 = vmatpush1.msra.mxu1 %v5437_v4  ;;  %v5531_v36 = vld [vmem:[#allocation7 + $0x14d8] sm:$0xff]  ;;  %v5628_v4 = vld [vmem:[#allocation7 + $0x1588] sm:$0xff] }
 0x4bf   :  { %5367 = vmatprep.subr.mxu0 %v6144_v3  ;;  %5464 = vmatprep.subr.mxu1 %v6144_v3 }
 0x4c0   :  { %5368 = vmatpush1.msra.mxu0 %v5339_v38  ;;  %5465 = vmatpush1.msra.mxu1 %v5436_v2  ;;  %v5626_v38 = vld [vmem:[#allocation7 + $0x1578] sm:$0xff]  ;;  %v5528_v2 = vld [vmem:[#allocation7 + $0x14c0] sm:$0xff] }
 0x4c1   :  { %5369 = vmatprep.subr.mxu0 %v6144_v3  ;;  %5466 = vmatprep.subr.mxu1 %v6144_v3 }
 0x4c2   :  { %5370 = vmatpush1.msra.mxu0 %v5338_v32  ;;  %5467 = vmatpush1.msra.mxu1 %v5435_v61  ;;  %v5625_v32 = vld [vmem:[#allocation7 + $0x1570] sm:$0xff]  ;;  %v5527_v61 = vld [vmem:[#allocation7 + $0x14b8] sm:$0xff] }
 0x4c3   :  { %5371 = vmatprep.subr.mxu0 %v6144_v3  ;;  %5468 = vmatprep.subr.mxu1 %v6144_v3 }
 0x4c4   :  { %5372 = vmatpush1.msra.mxu0 %v5337_v26  ;;  %5469 = vmatpush1.msra.mxu1 %v5434_v20  ;;  %v5624_v26 = vld [vmem:[#allocation7 + $0x1568] sm:$0xff]  ;;  %v5526_v20 = vld [vmem:[#allocation7 + $0x14b0] sm:$0xff] }
 0x4c5   :  { %5373 = vmatprep.subr.mxu0 %v6144_v3  ;;  %5470 = vmatprep.subr.mxu1 %v6144_v3 }
 0x4c6   :  { %5374 = vmatpush1.msra.mxu0 %v5336_v29  ;;  %5471 = vmatpush1.msra.mxu1 %v5433_v17  ;;  %v5623_v29 = vld [vmem:[#allocation7 + $0x1560] sm:$0xff]  ;;  %v5525_v17 = vld [vmem:[#allocation7 + $0x14a8] sm:$0xff] }
 0x4c7   :  { %5375 = vmatprep.subr.mxu0 %v6144_v3  ;;  %5472 = vmatprep.subr.mxu1 %v6144_v3 }
 0x4c8   :  { %5376 = vmatpush1.msra.mxu0 %v5335_v35  ;;  %5473 = vmatpush1.msra.mxu1 %v5432_v0  ;;  %v5622_v35 = vld [vmem:[#allocation7 + $0x1558] sm:$0xff]  ;;  %v5524_v0 = vld [vmem:[#allocation7 + $0x14a0] sm:$0xff] }
 0x4c9   :  { %5377 = vmatprep.subr.mxu0 %v6144_v3  ;;  %5474 = vmatprep.subr.mxu1 %v6144_v3 }
 0x4ca   :  { %5378 = vmatpush1.msra.mxu0 %v5334_v37  ;;  %5475 = vmatpush1.msra.mxu1 %v5431_v53  ;;  %v5621_v37 = vld [vmem:[#allocation7 + $0x1550] sm:$0xff]  ;;  %v5545_v53 = vld [vmem:[#allocation7 + $0x1548] sm:$0xff] }
 0x4cb   :  { %5379 = vmatprep.subr.mxu0 %v6144_v3  ;;  %5476 = vmatprep.subr.mxu1 %v6144_v3 }
 0x4cc   :  { %5380 = vmatpush1.msra.mxu0 %v5333_v58  ;;  %5477 = vmatpush1.msra.mxu1 %v5430_v51  ;;  %v5642_v58 = vld [vmem:[#allocation7 + $0x15f8] sm:$0xff]  ;;  %v5544_v51 = vld [vmem:[#allocation7 + $0x1540] sm:$0xff] }
 0x4cd   :  { %5381 = vmatprep.subr.mxu0 %v6144_v3  ;;  %5478 = vmatprep.subr.mxu1 %v6144_v3 }
 0x4ce   :  { %5382 = vmatpush1.msra.mxu0 %v5332_v49  ;;  %5479 = vmatpush1.msra.mxu1 %v5429_v15  ;;  %v5641_v49 = vld [vmem:[#allocation7 + $0x15f0] sm:$0xff]  ;;  %v5543_v15 = vld [vmem:[#allocation7 + $0x1538] sm:$0xff] }
 0x4cf   :  { %5383 = vmatprep.subr.mxu0 %v6144_v3  ;;  %5480 = vmatprep.subr.mxu1 %v6144_v3 }
 0x4d0   :  { %5384 = vmatpush1.msra.mxu0 %v5331_v34  ;;  %5481 = vmatpush1.msra.mxu1 %v5428_v42  ;;  %v5640_v34 = vld [vmem:[#allocation7 + $0x15e8] sm:$0xff]  ;;  %v5542_v42 = vld [vmem:[#allocation7 + $0x1530] sm:$0xff] }
 0x4d1   :  { %5385 = vmatprep.subr.mxu0 %v6144_v3  ;;  %5482 = vmatprep.subr.mxu1 %v6144_v3 }
 0x4d2   :  { %5386 = vmatpush1.msra.mxu0 %v5330_v44  ;;  %5483 = vmatpush1.msra.mxu1 %v5427_v31  ;;  %v5639_v44 = vld [vmem:[#allocation7 + $0x15e0] sm:$0xff]  ;;  %v5541_v31 = vld [vmem:[#allocation7 + $0x1528] sm:$0xff] }
 0x4d3   :  { %5407 = vmatprep.subr.mxu0 %v6144_v3  ;;  %5504 = vmatprep.subr.mxu1 %v6144_v3 }
 0x4d4   :  { %5408 = vmatpush2.msra.mxu0 %v5351_v45  ;;  %5505 = vmatpush2.msra.mxu1 %v5448_v54  ;;  %v5638_v45 = vld [vmem:[#allocation7 + $0x15d8] sm:$0xff]  ;;  %v5540_v54 = vld [vmem:[#allocation7 + $0x1520] sm:$0xff] }
 0x4d5   :  { %5409 = vmatprep.subr.mxu0 %v6144_v3  ;;  %5506 = vmatprep.subr.mxu1 %v6144_v3 }
 0x4d6   :  { %5410 = vmatpush2.msra.mxu0 %v5350_v43  ;;  %5507 = vmatpush2.msra.mxu1 %v5447_v52  ;;  %v5637_v43 = vld [vmem:[#allocation7 + $0x15d0] sm:$0xff] }
 0x4d7   :  { %5411 = vmatprep.subr.mxu0 %v6144_v3  ;;  %5508 = vmatprep.subr.mxu1 %v6144_v3 }
 0x4d8   :  { %5412 = vmatpush2.msra.mxu0 %v5349_v55  ;;  %5509 = vmatpush2.msra.mxu1 %v5446_v19 }
 0x4d9   :  { %5413 = vmatprep.subr.mxu0 %v6144_v3  ;;  %5510 = vmatprep.subr.mxu1 %v6144_v3 }
 0x4da   :  { %5414 = vmatpush2.msra.mxu0 %v5348_v40  ;;  %5511 = vmatpush2.msra.mxu1 %v5445_v41 }
 0x4db   :  { %5415 = vmatprep.subr.mxu0 %v6144_v3  ;;  %5512 = vmatprep.subr.mxu1 %v6144_v3 }
 0x4dc   :  { %5416 = vmatpush2.msra.mxu0 %v5347_v7  ;;  %5513 = vmatpush2.msra.mxu1 %v5444_v5  ;;  %v5738_v5 = vld [vmem:[%s8559_s7 + $0x60] sm:$0xf] }
 0x4dd   :  { %5417 = vmatprep.subr.mxu0 %v6144_v3  ;;  %5514 = vmatprep.subr.mxu1 %v6144_v3 }
 0x4de   :  { %5418 = vmatpush2.msra.mxu0 %v5346_v57  ;;  %5515 = vmatpush2.msra.mxu1 %v5443_v46  ;;  %v5733_v57 = vld [vmem:[%s8559_s7 + $0x38] sm:$0xff]  ;;  %v5732_v46 = vld [vmem:[%s8559_s7 + $0x30] sm:$0xff] }
 0x4df   :  { %5420 = vmatmul.mubr.f32.vlgmr.msra.gmra.mxu0 %v2068_v48  ;;  %5517 = vmatmul.mubr.f32.vlgmr.msra.gmra.mxu1 %v2069_v33  ;;  %v5536_v48 = vld [vmem:[#allocation7 + $0x1500] sm:$0xff]  ;;  %v5633_v33 = vld [vmem:[#allocation7 + $0x15b0] sm:$0xff] }
 0x4e0   :  { %5549 = vmatprep.subr.mxu0 %v6144_v3  ;;  %5646 = vmatprep.subr.mxu1 %v6144_v3 }
 0x4e1   :  { %5550 = vmatpush1.msra.mxu0 %v5539_v47  ;;  %5911 = vmatprep.mubr.msk.f32.mxu0 %vm1515_vm6, %v2614_v30  ;;  %v5731_v47 = vld [vmem:[%s8559_s7 + $0x28] sm:$0xff] }
 0x4e2   :  { %5647 = vmatpush1.msra.mxu1 %v5636_v24  ;;  %5912 = vmatprep.mubr.msk.f32.mxu1 %vm1515_vm6, %v2615_v9 }
 0x4e3   :  { %5551 = vmatprep.subr.mxu0 %v6144_v3  ;;  %5648 = vmatprep.subr.mxu1 %v6144_v3 }
 0x4e4   :  { %5552 = vmatpush1.msra.mxu0 %v5538_v12  ;;  %5649 = vmatpush1.msra.mxu1 %v5635_v39 }
 0x4e5   :  { %5553 = vmatprep.subr.mxu0 %v6144_v3  ;;  %5650 = vmatprep.subr.mxu1 %v6144_v3 }
 0x4e6   :  { %5554 = vmatpush1.msra.mxu0 %v5537_v62  ;;  %5651 = vmatpush1.msra.mxu1 %v5634_v56 }
 0x4e7   :  { %5555 = vmatprep.subr.mxu0 %v6144_v3  ;;  %5652 = vmatprep.subr.mxu1 %v6144_v3  ;;  %v4645_v30 = vpop.f32.mrf.mxu0  ;;  %v4742_v9 = vpop.f32.mrf.mxu1 }
 0x4e8   :  { %5556 = vmatpush1.msra.mxu0 %v5536_v48  ;;  %5653 = vmatpush1.msra.mxu1 %v5633_v33  ;;  %v4649_v60 = vadd.f32 %v4645_v30, %v8389_v1  ;;  %v5529_v1 = vld [vmem:[#allocation7 + $0x14c8] sm:$0xff]  ;;  %v5730_v33 = vld [vmem:[%s8559_s7 + $0x20] sm:$0xff]  ;;  %v5727_v30 = vld [vmem:[%s8559_s7 + $0x8] sm:$0xff] }
 0x4e9   :  { %5557 = vmatprep.subr.mxu0 %v6144_v3  ;;  %5654 = vmatprep.subr.mxu1 %v6144_v3  ;;  %v4647_v59 = vpop.f32.mrf.mxu0  ;;  %v4744_v63 = vpop.f32.mrf.mxu1 }
 0x4ea   :  { %5558 = vmatpush1.msra.mxu0 %v5535_v6  ;;  %5655 = vmatpush1.msra.mxu1 %v5632_v11  ;;  %v8450_v16 = vadd.f32 %v4742_v9, %v4649_v60  ;;  %v5729_v6 = vld [vmem:[%s8559_s7 + $0x18] sm:$0xff]  ;;  %v5728_v11 = vld [vmem:[%s8559_s7 + $0x10] sm:$0xff]  ;;  %v5726_v9 = vld [vmem:[%s8559_s7] sm:$0xff] }
 0x4eb   :  { %5559 = vmatprep.subr.mxu0 %v6144_v3  ;;  %5656 = vmatprep.subr.mxu1 %v6144_v3 }
 0x4ec   :  { %5560 = vmatpush1.msra.mxu0 %v5534_v18  ;;  %5657 = vmatpush1.msra.mxu1 %v5631_v13 }
 0x4ed   :  { %5561 = vmatprep.subr.mxu0 %v6144_v3  ;;  %5658 = vmatprep.subr.mxu1 %v6144_v3 }
 0x4ee   :  { %5562 = vmatpush1.msra.mxu0 %v5533_v8  ;;  %5659 = vmatpush1.msra.mxu1 %v5630_v14 }
 0x4ef   :  { %5563 = vmatprep.subr.mxu0 %v6144_v3  ;;  %5660 = vmatprep.subr.mxu1 %v6144_v3 }
 0x4f0   :  { %5564 = vmatpush1.msra.mxu0 %v5532_v25  ;;  %5661 = vmatpush1.msra.mxu1 %v5629_v28 }
 0x4f1   :  { %5565 = vmatprep.subr.mxu0 %v6144_v3  ;;  %5662 = vmatprep.subr.mxu1 %v6144_v3 }
 0x4f2   :  { %5566 = vmatpush1.msra.mxu0 %v5531_v36  ;;  %5663 = vmatpush1.msra.mxu1 %v5628_v4 }
 0x4f3   :  { %5567 = vmatprep.subr.mxu0 %v6144_v3  ;;  %5664 = vmatprep.subr.mxu1 %v6144_v3 }
 0x4f4   :  { %5568 = vmatpush1.msra.mxu0 %v5530_v21  ;;  %5665 = vmatpush1.msra.mxu1 %v5627_v23 }
 0x4f5   :  { %5569 = vmatprep.subr.mxu0 %v6144_v3  ;;  %5666 = vmatprep.subr.mxu1 %v6144_v3 }
 0x4f6   :  { %5570 = vmatpush1.msra.mxu0 %v5529_v1  ;;  %5667 = vmatpush1.msra.mxu1 %v5626_v38  ;;  %v5913_v38 = vld [vmem:[#allocation8] ss:$0 sm:$0xff] }
 0x4f7   :  { %5571 = vmatprep.subr.mxu0 %v6144_v3  ;;  %5668 = vmatprep.subr.mxu1 %v6144_v3 }
 0x4f8   :  { %5572 = vmatpush1.msra.mxu0 %v5528_v2  ;;  %5669 = vmatpush1.msra.mxu1 %v5625_v32 }
 0x4f9   :  { %5573 = vmatprep.subr.mxu0 %v6144_v3  ;;  %5670 = vmatprep.subr.mxu1 %v6144_v3 }
 0x4fa   :  { %5574 = vmatpush1.msra.mxu0 %v5527_v61  ;;  %5671 = vmatpush1.msra.mxu1 %v5624_v26 }
 0x4fb   :  { %5575 = vmatprep.subr.mxu0 %v6144_v3  ;;  %5672 = vmatprep.subr.mxu1 %v6144_v3 }
 0x4fc   :  { %5576 = vmatpush1.msra.mxu0 %v5526_v20  ;;  %5673 = vmatpush1.msra.mxu1 %v5623_v29  ;;  %v5914_v20 = vld [vmem:[#allocation10] ss:$0 sm:$0xff] }
 0x4fd   :  { %5577 = vmatprep.subr.mxu0 %v6144_v3  ;;  %5674 = vmatprep.subr.mxu1 %v6144_v3 }
 0x4fe   :  { %5578 = vmatpush1.msra.mxu0 %v5525_v17  ;;  %5675 = vmatpush1.msra.mxu1 %v5622_v35 }
 0x4ff   :  { %5579 = vmatprep.subr.mxu0 %v6144_v3  ;;  %5676 = vmatprep.subr.mxu1 %v6144_v3 }
 0x500   :  { %5580 = vmatpush1.msra.mxu0 %v5524_v0  ;;  %5677 = vmatpush1.msra.mxu1 %v5621_v37 }
 0x501   :  { %5601 = vmatprep.subr.mxu0 %v6144_v3  ;;  %5698 = vmatprep.subr.mxu1 %v6144_v3 }
 0x502   :  { %5602 = vmatpush2.msra.mxu0 %v5545_v53  ;;  %5699 = vmatpush2.msra.mxu1 %v5642_v58 }
 0x503   :  { %5603 = vmatprep.subr.mxu0 %v6144_v3  ;;  %5700 = vmatprep.subr.mxu1 %v6144_v3 }
 0x504   :  { %5604 = vmatpush2.msra.mxu0 %v5544_v51  ;;  %5701 = vmatpush2.msra.mxu1 %v5641_v49 }
 0x505   :  { %5605 = vmatprep.subr.mxu0 %v6144_v3  ;;  %5702 = vmatprep.subr.mxu1 %v6144_v3 }
 0x506   :  { %5606 = vmatpush2.msra.mxu0 %v5543_v15  ;;  %5703 = vmatpush2.msra.mxu1 %v5640_v34 }
 0x507   :  { %5607 = vmatprep.subr.mxu0 %v6144_v3  ;;  %5704 = vmatprep.subr.mxu1 %v6144_v3 }
 0x508   :  { %5608 = vmatpush2.msra.mxu0 %v5542_v42  ;;  %5705 = vmatpush2.msra.mxu1 %v5639_v44 }
 0x509   :  { %5609 = vmatprep.subr.mxu0 %v6144_v3  ;;  %5706 = vmatprep.subr.mxu1 %v6144_v3 }
 0x50a   :  { %5610 = vmatpush2.msra.mxu0 %v5541_v31  ;;  %5707 = vmatpush2.msra.mxu1 %v5638_v45 }
 0x50b   :  { %5611 = vmatprep.subr.mxu0 %v6144_v3  ;;  %5708 = vmatprep.subr.mxu1 %v6144_v3 }
 0x50c   :  { %5612 = vmatpush2.msra.mxu0 %v5540_v54  ;;  %5709 = vmatpush2.msra.mxu1 %v5637_v43 }
 0x50d   :  { %5614 = vmatmul.mubr.f32.vlgmr.msra.gmra.mxu0 %v2070_v22  ;;  %5711 = vmatmul.mubr.f32.vlgmr.msra.gmra.mxu1 %v2071_v10  ;;  %v5737_v22 = vld [vmem:[%s8559_s7 + $0x58] sm:$0xff]  ;;  %v5734_v10 = vld [vmem:[%s8559_s7 + $0x40] sm:$0xff]  ;;  %s6155_s7 = smov [#allocation11]  }
 0x50e   :  { %5953 = vmatprep.subr.mxu0 %v6144_v3  ;;  %5979 = vmatprep.mubr.msk.f32.mxu0 %vm6154_vm8, %v6144_v3  ;;  %s5846_s25 = sshll.u32 %s6155_s7, 4  ;;  %s5847_s25 = int_to_ptr.vmem [resolvable:$true] %s5846_s25 }
 0x50f   :  { %5954 = vmatpush3.msk.msra.mxu0 %vm5750_vm7, %v5738_v5  ;;  %s6108_s26 = scalar_lea.vmem %s5847_s25, 128  ;;  %p6113_p12 = scmp.lt.s32.totalorder %s5847_s25, %s5847_s25 }
 0x510   :  { %5955 = vmatprep.subr.mxu0 %v6144_v3  ;;  %p6109_p11 = scmp.ne.s32.totalorder %s5847_s25, %s6108_s26  ;;  %p6114_p13 = scmp.lt.s32.totalorder %s6108_s26, %s6108_s26 }
 0x511   :  { %5956 = vmatpush3.msra.mxu0 %v5737_v22 }
 0x512   :  { %5957 = vmatprep.subr.mxu0 %v6144_v3  ;;  %p6115_p0 = por %p6114_p13, %p6113_p12 }
 0x513   :  { %5958 = vmatpush3.msra.mxu0 %v5736_v27 }
 0x514   :  { %5959 = vmatprep.subr.mxu0 %v6144_v3  ;;  %p6116_p1 = pnand %p6115_p0, %p6109_p11 }
 0x515   :  { %v4839_v52 = vpop.f32.mrf.mxu0  ;;  %v4936_v55 = vpop.f32.mrf.mxu1  ;;  %5960 = vmatpush3.msra.mxu0 %v5735_v50 }
 0x516   :  { %v4843_v19 = vadd.f32 %v4839_v52, %v8450_v16  ;;  %5961 = vmatprep.subr.mxu0 %v6144_v3 }
 0x517   :  { %v4841_v40 = vpop.f32.mrf.mxu0  ;;  %v4938_v41 = vpop.f32.mrf.mxu1  ;;  %5962 = vmatpush3.msra.mxu0 %v5734_v10 }
 0x518   :  { %v4940_v7 = vadd.f32 %v4936_v55, %v4843_v19  ;;  %5963 = vmatprep.subr.mxu0 %v6144_v3 }
 0x519   :  { %5964 = vmatpush3.msra.mxu0 %v5733_v57 }
 0x51a   :  { %5965 = vmatprep.subr.mxu0 %v6144_v3 }
 0x51b   :  { %5966 = vmatpush3.msra.mxu0 %v5732_v46 }
 0x51c   :  { %5967 = vmatprep.subr.mxu0 %v6144_v3 }
 0x51d   :  { %5968 = vmatpush3.msra.mxu0 %v5731_v47 }
 0x51e   :  { %5969 = vmatprep.subr.mxu0 %v6144_v3 }
 0x51f   :  { %5970 = vmatpush3.msra.mxu0 %v5730_v33 }
 0x520   :  { %5971 = vmatprep.subr.mxu0 %v6144_v3 }
 0x521   :  { %5972 = vmatpush3.msra.mxu0 %v5729_v6 }
 0x522   :  { %5973 = vmatprep.subr.mxu0 %v6144_v3 }
 0x523   :  { %5974 = vmatpush3.msra.mxu0 %v5728_v11 }
 0x524   :  { %5975 = vmatprep.subr.mxu0 %v6144_v3 }
 0x525   :  { %5976 = vmatpush3.msra.mxu0 %v5727_v30 }
 0x526   :  { %5977 = vmatprep.subr.mxu0 %v6144_v3 }
 0x527   :  { %5978 = vmatpush3.msra.mxu0 %v5726_v9 }
 0x543   :  { %v5033_v24 = vpop.f32.mrf.mxu0  ;;  %v5130_v12 = vpop.f32.mrf.mxu1 }
 0x544   :  { %v5037_v39 = vadd.f32 %v5033_v24, %v4940_v7 }
 0x545   :  { %v5035_v62 = vpop.f32.mrf.mxu0  ;;  %v5132_v56 = vpop.f32.mrf.mxu1 }
 0x546   :  { %v5134_v48 = vadd.f32 %v5130_v12, %v5037_v39 }
 0x571   :  { %v5227_v60 = vpop.f32.mrf.mxu0  ;;  %v5324_v18 = vpop.f32.mrf.mxu1 }
 0x572   :  { %v5231_v13 = vadd.f32 %v5227_v60, %v5134_v48 }
 0x573   :  { %v5229_v59 = vpop.f32.mrf.mxu0  ;;  %v5326_v63 = vpop.f32.mrf.mxu1 }
 0x574   :  { %v5328_v16 = vadd.f32 %v5324_v18, %v5231_v13 }
 0x59f   :  { %v5421_v8 = vpop.f32.mrf.mxu0  ;;  %v5518_v14 = vpop.f32.mrf.mxu1 }
 0x5a0   :  { %v5425_v36 = vadd.f32 %v5421_v8, %v5328_v16 }
 0x5a1   :  { %v5423_v25 = vpop.f32.mrf.mxu0  ;;  %v5520_v28 = vpop.f32.mrf.mxu1 }
 0x5a2   :  { %v5522_v4 = vadd.f32 %v5518_v14, %v5425_v36 }
 0x5cd   :  { %v5615_v21 = vpop.f32.mrf.mxu0  ;;  %v5712_v23 = vpop.f32.mrf.mxu1 }
 0x5ce   :  { %v5619_v1 = vadd.f32 %v5615_v21, %v5522_v4 }
 0x5cf   :  { %v5617_v2 = vpop.f32.mrf.mxu0  ;;  %v5714_v32 = vpop.f32.mrf.mxu1 }
 0x5d0   :  { %v5716_v61 = vadd.f32 %v5712_v23, %v5619_v1 }
 0x5d2   :  { %v5724_v3 = vadd.f32 %v5913_v38, %v5716_v61 }
 0x5d4   :  { %v5725_v26 = vmax.f32 %v5724_v3, 0.0 }
 0x5d6   :  { %5980 = vmatmul.mubr.msk.f32.vlgmr.msra.gmra.mxu0 %vm5746_vm9, %v5725_v26 }
 0x696   :  { %v5820_v29 = vpop.f32.mrf.mxu0 }
 0x697   :  { %v5821_v17 = vadd.f32 %v5914_v20, %v5820_v29 }
 0x698   :  { %v5981_v35 = vpop.f32.mrf.mxu0 }
 0x699   :  { %v5824_v0 = vmax.f32 %v5821_v17, 0.0 }
 0x69b   :  { %v5826_v37 = vsel %vm5825_vm10, %v5824_v0, -inf }
 0x69c   :  { %5827 = vmax.xlane.f32.xlu0 %v5826_v37 }
 0x725   :  { %v5828_v53 = vpop.xlane.xlu0 %5827 }
 0x726   :  { %v5829_v58 = vsub.f32 %v5824_v0, %v5828_v53 }
 0x728   :  { %v5830_v51 = vmul.f32 1.442695, %v5829_v58 }
 0x72a   :  { %6004 = vpow2.f32 %v5830_v51 }
 0x737   :  { %v6005_v49 = vpop.eup %6004 }
 0x738   :  { %v5832_v15 = vsel %vm5825_vm10, %v6005_v49, 0.0 }
 0x739   :  { %5833 = vadd.xlane.f32.xlu1 %v5832_v15 }
 0x7c2   :  { %v5834_v34 = vpop.xlane.xlu1 %5833 }
 0x7c3   :  { %6006 = vlog2.f32 %v5834_v34 }
 0x7d0   :  { %v6007_v42 = vpop.eup %6006 }
 0x7d1   :  { %v5836_v44 = vmul.f32 0.6931472, %v6007_v42 }
 0x7d3   :  { %v5837_v31 = vadd.f32 %v5836_v44, %v5828_v53 }
 0x7d5   :  { %v5838_v45 = vsub.f32 %v5824_v0, %v5837_v31 }
 0x7d7   :  { %5839 = vst.msk [vmem:[#allocation11] sm:$0xff] %vm5825_vm10, %v5838_v45 }
 0x7d8   :  { %6119 = shalt.err (!%p6116_p1)
}
 0x7d9   :  { %5849 = dma.vmem_to_hbm [thread:$0]  %s5847_s25, 128, %s8561_s9, [#allocation4]  }
 0x7da   :  { %6134 = dma.done.wait [#allocation4], 128  }
 0x7db   :  { %6135 = vsyncadd [#allocation4], 4294967168 }
 0x7dc   :  { %5853 = vsyncpa [#allocation3], 1 }
 0x7dd   :  { %5854 = vsyncpa [#allocation6], 1 }
 0x7de   :  { %5855 = vsyncpa [#allocation9], 1 }
 0x7df   :  { %5856 = vsyncpa [#allocation4], 1 }

// kernel: tpu_custom_call.1
= control target key start
LH: loop header
LB: loop body
LE: loop exit
PB: predicated region body
PF: predicated region fallthrough
CT: control target
= control target key end

     0   :  { %s2508_s18 = smov 0   ;;  %s3198_s0 = inlined_call_operand.vmem [shape: f32[2,169,4], index: 0, kind: input, shape index: {}]   ;;  %s3199_s1 = inlined_call_operand.vmem [shape: f32[1,8], index: 1, kind: input, shape index: {}]   ;;  %s3200_s2 = inlined_call_operand.vmem [shape: f32[1,8], index: 2, kind: input, shape index: {}]   ;;  %s3201_s3 = inlined_call_operand.vmem [shape: f32[4,8,32], index: 3, kind: input, shape index: {}]   ;;  %s3202_s4 = inlined_call_operand.vmem [shape: f32[1,32], index: 4, kind: input, shape index: {}]   ;;  %s3203_s5 = inlined_call_operand.vmem [shape: f32[2,169,32], index: 5, kind: output, shape index: {}]  }
   0x1 LB: > { %s2067_s19 = sadd.s32 4294967295, %s2472_s18   ;;  %p2071_p0 = scmp.ge.s32.totalorder %s2472_s18, 1  ;;  %s2472_s18 = sphi %s2508_s18, %s15_s18  }
   0x2   : > { %p187_p1 = scmp.lt.s32.totalorder %s2472_s18, 3 }
   0x4   : > { %p188_p2 = pnand %p2071_p0, %p187_p1 }
   0x5   : > { %p215_p3 = scmp.lt.s32.totalorder (!%p188_p2), %s2067_s19, 1 }
   0x6   : > { %191 = sbr.rel (%p188_p2) target bundleno = 601 (0x259), region = 40 }
   0xb   : > { %v2474_v0 = vmov 1   ;;  %s3205_s19 = smov (!%p215_p3, %s2067_s19), 1  ;;  %v2099_v7 = vld [vmem:[%s3201_s3 + $0x8] sm:$0xff]  ;;  %v2475_v8 = vmov 0   ;;  %v444_v12 = vld [vmem:[%s3201_s3] sm:$0xff]  ;;  %v2476_v22 = vmov 2  }
   0xc   : > { %2417 = vset.pattern.permute.xlu0 %v2474_v0  ;;  %2415 = vset.pattern.permute.xlu1 %v2474_v0  ;;  %s2402_s20 = smul.u32 176, %s3205_s19  ;;  %v2477_v24 = vmov 3   ;;  %v2682_v28 = vld [vmem:[%s3199_s1] ss:$0 sm:$0xff]  ;;  %vm445_vm0 = vcmask 64512   ;;  %v2702_v40 = vld [vmem:[%s3201_s3 + $0x10] sm:$0xff] }
   0xd   : > { %2297 = vmatprep.subr.mxu1 %v2099_v7  ;;  %2262 = vmatprep.subr.mxu0 %v444_v12  ;;  %v2687_v30 = vld [vmem:[%s3200_s2] ss:$0 sm:$0xff]  ;;  %v2145_v46 = vld [vmem:[%s3201_s3 + $0x18] sm:$0xff]  ;;  %vm1988_vm1 = vcmask 261120   ;;  %vm2010_vm2 = vcmask 253952  }
   0xe   : > { %s2526_s23 = scalar_lea.vmem %s3198_s0, %s2402_s20  ;;  %2298 = vmatpush3.msra.mxu1 %v2099_v7  ;;  %2263 = vmatpush3.msra.mxu0 %v444_v12  ;;  %s3122_s22 = scalar_lea.vmem %s3203_s5, %s2402_s20 }
   0xf   : > { %v2529_v1 = vld [vmem:[%s2526_s23 + $0x10] sm:$0xff]  ;;  %v2532_v2 = vld [vmem:[%s2526_s23] sm:$0xff]  ;;  %v2540_v4 = vld [vmem:[%s2526_s23 + $0x8] sm:$0xff]  ;;  %2332 = vmatprep.subr.mxu0 %v2702_v40  ;;  %2367 = vmatprep.subr.mxu1 %v2145_v46 }
  0x10   : > { %718 = vperm.xlu0 %2417, %v2529_v1   ;;  %710 = vperm.xlu1 %2415, %v2532_v2   ;;  %v2537_v3 = vld [vmem:[%s2526_s23 + $0x30] sm:$0xff]  ;;  %v2548_v6 = vld [vmem:[%s2526_s23 + $0x18] sm:$0xff]  ;;  %v2567_v11 = vld [vmem:[%s2526_s23 + $0x20] sm:$0xff] }
  0x11   : > { %v2545_v5 = vld [vmem:[%s2526_s23 + $0x50] sm:$0xff]  ;;  %v2580_v13 = vld [vmem:[%s2526_s23 + $0x28] sm:$0xff]  ;;  %v2585_v14 = vld [vmem:[%s2526_s23 + $0x38] sm:$0xff] }
  0x12   : > { %v2557_v9 = vld [vmem:[%s2526_s23 + $0x70] sm:$0xff]  ;;  %v2594_v15 = vld [vmem:[%s2526_s23 + $0x48] sm:$0xff]  ;;  %v2597_v16 = vld [vmem:[%s2526_s23 + $0x40] sm:$0xff] }
  0x13   : > { %v2562_v10 = vld [vmem:[%s2526_s23 + $0x90] sm:$0xff]  ;;  %v2604_v17 = vld [vmem:[%s2526_s23 + $0x68] sm:$0xff]  ;;  %v2612_v18 = vld [vmem:[%s2526_s23 + $0x58] sm:$0xff] }
  0x14   : > { %734 = vperm.xlu0 %2417, %v2537_v3   ;;  %714 = vperm.xlu1 %2415, %v2540_v4   ;;  %v2615_v19 = vld [vmem:[%s2526_s23 + $0x88] sm:$0xff]  ;;  %v2627_v21 = vld [vmem:[%s2526_s23 + $0x60] sm:$0xff]  ;;  %v2639_v23 = vld [vmem:[%s2526_s23 + $0x78] sm:$0xff] }
  0x15   : > { %v2624_v20 = vld [vmem:[%s2526_s23 + $0xa8] sm:$0x1]  ;;  %v2650_v25 = vld [vmem:[%s2526_s23 + $0x80] sm:$0xff]  ;;  %v2661_v26 = vld [vmem:[%s2526_s23 + $0x98] sm:$0xff] }
  0x16   : > { %v2671_v27 = vld [vmem:[%s2526_s23 + $0xa0] sm:$0xff] }
  0x18   : > { %750 = vperm.xlu0 %2417, %v2545_v5   ;;  %2416 = vset.pattern.permute.xlu1 %v2475_v8 }
  0x19   : > { %273 = vperm.xlu1 %2416, %v2548_v6  }
  0x1c   : > { %766 = vperm.xlu0 %2417, %v2557_v9  }
  0x1d   : > { %2418 = vset.pattern.permute.xlu1 %v2474_v0 }
  0x1e   : > { %722 = vperm.xlu1 %2418, %v2548_v6  }
  0x20   : > { %782 = vperm.xlu0 %2417, %v2562_v10  }
  0x22   : > { %2419 = vset.pattern.permute.xlu1 %v2475_v8 }
  0x23   : > { %278 = vperm.xlu1 %2419, %v2567_v11  }
  0x24   : > { %2434 = vset.pattern.permute.xlu0 %v2475_v8 }
  0x25   : > { %258 = vperm.xlu0 %2434, %v2532_v2  }
  0x27   : > { %2420 = vset.pattern.permute.xlu1 %v2474_v0 }
  0x28   : > { %726 = vperm.xlu1 %2420, %v2567_v11  }
  0x29   : > { %263 = vperm.xlu0 %2434, %v2540_v4  }
  0x2c   : > { %730 = vperm.xlu1 %2420, %v2580_v13  }
  0x2d   : > { %268 = vperm.xlu0 %2434, %v2529_v1  }
  0x30   : > { %2421 = vset.pattern.permute.xlu1 %v2475_v8 }
  0x31   : > { %283 = vperm.xlu0 %2434, %v2580_v13   ;;  %293 = vperm.xlu1 %2421, %v2585_v14  }
  0x35   : > { %288 = vperm.xlu0 %2434, %v2537_v3   ;;  %2422 = vset.pattern.permute.xlu1 %v2474_v0 }
  0x36   : > { %738 = vperm.xlu1 %2422, %v2585_v14  }
  0x39   : > { %303 = vperm.xlu0 %2434, %v2594_v15  }
  0x3a   : > { %2423 = vset.pattern.permute.xlu1 %v2475_v8 }
  0x3b   : > { %298 = vperm.xlu1 %2423, %v2597_v16  }
  0x3d   : > { %308 = vperm.xlu0 %2434, %v2545_v5  }
  0x3f   : > { %2424 = vset.pattern.permute.xlu1 %v2474_v0 }
  0x40   : > { %742 = vperm.xlu1 %2424, %v2597_v16  }
  0x41   : > { %323 = vperm.xlu0 %2434, %v2604_v17  }
  0x44   : > { %746 = vperm.xlu1 %2424, %v2594_v15  }
  0x45   : > { %328 = vperm.xlu0 %2434, %v2557_v9  }
  0x48   : > { %2425 = vset.pattern.permute.xlu1 %v2475_v8 }
  0x49   : > { %313 = vperm.xlu1 %2425, %v2612_v18   ;;  %343 = vperm.xlu0 %2434, %v2615_v19  }
  0x4d   : > { %2426 = vset.pattern.permute.xlu1 %v2474_v0  ;;  %348 = vperm.xlu0 %2434, %v2562_v10  }
  0x4e   : > { %754 = vperm.xlu1 %2426, %v2612_v18  }
  0x51   : > { %363 = vperm.xlu0 %2434, %v2624_v20  }
  0x52   : > { %2427 = vset.pattern.permute.xlu1 %v2475_v8 }
  0x53   : > { %318 = vperm.xlu1 %2427, %v2627_v21  }
  0x55   : > { %2438 = vset.pattern.permute.xlu0 %v2476_v22 }
  0x56   : > { %1129 = vperm.xlu0 %2438, %v2532_v2  }
  0x57   : > { %2428 = vset.pattern.permute.xlu1 %v2474_v0 }
  0x58   : > { %758 = vperm.xlu1 %2428, %v2627_v21  }
  0x5a   : > { %1145 = vperm.xlu0 %2438, %v2567_v11  }
  0x5c   : > { %762 = vperm.xlu1 %2428, %v2604_v17  }
  0x5e   : > { %1161 = vperm.xlu0 %2438, %v2597_v16  }
  0x60   : > { %2429 = vset.pattern.permute.xlu1 %v2475_v8 }
  0x61   : > { %333 = vperm.xlu1 %2429, %v2639_v23  }
  0x62   : > { %1177 = vperm.xlu0 %2438, %v2627_v21  }
  0x65   : > { %2430 = vset.pattern.permute.xlu1 %v2474_v0 }
  0x66   : > { %770 = vperm.xlu1 %2430, %v2639_v23   ;;  %2451 = vset.pattern.permute.xlu0 %v2477_v24 }
  0x67   : > { %1552 = vperm.xlu0 %2451, %v2540_v4  }
  0x6a   : > { %2431 = vset.pattern.permute.xlu1 %v2475_v8 }
  0x6b   : > { %338 = vperm.xlu1 %2431, %v2650_v25   ;;  %1556 = vperm.xlu0 %2451, %v2529_v1  }
  0x6f   : > { %2432 = vset.pattern.permute.xlu1 %v2474_v0  ;;  %1568 = vperm.xlu0 %2451, %v2580_v13  }
  0x70   : > { %774 = vperm.xlu1 %2432, %v2650_v25  }
  0x73   : > { %1572 = vperm.xlu0 %2451, %v2537_v3  }
  0x74   : > { %778 = vperm.xlu1 %2432, %v2615_v19  }
  0x77   : > { %1584 = vperm.xlu0 %2451, %v2594_v15  }
  0x78   : > { %2433 = vset.pattern.permute.xlu1 %v2475_v8 }
  0x79   : > { %353 = vperm.xlu1 %2433, %v2661_v26  }
  0x7b   : > { %1588 = vperm.xlu0 %2451, %v2545_v5  }
  0x7d   : > { %2435 = vset.pattern.permute.xlu1 %v2474_v0 }
  0x7e   : > { %786 = vperm.xlu1 %2435, %v2661_v26  }
  0x7f   : > { %1600 = vperm.xlu0 %2451, %v2604_v17  }
  0x82   : > { %2436 = vset.pattern.permute.xlu1 %v2475_v8 }
  0x83   : > { %358 = vperm.xlu1 %2436, %v2671_v27   ;;  %1604 = vperm.xlu0 %2451, %v2557_v9  }
  0x87   : > { %2437 = vset.pattern.permute.xlu1 %v2474_v0  ;;  %1616 = vperm.xlu0 %2451, %v2615_v19  }
  0x88   : > { %790 = vperm.xlu1 %2437, %v2671_v27  }
  0x8b   : > { %v711_v29 = vpop.permute.xlu1 %710  ;;  %v719_v31 = vpop.permute.xlu0 %718  ;;  %1620 = vperm.xlu0 %2451, %v2562_v10  }
  0x8c   : > { %v797_v32 = vmul.f32 %v2682_v28, %v711_v29  ;;  %v799_v33 = vmul.f32 %v2682_v28, %v719_v31  ;;  %794 = vperm.xlu1 %2437, %v2624_v20  }
  0x8e   : > { %v819_v34 = vadd.f32 %v2687_v30, %v797_v32  ;;  %v821_v35 = vadd.f32 %v2687_v30, %v799_v33 }
  0x8f   : > { %v715_v36 = vpop.permute.xlu1 %714  ;;  %v735_v37 = vpop.permute.xlu0 %734  ;;  %2459 = vset.pattern.permute.xlu0 %v2476_v22 }
  0x90   : > { %v798_v38 = vmul.f32 %v2682_v28, %v715_v36  ;;  %2439 = vset.pattern.permute.xlu1 %v2476_v22  ;;  %v841_v39 = vmax.f32 %v819_v34, 0.0  ;;  %1193 = vperm.xlu0 %2459, %v2650_v25   ;;  %v843_v42 = vmax.f32 %v821_v35, 0.0  ;;  %v803_v56 = vmul.f32 %v2682_v28, %v735_v37 }
  0x91   : > { %1133 = vperm.xlu1 %2439, %v2540_v4  }
  0x92   : > { %v820_v41 = vadd.f32 %v2687_v30, %v798_v38  ;;  %2299 = vmatprep.mubr.msk.f32.mxu1 %vm445_vm0, %v841_v39 }
  0x93   : > { %v2708_v43 = vpop.permute.xlu0 %750 }
  0x94   : > { %v842_v44 = vmax.f32 %v820_v41, 0.0  ;;  %v274_v45 = vpop.permute.xlu1 %273  ;;  %1209 = vperm.xlu0 %2459, %v2671_v27  }
  0x95   : > { %2440 = vset.pattern.permute.xlu1 %v2477_v24  ;;  %v375_v63 = vmul.f32 %v2682_v28, %v274_v45 }
  0x96   : > { %1548 = vperm.xlu1 %2440, %v2532_v2   ;;  %2300 = vmatmul.mubr.msk.f32.vlgmr.msra.gmra.mxu1 %vm445_vm0, %v842_v44 }
  0x97   : > { %v2717_v47 = vpop.permute.xlu0 %766  ;;  %2302 = vmatprep.mubr.msk.f32.mxu1 %vm445_vm0, %v843_v42  ;;  %2368 = vmatpush3.msra.mxu1 %v2145_v46  ;;  %v403_v32 = vadd.f32 %v2687_v30, %v375_v63 }
  0x98   : > { %2463 = vset.pattern.permute.xlu0 %v2477_v24 }
  0x99   : > { %v723_v48 = vpop.permute.xlu1 %722  ;;  %1632 = vperm.xlu0 %2463, %v2624_v20   ;;  %v425_v42 = vmax.f32 %v403_v32, 0.0 }
  0x9a   : > { %v800_v49 = vmul.f32 %v2682_v28, %v723_v48  ;;  %2441 = vset.pattern.permute.xlu1 %v2476_v22 }
  0x9b   : > { %1137 = vperm.xlu1 %2441, %v2529_v1   ;;  %v2725_v50 = vpop.permute.xlu0 %782  ;;  %v825_v1 = vadd.f32 %v2687_v30, %v803_v56 }
  0x9c   : > { %v822_v51 = vadd.f32 %v2687_v30, %v800_v49 }
  0x9d   : > { %v847_v34 = vmax.f32 %v825_v1, 0.0 }
  0x9e   : > { %v844_v52 = vmax.f32 %v822_v51, 0.0  ;;  %v279_v53 = vpop.permute.xlu1 %278 }
  0x9f   : > { %1141 = vperm.xlu1 %2441, %v2548_v6   ;;  %v376_v2 = vmul.f32 %v2682_v28, %v279_v53 }
  0xa0   : > { %v259_v54 = vpop.permute.xlu0 %258  ;;  %2303 = vmatmul.mubr.msk.f32.gmra.mxu1 %vm445_vm0, %v844_v52 }
  0xa1   : > { %v372_v55 = vmul.f32 %v2682_v28, %v259_v54  ;;  %v404_v35 = vadd.f32 %v2687_v30, %v376_v2  ;;  %v807_v2 = vmul.f32 %v2682_v28, %v2708_v43 }
  0xa3   : > { %2442 = vset.pattern.permute.xlu1 %v2477_v24  ;;  %v727_v57 = vpop.permute.xlu1 %726  ;;  %v400_v58 = vadd.f32 %v2687_v30, %v372_v55  ;;  %v426_v45 = vmax.f32 %v404_v35, 0.0 }
  0xa4   : > { %v801_v59 = vmul.f32 %v2682_v28, %v727_v57  ;;  %v264_v60 = vpop.permute.xlu0 %263  ;;  %1560 = vperm.xlu1 %2442, %v2548_v6  }
  0xa5   : > { %v373_v61 = vmul.f32 %v2682_v28, %v264_v60  ;;  %v422_v62 = vmax.f32 %v400_v58, 0.0 }
  0xa6   : > { %v823_v0 = vadd.f32 %v2687_v30, %v801_v59 }
  0xa7   : > { %v401_v4 = vadd.f32 %v2687_v30, %v373_v61  ;;  %v731_v7 = vpop.permute.xlu1 %730  ;;  %2264 = vmatprep.mubr.msk.f32.mxu0 %vm445_vm0, %v422_v62 }
  0xa8   : > { %v845_v8 = vmax.f32 %v823_v0, 0.0  ;;  %v802_v12 = vmul.f32 %v2682_v28, %v731_v7  ;;  %v269_v6 = vpop.permute.xlu0 %268  ;;  %2443 = vset.pattern.permute.xlu1 %v2476_v22 }
  0xa9   : > { %v423_v29 = vmax.f32 %v401_v4, 0.0  ;;  %v374_v31 = vmul.f32 %v2682_v28, %v269_v6  ;;  %1149 = vperm.xlu1 %2443, %v2580_v13  }
  0xaa   : > { %v824_v33 = vadd.f32 %v2687_v30, %v802_v12  ;;  %2305 = vmatprep.mubr.msk.f32.mxu1 %vm445_vm0, %v845_v8 }
  0xab   : > { %v402_v36 = vadd.f32 %v2687_v30, %v374_v31  ;;  %2265 = vmatmul.mubr.msk.f32.vlgmr.msra.gmra.mxu0 %vm445_vm0, %v423_v29  ;;  %v829_v31 = vadd.f32 %v2687_v30, %v807_v2 }
  0xac   : > { %v846_v37 = vmax.f32 %v824_v33, 0.0  ;;  %v284_v38 = vpop.permute.xlu0 %283  ;;  %v294_v39 = vpop.permute.xlu1 %293  ;;  %2333 = vmatpush3.msra.mxu0 %v2702_v40 }
  0xad   : > { %v424_v41 = vmax.f32 %v402_v36, 0.0  ;;  %v377_v13 = vmul.f32 %v2682_v28, %v284_v38  ;;  %2444 = vset.pattern.permute.xlu1 %v2477_v24  ;;  %v379_v44 = vmul.f32 %v2682_v28, %v294_v39 }
  0xae   : > { %1564 = vperm.xlu1 %2444, %v2567_v11   ;;  %2306 = vmatmul.mubr.msk.f32.gmra.mxu1 %vm445_vm0, %v846_v37 }
  0xaf   : > { %v405_v46 = vadd.f32 %v2687_v30, %v377_v13  ;;  %2267 = vmatprep.mubr.msk.f32.mxu0 %vm445_vm0, %v424_v41  ;;  %2308 = vmatprep.mubr.msk.f32.mxu1 %vm445_vm0, %v847_v34  ;;  %v407_v11 = vadd.f32 %v2687_v30, %v379_v44  ;;  %v851_v34 = vmax.f32 %v829_v31, 0.0 }
  0xb0   : > { %v289_v40 = vpop.permute.xlu0 %288  ;;  %2268 = vmatmul.mubr.msk.f32.gmra.mxu0 %vm445_vm0, %v425_v42 }
  0xb1   : > { %v427_v48 = vmax.f32 %v405_v46, 0.0  ;;  %v378_v49 = vmul.f32 %v2682_v28, %v289_v40  ;;  %2270 = vmatprep.mubr.msk.f32.mxu0 %vm445_vm0, %v426_v45  ;;  %v739_v51 = vpop.permute.xlu1 %738  ;;  %v429_v58 = vmax.f32 %v407_v11, 0.0 }
  0xb2   : > { %v804_v52 = vmul.f32 %v2682_v28, %v739_v51  ;;  %2445 = vset.pattern.permute.xlu1 %v2476_v22 }
  0xb3   : > { %v406_v53 = vadd.f32 %v2687_v30, %v378_v49  ;;  %1153 = vperm.xlu1 %2445, %v2537_v3  }
  0xb4   : > { %v826_v54 = vadd.f32 %v2687_v30, %v804_v52  ;;  %2271 = vmatmul.mubr.msk.f32.gmra.mxu0 %vm445_vm0, %v427_v48  ;;  %v304_v55 = vpop.permute.xlu0 %303  ;;  %v811_v52 = vmul.f32 %v2682_v28, %v2717_v47 }
  0xb5   : > { %v428_v56 = vmax.f32 %v406_v53, 0.0  ;;  %v381_v57 = vmul.f32 %v2682_v28, %v304_v55 }
  0xb6   : > { %v848_v59 = vmax.f32 %v826_v54, 0.0  ;;  %v299_v60 = vpop.permute.xlu1 %298 }
  0xb7   : > { %v380_v61 = vmul.f32 %v2682_v28, %v299_v60  ;;  %1157 = vperm.xlu1 %2445, %v2585_v14   ;;  %2273 = vmatprep.mubr.msk.f32.mxu0 %vm445_vm0, %v428_v56  ;;  %v409_v62 = vadd.f32 %v2687_v30, %v381_v57 }
  0xb8   : > { %2274 = vmatmul.mubr.msk.f32.gmra.mxu0 %vm445_vm0, %v429_v58  ;;  %2309 = vmatmul.mubr.msk.f32.gmra.mxu1 %vm445_vm0, %v848_v59  ;;  %v309_v3 = vpop.permute.xlu0 %308  ;;  %v833_v58 = vadd.f32 %v2687_v30, %v811_v52 }
  0xb9   : > { %v408_v63 = vadd.f32 %v2687_v30, %v380_v61  ;;  %v382_v0 = vmul.f32 %v2682_v28, %v309_v3  ;;  %v431_v1 = vmax.f32 %v409_v62, 0.0 }
  0xba   : > { %v855_v61 = vmax.f32 %v833_v58, 0.0 }
  0xbb   : > { %v430_v4 = vmax.f32 %v408_v63, 0.0  ;;  %2446 = vset.pattern.permute.xlu1 %v2477_v24  ;;  %v743_v7 = vpop.permute.xlu1 %742  ;;  %v410_v8 = vadd.f32 %v2687_v30, %v382_v0 }
  0xbc   : > { %v805_v12 = vmul.f32 %v2682_v28, %v743_v7  ;;  %1576 = vperm.xlu1 %2446, %v2585_v14   ;;  %v324_v37 = vpop.permute.xlu0 %323 }
  0xbd   : > { %2276 = vmatprep.mubr.msk.f32.mxu0 %vm445_vm0, %v430_v4  ;;  %v432_v6 = vmax.f32 %v410_v8, 0.0  ;;  %v385_v44 = vmul.f32 %v2682_v28, %v324_v37 }
  0xbe   : > { %v827_v29 = vadd.f32 %v2687_v30, %v805_v12  ;;  %2277 = vmatmul.mubr.msk.f32.gmra.mxu0 %vm445_vm0, %v431_v1 }
  0xbf   : > { %v747_v43 = vpop.permute.xlu1 %746  ;;  %2279 = vmatprep.mubr.msk.f32.mxu0 %vm445_vm0, %v432_v6  ;;  %v413_v48 = vadd.f32 %v2687_v30, %v385_v44 }
  0xc0   : > { %v849_v32 = vmax.f32 %v827_v29, 0.0  ;;  %v806_v33 = vmul.f32 %v2682_v28, %v747_v43  ;;  %2447 = vset.pattern.permute.xlu1 %v2476_v22 }
  0xc1   : > { %1165 = vperm.xlu1 %2447, %v2594_v15   ;;  %v329_v15 = vpop.permute.xlu0 %328  ;;  %v435_v11 = vmax.f32 %v413_v48, 0.0 }
  0xc2   : > { %v828_v14 = vadd.f32 %v2687_v30, %v806_v33  ;;  %2311 = vmatprep.mubr.msk.f32.mxu1 %vm445_vm0, %v849_v32 }
  0xc4   : > { %v850_v35 = vmax.f32 %v828_v14, 0.0  ;;  %v314_v36 = vpop.permute.xlu1 %313 }
  0xc5   : > { %v383_v38 = vmul.f32 %v2682_v28, %v314_v36  ;;  %2448 = vset.pattern.permute.xlu1 %v2477_v24  ;;  %v344_v63 = vpop.permute.xlu0 %343 }
  0xc6   : > { %1580 = vperm.xlu1 %2448, %v2597_v16   ;;  %2312 = vmatmul.mubr.msk.f32.gmra.mxu1 %vm445_vm0, %v850_v35  ;;  %v386_v16 = vmul.f32 %v2682_v28, %v329_v15  ;;  %v389_v8 = vmul.f32 %v2682_v28, %v344_v63 }
  0xc7   : > { %v411_v39 = vadd.f32 %v2687_v30, %v383_v38  ;;  %2314 = vmatprep.mubr.msk.f32.mxu1 %vm445_vm0, %v851_v34  ;;  %v815_v34 = vmul.f32 %v2682_v28, %v2725_v50 }
  0xc8   : > { %v414_v51 = vadd.f32 %v2687_v30, %v386_v16  ;;  %v417_v31 = vadd.f32 %v2687_v30, %v389_v8 }
  0xc9   : > { %v433_v41 = vmax.f32 %v411_v39, 0.0  ;;  %v755_v13 = vpop.permute.xlu1 %754  ;;  %v837_v15 = vadd.f32 %v2687_v30, %v815_v34 }
  0xca   : > { %v808_v42 = vmul.f32 %v2682_v28, %v755_v13  ;;  %2449 = vset.pattern.permute.xlu1 %v2476_v22  ;;  %v436_v55 = vmax.f32 %v414_v51, 0.0  ;;  %v439_v14 = vmax.f32 %v417_v31, 0.0 }
  0xcb   : > { %1169 = vperm.xlu1 %2449, %v2545_v5   ;;  %2280 = vmatmul.mubr.msk.f32.gmra.mxu0 %vm445_vm0, %v433_v41  ;;  %v859_v44 = vmax.f32 %v837_v15, 0.0 }
  0xcc   : > { %v830_v45 = vadd.f32 %v2687_v30, %v808_v42 }
  0xce   : > { %v852_v46 = vmax.f32 %v830_v45, 0.0  ;;  %v319_v40 = vpop.permute.xlu1 %318 }
  0xcf   : > { %v384_v49 = vmul.f32 %v2682_v28, %v319_v40  ;;  %1173 = vperm.xlu1 %2449, %v2612_v18  }
  0xd0   : > { %2315 = vmatmul.mubr.msk.f32.gmra.mxu1 %vm445_vm0, %v852_v46 }
  0xd1   : > { %v412_v5 = vadd.f32 %v2687_v30, %v384_v49 }
  0xd3   : > { %v434_v53 = vmax.f32 %v412_v5, 0.0  ;;  %2450 = vset.pattern.permute.xlu1 %v2477_v24  ;;  %v759_v54 = vpop.permute.xlu1 %758 }
  0xd4   : > { %v809_v56 = vmul.f32 %v2682_v28, %v759_v54  ;;  %1592 = vperm.xlu1 %2450, %v2612_v18  }
  0xd5   : > { %2282 = vmatprep.mubr.msk.f32.mxu0 %vm445_vm0, %v434_v53 }
  0xd6   : > { %v831_v57 = vadd.f32 %v2687_v30, %v809_v56  ;;  %2283 = vmatmul.mubr.msk.f32.gmra.mxu0 %vm445_vm0, %v435_v11 }
  0xd7   : > { %v763_v59 = vpop.permute.xlu1 %762  ;;  %2285 = vmatprep.mubr.msk.f32.mxu0 %vm445_vm0, %v436_v55 }
  0xd8   : > { %v853_v47 = vmax.f32 %v831_v57, 0.0  ;;  %v810_v60 = vmul.f32 %v2682_v28, %v763_v59  ;;  %2452 = vset.pattern.permute.xlu1 %v2476_v22 }
  0xd9   : > { %1181 = vperm.xlu1 %2452, %v2604_v17   ;;  %v349_v17 = vpop.permute.xlu0 %348 }
  0xda   : > { %v832_v18 = vadd.f32 %v2687_v30, %v810_v60  ;;  %2317 = vmatprep.mubr.msk.f32.mxu1 %vm445_vm0, %v853_v47 }
  0xdc   : > { %v854_v62 = vmax.f32 %v832_v18, 0.0  ;;  %v334_v3 = vpop.permute.xlu1 %333 }
  0xdd   : > { %v387_v0 = vmul.f32 %v2682_v28, %v334_v3  ;;  %2453 = vset.pattern.permute.xlu1 %v2477_v24  ;;  %v364_v33 = vpop.permute.xlu0 %363 }
  0xde   : > { %1596 = vperm.xlu1 %2453, %v2627_v21   ;;  %2318 = vmatmul.mubr.msk.f32.gmra.mxu1 %vm445_vm0, %v854_v62  ;;  %v390_v21 = vmul.f32 %v2682_v28, %v349_v17  ;;  %v393_v5 = vmul.f32 %v2682_v28, %v364_v33 }
  0xdf   : > { %v415_v1 = vadd.f32 %v2687_v30, %v387_v0  ;;  %2320 = vmatprep.mubr.msk.f32.mxu1 %vm445_vm0, %v855_v61 }
  0xe0   : > { %v418_v32 = vadd.f32 %v2687_v30, %v390_v21  ;;  %v421_v54 = vadd.f32 %v2687_v30, %v393_v5 }
  0xe1   : > { %v437_v2 = vmax.f32 %v415_v1, 0.0  ;;  %v771_v4 = vpop.permute.xlu1 %770  ;;  %v1130_v50 = vpop.permute.xlu0 %1129 }
  0xe2   : > { %v812_v7 = vmul.f32 %v2682_v28, %v771_v4  ;;  %2454 = vset.pattern.permute.xlu1 %v2476_v22  ;;  %v440_v37 = vmax.f32 %v418_v32, 0.0  ;;  %v443_v59 = vmax.f32 %v421_v54, 0.0 }
  0xe3   : > { %1185 = vperm.xlu1 %2454, %v2557_v9   ;;  %2286 = vmatmul.mubr.msk.f32.gmra.mxu0 %vm445_vm0, %v437_v2 }
  0xe4   : > { %v834_v12 = vadd.f32 %v2687_v30, %v812_v7 }
  0xe5   : > { %v1146_v40 = vpop.permute.xlu0 %1145 }
  0xe6   : > { %v856_v6 = vmax.f32 %v834_v12, 0.0  ;;  %v339_v29 = vpop.permute.xlu1 %338 }
  0xe7   : > { %v388_v43 = vmul.f32 %v2682_v28, %v339_v29  ;;  %1189 = vperm.xlu1 %2454, %v2639_v23  }
  0xe8   : > { %2321 = vmatmul.mubr.msk.f32.gmra.mxu1 %vm445_vm0, %v856_v6 }
  0xe9   : > { %v416_v9 = vadd.f32 %v2687_v30, %v388_v43  ;;  %v2877_v11 = vpop.permute.xlu0 %1161 }
  0xeb   : > { %v438_v35 = vmax.f32 %v416_v9, 0.0  ;;  %2455 = vset.pattern.permute.xlu1 %v2477_v24  ;;  %v775_v36 = vpop.permute.xlu1 %774 }
  0xec   : > { %v813_v38 = vmul.f32 %v2682_v28, %v775_v36  ;;  %1608 = vperm.xlu1 %2455, %v2639_v23  }
  0xed   : > { %2288 = vmatprep.mubr.msk.f32.mxu0 %vm445_vm0, %v438_v35  ;;  %v2886_v58 = vpop.permute.xlu0 %1177 }
  0xee   : > { %v835_v39 = vadd.f32 %v2687_v30, %v813_v38  ;;  %2289 = vmatmul.mubr.msk.f32.gmra.mxu0 %vm445_vm0, %v439_v14 }
  0xef   : > { %v779_v41 = vpop.permute.xlu1 %778  ;;  %2291 = vmatprep.mubr.msk.f32.mxu0 %vm445_vm0, %v440_v37 }
  0xf0   : > { %v857_v13 = vmax.f32 %v835_v39, 0.0  ;;  %v814_v42 = vmul.f32 %v2682_v28, %v779_v41  ;;  %2456 = vset.pattern.permute.xlu1 %v2476_v22 }
  0xf1   : > { %1197 = vperm.xlu1 %2456, %v2615_v19   ;;  %v1553_v63 = vpop.permute.xlu0 %1552 }
  0xf2   : > { %v836_v23 = vadd.f32 %v2687_v30, %v814_v42  ;;  %2323 = vmatprep.mubr.msk.f32.mxu1 %vm445_vm0, %v857_v13  ;;  %v1636_v8 = vmul.f32 %v2682_v28, %v1553_v63 }
  0xf4   : > { %v858_v16 = vmax.f32 %v836_v23, 0.0  ;;  %v354_v45 = vpop.permute.xlu1 %353  ;;  %v1658_v6 = vadd.f32 %v2687_v30, %v1636_v8 }
  0xf5   : > { %v391_v46 = vmul.f32 %v2682_v28, %v354_v45  ;;  %2457 = vset.pattern.permute.xlu1 %v2477_v24 }
  0xf6   : > { %1612 = vperm.xlu1 %2457, %v2650_v25   ;;  %2324 = vmatmul.mubr.msk.f32.gmra.mxu1 %vm445_vm0, %v858_v16  ;;  %v1216_v25 = vmul.f32 %v2682_v28, %v1130_v50  ;;  %v1680_v43 = vmax.f32 %v1658_v6, 0.0 }
  0xf7   : > { %v419_v48 = vadd.f32 %v2687_v30, %v391_v46  ;;  %2326 = vmatprep.mubr.msk.f32.mxu1 %vm445_vm0, %v859_v44 }
  0xf8   : > { %v1238_v57 = vadd.f32 %v2687_v30, %v1216_v25 }
  0xf9   : > { %v441_v19 = vmax.f32 %v419_v48, 0.0  ;;  %v787_v49 = vpop.permute.xlu1 %786 }
  0xfa   : > { %v816_v51 = vmul.f32 %v2682_v28, %v787_v49  ;;  %2458 = vset.pattern.permute.xlu1 %v2476_v22  ;;  %v1260_v60 = vmax.f32 %v1238_v57, 0.0 }
  0xfb   : > { %1201 = vperm.xlu1 %2458, %v2562_v10   ;;  %2292 = vmatmul.mubr.msk.f32.gmra.mxu0 %vm445_vm0, %v441_v19 }
  0xfc   : > { %v838_v52 = vadd.f32 %v2687_v30, %v816_v51 }
  0xfe   : > { %v860_v53 = vmax.f32 %v838_v52, 0.0  ;;  %v359_v55 = vpop.permute.xlu1 %358 }
  0xff   : > { %v392_v56 = vmul.f32 %v2682_v28, %v359_v55  ;;  %1205 = vperm.xlu1 %2458, %v2661_v26   ;;  %v1224_v55 = vmul.f32 %v2682_v28, %v2877_v11 }
 0x100   : > { %2327 = vmatmul.mubr.msk.f32.gmra.mxu1 %vm445_vm0, %v860_v53 }
 0x101   : > { %v420_v10 = vadd.f32 %v2687_v30, %v392_v56 }
 0x103   : > { %v442_v47 = vmax.f32 %v420_v10, 0.0  ;;  %2460 = vset.pattern.permute.xlu1 %v2477_v24  ;;  %v791_v18 = vpop.permute.xlu1 %790 }
 0x104   : > { %v817_v61 = vmul.f32 %v2682_v28, %v791_v18  ;;  %1624 = vperm.xlu1 %2460, %v2661_v26   ;;  %v1557_v26 = vpop.permute.xlu0 %1556 }
 0x105   : > { %2294 = vmatprep.mubr.msk.f32.mxu0 %vm445_vm0, %v442_v47 }
 0x106   : > { %v839_v62 = vadd.f32 %v2687_v30, %v817_v61  ;;  %2295 = vmatmul.mubr.msk.f32.gmra.mxu0 %vm445_vm0, %v443_v59 }
 0x107   : > { %v795_v3 = vpop.permute.xlu1 %794  ;;  %2334 = vmatprep.mubr.msk.f32.mxu0 %vm445_vm0, %v1260_v60  ;;  %v1246_v60 = vadd.f32 %v2687_v30, %v1224_v55 }
 0x108   : > { %v861_v0 = vmax.f32 %v839_v62, 0.0  ;;  %v818_v1 = vmul.f32 %v2682_v28, %v795_v3  ;;  %2461 = vset.pattern.permute.xlu1 %v2476_v22  ;;  %v1637_v22 = vmul.f32 %v2682_v28, %v1557_v26  ;;  %v1569_v13 = vpop.permute.xlu0 %1568 }
 0x109   : > { %1213 = vperm.xlu1 %2461, %v2624_v20   ;;  %v1268_v3 = vmax.f32 %v1246_v60, 0.0 }
 0x10a   : > { %v840_v17 = vadd.f32 %v2687_v30, %v818_v1  ;;  %2329 = vmatprep.mubr.msk.f32.mxu1 %vm445_vm0, %v861_v0  ;;  %v1659_v31 = vadd.f32 %v2687_v30, %v1637_v22 }
 0x10c   : > { %v862_v2 = vmax.f32 %v840_v17, 0.0  ;;  %v1134_v4 = vpop.permute.xlu1 %1133  ;;  %v1681_v33 = vmax.f32 %v1659_v31, 0.0  ;;  %v1573_v44 = vpop.permute.xlu0 %1572 }
 0x10d   : > { %v1217_v7 = vmul.f32 %v2682_v28, %v1134_v4  ;;  %2462 = vset.pattern.permute.xlu1 %v2477_v24  ;;  %v1641_v48 = vmul.f32 %v2682_v28, %v1573_v44 }
 0x10e   : > { %1628 = vperm.xlu1 %2462, %v2671_v27   ;;  %2330 = vmatmul.mubr.msk.f32.gmra.mxu1 %vm445_vm0, %v862_v2  ;;  %v1220_v27 = vmul.f32 %v2682_v28, %v1146_v40  ;;  %v1640_v40 = vmul.f32 %v2682_v28, %v1569_v13 }
 0x10f   : > { %v1239_v20 = vadd.f32 %v2687_v30, %v1217_v7  ;;  %v1663_v52 = vadd.f32 %v2687_v30, %v1641_v48 }
 0x110   : > { %v1242_v35 = vadd.f32 %v2687_v30, %v1220_v27  ;;  %v1662_v5 = vadd.f32 %v2687_v30, %v1640_v40  ;;  %v1585_v1 = vpop.permute.xlu0 %1584 }
 0x111   : > { %v1261_v21 = vmax.f32 %v1239_v20, 0.0  ;;  %v1549_v12 = vpop.permute.xlu1 %1548  ;;  %v1685_v10 = vmax.f32 %v1663_v52, 0.0  ;;  %v1644_v8 = vmul.f32 %v2682_v28, %v1585_v1 }
 0x112   : > { %v1635_v29 = vmul.f32 %v2682_v28, %v1549_v12  ;;  %v1264_v15 = vmax.f32 %v1242_v35, 0.0  ;;  %v1684_v54 = vmax.f32 %v1662_v5, 0.0  ;;  %v1228_v35 = vmul.f32 %v2682_v28, %v2886_v58 }
 0x113   : > { %2335 = vmatmul.mubr.msk.f32.vlgmr.msra.gmra.mxu0 %vm445_vm0, %v1261_v21 }
 0x114   : > { %v1657_v24 = vadd.f32 %v2687_v30, %v1635_v29  ;;  %v1589_v22 = vpop.permute.xlu0 %1588  ;;  %v1666_v29 = vadd.f32 %v2687_v30, %v1644_v8 }
 0x115   : > { %v1645_v20 = vmul.f32 %v2682_v28, %v1589_v22 }
 0x116   : > { %v1679_v32 = vmax.f32 %v1657_v24, 0.0  ;;  %v1138_v9 = vpop.permute.xlu1 %1137  ;;  %v1688_v27 = vmax.f32 %v1666_v29, 0.0 }
 0x117   : > { %v1218_v14 = vmul.f32 %v2682_v28, %v1138_v9  ;;  %v1667_v24 = vadd.f32 %v2687_v30, %v1645_v20 }
 0x118   : > { %2369 = vmatprep.mubr.msk.f32.mxu1 %vm445_vm0, %v1679_v32  ;;  %v1601_v32 = vpop.permute.xlu0 %1600 }
 0x119   : > { %v1240_v34 = vadd.f32 %v2687_v30, %v1218_v14  ;;  %2370 = vmatmul.mubr.msk.f32.vlgmr.msra.gmra.mxu1 %vm445_vm0, %v1680_v43  ;;  %v1648_v48 = vmul.f32 %v2682_v28, %v1601_v32 }
 0x11a   : > { %v1142_v36 = vpop.permute.xlu1 %1141  ;;  %2372 = vmatprep.mubr.msk.f32.mxu1 %vm445_vm0, %v1681_v33  ;;  %v1689_v33 = vmax.f32 %v1667_v24, 0.0 }
 0x11b   : > { %v1262_v37 = vmax.f32 %v1240_v34, 0.0  ;;  %v1219_v38 = vmul.f32 %v2682_v28, %v1142_v36 }
 0x11d   : > { %v1241_v39 = vadd.f32 %v2687_v30, %v1219_v38  ;;  %2337 = vmatprep.mubr.msk.f32.mxu0 %vm445_vm0, %v1262_v37 }
 0x11f   : > { %v1263_v41 = vmax.f32 %v1241_v39, 0.0  ;;  %v1561_v50 = vpop.permute.xlu1 %1560 }
 0x120   : > { %v1638_v42 = vmul.f32 %v2682_v28, %v1561_v50 }
 0x121   : > { %2338 = vmatmul.mubr.msk.f32.gmra.mxu0 %vm445_vm0, %v1263_v41  ;;  %v1250_v41 = vadd.f32 %v2687_v30, %v1228_v35 }
 0x122   : > { %v1660_v23 = vadd.f32 %v2687_v30, %v1638_v42  ;;  %2340 = vmatprep.mubr.msk.f32.mxu0 %vm445_vm0, %v1264_v15  ;;  %v1605_v15 = vpop.permute.xlu0 %1604 }
 0x123   : > { %v1272_v42 = vmax.f32 %v1250_v41, 0.0 }
 0x124   : > { %v1682_v16 = vmax.f32 %v1660_v23, 0.0  ;;  %v1150_v45 = vpop.permute.xlu1 %1149 }
 0x125   : > { %v1221_v46 = vmul.f32 %v2682_v28, %v1150_v45 }
 0x126   : > { %2373 = vmatmul.mubr.msk.f32.gmra.mxu1 %vm445_vm0, %v1682_v16  ;;  %v1617_v44 = vpop.permute.xlu0 %1616 }
 0x127   : > { %v1243_v19 = vadd.f32 %v2687_v30, %v1221_v46 }
 0x129   : > { %v1265_v49 = vmax.f32 %v1243_v19, 0.0  ;;  %v1565_v51 = vpop.permute.xlu1 %1564 }
 0x12a   : > { %v1639_v25 = vmul.f32 %v2682_v28, %v1565_v51  ;;  %v1649_v51 = vmul.f32 %v2682_v28, %v1605_v15 }
 0x12b   : > { %2341 = vmatmul.mubr.msk.f32.gmra.mxu0 %vm445_vm0, %v1265_v49  ;;  %v1621_v49 = vpop.permute.xlu0 %1620 }
 0x12c   : > { %v1661_v53 = vadd.f32 %v2687_v30, %v1639_v25  ;;  %v1671_v55 = vadd.f32 %v2687_v30, %v1649_v51 }
 0x12e   : > { %v1683_v56 = vmax.f32 %v1661_v53, 0.0  ;;  %v1154_v57 = vpop.permute.xlu1 %1153  ;;  %v1670_v53 = vadd.f32 %v2687_v30, %v1648_v48 }
 0x12f   : > { %v1222_v59 = vmul.f32 %v2682_v28, %v1154_v57 }
 0x130   : > { %2375 = vmatprep.mubr.msk.f32.mxu1 %vm445_vm0, %v1683_v56 }
 0x131   : > { %v1244_v47 = vadd.f32 %v2687_v30, %v1222_v59  ;;  %2376 = vmatmul.mubr.msk.f32.gmra.mxu1 %vm445_vm0, %v1684_v54  ;;  %v1194_v54 = vpop.permute.xlu0 %1193 }
 0x132   : > { %v1158_v18 = vpop.permute.xlu1 %1157  ;;  %2378 = vmatprep.mubr.msk.f32.mxu1 %vm445_vm0, %v1685_v10  ;;  %v1232_v59 = vmul.f32 %v2682_v28, %v1194_v54 }
 0x133   : > { %v1266_v61 = vmax.f32 %v1244_v47, 0.0  ;;  %v1223_v62 = vmul.f32 %v2682_v28, %v1158_v18  ;;  %v1692_v47 = vmax.f32 %v1670_v53, 0.0  ;;  %v1693_v18 = vmax.f32 %v1671_v55, 0.0 }
 0x135   : > { %v1245_v11 = vadd.f32 %v2687_v30, %v1223_v62  ;;  %2343 = vmatprep.mubr.msk.f32.mxu0 %vm445_vm0, %v1266_v61  ;;  %v1210_v15 = vpop.permute.xlu0 %1209 }
 0x137   : > { %v1267_v63 = vmax.f32 %v1245_v11, 0.0  ;;  %v1577_v0 = vpop.permute.xlu1 %1576  ;;  %v1254_v11 = vadd.f32 %v2687_v30, %v1232_v59 }
 0x138   : > { %v1642_v17 = vmul.f32 %v2682_v28, %v1577_v0 }
 0x139   : > { %2344 = vmatmul.mubr.msk.f32.gmra.mxu0 %vm445_vm0, %v1267_v63 }
 0x13a   : > { %v1664_v26 = vadd.f32 %v2687_v30, %v1642_v17  ;;  %2346 = vmatprep.mubr.msk.f32.mxu0 %vm445_vm0, %v1268_v3  ;;  %v1276_v17 = vmax.f32 %v1254_v11, 0.0  ;;  %v1633_v11 = vpop.permute.xlu0 %1632 }
 0x13c   : > { %v1686_v2 = vmax.f32 %v1664_v26, 0.0  ;;  %v1166_v4 = vpop.permute.xlu1 %1165 }
 0x13d   : > { %v1225_v7 = vmul.f32 %v2682_v28, %v1166_v4 }
 0x13e   : > { %2379 = vmatmul.mubr.msk.f32.gmra.mxu1 %vm445_vm0, %v1686_v2 }
 0x13f   : > { %v1247_v21 = vadd.f32 %v2687_v30, %v1225_v7 }
 0x141   : > { %v1269_v12 = vmax.f32 %v1247_v21, 0.0  ;;  %v1581_v6 = vpop.permute.xlu1 %1580 }
 0x142   : > { %v1643_v31 = vmul.f32 %v2682_v28, %v1581_v6 }
 0x143   : > { %2347 = vmatmul.mubr.msk.f32.gmra.mxu0 %vm445_vm0, %v1269_v12 }
 0x144   : > { %v1665_v43 = vadd.f32 %v2687_v30, %v1643_v31  ;;  %v1652_v31 = vmul.f32 %v2682_v28, %v1617_v44  ;;  %v1236_v44 = vmul.f32 %v2682_v28, %v1210_v15 }
 0x146   : > { %v1687_v9 = vmax.f32 %v1665_v43, 0.0  ;;  %v1170_v14 = vpop.permute.xlu1 %1169  ;;  %v1258_v53 = vadd.f32 %v2687_v30, %v1236_v44 }
 0x147   : > { %v1226_v34 = vmul.f32 %v2682_v28, %v1170_v14 }
 0x148   : > { %2381 = vmatprep.mubr.msk.f32.mxu1 %vm445_vm0, %v1687_v9  ;;  %v1280_v59 = vmax.f32 %v1258_v53, 0.0 }
 0x149   : > { %v1248_v36 = vadd.f32 %v2687_v30, %v1226_v34  ;;  %2382 = vmatmul.mubr.msk.f32.gmra.mxu1 %vm445_vm0, %v1688_v27  ;;  %v1653_v27 = vmul.f32 %v2682_v28, %v1621_v49 }
 0x14a   : > { %v1174_v37 = vpop.permute.xlu1 %1173  ;;  %2384 = vmatprep.mubr.msk.f32.mxu1 %vm445_vm0, %v1689_v33 }
 0x14b   : > { %v1270_v38 = vmax.f32 %v1248_v36, 0.0  ;;  %v1227_v39 = vmul.f32 %v2682_v28, %v1174_v37  ;;  %v1674_v36 = vadd.f32 %v2687_v30, %v1652_v31  ;;  %v1675_v37 = vadd.f32 %v2687_v30, %v1653_v27 }
 0x14d   : > { %v1249_v50 = vadd.f32 %v2687_v30, %v1227_v39  ;;  %2349 = vmatprep.mubr.msk.f32.mxu0 %vm445_vm0, %v1270_v38 }
 0x14f   : > { %v1271_v58 = vmax.f32 %v1249_v50, 0.0  ;;  %v1593_v13 = vpop.permute.xlu1 %1592 }
 0x150   : > { %v1646_v23 = vmul.f32 %v2682_v28, %v1593_v13 }
 0x151   : > { %2350 = vmatmul.mubr.msk.f32.gmra.mxu0 %vm445_vm0, %v1271_v58 }
 0x152   : > { %v1668_v16 = vadd.f32 %v2687_v30, %v1646_v23  ;;  %2352 = vmatprep.mubr.msk.f32.mxu0 %vm445_vm0, %v1272_v42  ;;  %v1696_v42 = vmax.f32 %v1674_v36, 0.0 }
 0x154   : > { %v1690_v45 = vmax.f32 %v1668_v16, 0.0  ;;  %v1182_v46 = vpop.permute.xlu1 %1181  ;;  %v1697_v16 = vmax.f32 %v1675_v37, 0.0 }
 0x155   : > { %v1229_v40 = vmul.f32 %v2682_v28, %v1182_v46 }
 0x156   : > { %2385 = vmatmul.mubr.msk.f32.gmra.mxu1 %vm445_vm0, %v1690_v45  ;;  %v2994_v0 = vpop.f32.mrf.mxu1  ;;  %v3039_v45 = vld [vmem:[%s3202_s4] ss:$0 sm:$0xff] }
 0x157   : > { %v1251_v19 = vadd.f32 %v2687_v30, %v1229_v40 }
 0x158   : > { %v2999_v7 = vpop.f32.mrf.mxu1 }
 0x159   : > { %v1273_v5 = vmax.f32 %v1251_v19, 0.0  ;;  %v1597_v25 = vpop.permute.xlu1 %1596 }
 0x15a   : > { %v1647_v52 = vmul.f32 %v2682_v28, %v1597_v25 }
 0x15b   : > { %2353 = vmatmul.mubr.msk.f32.gmra.mxu0 %vm445_vm0, %v1273_v5 }
 0x15c   : > { %v1669_v56 = vadd.f32 %v2687_v30, %v1647_v52 }
 0x15e   : > { %v1691_v57 = vmax.f32 %v1669_v56, 0.0  ;;  %v1186_v10 = vpop.permute.xlu1 %1185 }
 0x15f   : > { %v1230_v60 = vmul.f32 %v2682_v28, %v1186_v10 }
 0x160   : > { %2387 = vmatprep.mubr.msk.f32.mxu1 %vm445_vm0, %v1691_v57  ;;  %v3004_v22 = vpop.f32.mrf.mxu1 }
 0x161   : > { %v1252_v61 = vadd.f32 %v2687_v30, %v1230_v60  ;;  %2388 = vmatmul.mubr.msk.f32.gmra.mxu1 %vm445_vm0, %v1692_v47 }
 0x162   : > { %2390 = vmatprep.mubr.msk.f32.mxu1 %vm445_vm0, %v1693_v18  ;;  %v1190_v62 = vpop.permute.xlu1 %1189  ;;  %v3013_v24 = vpop.f32.mrf.mxu1 }
 0x163   : > { %v1274_v3 = vmax.f32 %v1252_v61, 0.0  ;;  %v1231_v63 = vmul.f32 %v2682_v28, %v1190_v62 }
 0x165   : > { %v1253_v1 = vadd.f32 %v2687_v30, %v1231_v63  ;;  %2355 = vmatprep.mubr.msk.f32.mxu0 %vm445_vm0, %v1274_v3 }
 0x167   : > { %v1275_v26 = vmax.f32 %v1253_v1, 0.0  ;;  %v1609_v2 = vpop.permute.xlu1 %1608 }
 0x168   : > { %v1650_v4 = vmul.f32 %v2682_v28, %v1609_v2 }
 0x169   : > { %2356 = vmatmul.mubr.msk.f32.gmra.mxu0 %vm445_vm0, %v1275_v26 }
 0x16a   : > { %v1672_v8 = vadd.f32 %v2687_v30, %v1650_v4  ;;  %2358 = vmatprep.mubr.msk.f32.mxu0 %vm445_vm0, %v1276_v17  ;;  %v2464_v17 = vld [vmem:[%s3199_s1] ss:$0 sm:$0xff] }
 0x16b   : > { %v3006_v20 = vpop.f32.mrf.mxu0 }
 0x16c   : > { %v1694_v21 = vmax.f32 %v1672_v8, 0.0  ;;  %v1198_v12 = vpop.permute.xlu1 %1197 }
 0x16d   : > { %v1233_v6 = vmul.f32 %v2682_v28, %v1198_v12  ;;  %v3009_v29 = vpop.f32.mrf.mxu0 }
 0x16e   : > { %2391 = vmatmul.mubr.msk.f32.gmra.mxu1 %vm445_vm0, %v1694_v21  ;;  %v3019_v33 = vpop.f32.mrf.mxu1 }
 0x16f   : > { %v1255_v43 = vadd.f32 %v2687_v30, %v1233_v6 }
 0x170   : > { %v3017_v32 = vpop.f32.mrf.mxu0  ;;  %v3030_v41 = vpop.f32.mrf.mxu1 }
 0x171   : > { %v1277_v9 = vmax.f32 %v1255_v43, 0.0  ;;  %v1613_v14 = vpop.permute.xlu1 %1612 }
 0x172   : > { %v1651_v34 = vmul.f32 %v2682_v28, %v1613_v14  ;;  %v3022_v35 = vpop.f32.mrf.mxu0 }
 0x173   : > { %2359 = vmatmul.mubr.msk.f32.gmra.mxu0 %vm445_vm0, %v1277_v9 }
 0x174   : > { %v1673_v38 = vadd.f32 %v2687_v30, %v1651_v34  ;;  %v3028_v39 = vpop.f32.mrf.mxu0 }
 0x176   : > { %v1695_v50 = vmax.f32 %v1673_v38, 0.0  ;;  %v3032_v58 = vpop.f32.mrf.mxu0  ;;  %v1202_v13 = vpop.permute.xlu1 %1201 }
 0x177   : > { %v1234_v23 = vmul.f32 %v2682_v28, %v1202_v13 }
 0x178   : > { %v2275_v46 = vpop.f32.mrf.mxu0  ;;  %v2310_v40 = vpop.f32.mrf.mxu1  ;;  %2393 = vmatprep.mubr.msk.f32.mxu1 %vm445_vm0, %v1695_v50 }
 0x179   : > { %v1256_v48 = vadd.f32 %v2687_v30, %v1234_v23  ;;  %v694_v19 = vadd.f32 %v2275_v46, %v3039_v45  ;;  %2394 = vmatmul.mubr.msk.f32.gmra.mxu1 %vm445_vm0, %v1696_v42 }
 0x17a   : > { %v608_v49 = vpop.f32.mrf.mxu0  ;;  %2396 = vmatprep.mubr.msk.f32.mxu1 %vm445_vm0, %v1697_v16  ;;  %v1206_v52 = vpop.permute.xlu1 %1205 }
 0x17b   : > { %v1278_v51 = vmax.f32 %v1256_v48, 0.0  ;;  %v3046_v5 = vadd.f32 %v2310_v40, %v694_v19  ;;  %v693_v25 = vadd.f32 %v3039_v45, %v608_v49  ;;  %v1027_v54 = vpop.f32.mrf.mxu1  ;;  %v1235_v55 = vmul.f32 %v2682_v28, %v1206_v52 }
 0x17d   : > { %v3051_v56 = vadd.f32 %v1027_v54, %v693_v25  ;;  %2361 = vmatprep.mubr.msk.f32.mxu0 %vm445_vm0, %v1278_v51  ;;  %v1257_v57 = vadd.f32 %v2687_v30, %v1235_v55 }
 0x17e   : > { %v2278_v10 = vpop.f32.mrf.mxu0 }
 0x17f   : > { %v1625_v47 = vpop.permute.xlu1 %1624  ;;  %v1279_v60 = vmax.f32 %v1257_v57, 0.0  ;;  %v696_v3 = vadd.f32 %v2278_v10, %v3039_v45 }
 0x180   : > { %v1654_v18 = vmul.f32 %v2682_v28, %v1625_v47  ;;  %v618_v62 = vpop.f32.mrf.mxu0  ;;  %v1656_v28 = vmul.f32 %v2464_v17, %v1633_v11 }
 0x181   : > { %2362 = vmatmul.mubr.msk.f32.gmra.mxu0 %vm445_vm0, %v1279_v60  ;;  %v695_v2 = vadd.f32 %v3039_v45, %v618_v62 }
 0x182   : > { %v1676_v61 = vadd.f32 %v2687_v30, %v1654_v18  ;;  %2364 = vmatprep.mubr.msk.f32.mxu0 %vm445_vm0, %v1280_v59  ;;  %v2465_v30 = vld [vmem:[%s3200_s2] ss:$0 sm:$0xff] }
 0x183   : > { %v1678_v27 = vadd.f32 %v2465_v30, %v1656_v28 }
 0x184   : > { %v1698_v63 = vmax.f32 %v1676_v61, 0.0  ;;  %v1214_v1 = vpop.permute.xlu1 %1213 }
 0x185   : > { %v1237_v26 = vmul.f32 %v2464_v17, %v1214_v1  ;;  %v1700_v36 = vmax.f32 %v1678_v27, 0.0 }
 0x186   : > { %v2313_v4 = vpop.f32.mrf.mxu1  ;;  %2397 = vmatmul.mubr.msk.f32.gmra.mxu1 %vm445_vm0, %v1698_v63 }
 0x187   : > { %v1259_v8 = vadd.f32 %v2465_v30, %v1237_v26  ;;  %v3068_v21 = vadd.f32 %v2313_v4, %v696_v3 }
 0x188   : > { %v1037_v12 = vpop.f32.mrf.mxu1 }
 0x189   : > { %v1281_v6 = vmax.f32 %v1259_v8, 0.0  ;;  %v3070_v31 = vadd.f32 %v1037_v12, %v695_v2  ;;  %v1629_v43 = vpop.permute.xlu1 %1628 }
 0x18a   : > { %v1655_v9 = vmul.f32 %v2464_v17, %v1629_v43 }
 0x18b   : > { %v2281_v14 = vpop.f32.mrf.mxu0  ;;  %2365 = vmatmul.mubr.msk.f32.gmra.mxu0 %vm445_vm0, %v1281_v6 }
 0x18c   : > { %v1677_v34 = vadd.f32 %v2465_v30, %v1655_v9  ;;  %v698_v15 = vadd.f32 %v2281_v14, %v3039_v45 }
 0x18d   : > { %v628_v38 = vpop.f32.mrf.mxu0 }
 0x18e   : > { %v1699_v37 = vmax.f32 %v1677_v34, 0.0  ;;  %v697_v13 = vadd.f32 %v3039_v45, %v628_v38  ;;  %v688_v38 = vadd.f32 %v3006_v20, %v3039_v45 }
 0x190   : > { %v2316_v50 = vpop.f32.mrf.mxu1  ;;  %2399 = vmatprep.mubr.msk.f32.mxu1 %vm445_vm0, %v1699_v37 }
 0x191   : > { %v3076_v42 = vadd.f32 %v2316_v50, %v698_v15  ;;  %2400 = vmatmul.mubr.msk.f32.gmra.mxu1 %vm445_vm0, %v1700_v36  ;;  %v687_v50 = vadd.f32 %v3039_v45, %v3009_v29 }
 0x192   : > { %v1047_v23 = vpop.f32.mrf.mxu1 }
 0x193   : > { %v3079_v44 = vadd.f32 %v1047_v23, %v697_v13  ;;  %v1107_v13 = vadd.f32 %v2994_v0, %v688_v38 }
 0x196   : > { %v2284_v16 = vpop.f32.mrf.mxu0 }
 0x197   : > { %v700_v40 = vadd.f32 %v2284_v16, %v3039_v45 }
 0x198   : > { %v638_v46 = vpop.f32.mrf.mxu0 }
 0x199   : > { %v699_v48 = vadd.f32 %v3039_v45, %v638_v46  ;;  %v1106_v46 = vadd.f32 %v2999_v7, %v687_v50  ;;  %v690_v7 = vadd.f32 %v3017_v32, %v3039_v45  ;;  %v692_v32 = vadd.f32 %v3028_v39, %v3039_v45 }
 0x19e   : > { %v2319_v19 = vpop.f32.mrf.mxu1 }
 0x19f   : > { %v3083_v49 = vadd.f32 %v2319_v19, %v700_v40 }
 0x1a0   : > { %v1057_v51 = vpop.f32.mrf.mxu1 }
 0x1a1   : > { %v3085_v25 = vadd.f32 %v1057_v51, %v699_v48 }
 0x1a3   : > { %v2287_v52 = vpop.f32.mrf.mxu0 }
 0x1a4   : > { %v702_v54 = vadd.f32 %v2287_v52, %v3039_v45  ;;  %v689_v52 = vadd.f32 %v3039_v45, %v3022_v35 }
 0x1a5   : > { %v648_v53 = vpop.f32.mrf.mxu0 }
 0x1a6   : > { %v701_v57 = vadd.f32 %v3039_v45, %v648_v53 }
 0x1a8   : > { %v2322_v55 = vpop.f32.mrf.mxu1 }
 0x1a9   : > { %v3089_v10 = vadd.f32 %v2322_v55, %v702_v54  ;;  %v1109_v54 = vadd.f32 %v3004_v22, %v690_v7  ;;  %v691_v22 = vadd.f32 %v3039_v45, %v3032_v58 }
 0x1aa   : > { %v1067_v59 = vpop.f32.mrf.mxu1 }
 0x1ab   : > { %v3091_v47 = vadd.f32 %v1067_v59, %v701_v57  ;;  %v1108_v59 = vadd.f32 %v3013_v24, %v689_v52  ;;  %v1111_v24 = vadd.f32 %v3019_v33, %v692_v32 }
 0x1ae   : > { %v2290_v60 = vpop.f32.mrf.mxu0 }
 0x1af   : > { %v704_v61 = vadd.f32 %v2290_v60, %v3039_v45 }
 0x1b0   : > { %v658_v18 = vpop.f32.mrf.mxu0 }
 0x1b1   : > { %v703_v62 = vadd.f32 %v3039_v45, %v658_v18 }
 0x1b6   : > { %v2325_v11 = vpop.f32.mrf.mxu1 }
 0x1b7   : > { %v3095_v3 = vadd.f32 %v2325_v11, %v704_v61 }
 0x1b8   : > { %v1077_v63 = vpop.f32.mrf.mxu1 }
 0x1b9   : > { %v3097_v1 = vadd.f32 %v1077_v63, %v703_v62 }
 0x1bb   : > { %v2293_v17 = vpop.f32.mrf.mxu0 }
 0x1bc   : > { %v706_v2 = vadd.f32 %v2293_v17, %v3039_v45 }
 0x1bd   : > { %v668_v26 = vpop.f32.mrf.mxu0 }
 0x1be   : > { %v705_v4 = vadd.f32 %v3039_v45, %v668_v26 }
 0x1c0   : > { %v2328_v28 = vpop.f32.mrf.mxu1 }
 0x1c1   : > { %v3101_v30 = vadd.f32 %v2328_v28, %v706_v2  ;;  %v1110_v28 = vadd.f32 %v3030_v41, %v691_v22 }
 0x1c2   : > { %v1087_v8 = vpop.f32.mrf.mxu1 }
 0x1c3   : > { %v3103_v12 = vadd.f32 %v1087_v8, %v705_v4 }
 0x1c6   : > { %v2296_v6 = vpop.f32.mrf.mxu0 }
 0x1c7   : > { %v708_v27 = vadd.f32 %v2296_v6, %v3039_v45 }
 0x1c8   : > { %v678_v43 = vpop.f32.mrf.mxu0 }
 0x1c9   : > { %v707_v9 = vadd.f32 %v3039_v45, %v678_v43 }
 0x1ce   : > { %v2331_v14 = vpop.f32.mrf.mxu1 }
 0x1cf   : > { %v3107_v34 = vadd.f32 %v2331_v14, %v708_v27 }
 0x1d0   : > { %v1097_v36 = vpop.f32.mrf.mxu1 }
 0x1d1   : > { %v3109_v37 = vadd.f32 %v1097_v36, %v707_v9 }
 0x1d3   : > { %v2336_v15 = vpop.f32.mrf.mxu0 }
 0x1d4   : > { %v1526_v16 = vadd.f32 %v2336_v15, %v1107_v13 }
 0x1d5   : > { %v1416_v23 = vpop.f32.mrf.mxu0 }
 0x1d6   : > { %v1525_v48 = vadd.f32 %v1416_v23, %v1106_v46 }
 0x1d9   : > { %v2371_v40 = vpop.f32.mrf.mxu1 }
 0x1da   : > { %v1945_v19 = vadd.f32 %v2371_v40, %v1526_v16 }
 0x1db   : > { %v1835_v20 = vpop.f32.mrf.mxu1 }
 0x1dc   : > { %v1967_v29 = vmax.f32 %v1945_v19, 0.0  ;;  %v1944_v51 = vadd.f32 %v1835_v20, %v1525_v48 }
 0x1de   : > { %1990 = vst.msk [vmem:[%s3122_s22 + $0x8] sm:$0xff] %vm1988_vm1, %v1967_v29  ;;  %v1966_v0 = vmax.f32 %v1944_v51, 0.0 }
 0x1e0   : > { %1989 = vst.msk [vmem:[%s3122_s22] sm:$0xff] %vm1988_vm1, %v1966_v0 }
 0x1e1   : > { %v2339_v53 = vpop.f32.mrf.mxu0 }
 0x1e2   : > { %v1528_v57 = vadd.f32 %v2339_v53, %v1109_v54 }
 0x1e3   : > { %v1426_v55 = vpop.f32.mrf.mxu0 }
 0x1e4   : > { %v1527_v18 = vadd.f32 %v1426_v55, %v1108_v59 }
 0x1e6   : > { %v2374_v60 = vpop.f32.mrf.mxu1 }
 0x1e7   : > { %v1947_v61 = vadd.f32 %v2374_v60, %v1528_v57 }
 0x1e8   : > { %v1845_v62 = vpop.f32.mrf.mxu1 }
 0x1e9   : > { %v1969_v11 = vmax.f32 %v1947_v61, 0.0  ;;  %v1946_v63 = vadd.f32 %v1845_v62, %v1527_v18 }
 0x1eb   : > { %1992 = vst.msk [vmem:[%s3122_s22 + $0x18] sm:$0xff] %vm1988_vm1, %v1969_v11  ;;  %v1968_v35 = vmax.f32 %v1946_v63, 0.0  ;;  %v2342_v17 = vpop.f32.mrf.mxu0 }
 0x1ec   : > { %v1530_v2 = vadd.f32 %v2342_v17, %v1111_v24 }
 0x1ed   : > { %1991 = vst.msk [vmem:[%s3122_s22 + $0x10] sm:$0xff] %vm1988_vm1, %v1968_v35  ;;  %v1436_v26 = vpop.f32.mrf.mxu0 }
 0x1ee   : > { %v1529_v8 = vadd.f32 %v1436_v26, %v1110_v28 }
 0x1f1   : > { %v2377_v4 = vpop.f32.mrf.mxu1 }
 0x1f2   : > { %v1949_v39 = vadd.f32 %v2377_v4, %v1530_v2 }
 0x1f3   : > { %v1855_v6 = vpop.f32.mrf.mxu1 }
 0x1f4   : > { %v1971_v43 = vmax.f32 %v1949_v39, 0.0  ;;  %v1948_v27 = vadd.f32 %v1855_v6, %v1529_v8 }
 0x1f6   : > { %1994 = vst.msk [vmem:[%s3122_s22 + $0x28] sm:$0xff] %vm1988_vm1, %v1971_v43  ;;  %v1970_v9 = vmax.f32 %v1948_v27, 0.0 }
 0x1f8   : > { %1993 = vst.msk [vmem:[%s3122_s22 + $0x20] sm:$0xff] %vm1988_vm1, %v1970_v9 }
 0x1f9   : > { %v2345_v58 = vpop.f32.mrf.mxu0 }
 0x1fa   : > { %v1532_v33 = vadd.f32 %v2345_v58, %v3046_v5 }
 0x1fb   : > { %v1446_v45 = vpop.f32.mrf.mxu0 }
 0x1fc   : > { %v1531_v41 = vadd.f32 %v1446_v45, %v3051_v56 }
 0x1fe   : > { %v2380_v14 = vpop.f32.mrf.mxu1 }
 0x1ff   : > { %v1951_v36 = vadd.f32 %v2380_v14, %v1532_v33 }
 0x200   : > { %v1865_v38 = vpop.f32.mrf.mxu1 }
 0x201   : > { %v1973_v15 = vmax.f32 %v1951_v36, 0.0  ;;  %v1950_v50 = vadd.f32 %v1865_v38, %v1531_v41 }
 0x203   : > { %1996 = vst.msk [vmem:[%s3122_s22 + $0x38] sm:$0xff] %vm1988_vm1, %v1973_v15  ;;  %v1972_v13 = vmax.f32 %v1950_v50, 0.0  ;;  %v2348_v23 = vpop.f32.mrf.mxu0 }
 0x204   : > { %v1534_v46 = vadd.f32 %v2348_v23, %v3068_v21 }
 0x205   : > { %1995 = vst.msk [vmem:[%s3122_s22 + $0x30] sm:$0xff] %vm1988_vm1, %v1972_v13  ;;  %v1456_v16 = vpop.f32.mrf.mxu0 }
 0x206   : > { %v1533_v5 = vadd.f32 %v1456_v16, %v3070_v31 }
 0x209   : > { %v2383_v40 = vpop.f32.mrf.mxu1 }
 0x20a   : > { %v1953_v48 = vadd.f32 %v2383_v40, %v1534_v46 }
 0x20b   : > { %v1875_v56 = vpop.f32.mrf.mxu1 }
 0x20c   : > { %v1975_v19 = vmax.f32 %v1953_v48, 0.0  ;;  %v1952_v20 = vadd.f32 %v1875_v56, %v1533_v5 }
 0x20e   : > { %1998 = vst.msk [vmem:[%s3122_s22 + $0x48] sm:$0xff] %vm1988_vm1, %v1975_v19  ;;  %v1974_v29 = vmax.f32 %v1952_v20, 0.0 }
 0x210   : > { %1997 = vst.msk [vmem:[%s3122_s22 + $0x40] sm:$0xff] %vm1988_vm1, %v1974_v29 }
 0x211   : > { %v2351_v51 = vpop.f32.mrf.mxu0 }
 0x212   : > { %v1536_v7 = vadd.f32 %v2351_v51, %v3076_v42 }
 0x213   : > { %v1466_v0 = vpop.f32.mrf.mxu0 }
 0x214   : > { %v1535_v21 = vadd.f32 %v1466_v0, %v3079_v44 }
 0x216   : > { %v2386_v52 = vpop.f32.mrf.mxu1 }
 0x217   : > { %v1955_v53 = vadd.f32 %v2386_v52, %v1536_v7 }
 0x218   : > { %v1885_v31 = vpop.f32.mrf.mxu1 }
 0x219   : > { %v1977_v54 = vmax.f32 %v1955_v53, 0.0  ;;  %v1954_v55 = vadd.f32 %v1885_v31, %v1535_v21 }
 0x21b   : > { %2000 = vst.msk [vmem:[%s3122_s22 + $0x58] sm:$0xff] %vm1988_vm1, %v1977_v54  ;;  %v1976_v57 = vmax.f32 %v1954_v55, 0.0  ;;  %v2354_v59 = vpop.f32.mrf.mxu0 }
 0x21c   : > { %v1538_v18 = vadd.f32 %v2354_v59, %v3083_v49 }
 0x21d   : > { %1999 = vst.msk [vmem:[%s3122_s22 + $0x50] sm:$0xff] %vm1988_vm1, %v1976_v57  ;;  %v1476_v60 = vpop.f32.mrf.mxu0 }
 0x21e   : > { %v1537_v42 = vadd.f32 %v1476_v60, %v3085_v25 }
 0x221   : > { %v2389_v61 = vpop.f32.mrf.mxu1 }
 0x222   : > { %v1957_v62 = vadd.f32 %v2389_v61, %v1538_v18 }
 0x223   : > { %v1895_v44 = vpop.f32.mrf.mxu1 }
 0x224   : > { %v1979_v11 = vmax.f32 %v1957_v62, 0.0  ;;  %v1956_v63 = vadd.f32 %v1895_v44, %v1537_v42 }
 0x226   : > { %2002 = vst.msk [vmem:[%s3122_s22 + $0x68] sm:$0xff] %vm1988_vm1, %v1979_v11  ;;  %v1978_v32 = vmax.f32 %v1956_v63, 0.0 }
 0x228   : > { %2001 = vst.msk [vmem:[%s3122_s22 + $0x60] sm:$0xff] %vm1988_vm1, %v1978_v32 }
 0x229   : > { %v2357_v35 = vpop.f32.mrf.mxu0 }
 0x22a   : > { %v1540_v22 = vadd.f32 %v2357_v35, %v3089_v10 }
 0x22b   : > { %v1486_v17 = vpop.f32.mrf.mxu0 }
 0x22c   : > { %v1539_v49 = vadd.f32 %v1486_v17, %v3091_v47 }
 0x22e   : > { %v2392_v24 = vpop.f32.mrf.mxu1 }
 0x22f   : > { %v1959_v26 = vadd.f32 %v2392_v24, %v1540_v22 }
 0x230   : > { %v1905_v25 = vpop.f32.mrf.mxu1 }
 0x231   : > { %v1981_v2 = vmax.f32 %v1959_v26, 0.0  ;;  %v1958_v28 = vadd.f32 %v1905_v25, %v1539_v49 }
 0x233   : > { %2004 = vst.msk [vmem:[%s3122_s22 + $0x78] sm:$0xff] %vm1988_vm1, %v1981_v2  ;;  %v1980_v4 = vmax.f32 %v1958_v28, 0.0  ;;  %v2360_v8 = vpop.f32.mrf.mxu0 }
 0x234   : > { %v1542_v6 = vadd.f32 %v2360_v8, %v3095_v3 }
 0x235   : > { %2003 = vst.msk [vmem:[%s3122_s22 + $0x70] sm:$0xff] %vm1988_vm1, %v1980_v4  ;;  %v1496_v39 = vpop.f32.mrf.mxu0 }
 0x236   : > { %v1541_v10 = vadd.f32 %v1496_v39, %v3097_v1 }
 0x239   : > { %v2395_v43 = vpop.f32.mrf.mxu1 }
 0x23a   : > { %v1961_v27 = vadd.f32 %v2395_v43, %v1542_v6 }
 0x23b   : > { %v1915_v47 = vpop.f32.mrf.mxu1 }
 0x23c   : > { %v1983_v9 = vmax.f32 %v1961_v27, 0.0  ;;  %v1960_v58 = vadd.f32 %v1915_v47, %v1541_v10 }
 0x23e   : > { %2006 = vst.msk [vmem:[%s3122_s22 + $0x88] sm:$0xff] %vm1988_vm1, %v1983_v9  ;;  %v1982_v45 = vmax.f32 %v1960_v58, 0.0 }
 0x240   : > { %2005 = vst.msk [vmem:[%s3122_s22 + $0x80] sm:$0xff] %vm1988_vm1, %v1982_v45 }
 0x241   : > { %v2363_v33 = vpop.f32.mrf.mxu0 }
 0x242   : > { %v1544_v41 = vadd.f32 %v2363_v33, %v3101_v30 }
 0x243   : > { %v1506_v14 = vpop.f32.mrf.mxu0 }
 0x244   : > { %v1543_v3 = vadd.f32 %v1506_v14, %v3103_v12 }
 0x246   : > { %v2398_v36 = vpop.f32.mrf.mxu1 }
 0x247   : > { %v1963_v38 = vadd.f32 %v2398_v36, %v1544_v41 }
 0x248   : > { %v1925_v1 = vpop.f32.mrf.mxu1 }
 0x249   : > { %v1985_v15 = vmax.f32 %v1963_v38, 0.0  ;;  %v1962_v50 = vadd.f32 %v1925_v1, %v1543_v3 }
 0x24b   : > { %2008 = vst.msk [vmem:[%s3122_s22 + $0x98] sm:$0xff] %vm1988_vm1, %v1985_v15  ;;  %v1984_v13 = vmax.f32 %v1962_v50, 0.0  ;;  %v2366_v23 = vpop.f32.mrf.mxu0 }
 0x24c   : > { %v1546_v46 = vadd.f32 %v2366_v23, %v3107_v34 }
 0x24d   : > { %2007 = vst.msk [vmem:[%s3122_s22 + $0x90] sm:$0xff] %vm1988_vm1, %v1984_v13  ;;  %v1516_v16 = vpop.f32.mrf.mxu0 }
 0x24e   : > { %v1545_v30 = vadd.f32 %v1516_v16, %v3109_v37 }
 0x251   : > { %v2401_v40 = vpop.f32.mrf.mxu1 }
 0x252   : > { %v1965_v5 = vadd.f32 %v2401_v40, %v1546_v46 }
 0x253   : > { %v1935_v12 = vpop.f32.mrf.mxu1 }
 0x254   : > { %v1987_v48 = vmax.f32 %v1965_v5, 0.0  ;;  %v1964_v56 = vadd.f32 %v1935_v12, %v1545_v30 }
 0x256   : > { %2011 = vst.msk [vmem:[%s3122_s22 + $0xa8] sm:$0x1] %vm2010_vm2, %v1987_v48  ;;  %v1986_v19 = vmax.f32 %v1964_v56, 0.0 }
 0x258   : > { %2009 = vst.msk [vmem:[%s3122_s22 + $0xa0] sm:$0xff] %vm1988_vm1, %v1986_v19 }
 0x259 PF: > { %s15_s18 = sadd.s32 1, %s2472_s18  }
 0x25a   : > { %p12_p4 = scmp.ge.s32.totalorder %s15_s18, 4  }
 0x25c   :  { %14 = sbr.rel (!%p12_p4) target bundleno = 1 (0x1), region = 73 }

</bundles_post_ra>
